<compile_context>
chip_gen: v6e
topology: v6e:2x2x1
jax: 0.10.0
libtpu: 0.0.40
codegen_flags: <defaults>
</compile_context>

<pallas_src>
import functools

import jax
import jax.numpy as jnp
import numpy as np
from jax.experimental import pallas as pl
from jax.experimental.pallas import tpu as pltpu  # noqa: F401  (TPU backend)


# --------------------------------------------------------------------------------------
# Model hyper-parameters (small, consistent with the module's forward)
# --------------------------------------------------------------------------------------
INPUT_SIZE = 8
HIDDEN_SIZE = 32
SUB_SIZE = 8
OUTPUT_SIZE = 4
NUM_TASK = 4            # unused by forward
MD_SIZE = 4
MD_ACTIVE_SIZE = 1      # winner-take-all threshold = median of top 2 values
MD_DT = 0.001
CTRNN_DT = 10.0         # passed as dt kwarg -> alpha = dt / tau = 0.1
CTRNN_TAU = 100.0
ALPHA = CTRNN_DT / CTRNN_TAU
ONE_MINUS_ALPHA = 1.0 - ALPHA

MD_TAU = 0.02 * 4                   # tau * tau_times
MD_GAIN = MD_DT / MD_TAU            # dt / tauMD
INV_TAU_PRETRACE = 1.0 / 1000.0
INV_TAU_POSTTRACE = 1.0 / 1000.0
HEBB = 0.5 * 0.0001                 # 0.5 * Hebb_learning_rate

T_STEPS = 8
BATCH = 1
SUB_ID = 1


# --------------------------------------------------------------------------------------
# In-kernel helpers (all elementwise / lane reductions; iota is hoisted by the caller)
# --------------------------------------------------------------------------------------
def _wta_top2(v, iota):
    """Winner-take-all for num_active=1: threshold = mean of the two largest values.
    v: (1, N) row, iota: (1, N) int32 lane indices."""
    m1 = jnp.max(v, axis=-1, keepdims=True)
    first = jnp.min(
        jnp.where(v == m1, iota, jnp.int32(v.shape[-1])), axis=-1, keepdims=True
    )
    m2 = jnp.max(jnp.where(iota == first, -jnp.inf, v), axis=-1, keepdims=True)
    thr = 0.5 * (m1 + m2)
    return jnp.where(v >= thr, 1.0, 0.0).astype(jnp.float32)


def _sum_top_k(v, k, iota):
    """Sum of the k largest entries of a (1, N) row; exactly one element removed per pass
    (robust to duplicate values, matching sorted-top-k semantics)."""
    n = v.shape[-1]
    s = jnp.zeros((1, 1), jnp.float32)
    w = v
    for _ in range(k):
        m = jnp.max(w, axis=-1, keepdims=True)
        s = s + m
        first = jnp.min(jnp.where(w == m, iota, jnp.int32(n)), axis=-1, keepdims=True)
        w = jnp.where(iota == first, -jnp.inf, w)
    return s


# --------------------------------------------------------------------------------------
# Single fused Pallas kernel: projections + pretrace/threshold + recurrence + fc
# --------------------------------------------------------------------------------------
def _fused_kernel(
    x_ref, xT_ref, w_in_ref, b_tot_ref, w_ctxT_ref, w_ctx_ref,
    mask_row_ref, mask_col_ref, wh_ref, wmd2pfc_ref, wpfc2md0_ref,
    wfc_ref, bfc_ref, out_ref, act_ref,
):
    T = x_ref.shape[0]
    H = wh_ref.shape[0]
    MD = wpfc2md0_ref.shape[1]
    kpart = int(0.8 * H)               # 25 for H=32
    n_top = H - kpart                  # 7
    inv_kpart = jnp.float32(1.0 / kpart)

    x = x_ref[...]                     # (T, I)

    # ---- input-side projections for all timesteps (MXU) ------------------------------
    # ext = input2h(x) with b_in + b_h2h folded in (b_h2h never re-added in the loop)
    ext = jnp.dot(x, w_in_ref[...], preferred_element_type=jnp.float32) + b_tot_ref[...]
    # PFC context in row orientation (T, H): feeds MD input projection + pretrace row
    ctx_row = jnp.maximum(
        jnp.dot(x, w_ctxT_ref[...], preferred_element_type=jnp.float32)
        * mask_row_ref[...],
        0.0,
    )
    # PFC context in column orientation (H, T): feeds pretrace column -> Hebbian outer prod
    ctx_col = jnp.maximum(
        jnp.dot(w_ctx_ref[...], xT_ref[...], preferred_element_type=jnp.float32)
        * mask_col_ref[...],
        0.0,
    )

    wh = wh_ref[...]                   # (H, H)  h2h weight (transposed, no bias)
    wmd2pfc = wmd2pfc_ref[...]         # (MD, H) (wMD2PFC / MD)^T
    wpfc = wpfc2md0_ref[...]           # (H, MD) wPFC2MD^T  (Hebbian-updated)

    # Hoisted lane-index iotas (JAX does not CSE broadcast_in_dim inside the loop)
    iota_h = jax.lax.broadcasted_iota(jnp.int32, (1, H), 1)
    iota_md = jax.lax.broadcasted_iota(jnp.int32, (1, MD), 1)

    hidden = jnp.zeros((1, H), jnp.float32)
    mdinp = jnp.zeros((1, MD), jnp.float32)
    posttr = jnp.zeros((1, MD), jnp.float32)
    pre_row = jnp.zeros((1, H), jnp.float32)   # MDpreTrace (lane-dense row)
    pre_col = jnp.zeros((H, 1), jnp.float32)   # MDpreTrace (column copy for outer prod)

    # ---- fully unrolled recurrence (state lives in vregs) -----------------------------
    for t in range(T):
        ext_t = ext[t:t + 1, :]                # (1, H)
        rout = ctx_row[t:t + 1, :]             # (1, H)
        rout_col = ctx_col[:, t:t + 1]         # (H, 1)

        pre_act = ext_t + jnp.dot(hidden, wh, preferred_element_type=jnp.float32)

        # --- MD_GYM one step ---
        proj = jnp.dot(rout, wpfc, preferred_element_type=jnp.float32)   # (1, MD)
        mdinp = mdinp + MD_GAIN * (-mdinp + proj)
        mdout = _wta_top2(mdinp, iota_md)                                # (1, MD)

        # traces
        pre_row = pre_row + INV_TAU_PRETRACE * (-pre_row + rout)
        pre_col = pre_col + INV_TAU_PRETRACE * (-pre_col + rout_col)
        posttr = posttr + INV_TAU_POSTTRACE * (-posttr + mdout)
        mdouttrace = _wta_top2(posttr, iota_md)                          # (1, MD)

        # 80%-quantile threshold: mean of smallest `kpart` = (sum - top n_top) / kpart
        thr = (jnp.sum(pre_row, axis=-1, keepdims=True)
               - _sum_top_k(pre_row, n_top, iota_h)) * inv_kpart         # (1, 1)
        binary_col = jnp.where(pre_col > thr, 1.0, 0.0)                  # (H, 1)

        # Hebbian update of wPFC2MD (stored transposed): (H,1)*(1,MD) broadcast
        wpfc = jnp.clip(
            wpfc + HEBB * (binary_col - 0.5) * (mdouttrace - 0.5), 0.0, 1.0
        )

        # MD -> PFC feedback + leaky ReLU hidden update
        md2pfc = jnp.dot(mdout, wmd2pfc, preferred_element_type=jnp.float32)  # (1, H)
        hidden = jnp.maximum(
            hidden * ONE_MINUS_ALPHA + (pre_act + md2pfc) * ALPHA, 0.0
        )

        act_ref[t:t + 1, :] = hidden           # VMEM store; DMA'd back once at the end

    # ---- output fc layer (single matmul on the resident activity slab) ----------------
    act_all = act_ref[...]                     # (T, H)
    out_ref[...] = (
        jnp.dot(act_all, wfc_ref[...], preferred_element_type=jnp.float32) + bfc_ref[...]
    )


# --------------------------------------------------------------------------------------
# Parameters (deterministic, mirroring the module __init__ / reset_parameters shapes)
# --------------------------------------------------------------------------------------
def build_params(key):
    ks = jax.random.split(key, 9)
    I, H, O, MD = INPUT_SIZE, HIDDEN_SIZE, OUTPUT_SIZE, MD_SIZE
    k_in = 1.0 / np.sqrt(I)
    k_h = 1.0 / np.sqrt(H)
    p = {}
    p["w_in"] = jax.random.uniform(ks[0], (H, I), jnp.float32, -k_in, k_in)
    p["b_in"] = jax.random.uniform(ks[1], (H,), jnp.float32, -k_in, k_in)
    p["w_h2h"] = (0.5 * jnp.eye(H)).astype(jnp.float32)           # nn.init.eye_ * 0.5
    p["b_h2h"] = jax.random.uniform(ks[2], (H,), jnp.float32, -k_h, k_h)
    p["w_ctx"] = (k_h * jax.random.uniform(ks[3], (H, I), jnp.float32)).astype(jnp.float32)
    p["w_fc"] = jax.random.uniform(ks[4], (O, H), jnp.float32, -k_h, k_h)
    p["b_fc"] = jax.random.uniform(ks[5], (O,), jnp.float32, -k_h, k_h)
    p["wPFC2MD"] = ((1.0 / np.sqrt(MD * H)) * jax.random.normal(ks[6], (MD, H))).astype(jnp.float32)
    cols = jax.random.randint(ks[7], (H,), 0, MD)
    p["wMD2PFC"] = (-5.0 * jax.nn.one_hot(cols, MD)).astype(jnp.float32)    # (H, MD)
    return p, ks[8]


def sub_mask_row(sub_id):
    mask = np.zeros((1, HIDDEN_SIZE), np.float32)
    mask[0, sub_id * SUB_SIZE:(sub_id + 1) * SUB_SIZE] = 1.0
    return jnp.asarray(mask)


# --------------------------------------------------------------------------------------
# Full forward (single fused Pallas call)
# --------------------------------------------------------------------------------------
@functools.partial(jax.jit, static_argnums=1)
def rnn_md_forward(x, sub_id, p):
    T, B, I = x.shape
    assert B == 1, "MD path requires batch size 1 (as asserted in the PyTorch module)"
    H, O, MD = HIDDEN_SIZE, OUTPUT_SIZE, MD_SIZE
    x2d = x.reshape(T, I).astype(jnp.float32)
    mask_row = sub_mask_row(sub_id)                    # (1, H)
    mask_col = mask_row.reshape(H, 1)                  # (H, 1)
    b_tot = (p["b_in"] + p["b_h2h"]).reshape(1, H)     # fold both biases into ext

    out2d, act2d = pl.pallas_call(
        _fused_kernel,
        out_shape=(
            jax.ShapeDtypeStruct((T, O), jnp.float32),
            jax.ShapeDtypeStruct((T, H), jnp.float32),
        ),
    )(
        x2d, x2d.T,
        p["w_in"].T, b_tot,
        p["w_ctx"].T, p["w_ctx"],
        mask_row, mask_col,
        p["w_h2h"].T,
        (p["wMD2PFC"] / MD).T,          # (MD, H), pre-scaled
        p["wPFC2MD"].T,                 # (H, MD)
        p["w_fc"].T, p["b_fc"].reshape(1, O),
    )
    return out2d.reshape(T, B, O), act2d.reshape(T, B, H)


# --------------------------------------------------------------------------------------
# Pure-JAX reference (mirrors the PyTorch/numpy forward, MDeffect=True, batch=1)
# --------------------------------------------------------------------------------------
def reference_forward(x, sub_id, p):
    T = x.shape[0]
    H, O, MD = HIDDEN_SIZE, OUTPUT_SIZE, MD_SIZE
    mask = sub_mask_row(sub_id)

    def wta(v):
        s = jnp.sort(v)
        thr = jnp.mean(s[-2 * MD_ACTIVE_SIZE:])      # median of 2 values = mean
        return (v >= thr).astype(jnp.float32)

    hidden = jnp.zeros((1, H), jnp.float32)
    mdinp = jnp.zeros((MD,), jnp.float32)
    pretrace = jnp.zeros((H,), jnp.float32)
    posttrace = jnp.zeros((MD,), jnp.float32)
    wpfc2md = p["wPFC2MD"]
    acts = []
    kpart = int(0.8 * H)
    for t in range(T):
        inp = x[t]                                              # (1, I)
        ext = inp @ p["w_in"].T + p["b_in"]
        rec = hidden @ p["w_h2h"].T + p["b_h2h"]
        pre = ext + rec
        ctx = jnp.maximum((inp @ p["w_ctx"].T) * mask, 0.0)
        rout = ctx[0]
        # MD_GYM.__call__
        mdinp = mdinp + MD_GAIN * (-mdinp + wpfc2md @ rout)
        mdout = wta(mdinp)
        # update_weights (conv with ones(1) kernel is identity)
        pretrace = pretrace + INV_TAU_PRETRACE * (-pretrace + rout)
        posttrace = posttrace + INV_TAU_POSTTRACE * (-posttrace + mdout)
        mdouttrace = wta(posttrace)
        thr = jnp.mean(jnp.sort(pretrace)[:kpart])
        binary = (pretrace > thr).astype(jnp.float32)
        delta = HEBB * jnp.outer(mdouttrace - 0.5, binary - 0.5)
        wpfc2md = jnp.clip(wpfc2md + delta, 0.0, 1.0)
        # MD -> PFC
        md2pfc = (p["wMD2PFC"] / MD) @ mdout
        pre = pre + md2pfc[None, :]
        hidden = jnp.maximum(hidden * ONE_MINUS_ALPHA + pre * ALPHA, 0.0)
        acts.append(hidden)
    act = jnp.stack(acts, axis=0)                               # (T, 1, H)
    out = act @ p["w_fc"].T + p["b_fc"]
    return out, act


# --------------------------------------------------------------------------------------
if __name__ == "__main__":
    key = jax.random.PRNGKey(0)
    params, kx = build_params(key)
    x = jax.random.normal(kx, (T_STEPS, BATCH, INPUT_SIZE), jnp.float32)

    out, act = rnn_md_forward(x, SUB_ID, params)
    out, act = jax.block_until_ready((out, act))

    ref_out, ref_act = reference_forward(x, SUB_ID, params)
    np.testing.assert_allclose(np.asarray(act), np.asarray(ref_act), rtol=2e-3, atol=2e-3)
    np.testing.assert_allclose(np.asarray(out), np.asarray(ref_out), rtol=2e-3, atol=2e-3)
    assert out.shape == (T_STEPS, BATCH, OUTPUT_SIZE)
    assert act.shape == (T_STEPS, BATCH, HIDDEN_SIZE)
    print("KERNEL_OK")
</pallas_src>

<mosaic_0001>
module attributes {stable_mosaic.version = 11 : i64} {
  func.func @_fused_kernel(%arg0: memref<8x8xf32, #tpu.memory_space<vmem>>, %arg1: memref<8x8xf32, #tpu.memory_space<vmem>>, %arg2: memref<8x32xf32, #tpu.memory_space<vmem>>, %arg3: memref<1x32xf32, #tpu.memory_space<vmem>>, %arg4: memref<8x32xf32, #tpu.memory_space<vmem>>, %arg5: memref<32x8xf32, #tpu.memory_space<vmem>>, %arg6: memref<1x32xf32, #tpu.memory_space<vmem>>, %arg7: memref<32x1xf32, #tpu.memory_space<vmem>>, %arg8: memref<32x32xf32, #tpu.memory_space<vmem>>, %arg9: memref<4x32xf32, #tpu.memory_space<vmem>>, %arg10: memref<32x4xf32, #tpu.memory_space<vmem>>, %arg11: memref<32x4xf32, #tpu.memory_space<vmem>>, %arg12: memref<1x4xf32, #tpu.memory_space<vmem>>, %arg13: memref<8x4xf32, #tpu.memory_space<vmem>>, %arg14: memref<8x32xf32, #tpu.memory_space<vmem>>) attributes {dimension_semantics = [], scalar_prefetch = 0 : i64, scratch_operands = 0 : i64, tpu.core_type = #tpu.core_type<tc>} {
    %c0 = arith.constant 0 : index
    %c0_0 = arith.constant 0 : index
    %0 = vector.load %arg0[%c0, %c0_0] : memref<8x8xf32, #tpu.memory_space<vmem>>, vector<8x8xf32>
    %c0_1 = arith.constant 0 : index
    %c0_2 = arith.constant 0 : index
    %1 = vector.load %arg2[%c0_1, %c0_2] : memref<8x32xf32, #tpu.memory_space<vmem>>, vector<8x32xf32>
    %cst = arith.constant dense<0.000000e+00> : vector<8x32xf32>
    %2 = tpu.matmul %0, %1, %cst {dimension_numbers = #tpu.dot_dimension_numbers<[1], [0], [0], [1], [0, 0, 1, 1], [], []>} : vector<8x8xf32>, vector<8x32xf32>, vector<8x32xf32> -> vector<8x32xf32>
    %c0_3 = arith.constant 0 : index
    %c0_4 = arith.constant 0 : index
    %3 = vector.load %arg3[%c0_3, %c0_4] : memref<1x32xf32, #tpu.memory_space<vmem>>, vector<1x32xf32>
    %4 = vector.broadcast %3 : vector<1x32xf32> to vector<8x32xf32>
    %5 = arith.addf %2, %4 : vector<8x32xf32>
    %c0_5 = arith.constant 0 : index
    %c0_6 = arith.constant 0 : index
    %6 = vector.load %arg4[%c0_5, %c0_6] : memref<8x32xf32, #tpu.memory_space<vmem>>, vector<8x32xf32>
    %cst_7 = arith.constant dense<0.000000e+00> : vector<8x32xf32>
    %7 = tpu.matmul %0, %6, %cst_7 {dimension_numbers = #tpu.dot_dimension_numbers<[1], [0], [0], [1], [0, 0, 1, 1], [], []>} : vector<8x8xf32>, vector<8x32xf32>, vector<8x32xf32> -> vector<8x32xf32>
    %c0_8 = arith.constant 0 : index
    %c0_9 = arith.constant 0 : index
    %8 = vector.load %arg6[%c0_8, %c0_9] : memref<1x32xf32, #tpu.memory_space<vmem>>, vector<1x32xf32>
    %9 = vector.broadcast %8 : vector<1x32xf32> to vector<8x32xf32>
    %10 = arith.mulf %7, %9 : vector<8x32xf32>
    %cst_10 = arith.constant 0.000000e+00 : f32
    %11 = vector.broadcast %cst_10 : f32 to vector<8x32xf32>
    %12 = arith.maximumf %10, %11 : vector<8x32xf32>
    %c0_11 = arith.constant 0 : index
    %c0_12 = arith.constant 0 : index
    %13 = vector.load %arg5[%c0_11, %c0_12] : memref<32x8xf32, #tpu.memory_space<vmem>>, vector<32x8xf32>
    %c0_13 = arith.constant 0 : index
    %c0_14 = arith.constant 0 : index
    %14 = vector.load %arg1[%c0_13, %c0_14] : memref<8x8xf32, #tpu.memory_space<vmem>>, vector<8x8xf32>
    %cst_15 = arith.constant dense<0.000000e+00> : vector<32x8xf32>
    %15 = tpu.matmul %13, %14, %cst_15 {dimension_numbers = #tpu.dot_dimension_numbers<[1], [0], [0], [1], [0, 0, 1, 1], [], []>} : vector<32x8xf32>, vector<8x8xf32>, vector<32x8xf32> -> vector<32x8xf32>
    %c0_16 = arith.constant 0 : index
    %c0_17 = arith.constant 0 : index
    %16 = vector.load %arg7[%c0_16, %c0_17] : memref<32x1xf32, #tpu.memory_space<vmem>>, vector<32x1xf32>
    %17 = vector.broadcast %16 : vector<32x1xf32> to vector<32x8xf32>
    %18 = arith.mulf %15, %17 : vector<32x8xf32>
    %cst_18 = arith.constant 0.000000e+00 : f32
    %19 = vector.broadcast %cst_18 : f32 to vector<32x8xf32>
    %20 = arith.maximumf %18, %19 : vector<32x8xf32>
    %c0_19 = arith.constant 0 : index
    %c0_20 = arith.constant 0 : index
    %21 = vector.load %arg8[%c0_19, %c0_20] : memref<32x32xf32, #tpu.memory_space<vmem>>, vector<32x32xf32>
    %c0_21 = arith.constant 0 : index
    %c0_22 = arith.constant 0 : index
    %22 = vector.load %arg9[%c0_21, %c0_22] : memref<4x32xf32, #tpu.memory_space<vmem>>, vector<4x32xf32>
    %c0_23 = arith.constant 0 : index
    %c0_24 = arith.constant 0 : index
    %23 = vector.load %arg10[%c0_23, %c0_24] : memref<32x4xf32, #tpu.memory_space<vmem>>, vector<32x4xf32>
    %24 = tpu.iota {dimensions = array<i32: 1>} : vector<1x32xi32>
    %25 = tpu.iota {dimensions = array<i32: 1>} : vector<1x4xi32>
    %cst_25 = arith.constant 0.000000e+00 : f32
    %26 = vector.broadcast %cst_25 : f32 to vector<1x32xf32>
    %cst_26 = arith.constant 0.000000e+00 : f32
    %27 = vector.broadcast %cst_26 : f32 to vector<1x4xf32>
    %cst_27 = arith.constant 0.000000e+00 : f32
    %28 = vector.broadcast %cst_27 : f32 to vector<1x4xf32>
    %cst_28 = arith.constant 0.000000e+00 : f32
    %29 = vector.broadcast %cst_28 : f32 to vector<1x32xf32>
    %cst_29 = arith.constant 0.000000e+00 : f32
    %30 = vector.broadcast %cst_29 : f32 to vector<32x1xf32>
    %31 = vector.extract_strided_slice %5 {offsets = [0, 0], sizes = [1, 32], strides = [1, 1]} : vector<8x32xf32> to vector<1x32xf32>
    %32 = vector.extract_strided_slice %12 {offsets = [0, 0], sizes = [1, 32], strides = [1, 1]} : vector<8x32xf32> to vector<1x32xf32>
    %33 = vector.extract_strided_slice %20 {offsets = [0, 0], sizes = [32, 1], strides = [1, 1]} : vector<32x8xf32> to vector<32x1xf32>
    %cst_30 = arith.constant dense<0.000000e+00> : vector<1x32xf32>
    %34 = tpu.matmul %26, %21, %cst_30 {dimension_numbers = #tpu.dot_dimension_numbers<[1], [0], [0], [1], [0, 0, 1, 1], [], []>} : vector<1x32xf32>, vector<32x32xf32>, vector<1x32xf32> -> vector<1x32xf32>
    %35 = arith.addf %31, %34 : vector<1x32xf32>
    %cst_31 = arith.constant dense<0.000000e+00> : vector<1x4xf32>
    %36 = tpu.matmul %32, %23, %cst_31 {dimension_numbers = #tpu.dot_dimension_numbers<[1], [0], [0], [1], [0, 0, 1, 1], [], []>} : vector<1x32xf32>, vector<32x4xf32>, vector<1x4xf32> -> vector<1x4xf32>
    %cst_32 = arith.constant 0.000000e+00 : f32
    %37 = vector.broadcast %cst_32 : f32 to vector<1x4xf32>
    %38 = arith.subf %37, %27 : vector<1x4xf32>
    %39 = arith.addf %38, %36 : vector<1x4xf32>
    %cst_33 = arith.constant 1.250000e-02 : f32
    %40 = vector.broadcast %cst_33 : f32 to vector<1x4xf32>
    %41 = arith.mulf %40, %39 : vector<1x4xf32>
    %42 = arith.addf %27, %41 : vector<1x4xf32>
    %cst_34 = arith.constant dense<0xFF800000> : vector<1xf32>
    %43 = vector.multi_reduction <maximumf>, %42, %cst_34 [1] : vector<1x4xf32> to vector<1xf32>
    %44 = vector.shape_cast %43 : vector<1xf32> to vector<1x1xf32>
    %45 = vector.broadcast %44 : vector<1x1xf32> to vector<1x4xf32>
    %46 = arith.cmpf oeq, %42, %45 : vector<1x4xf32>
    %c4_i32 = arith.constant 4 : i32
    %47 = vector.broadcast %c4_i32 : i32 to vector<1x4xi32>
    %48 = arith.select %46, %25, %47 : vector<1x4xi1>, vector<1x4xi32>
    %cst_35 = arith.constant dense<2147483647> : vector<1xi32>
    %49 = vector.multi_reduction <minsi>, %48, %cst_35 [1] : vector<1x4xi32> to vector<1xi32>
    %50 = vector.shape_cast %49 : vector<1xi32> to vector<1x1xi32>
    %51 = vector.broadcast %50 : vector<1x1xi32> to vector<1x4xi32>
    %52 = arith.cmpi eq, %25, %51 : vector<1x4xi32>
    %cst_36 = arith.constant 0xFF800000 : f32
    %53 = vector.broadcast %cst_36 : f32 to vector<1x4xf32>
    %54 = arith.select %52, %53, %42 : vector<1x4xi1>, vector<1x4xf32>
    %cst_37 = arith.constant dense<0xFF800000> : vector<1xf32>
    %55 = vector.multi_reduction <maximumf>, %54, %cst_37 [1] : vector<1x4xf32> to vector<1xf32>
    %56 = vector.shape_cast %55 : vector<1xf32> to vector<1x1xf32>
    %57 = arith.addf %44, %56 : vector<1x1xf32>
    %cst_38 = arith.constant 5.000000e-01 : f32
    %58 = vector.broadcast %cst_38 : f32 to vector<1x1xf32>
    %59 = arith.mulf %58, %57 : vector<1x1xf32>
    %60 = vector.broadcast %59 : vector<1x1xf32> to vector<1x4xf32>
    %61 = arith.cmpf oge, %42, %60 : vector<1x4xf32>
    %cst_39 = arith.constant 1.000000e+00 : f32
    %cst_40 = arith.constant 0.000000e+00 : f32
    %62 = vector.broadcast %cst_39 : f32 to vector<1x4xf32>
    %63 = vector.broadcast %cst_40 : f32 to vector<1x4xf32>
    %64 = arith.select %61, %62, %63 : vector<1x4xi1>, vector<1x4xf32>
    %cst_41 = arith.constant 0.000000e+00 : f32
    %65 = vector.broadcast %cst_41 : f32 to vector<1x32xf32>
    %66 = arith.subf %65, %29 : vector<1x32xf32>
    %67 = arith.addf %66, %32 : vector<1x32xf32>
    %cst_42 = arith.constant 1.000000e-03 : f32
    %68 = vector.broadcast %cst_42 : f32 to vector<1x32xf32>
    %69 = arith.mulf %68, %67 : vector<1x32xf32>
    %70 = arith.addf %29, %69 : vector<1x32xf32>
    %cst_43 = arith.constant 0.000000e+00 : f32
    %71 = vector.broadcast %cst_43 : f32 to vector<32x1xf32>
    %72 = arith.subf %71, %30 : vector<32x1xf32>
    %73 = arith.addf %72, %33 : vector<32x1xf32>
    %cst_44 = arith.constant 1.000000e-03 : f32
    %74 = vector.broadcast %cst_44 : f32 to vector<32x1xf32>
    %75 = arith.mulf %74, %73 : vector<32x1xf32>
    %76 = arith.addf %30, %75 : vector<32x1xf32>
    %cst_45 = arith.constant 0.000000e+00 : f32
    %77 = vector.broadcast %cst_45 : f32 to vector<1x4xf32>
    %78 = arith.subf %77, %28 : vector<1x4xf32>
    %79 = arith.addf %78, %64 : vector<1x4xf32>
    %cst_46 = arith.constant 1.000000e-03 : f32
    %80 = vector.broadcast %cst_46 : f32 to vector<1x4xf32>
    %81 = arith.mulf %80, %79 : vector<1x4xf32>
    %82 = arith.addf %28, %81 : vector<1x4xf32>
    %cst_47 = arith.constant dense<0xFF800000> : vector<1xf32>
    %83 = vector.multi_reduction <maximumf>, %82, %cst_47 [1] : vector<1x4xf32> to vector<1xf32>
    %84 = vector.shape_cast %83 : vector<1xf32> to vector<1x1xf32>
    %85 = vector.broadcast %84 : vector<1x1xf32> to vector<1x4xf32>
    %86 = arith.cmpf oeq, %82, %85 : vector<1x4xf32>
    %c4_i32_48 = arith.constant 4 : i32
    %87 = vector.broadcast %c4_i32_48 : i32 to vector<1x4xi32>
    %88 = arith.select %86, %25, %87 : vector<1x4xi1>, vector<1x4xi32>
    %cst_49 = arith.constant dense<2147483647> : vector<1xi32>
    %89 = vector.multi_reduction <minsi>, %88, %cst_49 [1] : vector<1x4xi32> to vector<1xi32>
    %90 = vector.shape_cast %89 : vector<1xi32> to vector<1x1xi32>
    %91 = vector.broadcast %90 : vector<1x1xi32> to vector<1x4xi32>
    %92 = arith.cmpi eq, %25, %91 : vector<1x4xi32>
    %cst_50 = arith.constant 0xFF800000 : f32
    %93 = vector.broadcast %cst_50 : f32 to vector<1x4xf32>
    %94 = arith.select %92, %93, %82 : vector<1x4xi1>, vector<1x4xf32>
    %cst_51 = arith.constant dense<0xFF800000> : vector<1xf32>
    %95 = vector.multi_reduction <maximumf>, %94, %cst_51 [1] : vector<1x4xf32> to vector<1xf32>
    %96 = vector.shape_cast %95 : vector<1xf32> to vector<1x1xf32>
    %97 = arith.addf %84, %96 : vector<1x1xf32>
    %cst_52 = arith.constant 5.000000e-01 : f32
    %98 = vector.broadcast %cst_52 : f32 to vector<1x1xf32>
    %99 = arith.mulf %98, %97 : vector<1x1xf32>
    %100 = vector.broadcast %99 : vector<1x1xf32> to vector<1x4xf32>
    %101 = arith.cmpf oge, %82, %100 : vector<1x4xf32>
    %cst_53 = arith.constant 1.000000e+00 : f32
    %cst_54 = arith.constant 0.000000e+00 : f32
    %102 = vector.broadcast %cst_53 : f32 to vector<1x4xf32>
    %103 = vector.broadcast %cst_54 : f32 to vector<1x4xf32>
    %104 = arith.select %101, %102, %103 : vector<1x4xi1>, vector<1x4xf32>
    %cst_55 = arith.constant dense<0.000000e+00> : vector<1xf32>
    %105 = vector.multi_reduction <add>, %70, %cst_55 [1] : vector<1x32xf32> to vector<1xf32>
    %106 = vector.shape_cast %105 : vector<1xf32> to vector<1x1xf32>
    %cst_56 = arith.constant 0.000000e+00 : f32
    %107 = vector.broadcast %cst_56 : f32 to vector<1x1xf32>
    %cst_57 = arith.constant dense<0xFF800000> : vector<1xf32>
    %108 = vector.multi_reduction <maximumf>, %70, %cst_57 [1] : vector<1x32xf32> to vector<1xf32>
    %109 = vector.shape_cast %108 : vector<1xf32> to vector<1x1xf32>
    %110 = arith.addf %107, %109 : vector<1x1xf32>
    %111 = vector.broadcast %109 : vector<1x1xf32> to vector<1x32xf32>
    %112 = arith.cmpf oeq, %70, %111 : vector<1x32xf32>
    %c32_i32 = arith.constant 32 : i32
    %113 = vector.broadcast %c32_i32 : i32 to vector<1x32xi32>
    %114 = arith.select %112, %24, %113 : vector<1x32xi1>, vector<1x32xi32>
    %cst_58 = arith.constant dense<2147483647> : vector<1xi32>
    %115 = vector.multi_reduction <minsi>, %114, %cst_58 [1] : vector<1x32xi32> to vector<1xi32>
    %116 = vector.shape_cast %115 : vector<1xi32> to vector<1x1xi32>
    %117 = vector.broadcast %116 : vector<1x1xi32> to vector<1x32xi32>
    %118 = arith.cmpi eq, %24, %117 : vector<1x32xi32>
    %cst_59 = arith.constant 0xFF800000 : f32
    %119 = vector.broadcast %cst_59 : f32 to vector<1x32xf32>
    %120 = arith.select %118, %119, %70 : vector<1x32xi1>, vector<1x32xf32>
    %cst_60 = arith.constant dense<0xFF800000> : vector<1xf32>
    %121 = vector.multi_reduction <maximumf>, %120, %cst_60 [1] : vector<1x32xf32> to vector<1xf32>
    %122 = vector.shape_cast %121 : vector<1xf32> to vector<1x1xf32>
    %123 = arith.addf %110, %122 : vector<1x1xf32>
    %124 = vector.broadcast %122 : vector<1x1xf32> to vector<1x32xf32>
    %125 = arith.cmpf oeq, %120, %124 : vector<1x32xf32>
    %c32_i32_61 = arith.constant 32 : i32
    %126 = vector.broadcast %c32_i32_61 : i32 to vector<1x32xi32>
    %127 = arith.select %125, %24, %126 : vector<1x32xi1>, vector<1x32xi32>
    %cst_62 = arith.constant dense<2147483647> : vector<1xi32>
    %128 = vector.multi_reduction <minsi>, %127, %cst_62 [1] : vector<1x32xi32> to vector<1xi32>
    %129 = vector.shape_cast %128 : vector<1xi32> to vector<1x1xi32>
    %130 = vector.broadcast %129 : vector<1x1xi32> to vector<1x32xi32>
    %131 = arith.cmpi eq, %24, %130 : vector<1x32xi32>
    %cst_63 = arith.constant 0xFF800000 : f32
    %132 = vector.broadcast %cst_63 : f32 to vector<1x32xf32>
    %133 = arith.select %131, %132, %120 : vector<1x32xi1>, vector<1x32xf32>
    %cst_64 = arith.constant dense<0xFF800000> : vector<1xf32>
    %134 = vector.multi_reduction <maximumf>, %133, %cst_64 [1] : vector<1x32xf32> to vector<1xf32>
    %135 = vector.shape_cast %134 : vector<1xf32> to vector<1x1xf32>
    %136 = arith.addf %123, %135 : vector<1x1xf32>
    %137 = vector.broadcast %135 : vector<1x1xf32> to vector<1x32xf32>
    %138 = arith.cmpf oeq, %133, %137 : vector<1x32xf32>
    %c32_i32_65 = arith.constant 32 : i32
    %139 = vector.broadcast %c32_i32_65 : i32 to vector<1x32xi32>
    %140 = arith.select %138, %24, %139 : vector<1x32xi1>, vector<1x32xi32>
    %cst_66 = arith.constant dense<2147483647> : vector<1xi32>
    %141 = vector.multi_reduction <minsi>, %140, %cst_66 [1] : vector<1x32xi32> to vector<1xi32>
    %142 = vector.shape_cast %141 : vector<1xi32> to vector<1x1xi32>
    %143 = vector.broadcast %142 : vector<1x1xi32> to vector<1x32xi32>
    %144 = arith.cmpi eq, %24, %143 : vector<1x32xi32>
    %cst_67 = arith.constant 0xFF800000 : f32
    %145 = vector.broadcast %cst_67 : f32 to vector<1x32xf32>
    %146 = arith.select %144, %145, %133 : vector<1x32xi1>, vector<1x32xf32>
    %cst_68 = arith.constant dense<0xFF800000> : vector<1xf32>
    %147 = vector.multi_reduction <maximumf>, %146, %cst_68 [1] : vector<1x32xf32> to vector<1xf32>
    %148 = vector.shape_cast %147 : vector<1xf32> to vector<1x1xf32>
    %149 = arith.addf %136, %148 : vector<1x1xf32>
    %150 = vector.broadcast %148 : vector<1x1xf32> to vector<1x32xf32>
    %151 = arith.cmpf oeq, %146, %150 : vector<1x32xf32>
    %c32_i32_69 = arith.constant 32 : i32
    %152 = vector.broadcast %c32_i32_69 : i32 to vector<1x32xi32>
    %153 = arith.select %151, %24, %152 : vector<1x32xi1>, vector<1x32xi32>
    %cst_70 = arith.constant dense<2147483647> : vector<1xi32>
    %154 = vector.multi_reduction <minsi>, %153, %cst_70 [1] : vector<1x32xi32> to vector<1xi32>
    %155 = vector.shape_cast %154 : vector<1xi32> to vector<1x1xi32>
    %156 = vector.broadcast %155 : vector<1x1xi32> to vector<1x32xi32>
    %157 = arith.cmpi eq, %24, %156 : vector<1x32xi32>
    %cst_71 = arith.constant 0xFF800000 : f32
    %158 = vector.broadcast %cst_71 : f32 to vector<1x32xf32>
    %159 = arith.select %157, %158, %146 : vector<1x32xi1>, vector<1x32xf32>
    %cst_72 = arith.constant dense<0xFF800000> : vector<1xf32>
    %160 = vector.multi_reduction <maximumf>, %159, %cst_72 [1] : vector<1x32xf32> to vector<1xf32>
    %161 = vector.shape_cast %160 : vector<1xf32> to vector<1x1xf32>
    %162 = arith.addf %149, %161 : vector<1x1xf32>
    %163 = vector.broadcast %161 : vector<1x1xf32> to vector<1x32xf32>
    %164 = arith.cmpf oeq, %159, %163 : vector<1x32xf32>
    %c32_i32_73 = arith.constant 32 : i32
    %165 = vector.broadcast %c32_i32_73 : i32 to vector<1x32xi32>
    %166 = arith.select %164, %24, %165 : vector<1x32xi1>, vector<1x32xi32>
    %cst_74 = arith.constant dense<2147483647> : vector<1xi32>
    %167 = vector.multi_reduction <minsi>, %166, %cst_74 [1] : vector<1x32xi32> to vector<1xi32>
    %168 = vector.shape_cast %167 : vector<1xi32> to vector<1x1xi32>
    %169 = vector.broadcast %168 : vector<1x1xi32> to vector<1x32xi32>
    %170 = arith.cmpi eq, %24, %169 : vector<1x32xi32>
    %cst_75 = arith.constant 0xFF800000 : f32
    %171 = vector.broadcast %cst_75 : f32 to vector<1x32xf32>
    %172 = arith.select %170, %171, %159 : vector<1x32xi1>, vector<1x32xf32>
    %cst_76 = arith.constant dense<0xFF800000> : vector<1xf32>
    %173 = vector.multi_reduction <maximumf>, %172, %cst_76 [1] : vector<1x32xf32> to vector<1xf32>
    %174 = vector.shape_cast %173 : vector<1xf32> to vector<1x1xf32>
    %175 = arith.addf %162, %174 : vector<1x1xf32>
    %176 = vector.broadcast %174 : vector<1x1xf32> to vector<1x32xf32>
    %177 = arith.cmpf oeq, %172, %176 : vector<1x32xf32>
    %c32_i32_77 = arith.constant 32 : i32
    %178 = vector.broadcast %c32_i32_77 : i32 to vector<1x32xi32>
    %179 = arith.select %177, %24, %178 : vector<1x32xi1>, vector<1x32xi32>
    %cst_78 = arith.constant dense<2147483647> : vector<1xi32>
    %180 = vector.multi_reduction <minsi>, %179, %cst_78 [1] : vector<1x32xi32> to vector<1xi32>
    %181 = vector.shape_cast %180 : vector<1xi32> to vector<1x1xi32>
    %182 = vector.broadcast %181 : vector<1x1xi32> to vector<1x32xi32>
    %183 = arith.cmpi eq, %24, %182 : vector<1x32xi32>
    %cst_79 = arith.constant 0xFF800000 : f32
    %184 = vector.broadcast %cst_79 : f32 to vector<1x32xf32>
    %185 = arith.select %183, %184, %172 : vector<1x32xi1>, vector<1x32xf32>
    %cst_80 = arith.constant dense<0xFF800000> : vector<1xf32>
    %186 = vector.multi_reduction <maximumf>, %185, %cst_80 [1] : vector<1x32xf32> to vector<1xf32>
    %187 = vector.shape_cast %186 : vector<1xf32> to vector<1x1xf32>
    %188 = arith.addf %175, %187 : vector<1x1xf32>
    %189 = arith.subf %106, %188 : vector<1x1xf32>
    %cst_81 = arith.constant 4.000000e-02 : f32
    %190 = vector.broadcast %cst_81 : f32 to vector<1x1xf32>
    %191 = arith.mulf %189, %190 : vector<1x1xf32>
    %192 = vector.broadcast %191 : vector<1x1xf32> to vector<32x1xf32>
    %193 = arith.cmpf ogt, %76, %192 : vector<32x1xf32>
    %cst_82 = arith.constant 1.000000e+00 : f32
    %cst_83 = arith.constant 0.000000e+00 : f32
    %194 = vector.broadcast %cst_82 : f32 to vector<32x1xf32>
    %195 = vector.broadcast %cst_83 : f32 to vector<32x1xf32>
    %196 = arith.select %193, %194, %195 : vector<32x1xi1>, vector<32x1xf32>
    %cst_84 = arith.constant 5.000000e-01 : f32
    %197 = vector.broadcast %cst_84 : f32 to vector<32x1xf32>
    %198 = arith.subf %196, %197 : vector<32x1xf32>
    %cst_85 = arith.constant 5.000000e-05 : f32
    %199 = vector.broadcast %cst_85 : f32 to vector<32x1xf32>
    %200 = arith.mulf %199, %198 : vector<32x1xf32>
    %cst_86 = arith.constant 5.000000e-01 : f32
    %201 = vector.broadcast %cst_86 : f32 to vector<1x4xf32>
    %202 = arith.subf %104, %201 : vector<1x4xf32>
    %203 = vector.broadcast %200 : vector<32x1xf32> to vector<32x4xf32>
    %204 = vector.broadcast %202 : vector<1x4xf32> to vector<32x4xf32>
    %205 = arith.mulf %203, %204 : vector<32x4xf32>
    %206 = arith.addf %23, %205 : vector<32x4xf32>
    %cst_87 = arith.constant 0.000000e+00 : f32
    %cst_88 = arith.constant 1.000000e+00 : f32
    %207 = vector.broadcast %cst_87 : f32 to vector<32x4xf32>
    %208 = arith.maximumf %207, %206 : vector<32x4xf32>
    %209 = vector.broadcast %cst_88 : f32 to vector<32x4xf32>
    %210 = arith.minimumf %209, %208 : vector<32x4xf32>
    %cst_89 = arith.constant dense<0.000000e+00> : vector<1x32xf32>
    %211 = tpu.matmul %64, %22, %cst_89 {dimension_numbers = #tpu.dot_dimension_numbers<[1], [0], [0], [1], [0, 0, 1, 1], [], []>} : vector<1x4xf32>, vector<4x32xf32>, vector<1x32xf32> -> vector<1x32xf32>
    %cst_90 = arith.constant 0.899999976 : f32
    %212 = vector.broadcast %cst_90 : f32 to vector<1x32xf32>
    %213 = arith.mulf %26, %212 : vector<1x32xf32>
    %214 = arith.addf %35, %211 : vector<1x32xf32>
    %cst_91 = arith.constant 1.000000e-01 : f32
    %215 = vector.broadcast %cst_91 : f32 to vector<1x32xf32>
    %216 = arith.mulf %214, %215 : vector<1x32xf32>
    %217 = arith.addf %213, %216 : vector<1x32xf32>
    %cst_92 = arith.constant 0.000000e+00 : f32
    %218 = vector.broadcast %cst_92 : f32 to vector<1x32xf32>
    %219 = arith.maximumf %217, %218 : vector<1x32xf32>
    %c0_93 = arith.constant 0 : index
    %c0_94 = arith.constant 0 : index
    %220 = vector.load %arg14[%c0_93, %c0_94] : memref<8x32xf32, #tpu.memory_space<vmem>>, vector<1x32xf32>
    tpu.vector_store %arg14[%c0_93, %c0_94], %219 {strides = array<i32>} : memref<8x32xf32, #tpu.memory_space<vmem>>, vector<1x32xf32>,
    %221 = vector.extract_strided_slice %5 {offsets = [1, 0], sizes = [1, 32], strides = [1, 1]} : vector<8x32xf32> to vector<1x32xf32>
    %222 = vector.extract_strided_slice %12 {offsets = [1, 0], sizes = [1, 32], strides = [1, 1]} : vector<8x32xf32> to vector<1x32xf32>
    %223 = vector.extract_strided_slice %20 {offsets = [0, 1], sizes = [32, 1], strides = [1, 1]} : vector<32x8xf32> to vector<32x1xf32>
    %cst_95 = arith.constant dense<0.000000e+00> : vector<1x32xf32>
    %224 = tpu.matmul %219, %21, %cst_95 {dimension_numbers = #tpu.dot_dimension_numbers<[1], [0], [0], [1], [0, 0, 1, 1], [], []>} : vector<1x32xf32>, vector<32x32xf32>, vector<1x32xf32> -> vector<1x32xf32>
    %225 = arith.addf %221, %224 : vector<1x32xf32>
    %cst_96 = arith.constant dense<0.000000e+00> : vector<1x4xf32>
    %226 = tpu.matmul %222, %210, %cst_96 {dimension_numbers = #tpu.dot_dimension_numbers<[1], [0], [0], [1], [0, 0, 1, 1], [], []>} : vector<1x32xf32>, vector<32x4xf32>, vector<1x4xf32> -> vector<1x4xf32>
    %cst_97 = arith.constant 0.000000e+00 : f32
    %227 = vector.broadcast %cst_97 : f32 to vector<1x4xf32>
    %228 = arith.subf %227, %42 : vector<1x4xf32>
    %229 = arith.addf %228, %226 : vector<1x4xf32>
    %cst_98 = arith.constant 1.250000e-02 : f32
    %230 = vector.broadcast %cst_98 : f32 to vector<1x4xf32>
    %231 = arith.mulf %230, %229 : vector<1x4xf32>
    %232 = arith.addf %42, %231 : vector<1x4xf32>
    %cst_99 = arith.constant dense<0xFF800000> : vector<1xf32>
    %233 = vector.multi_reduction <maximumf>, %232, %cst_99 [1] : vector<1x4xf32> to vector<1xf32>
    %234 = vector.shape_cast %233 : vector<1xf32> to vector<1x1xf32>
    %235 = vector.broadcast %234 : vector<1x1xf32> to vector<1x4xf32>
    %236 = arith.cmpf oeq, %232, %235 : vector<1x4xf32>
    %c4_i32_100 = arith.constant 4 : i32
    %237 = vector.broadcast %c4_i32_100 : i32 to vector<1x4xi32>
    %238 = arith.select %236, %25, %237 : vector<1x4xi1>, vector<1x4xi32>
    %cst_101 = arith.constant dense<2147483647> : vector<1xi32>
    %239 = vector.multi_reduction <minsi>, %238, %cst_101 [1] : vector<1x4xi32> to vector<1xi32>
    %240 = vector.shape_cast %239 : vector<1xi32> to vector<1x1xi32>
    %241 = vector.broadcast %240 : vector<1x1xi32> to vector<1x4xi32>
    %242 = arith.cmpi eq, %25, %241 : vector<1x4xi32>
    %cst_102 = arith.constant 0xFF800000 : f32
    %243 = vector.broadcast %cst_102 : f32 to vector<1x4xf32>
    %244 = arith.select %242, %243, %232 : vector<1x4xi1>, vector<1x4xf32>
    %cst_103 = arith.constant dense<0xFF800000> : vector<1xf32>
    %245 = vector.multi_reduction <maximumf>, %244, %cst_103 [1] : vector<1x4xf32> to vector<1xf32>
    %246 = vector.shape_cast %245 : vector<1xf32> to vector<1x1xf32>
    %247 = arith.addf %234, %246 : vector<1x1xf32>
    %cst_104 = arith.constant 5.000000e-01 : f32
    %248 = vector.broadcast %cst_104 : f32 to vector<1x1xf32>
    %249 = arith.mulf %248, %247 : vector<1x1xf32>
    %250 = vector.broadcast %249 : vector<1x1xf32> to vector<1x4xf32>
    %251 = arith.cmpf oge, %232, %250 : vector<1x4xf32>
    %cst_105 = arith.constant 1.000000e+00 : f32
    %cst_106 = arith.constant 0.000000e+00 : f32
    %252 = vector.broadcast %cst_105 : f32 to vector<1x4xf32>
    %253 = vector.broadcast %cst_106 : f32 to vector<1x4xf32>
    %254 = arith.select %251, %252, %253 : vector<1x4xi1>, vector<1x4xf32>
    %cst_107 = arith.constant 0.000000e+00 : f32
    %255 = vector.broadcast %cst_107 : f32 to vector<1x32xf32>
    %256 = arith.subf %255, %70 : vector<1x32xf32>
    %257 = arith.addf %256, %222 : vector<1x32xf32>
    %cst_108 = arith.constant 1.000000e-03 : f32
    %258 = vector.broadcast %cst_108 : f32 to vector<1x32xf32>
    %259 = arith.mulf %258, %257 : vector<1x32xf32>
    %260 = arith.addf %70, %259 : vector<1x32xf32>
    %cst_109 = arith.constant 0.000000e+00 : f32
    %261 = vector.broadcast %cst_109 : f32 to vector<32x1xf32>
    %262 = arith.subf %261, %76 : vector<32x1xf32>
    %263 = arith.addf %262, %223 : vector<32x1xf32>
    %cst_110 = arith.constant 1.000000e-03 : f32
    %264 = vector.broadcast %cst_110 : f32 to vector<32x1xf32>
    %265 = arith.mulf %264, %263 : vector<32x1xf32>
    %266 = arith.addf %76, %265 : vector<32x1xf32>
    %cst_111 = arith.constant 0.000000e+00 : f32
    %267 = vector.broadcast %cst_111 : f32 to vector<1x4xf32>
    %268 = arith.subf %267, %82 : vector<1x4xf32>
    %269 = arith.addf %268, %254 : vector<1x4xf32>
    %cst_112 = arith.constant 1.000000e-03 : f32
    %270 = vector.broadcast %cst_112 : f32 to vector<1x4xf32>
    %271 = arith.mulf %270, %269 : vector<1x4xf32>
    %272 = arith.addf %82, %271 : vector<1x4xf32>
    %cst_113 = arith.constant dense<0xFF800000> : vector<1xf32>
    %273 = vector.multi_reduction <maximumf>, %272, %cst_113 [1] : vector<1x4xf32> to vector<1xf32>
    %274 = vector.shape_cast %273 : vector<1xf32> to vector<1x1xf32>
    %275 = vector.broadcast %274 : vector<1x1xf32> to vector<1x4xf32>
    %276 = arith.cmpf oeq, %272, %275 : vector<1x4xf32>
    %c4_i32_114 = arith.constant 4 : i32
    %277 = vector.broadcast %c4_i32_114 : i32 to vector<1x4xi32>
    %278 = arith.select %276, %25, %277 : vector<1x4xi1>, vector<1x4xi32>
    %cst_115 = arith.constant dense<2147483647> : vector<1xi32>
    %279 = vector.multi_reduction <minsi>, %278, %cst_115 [1] : vector<1x4xi32> to vector<1xi32>
    %280 = vector.shape_cast %279 : vector<1xi32> to vector<1x1xi32>
    %281 = vector.broadcast %280 : vector<1x1xi32> to vector<1x4xi32>
    %282 = arith.cmpi eq, %25, %281 : vector<1x4xi32>
    %cst_116 = arith.constant 0xFF800000 : f32
    %283 = vector.broadcast %cst_116 : f32 to vector<1x4xf32>
    %284 = arith.select %282, %283, %272 : vector<1x4xi1>, vector<1x4xf32>
    %cst_117 = arith.constant dense<0xFF800000> : vector<1xf32>
    %285 = vector.multi_reduction <maximumf>, %284, %cst_117 [1] : vector<1x4xf32> to vector<1xf32>
    %286 = vector.shape_cast %285 : vector<1xf32> to vector<1x1xf32>
    %287 = arith.addf %274, %286 : vector<1x1xf32>
    %cst_118 = arith.constant 5.000000e-01 : f32
    %288 = vector.broadcast %cst_118 : f32 to vector<1x1xf32>
    %289 = arith.mulf %288, %287 : vector<1x1xf32>
    %290 = vector.broadcast %289 : vector<1x1xf32> to vector<1x4xf32>
    %291 = arith.cmpf oge, %272, %290 : vector<1x4xf32>
    %cst_119 = arith.constant 1.000000e+00 : f32
    %cst_120 = arith.constant 0.000000e+00 : f32
    %292 = vector.broadcast %cst_119 : f32 to vector<1x4xf32>
    %293 = vector.broadcast %cst_120 : f32 to vector<1x4xf32>
    %294 = arith.select %291, %292, %293 : vector<1x4xi1>, vector<1x4xf32>
    %cst_121 = arith.constant dense<0.000000e+00> : vector<1xf32>
    %295 = vector.multi_reduction <add>, %260, %cst_121 [1] : vector<1x32xf32> to vector<1xf32>
    %296 = vector.shape_cast %295 : vector<1xf32> to vector<1x1xf32>
    %cst_122 = arith.constant 0.000000e+00 : f32
    %297 = vector.broadcast %cst_122 : f32 to vector<1x1xf32>
    %cst_123 = arith.constant dense<0xFF800000> : vector<1xf32>
    %298 = vector.multi_reduction <maximumf>, %260, %cst_123 [1] : vector<1x32xf32> to vector<1xf32>
    %299 = vector.shape_cast %298 : vector<1xf32> to vector<1x1xf32>
    %300 = arith.addf %297, %299 : vector<1x1xf32>
    %301 = vector.broadcast %299 : vector<1x1xf32> to vector<1x32xf32>
    %302 = arith.cmpf oeq, %260, %301 : vector<1x32xf32>
    %c32_i32_124 = arith.constant 32 : i32
    %303 = vector.broadcast %c32_i32_124 : i32 to vector<1x32xi32>
    %304 = arith.select %302, %24, %303 : vector<1x32xi1>, vector<1x32xi32>
    %cst_125 = arith.constant dense<2147483647> : vector<1xi32>
    %305 = vector.multi_reduction <minsi>, %304, %cst_125 [1] : vector<1x32xi32> to vector<1xi32>
    %306 = vector.shape_cast %305 : vector<1xi32> to vector<1x1xi32>
    %307 = vector.broadcast %306 : vector<1x1xi32> to vector<1x32xi32>
    %308 = arith.cmpi eq, %24, %307 : vector<1x32xi32>
    %cst_126 = arith.constant 0xFF800000 : f32
    %309 = vector.broadcast %cst_126 : f32 to vector<1x32xf32>
    %310 = arith.select %308, %309, %260 : vector<1x32xi1>, vector<1x32xf32>
    %cst_127 = arith.constant dense<0xFF800000> : vector<1xf32>
    %311 = vector.multi_reduction <maximumf>, %310, %cst_127 [1] : vector<1x32xf32> to vector<1xf32>
    %312 = vector.shape_cast %311 : vector<1xf32> to vector<1x1xf32>
    %313 = arith.addf %300, %312 : vector<1x1xf32>
    %314 = vector.broadcast %312 : vector<1x1xf32> to vector<1x32xf32>
    %315 = arith.cmpf oeq, %310, %314 : vector<1x32xf32>
    %c32_i32_128 = arith.constant 32 : i32
    %316 = vector.broadcast %c32_i32_128 : i32 to vector<1x32xi32>
    %317 = arith.select %315, %24, %316 : vector<1x32xi1>, vector<1x32xi32>
    %cst_129 = arith.constant dense<2147483647> : vector<1xi32>
    %318 = vector.multi_reduction <minsi>, %317, %cst_129 [1] : vector<1x32xi32> to vector<1xi32>
    %319 = vector.shape_cast %318 : vector<1xi32> to vector<1x1xi32>
    %320 = vector.broadcast %319 : vector<1x1xi32> to vector<1x32xi32>
    %321 = arith.cmpi eq, %24, %320 : vector<1x32xi32>
    %cst_130 = arith.constant 0xFF800000 : f32
    %322 = vector.broadcast %cst_130 : f32 to vector<1x32xf32>
    %323 = arith.select %321, %322, %310 : vector<1x32xi1>, vector<1x32xf32>
    %cst_131 = arith.constant dense<0xFF800000> : vector<1xf32>
    %324 = vector.multi_reduction <maximumf>, %323, %cst_131 [1] : vector<1x32xf32> to vector<1xf32>
    %325 = vector.shape_cast %324 : vector<1xf32> to vector<1x1xf32>
    %326 = arith.addf %313, %325 : vector<1x1xf32>
    %327 = vector.broadcast %325 : vector<1x1xf32> to vector<1x32xf32>
    %328 = arith.cmpf oeq, %323, %327 : vector<1x32xf32>
    %c32_i32_132 = arith.constant 32 : i32
    %329 = vector.broadcast %c32_i32_132 : i32 to vector<1x32xi32>
    %330 = arith.select %328, %24, %329 : vector<1x32xi1>, vector<1x32xi32>
    %cst_133 = arith.constant dense<2147483647> : vector<1xi32>
    %331 = vector.multi_reduction <minsi>, %330, %cst_133 [1] : vector<1x32xi32> to vector<1xi32>
    %332 = vector.shape_cast %331 : vector<1xi32> to vector<1x1xi32>
    %333 = vector.broadcast %332 : vector<1x1xi32> to vector<1x32xi32>
    %334 = arith.cmpi eq, %24, %333 : vector<1x32xi32>
    %cst_134 = arith.constant 0xFF800000 : f32
    %335 = vector.broadcast %cst_134 : f32 to vector<1x32xf32>
    %336 = arith.select %334, %335, %323 : vector<1x32xi1>, vector<1x32xf32>
    %cst_135 = arith.constant dense<0xFF800000> : vector<1xf32>
    %337 = vector.multi_reduction <maximumf>, %336, %cst_135 [1] : vector<1x32xf32> to vector<1xf32>
    %338 = vector.shape_cast %337 : vector<1xf32> to vector<1x1xf32>
    %339 = arith.addf %326, %338 : vector<1x1xf32>
    %340 = vector.broadcast %338 : vector<1x1xf32> to vector<1x32xf32>
    %341 = arith.cmpf oeq, %336, %340 : vector<1x32xf32>
    %c32_i32_136 = arith.constant 32 : i32
    %342 = vector.broadcast %c32_i32_136 : i32 to vector<1x32xi32>
    %343 = arith.select %341, %24, %342 : vector<1x32xi1>, vector<1x32xi32>
    %cst_137 = arith.constant dense<2147483647> : vector<1xi32>
    %344 = vector.multi_reduction <minsi>, %343, %cst_137 [1] : vector<1x32xi32> to vector<1xi32>
    %345 = vector.shape_cast %344 : vector<1xi32> to vector<1x1xi32>
    %346 = vector.broadcast %345 : vector<1x1xi32> to vector<1x32xi32>
    %347 = arith.cmpi eq, %24, %346 : vector<1x32xi32>
    %cst_138 = arith.constant 0xFF800000 : f32
    %348 = vector.broadcast %cst_138 : f32 to vector<1x32xf32>
    %349 = arith.select %347, %348, %336 : vector<1x32xi1>, vector<1x32xf32>
    %cst_139 = arith.constant dense<0xFF800000> : vector<1xf32>
    %350 = vector.multi_reduction <maximumf>, %349, %cst_139 [1] : vector<1x32xf32> to vector<1xf32>
    %351 = vector.shape_cast %350 : vector<1xf32> to vector<1x1xf32>
    %352 = arith.addf %339, %351 : vector<1x1xf32>
    %353 = vector.broadcast %351 : vector<1x1xf32> to vector<1x32xf32>
    %354 = arith.cmpf oeq, %349, %353 : vector<1x32xf32>
    %c32_i32_140 = arith.constant 32 : i32
    %355 = vector.broadcast %c32_i32_140 : i32 to vector<1x32xi32>
    %356 = arith.select %354, %24, %355 : vector<1x32xi1>, vector<1x32xi32>
    %cst_141 = arith.constant dense<2147483647> : vector<1xi32>
    %357 = vector.multi_reduction <minsi>, %356, %cst_141 [1] : vector<1x32xi32> to vector<1xi32>
    %358 = vector.shape_cast %357 : vector<1xi32> to vector<1x1xi32>
    %359 = vector.broadcast %358 : vector<1x1xi32> to vector<1x32xi32>
    %360 = arith.cmpi eq, %24, %359 : vector<1x32xi32>
    %cst_142 = arith.constant 0xFF800000 : f32
    %361 = vector.broadcast %cst_142 : f32 to vector<1x32xf32>
    %362 = arith.select %360, %361, %349 : vector<1x32xi1>, vector<1x32xf32>
    %cst_143 = arith.constant dense<0xFF800000> : vector<1xf32>
    %363 = vector.multi_reduction <maximumf>, %362, %cst_143 [1] : vector<1x32xf32> to vector<1xf32>
    %364 = vector.shape_cast %363 : vector<1xf32> to vector<1x1xf32>
    %365 = arith.addf %352, %364 : vector<1x1xf32>
    %366 = vector.broadcast %364 : vector<1x1xf32> to vector<1x32xf32>
    %367 = arith.cmpf oeq, %362, %366 : vector<1x32xf32>
    %c32_i32_144 = arith.constant 32 : i32
    %368 = vector.broadcast %c32_i32_144 : i32 to vector<1x32xi32>
    %369 = arith.select %367, %24, %368 : vector<1x32xi1>, vector<1x32xi32>
    %cst_145 = arith.constant dense<2147483647> : vector<1xi32>
    %370 = vector.multi_reduction <minsi>, %369, %cst_145 [1] : vector<1x32xi32> to vector<1xi32>
    %371 = vector.shape_cast %370 : vector<1xi32> to vector<1x1xi32>
    %372 = vector.broadcast %371 : vector<1x1xi32> to vector<1x32xi32>
    %373 = arith.cmpi eq, %24, %372 : vector<1x32xi32>
    %cst_146 = arith.constant 0xFF800000 : f32
    %374 = vector.broadcast %cst_146 : f32 to vector<1x32xf32>
    %375 = arith.select %373, %374, %362 : vector<1x32xi1>, vector<1x32xf32>
    %cst_147 = arith.constant dense<0xFF800000> : vector<1xf32>
    %376 = vector.multi_reduction <maximumf>, %375, %cst_147 [1] : vector<1x32xf32> to vector<1xf32>
    %377 = vector.shape_cast %376 : vector<1xf32> to vector<1x1xf32>
    %378 = arith.addf %365, %377 : vector<1x1xf32>
    %379 = arith.subf %296, %378 : vector<1x1xf32>
    %cst_148 = arith.constant 4.000000e-02 : f32
    %380 = vector.broadcast %cst_148 : f32 to vector<1x1xf32>
    %381 = arith.mulf %379, %380 : vector<1x1xf32>
    %382 = vector.broadcast %381 : vector<1x1xf32> to vector<32x1xf32>
    %383 = arith.cmpf ogt, %266, %382 : vector<32x1xf32>
    %cst_149 = arith.constant 1.000000e+00 : f32
    %cst_150 = arith.constant 0.000000e+00 : f32
    %384 = vector.broadcast %cst_149 : f32 to vector<32x1xf32>
    %385 = vector.broadcast %cst_150 : f32 to vector<32x1xf32>
    %386 = arith.select %383, %384, %385 : vector<32x1xi1>, vector<32x1xf32>
    %cst_151 = arith.constant 5.000000e-01 : f32
    %387 = vector.broadcast %cst_151 : f32 to vector<32x1xf32>
    %388 = arith.subf %386, %387 : vector<32x1xf32>
    %cst_152 = arith.constant 5.000000e-05 : f32
    %389 = vector.broadcast %cst_152 : f32 to vector<32x1xf32>
    %390 = arith.mulf %389, %388 : vector<32x1xf32>
    %cst_153 = arith.constant 5.000000e-01 : f32
    %391 = vector.broadcast %cst_153 : f32 to vector<1x4xf32>
    %392 = arith.subf %294, %391 : vector<1x4xf32>
    %393 = vector.broadcast %390 : vector<32x1xf32> to vector<32x4xf32>
    %394 = vector.broadcast %392 : vector<1x4xf32> to vector<32x4xf32>
    %395 = arith.mulf %393, %394 : vector<32x4xf32>
    %396 = arith.addf %210, %395 : vector<32x4xf32>
    %cst_154 = arith.constant 0.000000e+00 : f32
    %cst_155 = arith.constant 1.000000e+00 : f32
    %397 = vector.broadcast %cst_154 : f32 to vector<32x4xf32>
    %398 = arith.maximumf %397, %396 : vector<32x4xf32>
    %399 = vector.broadcast %cst_155 : f32 to vector<32x4xf32>
    %400 = arith.minimumf %399, %398 : vector<32x4xf32>
    %cst_156 = arith.constant dense<0.000000e+00> : vector<1x32xf32>
    %401 = tpu.matmul %254, %22, %cst_156 {dimension_numbers = #tpu.dot_dimension_numbers<[1], [0], [0], [1], [0, 0, 1, 1], [], []>} : vector<1x4xf32>, vector<4x32xf32>, vector<1x32xf32> -> vector<1x32xf32>
    %cst_157 = arith.constant 0.899999976 : f32
    %402 = vector.broadcast %cst_157 : f32 to vector<1x32xf32>
    %403 = arith.mulf %219, %402 : vector<1x32xf32>
    %404 = arith.addf %225, %401 : vector<1x32xf32>
    %cst_158 = arith.constant 1.000000e-01 : f32
    %405 = vector.broadcast %cst_158 : f32 to vector<1x32xf32>
    %406 = arith.mulf %404, %405 : vector<1x32xf32>
    %407 = arith.addf %403, %406 : vector<1x32xf32>
    %cst_159 = arith.constant 0.000000e+00 : f32
    %408 = vector.broadcast %cst_159 : f32 to vector<1x32xf32>
    %409 = arith.maximumf %407, %408 : vector<1x32xf32>
    %c1 = arith.constant 1 : index
    %c0_160 = arith.constant 0 : index
    %410 = vector.load %arg14[%c1, %c0_160] : memref<8x32xf32, #tpu.memory_space<vmem>>, vector<1x32xf32>
    tpu.vector_store %arg14[%c1, %c0_160], %409 {strides = array<i32>} : memref<8x32xf32, #tpu.memory_space<vmem>>, vector<1x32xf32>,
    %411 = vector.extract_strided_slice %5 {offsets = [2, 0], sizes = [1, 32], strides = [1, 1]} : vector<8x32xf32> to vector<1x32xf32>
    %412 = vector.extract_strided_slice %12 {offsets = [2, 0], sizes = [1, 32], strides = [1, 1]} : vector<8x32xf32> to vector<1x32xf32>
    %413 = vector.extract_strided_slice %20 {offsets = [0, 2], sizes = [32, 1], strides = [1, 1]} : vector<32x8xf32> to vector<32x1xf32>
    %cst_161 = arith.constant dense<0.000000e+00> : vector<1x32xf32>
    %414 = tpu.matmul %409, %21, %cst_161 {dimension_numbers = #tpu.dot_dimension_numbers<[1], [0], [0], [1], [0, 0, 1, 1], [], []>} : vector<1x32xf32>, vector<32x32xf32>, vector<1x32xf32> -> vector<1x32xf32>
    %415 = arith.addf %411, %414 : vector<1x32xf32>
    %cst_162 = arith.constant dense<0.000000e+00> : vector<1x4xf32>
    %416 = tpu.matmul %412, %400, %cst_162 {dimension_numbers = #tpu.dot_dimension_numbers<[1], [0], [0], [1], [0, 0, 1, 1], [], []>} : vector<1x32xf32>, vector<32x4xf32>, vector<1x4xf32> -> vector<1x4xf32>
    %cst_163 = arith.constant 0.000000e+00 : f32
    %417 = vector.broadcast %cst_163 : f32 to vector<1x4xf32>
    %418 = arith.subf %417, %232 : vector<1x4xf32>
    %419 = arith.addf %418, %416 : vector<1x4xf32>
    %cst_164 = arith.constant 1.250000e-02 : f32
    %420 = vector.broadcast %cst_164 : f32 to vector<1x4xf32>
    %421 = arith.mulf %420, %419 : vector<1x4xf32>
    %422 = arith.addf %232, %421 : vector<1x4xf32>
    %cst_165 = arith.constant dense<0xFF800000> : vector<1xf32>
    %423 = vector.multi_reduction <maximumf>, %422, %cst_165 [1] : vector<1x4xf32> to vector<1xf32>
    %424 = vector.shape_cast %423 : vector<1xf32> to vector<1x1xf32>
    %425 = vector.broadcast %424 : vector<1x1xf32> to vector<1x4xf32>
    %426 = arith.cmpf oeq, %422, %425 : vector<1x4xf32>
    %c4_i32_166 = arith.constant 4 : i32
    %427 = vector.broadcast %c4_i32_166 : i32 to vector<1x4xi32>
    %428 = arith.select %426, %25, %427 : vector<1x4xi1>, vector<1x4xi32>
    %cst_167 = arith.constant dense<2147483647> : vector<1xi32>
    %429 = vector.multi_reduction <minsi>, %428, %cst_167 [1] : vector<1x4xi32> to vector<1xi32>
    %430 = vector.shape_cast %429 : vector<1xi32> to vector<1x1xi32>
    %431 = vector.broadcast %430 : vector<1x1xi32> to vector<1x4xi32>
    %432 = arith.cmpi eq, %25, %431 : vector<1x4xi32>
    %cst_168 = arith.constant 0xFF800000 : f32
    %433 = vector.broadcast %cst_168 : f32 to vector<1x4xf32>
    %434 = arith.select %432, %433, %422 : vector<1x4xi1>, vector<1x4xf32>
    %cst_169 = arith.constant dense<0xFF800000> : vector<1xf32>
    %435 = vector.multi_reduction <maximumf>, %434, %cst_169 [1] : vector<1x4xf32> to vector<1xf32>
    %436 = vector.shape_cast %435 : vector<1xf32> to vector<1x1xf32>
    %437 = arith.addf %424, %436 : vector<1x1xf32>
    %cst_170 = arith.constant 5.000000e-01 : f32
    %438 = vector.broadcast %cst_170 : f32 to vector<1x1xf32>
    %439 = arith.mulf %438, %437 : vector<1x1xf32>
    %440 = vector.broadcast %439 : vector<1x1xf32> to vector<1x4xf32>
    %441 = arith.cmpf oge, %422, %440 : vector<1x4xf32>
    %cst_171 = arith.constant 1.000000e+00 : f32
    %cst_172 = arith.constant 0.000000e+00 : f32
    %442 = vector.broadcast %cst_171 : f32 to vector<1x4xf32>
    %443 = vector.broadcast %cst_172 : f32 to vector<1x4xf32>
    %444 = arith.select %441, %442, %443 : vector<1x4xi1>, vector<1x4xf32>
    %cst_173 = arith.constant 0.000000e+00 : f32
    %445 = vector.broadcast %cst_173 : f32 to vector<1x32xf32>
    %446 = arith.subf %445, %260 : vector<1x32xf32>
    %447 = arith.addf %446, %412 : vector<1x32xf32>
    %cst_174 = arith.constant 1.000000e-03 : f32
    %448 = vector.broadcast %cst_174 : f32 to vector<1x32xf32>
    %449 = arith.mulf %448, %447 : vector<1x32xf32>
    %450 = arith.addf %260, %449 : vector<1x32xf32>
    %cst_175 = arith.constant 0.000000e+00 : f32
    %451 = vector.broadcast %cst_175 : f32 to vector<32x1xf32>
    %452 = arith.subf %451, %266 : vector<32x1xf32>
    %453 = arith.addf %452, %413 : vector<32x1xf32>
    %cst_176 = arith.constant 1.000000e-03 : f32
    %454 = vector.broadcast %cst_176 : f32 to vector<32x1xf32>
    %455 = arith.mulf %454, %453 : vector<32x1xf32>
    %456 = arith.addf %266, %455 : vector<32x1xf32>
    %cst_177 = arith.constant 0.000000e+00 : f32
    %457 = vector.broadcast %cst_177 : f32 to vector<1x4xf32>
    %458 = arith.subf %457, %272 : vector<1x4xf32>
    %459 = arith.addf %458, %444 : vector<1x4xf32>
    %cst_178 = arith.constant 1.000000e-03 : f32
    %460 = vector.broadcast %cst_178 : f32 to vector<1x4xf32>
    %461 = arith.mulf %460, %459 : vector<1x4xf32>
    %462 = arith.addf %272, %461 : vector<1x4xf32>
    %cst_179 = arith.constant dense<0xFF800000> : vector<1xf32>
    %463 = vector.multi_reduction <maximumf>, %462, %cst_179 [1] : vector<1x4xf32> to vector<1xf32>
    %464 = vector.shape_cast %463 : vector<1xf32> to vector<1x1xf32>
    %465 = vector.broadcast %464 : vector<1x1xf32> to vector<1x4xf32>
    %466 = arith.cmpf oeq, %462, %465 : vector<1x4xf32>
    %c4_i32_180 = arith.constant 4 : i32
    %467 = vector.broadcast %c4_i32_180 : i32 to vector<1x4xi32>
    %468 = arith.select %466, %25, %467 : vector<1x4xi1>, vector<1x4xi32>
    %cst_181 = arith.constant dense<2147483647> : vector<1xi32>
    %469 = vector.multi_reduction <minsi>, %468, %cst_181 [1] : vector<1x4xi32> to vector<1xi32>
    %470 = vector.shape_cast %469 : vector<1xi32> to vector<1x1xi32>
    %471 = vector.broadcast %470 : vector<1x1xi32> to vector<1x4xi32>
    %472 = arith.cmpi eq, %25, %471 : vector<1x4xi32>
    %cst_182 = arith.constant 0xFF800000 : f32
    %473 = vector.broadcast %cst_182 : f32 to vector<1x4xf32>
    %474 = arith.select %472, %473, %462 : vector<1x4xi1>, vector<1x4xf32>
    %cst_183 = arith.constant dense<0xFF800000> : vector<1xf32>
    %475 = vector.multi_reduction <maximumf>, %474, %cst_183 [1] : vector<1x4xf32> to vector<1xf32>
    %476 = vector.shape_cast %475 : vector<1xf32> to vector<1x1xf32>
    %477 = arith.addf %464, %476 : vector<1x1xf32>
    %cst_184 = arith.constant 5.000000e-01 : f32
    %478 = vector.broadcast %cst_184 : f32 to vector<1x1xf32>
    %479 = arith.mulf %478, %477 : vector<1x1xf32>
    %480 = vector.broadcast %479 : vector<1x1xf32> to vector<1x4xf32>
    %481 = arith.cmpf oge, %462, %480 : vector<1x4xf32>
    %cst_185 = arith.constant 1.000000e+00 : f32
    %cst_186 = arith.constant 0.000000e+00 : f32
    %482 = vector.broadcast %cst_185 : f32 to vector<1x4xf32>
    %483 = vector.broadcast %cst_186 : f32 to vector<1x4xf32>
    %484 = arith.select %481, %482, %483 : vector<1x4xi1>, vector<1x4xf32>
    %cst_187 = arith.constant dense<0.000000e+00> : vector<1xf32>
    %485 = vector.multi_reduction <add>, %450, %cst_187 [1] : vector<1x32xf32> to vector<1xf32>
    %486 = vector.shape_cast %485 : vector<1xf32> to vector<1x1xf32>
    %cst_188 = arith.constant 0.000000e+00 : f32
    %487 = vector.broadcast %cst_188 : f32 to vector<1x1xf32>
    %cst_189 = arith.constant dense<0xFF800000> : vector<1xf32>
    %488 = vector.multi_reduction <maximumf>, %450, %cst_189 [1] : vector<1x32xf32> to vector<1xf32>
    %489 = vector.shape_cast %488 : vector<1xf32> to vector<1x1xf32>
    %490 = arith.addf %487, %489 : vector<1x1xf32>
    %491 = vector.broadcast %489 : vector<1x1xf32> to vector<1x32xf32>
    %492 = arith.cmpf oeq, %450, %491 : vector<1x32xf32>
    %c32_i32_190 = arith.constant 32 : i32
    %493 = vector.broadcast %c32_i32_190 : i32 to vector<1x32xi32>
    %494 = arith.select %492, %24, %493 : vector<1x32xi1>, vector<1x32xi32>
    %cst_191 = arith.constant dense<2147483647> : vector<1xi32>
    %495 = vector.multi_reduction <minsi>, %494, %cst_191 [1] : vector<1x32xi32> to vector<1xi32>
    %496 = vector.shape_cast %495 : vector<1xi32> to vector<1x1xi32>
    %497 = vector.broadcast %496 : vector<1x1xi32> to vector<1x32xi32>
    %498 = arith.cmpi eq, %24, %497 : vector<1x32xi32>
    %cst_192 = arith.constant 0xFF800000 : f32
    %499 = vector.broadcast %cst_192 : f32 to vector<1x32xf32>
    %500 = arith.select %498, %499, %450 : vector<1x32xi1>, vector<1x32xf32>
    %cst_193 = arith.constant dense<0xFF800000> : vector<1xf32>
    %501 = vector.multi_reduction <maximumf>, %500, %cst_193 [1] : vector<1x32xf32> to vector<1xf32>
    %502 = vector.shape_cast %501 : vector<1xf32> to vector<1x1xf32>
    %503 = arith.addf %490, %502 : vector<1x1xf32>
    %504 = vector.broadcast %502 : vector<1x1xf32> to vector<1x32xf32>
    %505 = arith.cmpf oeq, %500, %504 : vector<1x32xf32>
    %c32_i32_194 = arith.constant 32 : i32
    %506 = vector.broadcast %c32_i32_194 : i32 to vector<1x32xi32>
    %507 = arith.select %505, %24, %506 : vector<1x32xi1>, vector<1x32xi32>
    %cst_195 = arith.constant dense<2147483647> : vector<1xi32>
    %508 = vector.multi_reduction <minsi>, %507, %cst_195 [1] : vector<1x32xi32> to vector<1xi32>
    %509 = vector.shape_cast %508 : vector<1xi32> to vector<1x1xi32>
    %510 = vector.broadcast %509 : vector<1x1xi32> to vector<1x32xi32>
    %511 = arith.cmpi eq, %24, %510 : vector<1x32xi32>
    %cst_196 = arith.constant 0xFF800000 : f32
    %512 = vector.broadcast %cst_196 : f32 to vector<1x32xf32>
    %513 = arith.select %511, %512, %500 : vector<1x32xi1>, vector<1x32xf32>
    %cst_197 = arith.constant dense<0xFF800000> : vector<1xf32>
    %514 = vector.multi_reduction <maximumf>, %513, %cst_197 [1] : vector<1x32xf32> to vector<1xf32>
    %515 = vector.shape_cast %514 : vector<1xf32> to vector<1x1xf32>
    %516 = arith.addf %503, %515 : vector<1x1xf32>
    %517 = vector.broadcast %515 : vector<1x1xf32> to vector<1x32xf32>
    %518 = arith.cmpf oeq, %513, %517 : vector<1x32xf32>
    %c32_i32_198 = arith.constant 32 : i32
    %519 = vector.broadcast %c32_i32_198 : i32 to vector<1x32xi32>
    %520 = arith.select %518, %24, %519 : vector<1x32xi1>, vector<1x32xi32>
    %cst_199 = arith.constant dense<2147483647> : vector<1xi32>
    %521 = vector.multi_reduction <minsi>, %520, %cst_199 [1] : vector<1x32xi32> to vector<1xi32>
    %522 = vector.shape_cast %521 : vector<1xi32> to vector<1x1xi32>
    %523 = vector.broadcast %522 : vector<1x1xi32> to vector<1x32xi32>
    %524 = arith.cmpi eq, %24, %523 : vector<1x32xi32>
    %cst_200 = arith.constant 0xFF800000 : f32
    %525 = vector.broadcast %cst_200 : f32 to vector<1x32xf32>
    %526 = arith.select %524, %525, %513 : vector<1x32xi1>, vector<1x32xf32>
    %cst_201 = arith.constant dense<0xFF800000> : vector<1xf32>
    %527 = vector.multi_reduction <maximumf>, %526, %cst_201 [1] : vector<1x32xf32> to vector<1xf32>
    %528 = vector.shape_cast %527 : vector<1xf32> to vector<1x1xf32>
    %529 = arith.addf %516, %528 : vector<1x1xf32>
    %530 = vector.broadcast %528 : vector<1x1xf32> to vector<1x32xf32>
    %531 = arith.cmpf oeq, %526, %530 : vector<1x32xf32>
    %c32_i32_202 = arith.constant 32 : i32
    %532 = vector.broadcast %c32_i32_202 : i32 to vector<1x32xi32>
    %533 = arith.select %531, %24, %532 : vector<1x32xi1>, vector<1x32xi32>
    %cst_203 = arith.constant dense<2147483647> : vector<1xi32>
    %534 = vector.multi_reduction <minsi>, %533, %cst_203 [1] : vector<1x32xi32> to vector<1xi32>
    %535 = vector.shape_cast %534 : vector<1xi32> to vector<1x1xi32>
    %536 = vector.broadcast %535 : vector<1x1xi32> to vector<1x32xi32>
    %537 = arith.cmpi eq, %24, %536 : vector<1x32xi32>
    %cst_204 = arith.constant 0xFF800000 : f32
    %538 = vector.broadcast %cst_204 : f32 to vector<1x32xf32>
    %539 = arith.select %537, %538, %526 : vector<1x32xi1>, vector<1x32xf32>
    %cst_205 = arith.constant dense<0xFF800000> : vector<1xf32>
    %540 = vector.multi_reduction <maximumf>, %539, %cst_205 [1] : vector<1x32xf32> to vector<1xf32>
    %541 = vector.shape_cast %540 : vector<1xf32> to vector<1x1xf32>
    %542 = arith.addf %529, %541 : vector<1x1xf32>
    %543 = vector.broadcast %541 : vector<1x1xf32> to vector<1x32xf32>
    %544 = arith.cmpf oeq, %539, %543 : vector<1x32xf32>
    %c32_i32_206 = arith.constant 32 : i32
    %545 = vector.broadcast %c32_i32_206 : i32 to vector<1x32xi32>
    %546 = arith.select %544, %24, %545 : vector<1x32xi1>, vector<1x32xi32>
    %cst_207 = arith.constant dense<2147483647> : vector<1xi32>
    %547 = vector.multi_reduction <minsi>, %546, %cst_207 [1] : vector<1x32xi32> to vector<1xi32>
    %548 = vector.shape_cast %547 : vector<1xi32> to vector<1x1xi32>
    %549 = vector.broadcast %548 : vector<1x1xi32> to vector<1x32xi32>
    %550 = arith.cmpi eq, %24, %549 : vector<1x32xi32>
    %cst_208 = arith.constant 0xFF800000 : f32
    %551 = vector.broadcast %cst_208 : f32 to vector<1x32xf32>
    %552 = arith.select %550, %551, %539 : vector<1x32xi1>, vector<1x32xf32>
    %cst_209 = arith.constant dense<0xFF800000> : vector<1xf32>
    %553 = vector.multi_reduction <maximumf>, %552, %cst_209 [1] : vector<1x32xf32> to vector<1xf32>
    %554 = vector.shape_cast %553 : vector<1xf32> to vector<1x1xf32>
    %555 = arith.addf %542, %554 : vector<1x1xf32>
    %556 = vector.broadcast %554 : vector<1x1xf32> to vector<1x32xf32>
    %557 = arith.cmpf oeq, %552, %556 : vector<1x32xf32>
    %c32_i32_210 = arith.constant 32 : i32
    %558 = vector.broadcast %c32_i32_210 : i32 to vector<1x32xi32>
    %559 = arith.select %557, %24, %558 : vector<1x32xi1>, vector<1x32xi32>
    %cst_211 = arith.constant dense<2147483647> : vector<1xi32>
    %560 = vector.multi_reduction <minsi>, %559, %cst_211 [1] : vector<1x32xi32> to vector<1xi32>
    %561 = vector.shape_cast %560 : vector<1xi32> to vector<1x1xi32>
    %562 = vector.broadcast %561 : vector<1x1xi32> to vector<1x32xi32>
    %563 = arith.cmpi eq, %24, %562 : vector<1x32xi32>
    %cst_212 = arith.constant 0xFF800000 : f32
    %564 = vector.broadcast %cst_212 : f32 to vector<1x32xf32>
    %565 = arith.select %563, %564, %552 : vector<1x32xi1>, vector<1x32xf32>
    %cst_213 = arith.constant dense<0xFF800000> : vector<1xf32>
    %566 = vector.multi_reduction <maximumf>, %565, %cst_213 [1] : vector<1x32xf32> to vector<1xf32>
    %567 = vector.shape_cast %566 : vector<1xf32> to vector<1x1xf32>
    %568 = arith.addf %555, %567 : vector<1x1xf32>
    %569 = arith.subf %486, %568 : vector<1x1xf32>
    %cst_214 = arith.constant 4.000000e-02 : f32
    %570 = vector.broadcast %cst_214 : f32 to vector<1x1xf32>
    %571 = arith.mulf %569, %570 : vector<1x1xf32>
    %572 = vector.broadcast %571 : vector<1x1xf32> to vector<32x1xf32>
    %573 = arith.cmpf ogt, %456, %572 : vector<32x1xf32>
    %cst_215 = arith.constant 1.000000e+00 : f32
    %cst_216 = arith.constant 0.000000e+00 : f32
    %574 = vector.broadcast %cst_215 : f32 to vector<32x1xf32>
    %575 = vector.broadcast %cst_216 : f32 to vector<32x1xf32>
    %576 = arith.select %573, %574, %575 : vector<32x1xi1>, vector<32x1xf32>
    %cst_217 = arith.constant 5.000000e-01 : f32
    %577 = vector.broadcast %cst_217 : f32 to vector<32x1xf32>
    %578 = arith.subf %576, %577 : vector<32x1xf32>
    %cst_218 = arith.constant 5.000000e-05 : f32
    %579 = vector.broadcast %cst_218 : f32 to vector<32x1xf32>
    %580 = arith.mulf %579, %578 : vector<32x1xf32>
    %cst_219 = arith.constant 5.000000e-01 : f32
    %581 = vector.broadcast %cst_219 : f32 to vector<1x4xf32>
    %582 = arith.subf %484, %581 : vector<1x4xf32>
    %583 = vector.broadcast %580 : vector<32x1xf32> to vector<32x4xf32>
    %584 = vector.broadcast %582 : vector<1x4xf32> to vector<32x4xf32>
    %585 = arith.mulf %583, %584 : vector<32x4xf32>
    %586 = arith.addf %400, %585 : vector<32x4xf32>
    %cst_220 = arith.constant 0.000000e+00 : f32
    %cst_221 = arith.constant 1.000000e+00 : f32
    %587 = vector.broadcast %cst_220 : f32 to vector<32x4xf32>
    %588 = arith.maximumf %587, %586 : vector<32x4xf32>
    %589 = vector.broadcast %cst_221 : f32 to vector<32x4xf32>
    %590 = arith.minimumf %589, %588 : vector<32x4xf32>
    %cst_222 = arith.constant dense<0.000000e+00> : vector<1x32xf32>
    %591 = tpu.matmul %444, %22, %cst_222 {dimension_numbers = #tpu.dot_dimension_numbers<[1], [0], [0], [1], [0, 0, 1, 1], [], []>} : vector<1x4xf32>, vector<4x32xf32>, vector<1x32xf32> -> vector<1x32xf32>
    %cst_223 = arith.constant 0.899999976 : f32
    %592 = vector.broadcast %cst_223 : f32 to vector<1x32xf32>
    %593 = arith.mulf %409, %592 : vector<1x32xf32>
    %594 = arith.addf %415, %591 : vector<1x32xf32>
    %cst_224 = arith.constant 1.000000e-01 : f32
    %595 = vector.broadcast %cst_224 : f32 to vector<1x32xf32>
    %596 = arith.mulf %594, %595 : vector<1x32xf32>
    %597 = arith.addf %593, %596 : vector<1x32xf32>
    %cst_225 = arith.constant 0.000000e+00 : f32
    %598 = vector.broadcast %cst_225 : f32 to vector<1x32xf32>
    %599 = arith.maximumf %597, %598 : vector<1x32xf32>
    %c2 = arith.constant 2 : index
    %c0_226 = arith.constant 0 : index
    %600 = vector.load %arg14[%c2, %c0_226] : memref<8x32xf32, #tpu.memory_space<vmem>>, vector<1x32xf32>
    tpu.vector_store %arg14[%c2, %c0_226], %599 {strides = array<i32>} : memref<8x32xf32, #tpu.memory_space<vmem>>, vector<1x32xf32>,
    %601 = vector.extract_strided_slice %5 {offsets = [3, 0], sizes = [1, 32], strides = [1, 1]} : vector<8x32xf32> to vector<1x32xf32>
    %602 = vector.extract_strided_slice %12 {offsets = [3, 0], sizes = [1, 32], strides = [1, 1]} : vector<8x32xf32> to vector<1x32xf32>
    %603 = vector.extract_strided_slice %20 {offsets = [0, 3], sizes = [32, 1], strides = [1, 1]} : vector<32x8xf32> to vector<32x1xf32>
    %cst_227 = arith.constant dense<0.000000e+00> : vector<1x32xf32>
    %604 = tpu.matmul %599, %21, %cst_227 {dimension_numbers = #tpu.dot_dimension_numbers<[1], [0], [0], [1], [0, 0, 1, 1], [], []>} : vector<1x32xf32>, vector<32x32xf32>, vector<1x32xf32> -> vector<1x32xf32>
    %605 = arith.addf %601, %604 : vector<1x32xf32>
    %cst_228 = arith.constant dense<0.000000e+00> : vector<1x4xf32>
    %606 = tpu.matmul %602, %590, %cst_228 {dimension_numbers = #tpu.dot_dimension_numbers<[1], [0], [0], [1], [0, 0, 1, 1], [], []>} : vector<1x32xf32>, vector<32x4xf32>, vector<1x4xf32> -> vector<1x4xf32>
    %cst_229 = arith.constant 0.000000e+00 : f32
    %607 = vector.broadcast %cst_229 : f32 to vector<1x4xf32>
    %608 = arith.subf %607, %422 : vector<1x4xf32>
    %609 = arith.addf %608, %606 : vector<1x4xf32>
    %cst_230 = arith.constant 1.250000e-02 : f32
    %610 = vector.broadcast %cst_230 : f32 to vector<1x4xf32>
    %611 = arith.mulf %610, %609 : vector<1x4xf32>
    %612 = arith.addf %422, %611 : vector<1x4xf32>
    %cst_231 = arith.constant dense<0xFF800000> : vector<1xf32>
    %613 = vector.multi_reduction <maximumf>, %612, %cst_231 [1] : vector<1x4xf32> to vector<1xf32>
    %614 = vector.shape_cast %613 : vector<1xf32> to vector<1x1xf32>
    %615 = vector.broadcast %614 : vector<1x1xf32> to vector<1x4xf32>
    %616 = arith.cmpf oeq, %612, %615 : vector<1x4xf32>
    %c4_i32_232 = arith.constant 4 : i32
    %617 = vector.broadcast %c4_i32_232 : i32 to vector<1x4xi32>
    %618 = arith.select %616, %25, %617 : vector<1x4xi1>, vector<1x4xi32>
    %cst_233 = arith.constant dense<2147483647> : vector<1xi32>
    %619 = vector.multi_reduction <minsi>, %618, %cst_233 [1] : vector<1x4xi32> to vector<1xi32>
    %620 = vector.shape_cast %619 : vector<1xi32> to vector<1x1xi32>
    %621 = vector.broadcast %620 : vector<1x1xi32> to vector<1x4xi32>
    %622 = arith.cmpi eq, %25, %621 : vector<1x4xi32>
    %cst_234 = arith.constant 0xFF800000 : f32
    %623 = vector.broadcast %cst_234 : f32 to vector<1x4xf32>
    %624 = arith.select %622, %623, %612 : vector<1x4xi1>, vector<1x4xf32>
    %cst_235 = arith.constant dense<0xFF800000> : vector<1xf32>
    %625 = vector.multi_reduction <maximumf>, %624, %cst_235 [1] : vector<1x4xf32> to vector<1xf32>
    %626 = vector.shape_cast %625 : vector<1xf32> to vector<1x1xf32>
    %627 = arith.addf %614, %626 : vector<1x1xf32>
    %cst_236 = arith.constant 5.000000e-01 : f32
    %628 = vector.broadcast %cst_236 : f32 to vector<1x1xf32>
    %629 = arith.mulf %628, %627 : vector<1x1xf32>
    %630 = vector.broadcast %629 : vector<1x1xf32> to vector<1x4xf32>
    %631 = arith.cmpf oge, %612, %630 : vector<1x4xf32>
    %cst_237 = arith.constant 1.000000e+00 : f32
    %cst_238 = arith.constant 0.000000e+00 : f32
    %632 = vector.broadcast %cst_237 : f32 to vector<1x4xf32>
    %633 = vector.broadcast %cst_238 : f32 to vector<1x4xf32>
    %634 = arith.select %631, %632, %633 : vector<1x4xi1>, vector<1x4xf32>
    %cst_239 = arith.constant 0.000000e+00 : f32
    %635 = vector.broadcast %cst_239 : f32 to vector<1x32xf32>
    %636 = arith.subf %635, %450 : vector<1x32xf32>
    %637 = arith.addf %636, %602 : vector<1x32xf32>
    %cst_240 = arith.constant 1.000000e-03 : f32
    %638 = vector.broadcast %cst_240 : f32 to vector<1x32xf32>
    %639 = arith.mulf %638, %637 : vector<1x32xf32>
    %640 = arith.addf %450, %639 : vector<1x32xf32>
    %cst_241 = arith.constant 0.000000e+00 : f32
    %641 = vector.broadcast %cst_241 : f32 to vector<32x1xf32>
    %642 = arith.subf %641, %456 : vector<32x1xf32>
    %643 = arith.addf %642, %603 : vector<32x1xf32>
    %cst_242 = arith.constant 1.000000e-03 : f32
    %644 = vector.broadcast %cst_242 : f32 to vector<32x1xf32>
    %645 = arith.mulf %644, %643 : vector<32x1xf32>
    %646 = arith.addf %456, %645 : vector<32x1xf32>
    %cst_243 = arith.constant 0.000000e+00 : f32
    %647 = vector.broadcast %cst_243 : f32 to vector<1x4xf32>
    %648 = arith.subf %647, %462 : vector<1x4xf32>
    %649 = arith.addf %648, %634 : vector<1x4xf32>
    %cst_244 = arith.constant 1.000000e-03 : f32
    %650 = vector.broadcast %cst_244 : f32 to vector<1x4xf32>
    %651 = arith.mulf %650, %649 : vector<1x4xf32>
    %652 = arith.addf %462, %651 : vector<1x4xf32>
    %cst_245 = arith.constant dense<0xFF800000> : vector<1xf32>
    %653 = vector.multi_reduction <maximumf>, %652, %cst_245 [1] : vector<1x4xf32> to vector<1xf32>
    %654 = vector.shape_cast %653 : vector<1xf32> to vector<1x1xf32>
    %655 = vector.broadcast %654 : vector<1x1xf32> to vector<1x4xf32>
    %656 = arith.cmpf oeq, %652, %655 : vector<1x4xf32>
    %c4_i32_246 = arith.constant 4 : i32
    %657 = vector.broadcast %c4_i32_246 : i32 to vector<1x4xi32>
    %658 = arith.select %656, %25, %657 : vector<1x4xi1>, vector<1x4xi32>
    %cst_247 = arith.constant dense<2147483647> : vector<1xi32>
    %659 = vector.multi_reduction <minsi>, %658, %cst_247 [1] : vector<1x4xi32> to vector<1xi32>
    %660 = vector.shape_cast %659 : vector<1xi32> to vector<1x1xi32>
    %661 = vector.broadcast %660 : vector<1x1xi32> to vector<1x4xi32>
    %662 = arith.cmpi eq, %25, %661 : vector<1x4xi32>
    %cst_248 = arith.constant 0xFF800000 : f32
    %663 = vector.broadcast %cst_248 : f32 to vector<1x4xf32>
    %664 = arith.select %662, %663, %652 : vector<1x4xi1>, vector<1x4xf32>
    %cst_249 = arith.constant dense<0xFF800000> : vector<1xf32>
    %665 = vector.multi_reduction <maximumf>, %664, %cst_249 [1] : vector<1x4xf32> to vector<1xf32>
    %666 = vector.shape_cast %665 : vector<1xf32> to vector<1x1xf32>
    %667 = arith.addf %654, %666 : vector<1x1xf32>
    %cst_250 = arith.constant 5.000000e-01 : f32
    %668 = vector.broadcast %cst_250 : f32 to vector<1x1xf32>
    %669 = arith.mulf %668, %667 : vector<1x1xf32>
    %670 = vector.broadcast %669 : vector<1x1xf32> to vector<1x4xf32>
    %671 = arith.cmpf oge, %652, %670 : vector<1x4xf32>
    %cst_251 = arith.constant 1.000000e+00 : f32
    %cst_252 = arith.constant 0.000000e+00 : f32
    %672 = vector.broadcast %cst_251 : f32 to vector<1x4xf32>
    %673 = vector.broadcast %cst_252 : f32 to vector<1x4xf32>
    %674 = arith.select %671, %672, %673 : vector<1x4xi1>, vector<1x4xf32>
    %cst_253 = arith.constant dense<0.000000e+00> : vector<1xf32>
    %675 = vector.multi_reduction <add>, %640, %cst_253 [1] : vector<1x32xf32> to vector<1xf32>
    %676 = vector.shape_cast %675 : vector<1xf32> to vector<1x1xf32>
    %cst_254 = arith.constant 0.000000e+00 : f32
    %677 = vector.broadcast %cst_254 : f32 to vector<1x1xf32>
    %cst_255 = arith.constant dense<0xFF800000> : vector<1xf32>
    %678 = vector.multi_reduction <maximumf>, %640, %cst_255 [1] : vector<1x32xf32> to vector<1xf32>
    %679 = vector.shape_cast %678 : vector<1xf32> to vector<1x1xf32>
    %680 = arith.addf %677, %679 : vector<1x1xf32>
    %681 = vector.broadcast %679 : vector<1x1xf32> to vector<1x32xf32>
    %682 = arith.cmpf oeq, %640, %681 : vector<1x32xf32>
    %c32_i32_256 = arith.constant 32 : i32
    %683 = vector.broadcast %c32_i32_256 : i32 to vector<1x32xi32>
    %684 = arith.select %682, %24, %683 : vector<1x32xi1>, vector<1x32xi32>
    %cst_257 = arith.constant dense<2147483647> : vector<1xi32>
    %685 = vector.multi_reduction <minsi>, %684, %cst_257 [1] : vector<1x32xi32> to vector<1xi32>
    %686 = vector.shape_cast %685 : vector<1xi32> to vector<1x1xi32>
    %687 = vector.broadcast %686 : vector<1x1xi32> to vector<1x32xi32>
    %688 = arith.cmpi eq, %24, %687 : vector<1x32xi32>
    %cst_258 = arith.constant 0xFF800000 : f32
    %689 = vector.broadcast %cst_258 : f32 to vector<1x32xf32>
    %690 = arith.select %688, %689, %640 : vector<1x32xi1>, vector<1x32xf32>
    %cst_259 = arith.constant dense<0xFF800000> : vector<1xf32>
    %691 = vector.multi_reduction <maximumf>, %690, %cst_259 [1] : vector<1x32xf32> to vector<1xf32>
    %692 = vector.shape_cast %691 : vector<1xf32> to vector<1x1xf32>
    %693 = arith.addf %680, %692 : vector<1x1xf32>
    %694 = vector.broadcast %692 : vector<1x1xf32> to vector<1x32xf32>
    %695 = arith.cmpf oeq, %690, %694 : vector<1x32xf32>
    %c32_i32_260 = arith.constant 32 : i32
    %696 = vector.broadcast %c32_i32_260 : i32 to vector<1x32xi32>
    %697 = arith.select %695, %24, %696 : vector<1x32xi1>, vector<1x32xi32>
    %cst_261 = arith.constant dense<2147483647> : vector<1xi32>
    %698 = vector.multi_reduction <minsi>, %697, %cst_261 [1] : vector<1x32xi32> to vector<1xi32>
    %699 = vector.shape_cast %698 : vector<1xi32> to vector<1x1xi32>
    %700 = vector.broadcast %699 : vector<1x1xi32> to vector<1x32xi32>
    %701 = arith.cmpi eq, %24, %700 : vector<1x32xi32>
    %cst_262 = arith.constant 0xFF800000 : f32
    %702 = vector.broadcast %cst_262 : f32 to vector<1x32xf32>
    %703 = arith.select %701, %702, %690 : vector<1x32xi1>, vector<1x32xf32>
    %cst_263 = arith.constant dense<0xFF800000> : vector<1xf32>
    %704 = vector.multi_reduction <maximumf>, %703, %cst_263 [1] : vector<1x32xf32> to vector<1xf32>
    %705 = vector.shape_cast %704 : vector<1xf32> to vector<1x1xf32>
    %706 = arith.addf %693, %705 : vector<1x1xf32>
    %707 = vector.broadcast %705 : vector<1x1xf32> to vector<1x32xf32>
    %708 = arith.cmpf oeq, %703, %707 : vector<1x32xf32>
    %c32_i32_264 = arith.constant 32 : i32
    %709 = vector.broadcast %c32_i32_264 : i32 to vector<1x32xi32>
    %710 = arith.select %708, %24, %709 : vector<1x32xi1>, vector<1x32xi32>
    %cst_265 = arith.constant dense<2147483647> : vector<1xi32>
    %711 = vector.multi_reduction <minsi>, %710, %cst_265 [1] : vector<1x32xi32> to vector<1xi32>
    %712 = vector.shape_cast %711 : vector<1xi32> to vector<1x1xi32>
    %713 = vector.broadcast %712 : vector<1x1xi32> to vector<1x32xi32>
    %714 = arith.cmpi eq, %24, %713 : vector<1x32xi32>
    %cst_266 = arith.constant 0xFF800000 : f32
    %715 = vector.broadcast %cst_266 : f32 to vector<1x32xf32>
    %716 = arith.select %714, %715, %703 : vector<1x32xi1>, vector<1x32xf32>
    %cst_267 = arith.constant dense<0xFF800000> : vector<1xf32>
    %717 = vector.multi_reduction <maximumf>, %716, %cst_267 [1] : vector<1x32xf32> to vector<1xf32>
    %718 = vector.shape_cast %717 : vector<1xf32> to vector<1x1xf32>
    %719 = arith.addf %706, %718 : vector<1x1xf32>
    %720 = vector.broadcast %718 : vector<1x1xf32> to vector<1x32xf32>
    %721 = arith.cmpf oeq, %716, %720 : vector<1x32xf32>
    %c32_i32_268 = arith.constant 32 : i32
    %722 = vector.broadcast %c32_i32_268 : i32 to vector<1x32xi32>
    %723 = arith.select %721, %24, %722 : vector<1x32xi1>, vector<1x32xi32>
    %cst_269 = arith.constant dense<2147483647> : vector<1xi32>
    %724 = vector.multi_reduction <minsi>, %723, %cst_269 [1] : vector<1x32xi32> to vector<1xi32>
    %725 = vector.shape_cast %724 : vector<1xi32> to vector<1x1xi32>
    %726 = vector.broadcast %725 : vector<1x1xi32> to vector<1x32xi32>
    %727 = arith.cmpi eq, %24, %726 : vector<1x32xi32>
    %cst_270 = arith.constant 0xFF800000 : f32
    %728 = vector.broadcast %cst_270 : f32 to vector<1x32xf32>
    %729 = arith.select %727, %728, %716 : vector<1x32xi1>, vector<1x32xf32>
    %cst_271 = arith.constant dense<0xFF800000> : vector<1xf32>
    %730 = vector.multi_reduction <maximumf>, %729, %cst_271 [1] : vector<1x32xf32> to vector<1xf32>
    %731 = vector.shape_cast %730 : vector<1xf32> to vector<1x1xf32>
    %732 = arith.addf %719, %731 : vector<1x1xf32>
    %733 = vector.broadcast %731 : vector<1x1xf32> to vector<1x32xf32>
    %734 = arith.cmpf oeq, %729, %733 : vector<1x32xf32>
    %c32_i32_272 = arith.constant 32 : i32
    %735 = vector.broadcast %c32_i32_272 : i32 to vector<1x32xi32>
    %736 = arith.select %734, %24, %735 : vector<1x32xi1>, vector<1x32xi32>
    %cst_273 = arith.constant dense<2147483647> : vector<1xi32>
    %737 = vector.multi_reduction <minsi>, %736, %cst_273 [1] : vector<1x32xi32> to vector<1xi32>
    %738 = vector.shape_cast %737 : vector<1xi32> to vector<1x1xi32>
    %739 = vector.broadcast %738 : vector<1x1xi32> to vector<1x32xi32>
    %740 = arith.cmpi eq, %24, %739 : vector<1x32xi32>
    %cst_274 = arith.constant 0xFF800000 : f32
    %741 = vector.broadcast %cst_274 : f32 to vector<1x32xf32>
    %742 = arith.select %740, %741, %729 : vector<1x32xi1>, vector<1x32xf32>
    %cst_275 = arith.constant dense<0xFF800000> : vector<1xf32>
    %743 = vector.multi_reduction <maximumf>, %742, %cst_275 [1] : vector<1x32xf32> to vector<1xf32>
    %744 = vector.shape_cast %743 : vector<1xf32> to vector<1x1xf32>
    %745 = arith.addf %732, %744 : vector<1x1xf32>
    %746 = vector.broadcast %744 : vector<1x1xf32> to vector<1x32xf32>
    %747 = arith.cmpf oeq, %742, %746 : vector<1x32xf32>
    %c32_i32_276 = arith.constant 32 : i32
    %748 = vector.broadcast %c32_i32_276 : i32 to vector<1x32xi32>
    %749 = arith.select %747, %24, %748 : vector<1x32xi1>, vector<1x32xi32>
    %cst_277 = arith.constant dense<2147483647> : vector<1xi32>
    %750 = vector.multi_reduction <minsi>, %749, %cst_277 [1] : vector<1x32xi32> to vector<1xi32>
    %751 = vector.shape_cast %750 : vector<1xi32> to vector<1x1xi32>
    %752 = vector.broadcast %751 : vector<1x1xi32> to vector<1x32xi32>
    %753 = arith.cmpi eq, %24, %752 : vector<1x32xi32>
    %cst_278 = arith.constant 0xFF800000 : f32
    %754 = vector.broadcast %cst_278 : f32 to vector<1x32xf32>
    %755 = arith.select %753, %754, %742 : vector<1x32xi1>, vector<1x32xf32>
    %cst_279 = arith.constant dense<0xFF800000> : vector<1xf32>
    %756 = vector.multi_reduction <maximumf>, %755, %cst_279 [1] : vector<1x32xf32> to vector<1xf32>
    %757 = vector.shape_cast %756 : vector<1xf32> to vector<1x1xf32>
    %758 = arith.addf %745, %757 : vector<1x1xf32>
    %759 = arith.subf %676, %758 : vector<1x1xf32>
    %cst_280 = arith.constant 4.000000e-02 : f32
    %760 = vector.broadcast %cst_280 : f32 to vector<1x1xf32>
    %761 = arith.mulf %759, %760 : vector<1x1xf32>
    %762 = vector.broadcast %761 : vector<1x1xf32> to vector<32x1xf32>
    %763 = arith.cmpf ogt, %646, %762 : vector<32x1xf32>
    %cst_281 = arith.constant 1.000000e+00 : f32
    %cst_282 = arith.constant 0.000000e+00 : f32
    %764 = vector.broadcast %cst_281 : f32 to vector<32x1xf32>
    %765 = vector.broadcast %cst_282 : f32 to vector<32x1xf32>
    %766 = arith.select %763, %764, %765 : vector<32x1xi1>, vector<32x1xf32>
    %cst_283 = arith.constant 5.000000e-01 : f32
    %767 = vector.broadcast %cst_283 : f32 to vector<32x1xf32>
    %768 = arith.subf %766, %767 : vector<32x1xf32>
    %cst_284 = arith.constant 5.000000e-05 : f32
    %769 = vector.broadcast %cst_284 : f32 to vector<32x1xf32>
    %770 = arith.mulf %769, %768 : vector<32x1xf32>
    %cst_285 = arith.constant 5.000000e-01 : f32
    %771 = vector.broadcast %cst_285 : f32 to vector<1x4xf32>
    %772 = arith.subf %674, %771 : vector<1x4xf32>
    %773 = vector.broadcast %770 : vector<32x1xf32> to vector<32x4xf32>
    %774 = vector.broadcast %772 : vector<1x4xf32> to vector<32x4xf32>
    %775 = arith.mulf %773, %774 : vector<32x4xf32>
    %776 = arith.addf %590, %775 : vector<32x4xf32>
    %cst_286 = arith.constant 0.000000e+00 : f32
    %cst_287 = arith.constant 1.000000e+00 : f32
    %777 = vector.broadcast %cst_286 : f32 to vector<32x4xf32>
    %778 = arith.maximumf %777, %776 : vector<32x4xf32>
    %779 = vector.broadcast %cst_287 : f32 to vector<32x4xf32>
    %780 = arith.minimumf %779, %778 : vector<32x4xf32>
    %cst_288 = arith.constant dense<0.000000e+00> : vector<1x32xf32>
    %781 = tpu.matmul %634, %22, %cst_288 {dimension_numbers = #tpu.dot_dimension_numbers<[1], [0], [0], [1], [0, 0, 1, 1], [], []>} : vector<1x4xf32>, vector<4x32xf32>, vector<1x32xf32> -> vector<1x32xf32>
    %cst_289 = arith.constant 0.899999976 : f32
    %782 = vector.broadcast %cst_289 : f32 to vector<1x32xf32>
    %783 = arith.mulf %599, %782 : vector<1x32xf32>
    %784 = arith.addf %605, %781 : vector<1x32xf32>
    %cst_290 = arith.constant 1.000000e-01 : f32
    %785 = vector.broadcast %cst_290 : f32 to vector<1x32xf32>
    %786 = arith.mulf %784, %785 : vector<1x32xf32>
    %787 = arith.addf %783, %786 : vector<1x32xf32>
    %cst_291 = arith.constant 0.000000e+00 : f32
    %788 = vector.broadcast %cst_291 : f32 to vector<1x32xf32>
    %789 = arith.maximumf %787, %788 : vector<1x32xf32>
    %c3 = arith.constant 3 : index
    %c0_292 = arith.constant 0 : index
    %790 = vector.load %arg14[%c3, %c0_292] : memref<8x32xf32, #tpu.memory_space<vmem>>, vector<1x32xf32>
    tpu.vector_store %arg14[%c3, %c0_292], %789 {strides = array<i32>} : memref<8x32xf32, #tpu.memory_space<vmem>>, vector<1x32xf32>,
    %791 = vector.extract_strided_slice %5 {offsets = [4, 0], sizes = [1, 32], strides = [1, 1]} : vector<8x32xf32> to vector<1x32xf32>
    %792 = vector.extract_strided_slice %12 {offsets = [4, 0], sizes = [1, 32], strides = [1, 1]} : vector<8x32xf32> to vector<1x32xf32>
    %793 = vector.extract_strided_slice %20 {offsets = [0, 4], sizes = [32, 1], strides = [1, 1]} : vector<32x8xf32> to vector<32x1xf32>
    %cst_293 = arith.constant dense<0.000000e+00> : vector<1x32xf32>
    %794 = tpu.matmul %789, %21, %cst_293 {dimension_numbers = #tpu.dot_dimension_numbers<[1], [0], [0], [1], [0, 0, 1, 1], [], []>} : vector<1x32xf32>, vector<32x32xf32>, vector<1x32xf32> -> vector<1x32xf32>
    %795 = arith.addf %791, %794 : vector<1x32xf32>
    %cst_294 = arith.constant dense<0.000000e+00> : vector<1x4xf32>
    %796 = tpu.matmul %792, %780, %cst_294 {dimension_numbers = #tpu.dot_dimension_numbers<[1], [0], [0], [1], [0, 0, 1, 1], [], []>} : vector<1x32xf32>, vector<32x4xf32>, vector<1x4xf32> -> vector<1x4xf32>
    %cst_295 = arith.constant 0.000000e+00 : f32
    %797 = vector.broadcast %cst_295 : f32 to vector<1x4xf32>
    %798 = arith.subf %797, %612 : vector<1x4xf32>
    %799 = arith.addf %798, %796 : vector<1x4xf32>
    %cst_296 = arith.constant 1.250000e-02 : f32
    %800 = vector.broadcast %cst_296 : f32 to vector<1x4xf32>
    %801 = arith.mulf %800, %799 : vector<1x4xf32>
    %802 = arith.addf %612, %801 : vector<1x4xf32>
    %cst_297 = arith.constant dense<0xFF800000> : vector<1xf32>
    %803 = vector.multi_reduction <maximumf>, %802, %cst_297 [1] : vector<1x4xf32> to vector<1xf32>
    %804 = vector.shape_cast %803 : vector<1xf32> to vector<1x1xf32>
    %805 = vector.broadcast %804 : vector<1x1xf32> to vector<1x4xf32>
    %806 = arith.cmpf oeq, %802, %805 : vector<1x4xf32>
    %c4_i32_298 = arith.constant 4 : i32
    %807 = vector.broadcast %c4_i32_298 : i32 to vector<1x4xi32>
    %808 = arith.select %806, %25, %807 : vector<1x4xi1>, vector<1x4xi32>
    %cst_299 = arith.constant dense<2147483647> : vector<1xi32>
    %809 = vector.multi_reduction <minsi>, %808, %cst_299 [1] : vector<1x4xi32> to vector<1xi32>
    %810 = vector.shape_cast %809 : vector<1xi32> to vector<1x1xi32>
    %811 = vector.broadcast %810 : vector<1x1xi32> to vector<1x4xi32>
    %812 = arith.cmpi eq, %25, %811 : vector<1x4xi32>
    %cst_300 = arith.constant 0xFF800000 : f32
    %813 = vector.broadcast %cst_300 : f32 to vector<1x4xf32>
    %814 = arith.select %812, %813, %802 : vector<1x4xi1>, vector<1x4xf32>
    %cst_301 = arith.constant dense<0xFF800000> : vector<1xf32>
    %815 = vector.multi_reduction <maximumf>, %814, %cst_301 [1] : vector<1x4xf32> to vector<1xf32>
    %816 = vector.shape_cast %815 : vector<1xf32> to vector<1x1xf32>
    %817 = arith.addf %804, %816 : vector<1x1xf32>
    %cst_302 = arith.constant 5.000000e-01 : f32
    %818 = vector.broadcast %cst_302 : f32 to vector<1x1xf32>
    %819 = arith.mulf %818, %817 : vector<1x1xf32>
    %820 = vector.broadcast %819 : vector<1x1xf32> to vector<1x4xf32>
    %821 = arith.cmpf oge, %802, %820 : vector<1x4xf32>
    %cst_303 = arith.constant 1.000000e+00 : f32
    %cst_304 = arith.constant 0.000000e+00 : f32
    %822 = vector.broadcast %cst_303 : f32 to vector<1x4xf32>
    %823 = vector.broadcast %cst_304 : f32 to vector<1x4xf32>
    %824 = arith.select %821, %822, %823 : vector<1x4xi1>, vector<1x4xf32>
    %cst_305 = arith.constant 0.000000e+00 : f32
    %825 = vector.broadcast %cst_305 : f32 to vector<1x32xf32>
    %826 = arith.subf %825, %640 : vector<1x32xf32>
    %827 = arith.addf %826, %792 : vector<1x32xf32>
    %cst_306 = arith.constant 1.000000e-03 : f32
    %828 = vector.broadcast %cst_306 : f32 to vector<1x32xf32>
    %829 = arith.mulf %828, %827 : vector<1x32xf32>
    %830 = arith.addf %640, %829 : vector<1x32xf32>
    %cst_307 = arith.constant 0.000000e+00 : f32
    %831 = vector.broadcast %cst_307 : f32 to vector<32x1xf32>
    %832 = arith.subf %831, %646 : vector<32x1xf32>
    %833 = arith.addf %832, %793 : vector<32x1xf32>
    %cst_308 = arith.constant 1.000000e-03 : f32
    %834 = vector.broadcast %cst_308 : f32 to vector<32x1xf32>
    %835 = arith.mulf %834, %833 : vector<32x1xf32>
    %836 = arith.addf %646, %835 : vector<32x1xf32>
    %cst_309 = arith.constant 0.000000e+00 : f32
    %837 = vector.broadcast %cst_309 : f32 to vector<1x4xf32>
    %838 = arith.subf %837, %652 : vector<1x4xf32>
    %839 = arith.addf %838, %824 : vector<1x4xf32>
    %cst_310 = arith.constant 1.000000e-03 : f32
    %840 = vector.broadcast %cst_310 : f32 to vector<1x4xf32>
    %841 = arith.mulf %840, %839 : vector<1x4xf32>
    %842 = arith.addf %652, %841 : vector<1x4xf32>
    %cst_311 = arith.constant dense<0xFF800000> : vector<1xf32>
    %843 = vector.multi_reduction <maximumf>, %842, %cst_311 [1] : vector<1x4xf32> to vector<1xf32>
    %844 = vector.shape_cast %843 : vector<1xf32> to vector<1x1xf32>
    %845 = vector.broadcast %844 : vector<1x1xf32> to vector<1x4xf32>
    %846 = arith.cmpf oeq, %842, %845 : vector<1x4xf32>
    %c4_i32_312 = arith.constant 4 : i32
    %847 = vector.broadcast %c4_i32_312 : i32 to vector<1x4xi32>
    %848 = arith.select %846, %25, %847 : vector<1x4xi1>, vector<1x4xi32>
    %cst_313 = arith.constant dense<2147483647> : vector<1xi32>
    %849 = vector.multi_reduction <minsi>, %848, %cst_313 [1] : vector<1x4xi32> to vector<1xi32>
    %850 = vector.shape_cast %849 : vector<1xi32> to vector<1x1xi32>
    %851 = vector.broadcast %850 : vector<1x1xi32> to vector<1x4xi32>
    %852 = arith.cmpi eq, %25, %851 : vector<1x4xi32>
    %cst_314 = arith.constant 0xFF800000 : f32
    %853 = vector.broadcast %cst_314 : f32 to vector<1x4xf32>
    %854 = arith.select %852, %853, %842 : vector<1x4xi1>, vector<1x4xf32>
    %cst_315 = arith.constant dense<0xFF800000> : vector<1xf32>
    %855 = vector.multi_reduction <maximumf>, %854, %cst_315 [1] : vector<1x4xf32> to vector<1xf32>
    %856 = vector.shape_cast %855 : vector<1xf32> to vector<1x1xf32>
    %857 = arith.addf %844, %856 : vector<1x1xf32>
    %cst_316 = arith.constant 5.000000e-01 : f32
    %858 = vector.broadcast %cst_316 : f32 to vector<1x1xf32>
    %859 = arith.mulf %858, %857 : vector<1x1xf32>
    %860 = vector.broadcast %859 : vector<1x1xf32> to vector<1x4xf32>
    %861 = arith.cmpf oge, %842, %860 : vector<1x4xf32>
    %cst_317 = arith.constant 1.000000e+00 : f32
    %cst_318 = arith.constant 0.000000e+00 : f32
    %862 = vector.broadcast %cst_317 : f32 to vector<1x4xf32>
    %863 = vector.broadcast %cst_318 : f32 to vector<1x4xf32>
    %864 = arith.select %861, %862, %863 : vector<1x4xi1>, vector<1x4xf32>
    %cst_319 = arith.constant dense<0.000000e+00> : vector<1xf32>
    %865 = vector.multi_reduction <add>, %830, %cst_319 [1] : vector<1x32xf32> to vector<1xf32>
    %866 = vector.shape_cast %865 : vector<1xf32> to vector<1x1xf32>
    %cst_320 = arith.constant 0.000000e+00 : f32
    %867 = vector.broadcast %cst_320 : f32 to vector<1x1xf32>
    %cst_321 = arith.constant dense<0xFF800000> : vector<1xf32>
    %868 = vector.multi_reduction <maximumf>, %830, %cst_321 [1] : vector<1x32xf32> to vector<1xf32>
    %869 = vector.shape_cast %868 : vector<1xf32> to vector<1x1xf32>
    %870 = arith.addf %867, %869 : vector<1x1xf32>
    %871 = vector.broadcast %869 : vector<1x1xf32> to vector<1x32xf32>
    %872 = arith.cmpf oeq, %830, %871 : vector<1x32xf32>
    %c32_i32_322 = arith.constant 32 : i32
    %873 = vector.broadcast %c32_i32_322 : i32 to vector<1x32xi32>
    %874 = arith.select %872, %24, %873 : vector<1x32xi1>, vector<1x32xi32>
    %cst_323 = arith.constant dense<2147483647> : vector<1xi32>
    %875 = vector.multi_reduction <minsi>, %874, %cst_323 [1] : vector<1x32xi32> to vector<1xi32>
    %876 = vector.shape_cast %875 : vector<1xi32> to vector<1x1xi32>
    %877 = vector.broadcast %876 : vector<1x1xi32> to vector<1x32xi32>
    %878 = arith.cmpi eq, %24, %877 : vector<1x32xi32>
    %cst_324 = arith.constant 0xFF800000 : f32
    %879 = vector.broadcast %cst_324 : f32 to vector<1x32xf32>
    %880 = arith.select %878, %879, %830 : vector<1x32xi1>, vector<1x32xf32>
    %cst_325 = arith.constant dense<0xFF800000> : vector<1xf32>
    %881 = vector.multi_reduction <maximumf>, %880, %cst_325 [1] : vector<1x32xf32> to vector<1xf32>
    %882 = vector.shape_cast %881 : vector<1xf32> to vector<1x1xf32>
    %883 = arith.addf %870, %882 : vector<1x1xf32>
    %884 = vector.broadcast %882 : vector<1x1xf32> to vector<1x32xf32>
    %885 = arith.cmpf oeq, %880, %884 : vector<1x32xf32>
    %c32_i32_326 = arith.constant 32 : i32
    %886 = vector.broadcast %c32_i32_326 : i32 to vector<1x32xi32>
    %887 = arith.select %885, %24, %886 : vector<1x32xi1>, vector<1x32xi32>
    %cst_327 = arith.constant dense<2147483647> : vector<1xi32>
    %888 = vector.multi_reduction <minsi>, %887, %cst_327 [1] : vector<1x32xi32> to vector<1xi32>
    %889 = vector.shape_cast %888 : vector<1xi32> to vector<1x1xi32>
    %890 = vector.broadcast %889 : vector<1x1xi32> to vector<1x32xi32>
    %891 = arith.cmpi eq, %24, %890 : vector<1x32xi32>
    %cst_328 = arith.constant 0xFF800000 : f32
    %892 = vector.broadcast %cst_328 : f32 to vector<1x32xf32>
    %893 = arith.select %891, %892, %880 : vector<1x32xi1>, vector<1x32xf32>
    %cst_329 = arith.constant dense<0xFF800000> : vector<1xf32>
    %894 = vector.multi_reduction <maximumf>, %893, %cst_329 [1] : vector<1x32xf32> to vector<1xf32>
    %895 = vector.shape_cast %894 : vector<1xf32> to vector<1x1xf32>
    %896 = arith.addf %883, %895 : vector<1x1xf32>
    %897 = vector.broadcast %895 : vector<1x1xf32> to vector<1x32xf32>
    %898 = arith.cmpf oeq, %893, %897 : vector<1x32xf32>
    %c32_i32_330 = arith.constant 32 : i32
    %899 = vector.broadcast %c32_i32_330 : i32 to vector<1x32xi32>
    %900 = arith.select %898, %24, %899 : vector<1x32xi1>, vector<1x32xi32>
    %cst_331 = arith.constant dense<2147483647> : vector<1xi32>
    %901 = vector.multi_reduction <minsi>, %900, %cst_331 [1] : vector<1x32xi32> to vector<1xi32>
    %902 = vector.shape_cast %901 : vector<1xi32> to vector<1x1xi32>
    %903 = vector.broadcast %902 : vector<1x1xi32> to vector<1x32xi32>
    %904 = arith.cmpi eq, %24, %903 : vector<1x32xi32>
    %cst_332 = arith.constant 0xFF800000 : f32
    %905 = vector.broadcast %cst_332 : f32 to vector<1x32xf32>
    %906 = arith.select %904, %905, %893 : vector<1x32xi1>, vector<1x32xf32>
    %cst_333 = arith.constant dense<0xFF800000> : vector<1xf32>
    %907 = vector.multi_reduction <maximumf>, %906, %cst_333 [1] : vector<1x32xf32> to vector<1xf32>
    %908 = vector.shape_cast %907 : vector<1xf32> to vector<1x1xf32>
    %909 = arith.addf %896, %908 : vector<1x1xf32>
    %910 = vector.broadcast %908 : vector<1x1xf32> to vector<1x32xf32>
    %911 = arith.cmpf oeq, %906, %910 : vector<1x32xf32>
    %c32_i32_334 = arith.constant 32 : i32
    %912 = vector.broadcast %c32_i32_334 : i32 to vector<1x32xi32>
    %913 = arith.select %911, %24, %912 : vector<1x32xi1>, vector<1x32xi32>
    %cst_335 = arith.constant dense<2147483647> : vector<1xi32>
    %914 = vector.multi_reduction <minsi>, %913, %cst_335 [1] : vector<1x32xi32> to vector<1xi32>
    %915 = vector.shape_cast %914 : vector<1xi32> to vector<1x1xi32>
    %916 = vector.broadcast %915 : vector<1x1xi32> to vector<1x32xi32>
    %917 = arith.cmpi eq, %24, %916 : vector<1x32xi32>
    %cst_336 = arith.constant 0xFF800000 : f32
    %918 = vector.broadcast %cst_336 : f32 to vector<1x32xf32>
    %919 = arith.select %917, %918, %906 : vector<1x32xi1>, vector<1x32xf32>
    %cst_337 = arith.constant dense<0xFF800000> : vector<1xf32>
    %920 = vector.multi_reduction <maximumf>, %919, %cst_337 [1] : vector<1x32xf32> to vector<1xf32>
    %921 = vector.shape_cast %920 : vector<1xf32> to vector<1x1xf32>
    %922 = arith.addf %909, %921 : vector<1x1xf32>
    %923 = vector.broadcast %921 : vector<1x1xf32> to vector<1x32xf32>
    %924 = arith.cmpf oeq, %919, %923 : vector<1x32xf32>
    %c32_i32_338 = arith.constant 32 : i32
    %925 = vector.broadcast %c32_i32_338 : i32 to vector<1x32xi32>
    %926 = arith.select %924, %24, %925 : vector<1x32xi1>, vector<1x32xi32>
    %cst_339 = arith.constant dense<2147483647> : vector<1xi32>
    %927 = vector.multi_reduction <minsi>, %926, %cst_339 [1] : vector<1x32xi32> to vector<1xi32>
    %928 = vector.shape_cast %927 : vector<1xi32> to vector<1x1xi32>
    %929 = vector.broadcast %928 : vector<1x1xi32> to vector<1x32xi32>
    %930 = arith.cmpi eq, %24, %929 : vector<1x32xi32>
    %cst_340 = arith.constant 0xFF800000 : f32
    %931 = vector.broadcast %cst_340 : f32 to vector<1x32xf32>
    %932 = arith.select %930, %931, %919 : vector<1x32xi1>, vector<1x32xf32>
    %cst_341 = arith.constant dense<0xFF800000> : vector<1xf32>
    %933 = vector.multi_reduction <maximumf>, %932, %cst_341 [1] : vector<1x32xf32> to vector<1xf32>
    %934 = vector.shape_cast %933 : vector<1xf32> to vector<1x1xf32>
    %935 = arith.addf %922, %934 : vector<1x1xf32>
    %936 = vector.broadcast %934 : vector<1x1xf32> to vector<1x32xf32>
    %937 = arith.cmpf oeq, %932, %936 : vector<1x32xf32>
    %c32_i32_342 = arith.constant 32 : i32
    %938 = vector.broadcast %c32_i32_342 : i32 to vector<1x32xi32>
    %939 = arith.select %937, %24, %938 : vector<1x32xi1>, vector<1x32xi32>
    %cst_343 = arith.constant dense<2147483647> : vector<1xi32>
    %940 = vector.multi_reduction <minsi>, %939, %cst_343 [1] : vector<1x32xi32> to vector<1xi32>
    %941 = vector.shape_cast %940 : vector<1xi32> to vector<1x1xi32>
    %942 = vector.broadcast %941 : vector<1x1xi32> to vector<1x32xi32>
    %943 = arith.cmpi eq, %24, %942 : vector<1x32xi32>
    %cst_344 = arith.constant 0xFF800000 : f32
    %944 = vector.broadcast %cst_344 : f32 to vector<1x32xf32>
    %945 = arith.select %943, %944, %932 : vector<1x32xi1>, vector<1x32xf32>
    %cst_345 = arith.constant dense<0xFF800000> : vector<1xf32>
    %946 = vector.multi_reduction <maximumf>, %945, %cst_345 [1] : vector<1x32xf32> to vector<1xf32>
    %947 = vector.shape_cast %946 : vector<1xf32> to vector<1x1xf32>
    %948 = arith.addf %935, %947 : vector<1x1xf32>
    %949 = arith.subf %866, %948 : vector<1x1xf32>
    %cst_346 = arith.constant 4.000000e-02 : f32
    %950 = vector.broadcast %cst_346 : f32 to vector<1x1xf32>
    %951 = arith.mulf %949, %950 : vector<1x1xf32>
    %952 = vector.broadcast %951 : vector<1x1xf32> to vector<32x1xf32>
    %953 = arith.cmpf ogt, %836, %952 : vector<32x1xf32>
    %cst_347 = arith.constant 1.000000e+00 : f32
    %cst_348 = arith.constant 0.000000e+00 : f32
    %954 = vector.broadcast %cst_347 : f32 to vector<32x1xf32>
    %955 = vector.broadcast %cst_348 : f32 to vector<32x1xf32>
    %956 = arith.select %953, %954, %955 : vector<32x1xi1>, vector<32x1xf32>
    %cst_349 = arith.constant 5.000000e-01 : f32
    %957 = vector.broadcast %cst_349 : f32 to vector<32x1xf32>
    %958 = arith.subf %956, %957 : vector<32x1xf32>
    %cst_350 = arith.constant 5.000000e-05 : f32
    %959 = vector.broadcast %cst_350 : f32 to vector<32x1xf32>
    %960 = arith.mulf %959, %958 : vector<32x1xf32>
    %cst_351 = arith.constant 5.000000e-01 : f32
    %961 = vector.broadcast %cst_351 : f32 to vector<1x4xf32>
    %962 = arith.subf %864, %961 : vector<1x4xf32>
    %963 = vector.broadcast %960 : vector<32x1xf32> to vector<32x4xf32>
    %964 = vector.broadcast %962 : vector<1x4xf32> to vector<32x4xf32>
    %965 = arith.mulf %963, %964 : vector<32x4xf32>
    %966 = arith.addf %780, %965 : vector<32x4xf32>
    %cst_352 = arith.constant 0.000000e+00 : f32
    %cst_353 = arith.constant 1.000000e+00 : f32
    %967 = vector.broadcast %cst_352 : f32 to vector<32x4xf32>
    %968 = arith.maximumf %967, %966 : vector<32x4xf32>
    %969 = vector.broadcast %cst_353 : f32 to vector<32x4xf32>
    %970 = arith.minimumf %969, %968 : vector<32x4xf32>
    %cst_354 = arith.constant dense<0.000000e+00> : vector<1x32xf32>
    %971 = tpu.matmul %824, %22, %cst_354 {dimension_numbers = #tpu.dot_dimension_numbers<[1], [0], [0], [1], [0, 0, 1, 1], [], []>} : vector<1x4xf32>, vector<4x32xf32>, vector<1x32xf32> -> vector<1x32xf32>
    %cst_355 = arith.constant 0.899999976 : f32
    %972 = vector.broadcast %cst_355 : f32 to vector<1x32xf32>
    %973 = arith.mulf %789, %972 : vector<1x32xf32>
    %974 = arith.addf %795, %971 : vector<1x32xf32>
    %cst_356 = arith.constant 1.000000e-01 : f32
    %975 = vector.broadcast %cst_356 : f32 to vector<1x32xf32>
    %976 = arith.mulf %974, %975 : vector<1x32xf32>
    %977 = arith.addf %973, %976 : vector<1x32xf32>
    %cst_357 = arith.constant 0.000000e+00 : f32
    %978 = vector.broadcast %cst_357 : f32 to vector<1x32xf32>
    %979 = arith.maximumf %977, %978 : vector<1x32xf32>
    %c4 = arith.constant 4 : index
    %c0_358 = arith.constant 0 : index
    %980 = vector.load %arg14[%c4, %c0_358] : memref<8x32xf32, #tpu.memory_space<vmem>>, vector<1x32xf32>
    tpu.vector_store %arg14[%c4, %c0_358], %979 {strides = array<i32>} : memref<8x32xf32, #tpu.memory_space<vmem>>, vector<1x32xf32>,
    %981 = vector.extract_strided_slice %5 {offsets = [5, 0], sizes = [1, 32], strides = [1, 1]} : vector<8x32xf32> to vector<1x32xf32>
    %982 = vector.extract_strided_slice %12 {offsets = [5, 0], sizes = [1, 32], strides = [1, 1]} : vector<8x32xf32> to vector<1x32xf32>
    %983 = vector.extract_strided_slice %20 {offsets = [0, 5], sizes = [32, 1], strides = [1, 1]} : vector<32x8xf32> to vector<32x1xf32>
    %cst_359 = arith.constant dense<0.000000e+00> : vector<1x32xf32>
    %984 = tpu.matmul %979, %21, %cst_359 {dimension_numbers = #tpu.dot_dimension_numbers<[1], [0], [0], [1], [0, 0, 1, 1], [], []>} : vector<1x32xf32>, vector<32x32xf32>, vector<1x32xf32> -> vector<1x32xf32>
    %985 = arith.addf %981, %984 : vector<1x32xf32>
    %cst_360 = arith.constant dense<0.000000e+00> : vector<1x4xf32>
    %986 = tpu.matmul %982, %970, %cst_360 {dimension_numbers = #tpu.dot_dimension_numbers<[1], [0], [0], [1], [0, 0, 1, 1], [], []>} : vector<1x32xf32>, vector<32x4xf32>, vector<1x4xf32> -> vector<1x4xf32>
    %cst_361 = arith.constant 0.000000e+00 : f32
    %987 = vector.broadcast %cst_361 : f32 to vector<1x4xf32>
    %988 = arith.subf %987, %802 : vector<1x4xf32>
    %989 = arith.addf %988, %986 : vector<1x4xf32>
    %cst_362 = arith.constant 1.250000e-02 : f32
    %990 = vector.broadcast %cst_362 : f32 to vector<1x4xf32>
    %991 = arith.mulf %990, %989 : vector<1x4xf32>
    %992 = arith.addf %802, %991 : vector<1x4xf32>
    %cst_363 = arith.constant dense<0xFF800000> : vector<1xf32>
    %993 = vector.multi_reduction <maximumf>, %992, %cst_363 [1] : vector<1x4xf32> to vector<1xf32>
    %994 = vector.shape_cast %993 : vector<1xf32> to vector<1x1xf32>
    %995 = vector.broadcast %994 : vector<1x1xf32> to vector<1x4xf32>
    %996 = arith.cmpf oeq, %992, %995 : vector<1x4xf32>
    %c4_i32_364 = arith.constant 4 : i32
    %997 = vector.broadcast %c4_i32_364 : i32 to vector<1x4xi32>
    %998 = arith.select %996, %25, %997 : vector<1x4xi1>, vector<1x4xi32>
    %cst_365 = arith.constant dense<2147483647> : vector<1xi32>
    %999 = vector.multi_reduction <minsi>, %998, %cst_365 [1] : vector<1x4xi32> to vector<1xi32>
    %1000 = vector.shape_cast %999 : vector<1xi32> to vector<1x1xi32>
    %1001 = vector.broadcast %1000 : vector<1x1xi32> to vector<1x4xi32>
    %1002 = arith.cmpi eq, %25, %1001 : vector<1x4xi32>
    %cst_366 = arith.constant 0xFF800000 : f32
    %1003 = vector.broadcast %cst_366 : f32 to vector<1x4xf32>
    %1004 = arith.select %1002, %1003, %992 : vector<1x4xi1>, vector<1x4xf32>
    %cst_367 = arith.constant dense<0xFF800000> : vector<1xf32>
    %1005 = vector.multi_reduction <maximumf>, %1004, %cst_367 [1] : vector<1x4xf32> to vector<1xf32>
    %1006 = vector.shape_cast %1005 : vector<1xf32> to vector<1x1xf32>
    %1007 = arith.addf %994, %1006 : vector<1x1xf32>
    %cst_368 = arith.constant 5.000000e-01 : f32
    %1008 = vector.broadcast %cst_368 : f32 to vector<1x1xf32>
    %1009 = arith.mulf %1008, %1007 : vector<1x1xf32>
    %1010 = vector.broadcast %1009 : vector<1x1xf32> to vector<1x4xf32>
    %1011 = arith.cmpf oge, %992, %1010 : vector<1x4xf32>
    %cst_369 = arith.constant 1.000000e+00 : f32
    %cst_370 = arith.constant 0.000000e+00 : f32
    %1012 = vector.broadcast %cst_369 : f32 to vector<1x4xf32>
    %1013 = vector.broadcast %cst_370 : f32 to vector<1x4xf32>
    %1014 = arith.select %1011, %1012, %1013 : vector<1x4xi1>, vector<1x4xf32>
    %cst_371 = arith.constant 0.000000e+00 : f32
    %1015 = vector.broadcast %cst_371 : f32 to vector<1x32xf32>
    %1016 = arith.subf %1015, %830 : vector<1x32xf32>
    %1017 = arith.addf %1016, %982 : vector<1x32xf32>
    %cst_372 = arith.constant 1.000000e-03 : f32
    %1018 = vector.broadcast %cst_372 : f32 to vector<1x32xf32>
    %1019 = arith.mulf %1018, %1017 : vector<1x32xf32>
    %1020 = arith.addf %830, %1019 : vector<1x32xf32>
    %cst_373 = arith.constant 0.000000e+00 : f32
    %1021 = vector.broadcast %cst_373 : f32 to vector<32x1xf32>
    %1022 = arith.subf %1021, %836 : vector<32x1xf32>
    %1023 = arith.addf %1022, %983 : vector<32x1xf32>
    %cst_374 = arith.constant 1.000000e-03 : f32
    %1024 = vector.broadcast %cst_374 : f32 to vector<32x1xf32>
    %1025 = arith.mulf %1024, %1023 : vector<32x1xf32>
    %1026 = arith.addf %836, %1025 : vector<32x1xf32>
    %cst_375 = arith.constant 0.000000e+00 : f32
    %1027 = vector.broadcast %cst_375 : f32 to vector<1x4xf32>
    %1028 = arith.subf %1027, %842 : vector<1x4xf32>
    %1029 = arith.addf %1028, %1014 : vector<1x4xf32>
    %cst_376 = arith.constant 1.000000e-03 : f32
    %1030 = vector.broadcast %cst_376 : f32 to vector<1x4xf32>
    %1031 = arith.mulf %1030, %1029 : vector<1x4xf32>
    %1032 = arith.addf %842, %1031 : vector<1x4xf32>
    %cst_377 = arith.constant dense<0xFF800000> : vector<1xf32>
    %1033 = vector.multi_reduction <maximumf>, %1032, %cst_377 [1] : vector<1x4xf32> to vector<1xf32>
    %1034 = vector.shape_cast %1033 : vector<1xf32> to vector<1x1xf32>
    %1035 = vector.broadcast %1034 : vector<1x1xf32> to vector<1x4xf32>
    %1036 = arith.cmpf oeq, %1032, %1035 : vector<1x4xf32>
    %c4_i32_378 = arith.constant 4 : i32
    %1037 = vector.broadcast %c4_i32_378 : i32 to vector<1x4xi32>
    %1038 = arith.select %1036, %25, %1037 : vector<1x4xi1>, vector<1x4xi32>
    %cst_379 = arith.constant dense<2147483647> : vector<1xi32>
    %1039 = vector.multi_reduction <minsi>, %1038, %cst_379 [1] : vector<1x4xi32> to vector<1xi32>
    %1040 = vector.shape_cast %1039 : vector<1xi32> to vector<1x1xi32>
    %1041 = vector.broadcast %1040 : vector<1x1xi32> to vector<1x4xi32>
    %1042 = arith.cmpi eq, %25, %1041 : vector<1x4xi32>
    %cst_380 = arith.constant 0xFF800000 : f32
    %1043 = vector.broadcast %cst_380 : f32 to vector<1x4xf32>
    %1044 = arith.select %1042, %1043, %1032 : vector<1x4xi1>, vector<1x4xf32>
    %cst_381 = arith.constant dense<0xFF800000> : vector<1xf32>
    %1045 = vector.multi_reduction <maximumf>, %1044, %cst_381 [1] : vector<1x4xf32> to vector<1xf32>
    %1046 = vector.shape_cast %1045 : vector<1xf32> to vector<1x1xf32>
    %1047 = arith.addf %1034, %1046 : vector<1x1xf32>
    %cst_382 = arith.constant 5.000000e-01 : f32
    %1048 = vector.broadcast %cst_382 : f32 to vector<1x1xf32>
    %1049 = arith.mulf %1048, %1047 : vector<1x1xf32>
    %1050 = vector.broadcast %1049 : vector<1x1xf32> to vector<1x4xf32>
    %1051 = arith.cmpf oge, %1032, %1050 : vector<1x4xf32>
    %cst_383 = arith.constant 1.000000e+00 : f32
    %cst_384 = arith.constant 0.000000e+00 : f32
    %1052 = vector.broadcast %cst_383 : f32 to vector<1x4xf32>
    %1053 = vector.broadcast %cst_384 : f32 to vector<1x4xf32>
    %1054 = arith.select %1051, %1052, %1053 : vector<1x4xi1>, vector<1x4xf32>
    %cst_385 = arith.constant dense<0.000000e+00> : vector<1xf32>
    %1055 = vector.multi_reduction <add>, %1020, %cst_385 [1] : vector<1x32xf32> to vector<1xf32>
    %1056 = vector.shape_cast %1055 : vector<1xf32> to vector<1x1xf32>
    %cst_386 = arith.constant 0.000000e+00 : f32
    %1057 = vector.broadcast %cst_386 : f32 to vector<1x1xf32>
    %cst_387 = arith.constant dense<0xFF800000> : vector<1xf32>
    %1058 = vector.multi_reduction <maximumf>, %1020, %cst_387 [1] : vector<1x32xf32> to vector<1xf32>
    %1059 = vector.shape_cast %1058 : vector<1xf32> to vector<1x1xf32>
    %1060 = arith.addf %1057, %1059 : vector<1x1xf32>
    %1061 = vector.broadcast %1059 : vector<1x1xf32> to vector<1x32xf32>
    %1062 = arith.cmpf oeq, %1020, %1061 : vector<1x32xf32>
    %c32_i32_388 = arith.constant 32 : i32
    %1063 = vector.broadcast %c32_i32_388 : i32 to vector<1x32xi32>
    %1064 = arith.select %1062, %24, %1063 : vector<1x32xi1>, vector<1x32xi32>
    %cst_389 = arith.constant dense<2147483647> : vector<1xi32>
    %1065 = vector.multi_reduction <minsi>, %1064, %cst_389 [1] : vector<1x32xi32> to vector<1xi32>
    %1066 = vector.shape_cast %1065 : vector<1xi32> to vector<1x1xi32>
    %1067 = vector.broadcast %1066 : vector<1x1xi32> to vector<1x32xi32>
    %1068 = arith.cmpi eq, %24, %1067 : vector<1x32xi32>
    %cst_390 = arith.constant 0xFF800000 : f32
    %1069 = vector.broadcast %cst_390 : f32 to vector<1x32xf32>
    %1070 = arith.select %1068, %1069, %1020 : vector<1x32xi1>, vector<1x32xf32>
    %cst_391 = arith.constant dense<0xFF800000> : vector<1xf32>
    %1071 = vector.multi_reduction <maximumf>, %1070, %cst_391 [1] : vector<1x32xf32> to vector<1xf32>
    %1072 = vector.shape_cast %1071 : vector<1xf32> to vector<1x1xf32>
    %1073 = arith.addf %1060, %1072 : vector<1x1xf32>
    %1074 = vector.broadcast %1072 : vector<1x1xf32> to vector<1x32xf32>
    %1075 = arith.cmpf oeq, %1070, %1074 : vector<1x32xf32>
    %c32_i32_392 = arith.constant 32 : i32
    %1076 = vector.broadcast %c32_i32_392 : i32 to vector<1x32xi32>
    %1077 = arith.select %1075, %24, %1076 : vector<1x32xi1>, vector<1x32xi32>
    %cst_393 = arith.constant dense<2147483647> : vector<1xi32>
    %1078 = vector.multi_reduction <minsi>, %1077, %cst_393 [1] : vector<1x32xi32> to vector<1xi32>
    %1079 = vector.shape_cast %1078 : vector<1xi32> to vector<1x1xi32>
    %1080 = vector.broadcast %1079 : vector<1x1xi32> to vector<1x32xi32>
    %1081 = arith.cmpi eq, %24, %1080 : vector<1x32xi32>
    %cst_394 = arith.constant 0xFF800000 : f32
    %1082 = vector.broadcast %cst_394 : f32 to vector<1x32xf32>
    %1083 = arith.select %1081, %1082, %1070 : vector<1x32xi1>, vector<1x32xf32>
    %cst_395 = arith.constant dense<0xFF800000> : vector<1xf32>
    %1084 = vector.multi_reduction <maximumf>, %1083, %cst_395 [1] : vector<1x32xf32> to vector<1xf32>
    %1085 = vector.shape_cast %1084 : vector<1xf32> to vector<1x1xf32>
    %1086 = arith.addf %1073, %1085 : vector<1x1xf32>
    %1087 = vector.broadcast %1085 : vector<1x1xf32> to vector<1x32xf32>
    %1088 = arith.cmpf oeq, %1083, %1087 : vector<1x32xf32>
    %c32_i32_396 = arith.constant 32 : i32
    %1089 = vector.broadcast %c32_i32_396 : i32 to vector<1x32xi32>
    %1090 = arith.select %1088, %24, %1089 : vector<1x32xi1>, vector<1x32xi32>
    %cst_397 = arith.constant dense<2147483647> : vector<1xi32>
    %1091 = vector.multi_reduction <minsi>, %1090, %cst_397 [1] : vector<1x32xi32> to vector<1xi32>
    %1092 = vector.shape_cast %1091 : vector<1xi32> to vector<1x1xi32>
    %1093 = vector.broadcast %1092 : vector<1x1xi32> to vector<1x32xi32>
    %1094 = arith.cmpi eq, %24, %1093 : vector<1x32xi32>
    %cst_398 = arith.constant 0xFF800000 : f32
    %1095 = vector.broadcast %cst_398 : f32 to vector<1x32xf32>
    %1096 = arith.select %1094, %1095, %1083 : vector<1x32xi1>, vector<1x32xf32>
    %cst_399 = arith.constant dense<0xFF800000> : vector<1xf32>
    %1097 = vector.multi_reduction <maximumf>, %1096, %cst_399 [1] : vector<1x32xf32> to vector<1xf32>
    %1098 = vector.shape_cast %1097 : vector<1xf32> to vector<1x1xf32>
    %1099 = arith.addf %1086, %1098 : vector<1x1xf32>
    %1100 = vector.broadcast %1098 : vector<1x1xf32> to vector<1x32xf32>
    %1101 = arith.cmpf oeq, %1096, %1100 : vector<1x32xf32>
    %c32_i32_400 = arith.constant 32 : i32
    %1102 = vector.broadcast %c32_i32_400 : i32 to vector<1x32xi32>
    %1103 = arith.select %1101, %24, %1102 : vector<1x32xi1>, vector<1x32xi32>
    %cst_401 = arith.constant dense<2147483647> : vector<1xi32>
    %1104 = vector.multi_reduction <minsi>, %1103, %cst_401 [1] : vector<1x32xi32> to vector<1xi32>
    %1105 = vector.shape_cast %1104 : vector<1xi32> to vector<1x1xi32>
    %1106 = vector.broadcast %1105 : vector<1x1xi32> to vector<1x32xi32>
    %1107 = arith.cmpi eq, %24, %1106 : vector<1x32xi32>
    %cst_402 = arith.constant 0xFF800000 : f32
    %1108 = vector.broadcast %cst_402 : f32 to vector<1x32xf32>
    %1109 = arith.select %1107, %1108, %1096 : vector<1x32xi1>, vector<1x32xf32>
    %cst_403 = arith.constant dense<0xFF800000> : vector<1xf32>
    %1110 = vector.multi_reduction <maximumf>, %1109, %cst_403 [1] : vector<1x32xf32> to vector<1xf32>
    %1111 = vector.shape_cast %1110 : vector<1xf32> to vector<1x1xf32>
    %1112 = arith.addf %1099, %1111 : vector<1x1xf32>
    %1113 = vector.broadcast %1111 : vector<1x1xf32> to vector<1x32xf32>
    %1114 = arith.cmpf oeq, %1109, %1113 : vector<1x32xf32>
    %c32_i32_404 = arith.constant 32 : i32
    %1115 = vector.broadcast %c32_i32_404 : i32 to vector<1x32xi32>
    %1116 = arith.select %1114, %24, %1115 : vector<1x32xi1>, vector<1x32xi32>
    %cst_405 = arith.constant dense<2147483647> : vector<1xi32>
    %1117 = vector.multi_reduction <minsi>, %1116, %cst_405 [1] : vector<1x32xi32> to vector<1xi32>
    %1118 = vector.shape_cast %1117 : vector<1xi32> to vector<1x1xi32>
    %1119 = vector.broadcast %1118 : vector<1x1xi32> to vector<1x32xi32>
    %1120 = arith.cmpi eq, %24, %1119 : vector<1x32xi32>
    %cst_406 = arith.constant 0xFF800000 : f32
    %1121 = vector.broadcast %cst_406 : f32 to vector<1x32xf32>
    %1122 = arith.select %1120, %1121, %1109 : vector<1x32xi1>, vector<1x32xf32>
    %cst_407 = arith.constant dense<0xFF800000> : vector<1xf32>
    %1123 = vector.multi_reduction <maximumf>, %1122, %cst_407 [1] : vector<1x32xf32> to vector<1xf32>
    %1124 = vector.shape_cast %1123 : vector<1xf32> to vector<1x1xf32>
    %1125 = arith.addf %1112, %1124 : vector<1x1xf32>
    %1126 = vector.broadcast %1124 : vector<1x1xf32> to vector<1x32xf32>
    %1127 = arith.cmpf oeq, %1122, %1126 : vector<1x32xf32>
    %c32_i32_408 = arith.constant 32 : i32
    %1128 = vector.broadcast %c32_i32_408 : i32 to vector<1x32xi32>
    %1129 = arith.select %1127, %24, %1128 : vector<1x32xi1>, vector<1x32xi32>
    %cst_409 = arith.constant dense<2147483647> : vector<1xi32>
    %1130 = vector.multi_reduction <minsi>, %1129, %cst_409 [1] : vector<1x32xi32> to vector<1xi32>
    %1131 = vector.shape_cast %1130 : vector<1xi32> to vector<1x1xi32>
    %1132 = vector.broadcast %1131 : vector<1x1xi32> to vector<1x32xi32>
    %1133 = arith.cmpi eq, %24, %1132 : vector<1x32xi32>
    %cst_410 = arith.constant 0xFF800000 : f32
    %1134 = vector.broadcast %cst_410 : f32 to vector<1x32xf32>
    %1135 = arith.select %1133, %1134, %1122 : vector<1x32xi1>, vector<1x32xf32>
    %cst_411 = arith.constant dense<0xFF800000> : vector<1xf32>
    %1136 = vector.multi_reduction <maximumf>, %1135, %cst_411 [1] : vector<1x32xf32> to vector<1xf32>
    %1137 = vector.shape_cast %1136 : vector<1xf32> to vector<1x1xf32>
    %1138 = arith.addf %1125, %1137 : vector<1x1xf32>
    %1139 = arith.subf %1056, %1138 : vector<1x1xf32>
    %cst_412 = arith.constant 4.000000e-02 : f32
    %1140 = vector.broadcast %cst_412 : f32 to vector<1x1xf32>
    %1141 = arith.mulf %1139, %1140 : vector<1x1xf32>
    %1142 = vector.broadcast %1141 : vector<1x1xf32> to vector<32x1xf32>
    %1143 = arith.cmpf ogt, %1026, %1142 : vector<32x1xf32>
    %cst_413 = arith.constant 1.000000e+00 : f32
    %cst_414 = arith.constant 0.000000e+00 : f32
    %1144 = vector.broadcast %cst_413 : f32 to vector<32x1xf32>
    %1145 = vector.broadcast %cst_414 : f32 to vector<32x1xf32>
    %1146 = arith.select %1143, %1144, %1145 : vector<32x1xi1>, vector<32x1xf32>
    %cst_415 = arith.constant 5.000000e-01 : f32
    %1147 = vector.broadcast %cst_415 : f32 to vector<32x1xf32>
    %1148 = arith.subf %1146, %1147 : vector<32x1xf32>
    %cst_416 = arith.constant 5.000000e-05 : f32
    %1149 = vector.broadcast %cst_416 : f32 to vector<32x1xf32>
    %1150 = arith.mulf %1149, %1148 : vector<32x1xf32>
    %cst_417 = arith.constant 5.000000e-01 : f32
    %1151 = vector.broadcast %cst_417 : f32 to vector<1x4xf32>
    %1152 = arith.subf %1054, %1151 : vector<1x4xf32>
    %1153 = vector.broadcast %1150 : vector<32x1xf32> to vector<32x4xf32>
    %1154 = vector.broadcast %1152 : vector<1x4xf32> to vector<32x4xf32>
    %1155 = arith.mulf %1153, %1154 : vector<32x4xf32>
    %1156 = arith.addf %970, %1155 : vector<32x4xf32>
    %cst_418 = arith.constant 0.000000e+00 : f32
    %cst_419 = arith.constant 1.000000e+00 : f32
    %1157 = vector.broadcast %cst_418 : f32 to vector<32x4xf32>
    %1158 = arith.maximumf %1157, %1156 : vector<32x4xf32>
    %1159 = vector.broadcast %cst_419 : f32 to vector<32x4xf32>
    %1160 = arith.minimumf %1159, %1158 : vector<32x4xf32>
    %cst_420 = arith.constant dense<0.000000e+00> : vector<1x32xf32>
    %1161 = tpu.matmul %1014, %22, %cst_420 {dimension_numbers = #tpu.dot_dimension_numbers<[1], [0], [0], [1], [0, 0, 1, 1], [], []>} : vector<1x4xf32>, vector<4x32xf32>, vector<1x32xf32> -> vector<1x32xf32>
    %cst_421 = arith.constant 0.899999976 : f32
    %1162 = vector.broadcast %cst_421 : f32 to vector<1x32xf32>
    %1163 = arith.mulf %979, %1162 : vector<1x32xf32>
    %1164 = arith.addf %985, %1161 : vector<1x32xf32>
    %cst_422 = arith.constant 1.000000e-01 : f32
    %1165 = vector.broadcast %cst_422 : f32 to vector<1x32xf32>
    %1166 = arith.mulf %1164, %1165 : vector<1x32xf32>
    %1167 = arith.addf %1163, %1166 : vector<1x32xf32>
    %cst_423 = arith.constant 0.000000e+00 : f32
    %1168 = vector.broadcast %cst_423 : f32 to vector<1x32xf32>
    %1169 = arith.maximumf %1167, %1168 : vector<1x32xf32>
    %c5 = arith.constant 5 : index
    %c0_424 = arith.constant 0 : index
    %1170 = vector.load %arg14[%c5, %c0_424] : memref<8x32xf32, #tpu.memory_space<vmem>>, vector<1x32xf32>
    tpu.vector_store %arg14[%c5, %c0_424], %1169 {strides = array<i32>} : memref<8x32xf32, #tpu.memory_space<vmem>>, vector<1x32xf32>,
    %1171 = vector.extract_strided_slice %5 {offsets = [6, 0], sizes = [1, 32], strides = [1, 1]} : vector<8x32xf32> to vector<1x32xf32>
    %1172 = vector.extract_strided_slice %12 {offsets = [6, 0], sizes = [1, 32], strides = [1, 1]} : vector<8x32xf32> to vector<1x32xf32>
    %1173 = vector.extract_strided_slice %20 {offsets = [0, 6], sizes = [32, 1], strides = [1, 1]} : vector<32x8xf32> to vector<32x1xf32>
    %cst_425 = arith.constant dense<0.000000e+00> : vector<1x32xf32>
    %1174 = tpu.matmul %1169, %21, %cst_425 {dimension_numbers = #tpu.dot_dimension_numbers<[1], [0], [0], [1], [0, 0, 1, 1], [], []>} : vector<1x32xf32>, vector<32x32xf32>, vector<1x32xf32> -> vector<1x32xf32>
    %1175 = arith.addf %1171, %1174 : vector<1x32xf32>
    %cst_426 = arith.constant dense<0.000000e+00> : vector<1x4xf32>
    %1176 = tpu.matmul %1172, %1160, %cst_426 {dimension_numbers = #tpu.dot_dimension_numbers<[1], [0], [0], [1], [0, 0, 1, 1], [], []>} : vector<1x32xf32>, vector<32x4xf32>, vector<1x4xf32> -> vector<1x4xf32>
    %cst_427 = arith.constant 0.000000e+00 : f32
    %1177 = vector.broadcast %cst_427 : f32 to vector<1x4xf32>
    %1178 = arith.subf %1177, %992 : vector<1x4xf32>
    %1179 = arith.addf %1178, %1176 : vector<1x4xf32>
    %cst_428 = arith.constant 1.250000e-02 : f32
    %1180 = vector.broadcast %cst_428 : f32 to vector<1x4xf32>
    %1181 = arith.mulf %1180, %1179 : vector<1x4xf32>
    %1182 = arith.addf %992, %1181 : vector<1x4xf32>
    %cst_429 = arith.constant dense<0xFF800000> : vector<1xf32>
    %1183 = vector.multi_reduction <maximumf>, %1182, %cst_429 [1] : vector<1x4xf32> to vector<1xf32>
    %1184 = vector.shape_cast %1183 : vector<1xf32> to vector<1x1xf32>
    %1185 = vector.broadcast %1184 : vector<1x1xf32> to vector<1x4xf32>
    %1186 = arith.cmpf oeq, %1182, %1185 : vector<1x4xf32>
    %c4_i32_430 = arith.constant 4 : i32
    %1187 = vector.broadcast %c4_i32_430 : i32 to vector<1x4xi32>
    %1188 = arith.select %1186, %25, %1187 : vector<1x4xi1>, vector<1x4xi32>
    %cst_431 = arith.constant dense<2147483647> : vector<1xi32>
    %1189 = vector.multi_reduction <minsi>, %1188, %cst_431 [1] : vector<1x4xi32> to vector<1xi32>
    %1190 = vector.shape_cast %1189 : vector<1xi32> to vector<1x1xi32>
    %1191 = vector.broadcast %1190 : vector<1x1xi32> to vector<1x4xi32>
    %1192 = arith.cmpi eq, %25, %1191 : vector<1x4xi32>
    %cst_432 = arith.constant 0xFF800000 : f32
    %1193 = vector.broadcast %cst_432 : f32 to vector<1x4xf32>
    %1194 = arith.select %1192, %1193, %1182 : vector<1x4xi1>, vector<1x4xf32>
    %cst_433 = arith.constant dense<0xFF800000> : vector<1xf32>
    %1195 = vector.multi_reduction <maximumf>, %1194, %cst_433 [1] : vector<1x4xf32> to vector<1xf32>
    %1196 = vector.shape_cast %1195 : vector<1xf32> to vector<1x1xf32>
    %1197 = arith.addf %1184, %1196 : vector<1x1xf32>
    %cst_434 = arith.constant 5.000000e-01 : f32
    %1198 = vector.broadcast %cst_434 : f32 to vector<1x1xf32>
    %1199 = arith.mulf %1198, %1197 : vector<1x1xf32>
    %1200 = vector.broadcast %1199 : vector<1x1xf32> to vector<1x4xf32>
    %1201 = arith.cmpf oge, %1182, %1200 : vector<1x4xf32>
    %cst_435 = arith.constant 1.000000e+00 : f32
    %cst_436 = arith.constant 0.000000e+00 : f32
    %1202 = vector.broadcast %cst_435 : f32 to vector<1x4xf32>
    %1203 = vector.broadcast %cst_436 : f32 to vector<1x4xf32>
    %1204 = arith.select %1201, %1202, %1203 : vector<1x4xi1>, vector<1x4xf32>
    %cst_437 = arith.constant 0.000000e+00 : f32
    %1205 = vector.broadcast %cst_437 : f32 to vector<1x32xf32>
    %1206 = arith.subf %1205, %1020 : vector<1x32xf32>
    %1207 = arith.addf %1206, %1172 : vector<1x32xf32>
    %cst_438 = arith.constant 1.000000e-03 : f32
    %1208 = vector.broadcast %cst_438 : f32 to vector<1x32xf32>
    %1209 = arith.mulf %1208, %1207 : vector<1x32xf32>
    %1210 = arith.addf %1020, %1209 : vector<1x32xf32>
    %cst_439 = arith.constant 0.000000e+00 : f32
    %1211 = vector.broadcast %cst_439 : f32 to vector<32x1xf32>
    %1212 = arith.subf %1211, %1026 : vector<32x1xf32>
    %1213 = arith.addf %1212, %1173 : vector<32x1xf32>
    %cst_440 = arith.constant 1.000000e-03 : f32
    %1214 = vector.broadcast %cst_440 : f32 to vector<32x1xf32>
    %1215 = arith.mulf %1214, %1213 : vector<32x1xf32>
    %1216 = arith.addf %1026, %1215 : vector<32x1xf32>
    %cst_441 = arith.constant 0.000000e+00 : f32
    %1217 = vector.broadcast %cst_441 : f32 to vector<1x4xf32>
    %1218 = arith.subf %1217, %1032 : vector<1x4xf32>
    %1219 = arith.addf %1218, %1204 : vector<1x4xf32>
    %cst_442 = arith.constant 1.000000e-03 : f32
    %1220 = vector.broadcast %cst_442 : f32 to vector<1x4xf32>
    %1221 = arith.mulf %1220, %1219 : vector<1x4xf32>
    %1222 = arith.addf %1032, %1221 : vector<1x4xf32>
    %cst_443 = arith.constant dense<0xFF800000> : vector<1xf32>
    %1223 = vector.multi_reduction <maximumf>, %1222, %cst_443 [1] : vector<1x4xf32> to vector<1xf32>
    %1224 = vector.shape_cast %1223 : vector<1xf32> to vector<1x1xf32>
    %1225 = vector.broadcast %1224 : vector<1x1xf32> to vector<1x4xf32>
    %1226 = arith.cmpf oeq, %1222, %1225 : vector<1x4xf32>
    %c4_i32_444 = arith.constant 4 : i32
    %1227 = vector.broadcast %c4_i32_444 : i32 to vector<1x4xi32>
    %1228 = arith.select %1226, %25, %1227 : vector<1x4xi1>, vector<1x4xi32>
    %cst_445 = arith.constant dense<2147483647> : vector<1xi32>
    %1229 = vector.multi_reduction <minsi>, %1228, %cst_445 [1] : vector<1x4xi32> to vector<1xi32>
    %1230 = vector.shape_cast %1229 : vector<1xi32> to vector<1x1xi32>
    %1231 = vector.broadcast %1230 : vector<1x1xi32> to vector<1x4xi32>
    %1232 = arith.cmpi eq, %25, %1231 : vector<1x4xi32>
    %cst_446 = arith.constant 0xFF800000 : f32
    %1233 = vector.broadcast %cst_446 : f32 to vector<1x4xf32>
    %1234 = arith.select %1232, %1233, %1222 : vector<1x4xi1>, vector<1x4xf32>
    %cst_447 = arith.constant dense<0xFF800000> : vector<1xf32>
    %1235 = vector.multi_reduction <maximumf>, %1234, %cst_447 [1] : vector<1x4xf32> to vector<1xf32>
    %1236 = vector.shape_cast %1235 : vector<1xf32> to vector<1x1xf32>
    %1237 = arith.addf %1224, %1236 : vector<1x1xf32>
    %cst_448 = arith.constant 5.000000e-01 : f32
    %1238 = vector.broadcast %cst_448 : f32 to vector<1x1xf32>
    %1239 = arith.mulf %1238, %1237 : vector<1x1xf32>
    %1240 = vector.broadcast %1239 : vector<1x1xf32> to vector<1x4xf32>
    %1241 = arith.cmpf oge, %1222, %1240 : vector<1x4xf32>
    %cst_449 = arith.constant 1.000000e+00 : f32
    %cst_450 = arith.constant 0.000000e+00 : f32
    %1242 = vector.broadcast %cst_449 : f32 to vector<1x4xf32>
    %1243 = vector.broadcast %cst_450 : f32 to vector<1x4xf32>
    %1244 = arith.select %1241, %1242, %1243 : vector<1x4xi1>, vector<1x4xf32>
    %cst_451 = arith.constant dense<0.000000e+00> : vector<1xf32>
    %1245 = vector.multi_reduction <add>, %1210, %cst_451 [1] : vector<1x32xf32> to vector<1xf32>
    %1246 = vector.shape_cast %1245 : vector<1xf32> to vector<1x1xf32>
    %cst_452 = arith.constant 0.000000e+00 : f32
    %1247 = vector.broadcast %cst_452 : f32 to vector<1x1xf32>
    %cst_453 = arith.constant dense<0xFF800000> : vector<1xf32>
    %1248 = vector.multi_reduction <maximumf>, %1210, %cst_453 [1] : vector<1x32xf32> to vector<1xf32>
    %1249 = vector.shape_cast %1248 : vector<1xf32> to vector<1x1xf32>
    %1250 = arith.addf %1247, %1249 : vector<1x1xf32>
    %1251 = vector.broadcast %1249 : vector<1x1xf32> to vector<1x32xf32>
    %1252 = arith.cmpf oeq, %1210, %1251 : vector<1x32xf32>
    %c32_i32_454 = arith.constant 32 : i32
    %1253 = vector.broadcast %c32_i32_454 : i32 to vector<1x32xi32>
    %1254 = arith.select %1252, %24, %1253 : vector<1x32xi1>, vector<1x32xi32>
    %cst_455 = arith.constant dense<2147483647> : vector<1xi32>
    %1255 = vector.multi_reduction <minsi>, %1254, %cst_455 [1] : vector<1x32xi32> to vector<1xi32>
    %1256 = vector.shape_cast %1255 : vector<1xi32> to vector<1x1xi32>
    %1257 = vector.broadcast %1256 : vector<1x1xi32> to vector<1x32xi32>
    %1258 = arith.cmpi eq, %24, %1257 : vector<1x32xi32>
    %cst_456 = arith.constant 0xFF800000 : f32
    %1259 = vector.broadcast %cst_456 : f32 to vector<1x32xf32>
    %1260 = arith.select %1258, %1259, %1210 : vector<1x32xi1>, vector<1x32xf32>
    %cst_457 = arith.constant dense<0xFF800000> : vector<1xf32>
    %1261 = vector.multi_reduction <maximumf>, %1260, %cst_457 [1] : vector<1x32xf32> to vector<1xf32>
    %1262 = vector.shape_cast %1261 : vector<1xf32> to vector<1x1xf32>
    %1263 = arith.addf %1250, %1262 : vector<1x1xf32>
    %1264 = vector.broadcast %1262 : vector<1x1xf32> to vector<1x32xf32>
    %1265 = arith.cmpf oeq, %1260, %1264 : vector<1x32xf32>
    %c32_i32_458 = arith.constant 32 : i32
    %1266 = vector.broadcast %c32_i32_458 : i32 to vector<1x32xi32>
    %1267 = arith.select %1265, %24, %1266 : vector<1x32xi1>, vector<1x32xi32>
    %cst_459 = arith.constant dense<2147483647> : vector<1xi32>
    %1268 = vector.multi_reduction <minsi>, %1267, %cst_459 [1] : vector<1x32xi32> to vector<1xi32>
    %1269 = vector.shape_cast %1268 : vector<1xi32> to vector<1x1xi32>
    %1270 = vector.broadcast %1269 : vector<1x1xi32> to vector<1x32xi32>
    %1271 = arith.cmpi eq, %24, %1270 : vector<1x32xi32>
    %cst_460 = arith.constant 0xFF800000 : f32
    %1272 = vector.broadcast %cst_460 : f32 to vector<1x32xf32>
    %1273 = arith.select %1271, %1272, %1260 : vector<1x32xi1>, vector<1x32xf32>
    %cst_461 = arith.constant dense<0xFF800000> : vector<1xf32>
    %1274 = vector.multi_reduction <maximumf>, %1273, %cst_461 [1] : vector<1x32xf32> to vector<1xf32>
    %1275 = vector.shape_cast %1274 : vector<1xf32> to vector<1x1xf32>
    %1276 = arith.addf %1263, %1275 : vector<1x1xf32>
    %1277 = vector.broadcast %1275 : vector<1x1xf32> to vector<1x32xf32>
    %1278 = arith.cmpf oeq, %1273, %1277 : vector<1x32xf32>
    %c32_i32_462 = arith.constant 32 : i32
    %1279 = vector.broadcast %c32_i32_462 : i32 to vector<1x32xi32>
    %1280 = arith.select %1278, %24, %1279 : vector<1x32xi1>, vector<1x32xi32>
    %cst_463 = arith.constant dense<2147483647> : vector<1xi32>
    %1281 = vector.multi_reduction <minsi>, %1280, %cst_463 [1] : vector<1x32xi32> to vector<1xi32>
    %1282 = vector.shape_cast %1281 : vector<1xi32> to vector<1x1xi32>
    %1283 = vector.broadcast %1282 : vector<1x1xi32> to vector<1x32xi32>
    %1284 = arith.cmpi eq, %24, %1283 : vector<1x32xi32>
    %cst_464 = arith.constant 0xFF800000 : f32
    %1285 = vector.broadcast %cst_464 : f32 to vector<1x32xf32>
    %1286 = arith.select %1284, %1285, %1273 : vector<1x32xi1>, vector<1x32xf32>
    %cst_465 = arith.constant dense<0xFF800000> : vector<1xf32>
    %1287 = vector.multi_reduction <maximumf>, %1286, %cst_465 [1] : vector<1x32xf32> to vector<1xf32>
    %1288 = vector.shape_cast %1287 : vector<1xf32> to vector<1x1xf32>
    %1289 = arith.addf %1276, %1288 : vector<1x1xf32>
    %1290 = vector.broadcast %1288 : vector<1x1xf32> to vector<1x32xf32>
    %1291 = arith.cmpf oeq, %1286, %1290 : vector<1x32xf32>
    %c32_i32_466 = arith.constant 32 : i32
    %1292 = vector.broadcast %c32_i32_466 : i32 to vector<1x32xi32>
    %1293 = arith.select %1291, %24, %1292 : vector<1x32xi1>, vector<1x32xi32>
    %cst_467 = arith.constant dense<2147483647> : vector<1xi32>
    %1294 = vector.multi_reduction <minsi>, %1293, %cst_467 [1] : vector<1x32xi32> to vector<1xi32>
    %1295 = vector.shape_cast %1294 : vector<1xi32> to vector<1x1xi32>
    %1296 = vector.broadcast %1295 : vector<1x1xi32> to vector<1x32xi32>
    %1297 = arith.cmpi eq, %24, %1296 : vector<1x32xi32>
    %cst_468 = arith.constant 0xFF800000 : f32
    %1298 = vector.broadcast %cst_468 : f32 to vector<1x32xf32>
    %1299 = arith.select %1297, %1298, %1286 : vector<1x32xi1>, vector<1x32xf32>
    %cst_469 = arith.constant dense<0xFF800000> : vector<1xf32>
    %1300 = vector.multi_reduction <maximumf>, %1299, %cst_469 [1] : vector<1x32xf32> to vector<1xf32>
    %1301 = vector.shape_cast %1300 : vector<1xf32> to vector<1x1xf32>
    %1302 = arith.addf %1289, %1301 : vector<1x1xf32>
    %1303 = vector.broadcast %1301 : vector<1x1xf32> to vector<1x32xf32>
    %1304 = arith.cmpf oeq, %1299, %1303 : vector<1x32xf32>
    %c32_i32_470 = arith.constant 32 : i32
    %1305 = vector.broadcast %c32_i32_470 : i32 to vector<1x32xi32>
    %1306 = arith.select %1304, %24, %1305 : vector<1x32xi1>, vector<1x32xi32>
    %cst_471 = arith.constant dense<2147483647> : vector<1xi32>
    %1307 = vector.multi_reduction <minsi>, %1306, %cst_471 [1] : vector<1x32xi32> to vector<1xi32>
    %1308 = vector.shape_cast %1307 : vector<1xi32> to vector<1x1xi32>
    %1309 = vector.broadcast %1308 : vector<1x1xi32> to vector<1x32xi32>
    %1310 = arith.cmpi eq, %24, %1309 : vector<1x32xi32>
    %cst_472 = arith.constant 0xFF800000 : f32
    %1311 = vector.broadcast %cst_472 : f32 to vector<1x32xf32>
    %1312 = arith.select %1310, %1311, %1299 : vector<1x32xi1>, vector<1x32xf32>
    %cst_473 = arith.constant dense<0xFF800000> : vector<1xf32>
    %1313 = vector.multi_reduction <maximumf>, %1312, %cst_473 [1] : vector<1x32xf32> to vector<1xf32>
    %1314 = vector.shape_cast %1313 : vector<1xf32> to vector<1x1xf32>
    %1315 = arith.addf %1302, %1314 : vector<1x1xf32>
    %1316 = vector.broadcast %1314 : vector<1x1xf32> to vector<1x32xf32>
    %1317 = arith.cmpf oeq, %1312, %1316 : vector<1x32xf32>
    %c32_i32_474 = arith.constant 32 : i32
    %1318 = vector.broadcast %c32_i32_474 : i32 to vector<1x32xi32>
    %1319 = arith.select %1317, %24, %1318 : vector<1x32xi1>, vector<1x32xi32>
    %cst_475 = arith.constant dense<2147483647> : vector<1xi32>
    %1320 = vector.multi_reduction <minsi>, %1319, %cst_475 [1] : vector<1x32xi32> to vector<1xi32>
    %1321 = vector.shape_cast %1320 : vector<1xi32> to vector<1x1xi32>
    %1322 = vector.broadcast %1321 : vector<1x1xi32> to vector<1x32xi32>
    %1323 = arith.cmpi eq, %24, %1322 : vector<1x32xi32>
    %cst_476 = arith.constant 0xFF800000 : f32
    %1324 = vector.broadcast %cst_476 : f32 to vector<1x32xf32>
    %1325 = arith.select %1323, %1324, %1312 : vector<1x32xi1>, vector<1x32xf32>
    %cst_477 = arith.constant dense<0xFF800000> : vector<1xf32>
    %1326 = vector.multi_reduction <maximumf>, %1325, %cst_477 [1] : vector<1x32xf32> to vector<1xf32>
    %1327 = vector.shape_cast %1326 : vector<1xf32> to vector<1x1xf32>
    %1328 = arith.addf %1315, %1327 : vector<1x1xf32>
    %1329 = arith.subf %1246, %1328 : vector<1x1xf32>
    %cst_478 = arith.constant 4.000000e-02 : f32
    %1330 = vector.broadcast %cst_478 : f32 to vector<1x1xf32>
    %1331 = arith.mulf %1329, %1330 : vector<1x1xf32>
    %1332 = vector.broadcast %1331 : vector<1x1xf32> to vector<32x1xf32>
    %1333 = arith.cmpf ogt, %1216, %1332 : vector<32x1xf32>
    %cst_479 = arith.constant 1.000000e+00 : f32
    %cst_480 = arith.constant 0.000000e+00 : f32
    %1334 = vector.broadcast %cst_479 : f32 to vector<32x1xf32>
    %1335 = vector.broadcast %cst_480 : f32 to vector<32x1xf32>
    %1336 = arith.select %1333, %1334, %1335 : vector<32x1xi1>, vector<32x1xf32>
    %cst_481 = arith.constant 5.000000e-01 : f32
    %1337 = vector.broadcast %cst_481 : f32 to vector<32x1xf32>
    %1338 = arith.subf %1336, %1337 : vector<32x1xf32>
    %cst_482 = arith.constant 5.000000e-05 : f32
    %1339 = vector.broadcast %cst_482 : f32 to vector<32x1xf32>
    %1340 = arith.mulf %1339, %1338 : vector<32x1xf32>
    %cst_483 = arith.constant 5.000000e-01 : f32
    %1341 = vector.broadcast %cst_483 : f32 to vector<1x4xf32>
    %1342 = arith.subf %1244, %1341 : vector<1x4xf32>
    %1343 = vector.broadcast %1340 : vector<32x1xf32> to vector<32x4xf32>
    %1344 = vector.broadcast %1342 : vector<1x4xf32> to vector<32x4xf32>
    %1345 = arith.mulf %1343, %1344 : vector<32x4xf32>
    %1346 = arith.addf %1160, %1345 : vector<32x4xf32>
    %cst_484 = arith.constant 0.000000e+00 : f32
    %cst_485 = arith.constant 1.000000e+00 : f32
    %1347 = vector.broadcast %cst_484 : f32 to vector<32x4xf32>
    %1348 = arith.maximumf %1347, %1346 : vector<32x4xf32>
    %1349 = vector.broadcast %cst_485 : f32 to vector<32x4xf32>
    %1350 = arith.minimumf %1349, %1348 : vector<32x4xf32>
    %cst_486 = arith.constant dense<0.000000e+00> : vector<1x32xf32>
    %1351 = tpu.matmul %1204, %22, %cst_486 {dimension_numbers = #tpu.dot_dimension_numbers<[1], [0], [0], [1], [0, 0, 1, 1], [], []>} : vector<1x4xf32>, vector<4x32xf32>, vector<1x32xf32> -> vector<1x32xf32>
    %cst_487 = arith.constant 0.899999976 : f32
    %1352 = vector.broadcast %cst_487 : f32 to vector<1x32xf32>
    %1353 = arith.mulf %1169, %1352 : vector<1x32xf32>
    %1354 = arith.addf %1175, %1351 : vector<1x32xf32>
    %cst_488 = arith.constant 1.000000e-01 : f32
    %1355 = vector.broadcast %cst_488 : f32 to vector<1x32xf32>
    %1356 = arith.mulf %1354, %1355 : vector<1x32xf32>
    %1357 = arith.addf %1353, %1356 : vector<1x32xf32>
    %cst_489 = arith.constant 0.000000e+00 : f32
    %1358 = vector.broadcast %cst_489 : f32 to vector<1x32xf32>
    %1359 = arith.maximumf %1357, %1358 : vector<1x32xf32>
    %c6 = arith.constant 6 : index
    %c0_490 = arith.constant 0 : index
    %1360 = vector.load %arg14[%c6, %c0_490] : memref<8x32xf32, #tpu.memory_space<vmem>>, vector<1x32xf32>
    tpu.vector_store %arg14[%c6, %c0_490], %1359 {strides = array<i32>} : memref<8x32xf32, #tpu.memory_space<vmem>>, vector<1x32xf32>,
    %1361 = vector.extract_strided_slice %5 {offsets = [7, 0], sizes = [1, 32], strides = [1, 1]} : vector<8x32xf32> to vector<1x32xf32>
    %1362 = vector.extract_strided_slice %12 {offsets = [7, 0], sizes = [1, 32], strides = [1, 1]} : vector<8x32xf32> to vector<1x32xf32>
    %cst_491 = arith.constant dense<0.000000e+00> : vector<1x32xf32>
    %1363 = tpu.matmul %1359, %21, %cst_491 {dimension_numbers = #tpu.dot_dimension_numbers<[1], [0], [0], [1], [0, 0, 1, 1], [], []>} : vector<1x32xf32>, vector<32x32xf32>, vector<1x32xf32> -> vector<1x32xf32>
    %1364 = arith.addf %1361, %1363 : vector<1x32xf32>
    %cst_492 = arith.constant dense<0.000000e+00> : vector<1x4xf32>
    %1365 = tpu.matmul %1362, %1350, %cst_492 {dimension_numbers = #tpu.dot_dimension_numbers<[1], [0], [0], [1], [0, 0, 1, 1], [], []>} : vector<1x32xf32>, vector<32x4xf32>, vector<1x4xf32> -> vector<1x4xf32>
    %cst_493 = arith.constant 0.000000e+00 : f32
    %1366 = vector.broadcast %cst_493 : f32 to vector<1x4xf32>
    %1367 = arith.subf %1366, %1182 : vector<1x4xf32>
    %1368 = arith.addf %1367, %1365 : vector<1x4xf32>
    %cst_494 = arith.constant 1.250000e-02 : f32
    %1369 = vector.broadcast %cst_494 : f32 to vector<1x4xf32>
    %1370 = arith.mulf %1369, %1368 : vector<1x4xf32>
    %1371 = arith.addf %1182, %1370 : vector<1x4xf32>
    %cst_495 = arith.constant dense<0xFF800000> : vector<1xf32>
    %1372 = vector.multi_reduction <maximumf>, %1371, %cst_495 [1] : vector<1x4xf32> to vector<1xf32>
    %1373 = vector.shape_cast %1372 : vector<1xf32> to vector<1x1xf32>
    %1374 = vector.broadcast %1373 : vector<1x1xf32> to vector<1x4xf32>
    %1375 = arith.cmpf oeq, %1371, %1374 : vector<1x4xf32>
    %c4_i32_496 = arith.constant 4 : i32
    %1376 = vector.broadcast %c4_i32_496 : i32 to vector<1x4xi32>
    %1377 = arith.select %1375, %25, %1376 : vector<1x4xi1>, vector<1x4xi32>
    %cst_497 = arith.constant dense<2147483647> : vector<1xi32>
    %1378 = vector.multi_reduction <minsi>, %1377, %cst_497 [1] : vector<1x4xi32> to vector<1xi32>
    %1379 = vector.shape_cast %1378 : vector<1xi32> to vector<1x1xi32>
    %1380 = vector.broadcast %1379 : vector<1x1xi32> to vector<1x4xi32>
    %1381 = arith.cmpi eq, %25, %1380 : vector<1x4xi32>
    %cst_498 = arith.constant 0xFF800000 : f32
    %1382 = vector.broadcast %cst_498 : f32 to vector<1x4xf32>
    %1383 = arith.select %1381, %1382, %1371 : vector<1x4xi1>, vector<1x4xf32>
    %cst_499 = arith.constant dense<0xFF800000> : vector<1xf32>
    %1384 = vector.multi_reduction <maximumf>, %1383, %cst_499 [1] : vector<1x4xf32> to vector<1xf32>
    %1385 = vector.shape_cast %1384 : vector<1xf32> to vector<1x1xf32>
    %1386 = arith.addf %1373, %1385 : vector<1x1xf32>
    %cst_500 = arith.constant 5.000000e-01 : f32
    %1387 = vector.broadcast %cst_500 : f32 to vector<1x1xf32>
    %1388 = arith.mulf %1387, %1386 : vector<1x1xf32>
    %1389 = vector.broadcast %1388 : vector<1x1xf32> to vector<1x4xf32>
    %1390 = arith.cmpf oge, %1371, %1389 : vector<1x4xf32>
    %cst_501 = arith.constant 1.000000e+00 : f32
    %cst_502 = arith.constant 0.000000e+00 : f32
    %1391 = vector.broadcast %cst_501 : f32 to vector<1x4xf32>
    %1392 = vector.broadcast %cst_502 : f32 to vector<1x4xf32>
    %1393 = arith.select %1390, %1391, %1392 : vector<1x4xi1>, vector<1x4xf32>
    %cst_503 = arith.constant dense<0.000000e+00> : vector<1x32xf32>
    %1394 = tpu.matmul %1393, %22, %cst_503 {dimension_numbers = #tpu.dot_dimension_numbers<[1], [0], [0], [1], [0, 0, 1, 1], [], []>} : vector<1x4xf32>, vector<4x32xf32>, vector<1x32xf32> -> vector<1x32xf32>
    %cst_504 = arith.constant 0.899999976 : f32
    %1395 = vector.broadcast %cst_504 : f32 to vector<1x32xf32>
    %1396 = arith.mulf %1359, %1395 : vector<1x32xf32>
    %1397 = arith.addf %1364, %1394 : vector<1x32xf32>
    %cst_505 = arith.constant 1.000000e-01 : f32
    %1398 = vector.broadcast %cst_505 : f32 to vector<1x32xf32>
    %1399 = arith.mulf %1397, %1398 : vector<1x32xf32>
    %1400 = arith.addf %1396, %1399 : vector<1x32xf32>
    %cst_506 = arith.constant 0.000000e+00 : f32
    %1401 = vector.broadcast %cst_506 : f32 to vector<1x32xf32>
    %1402 = arith.maximumf %1400, %1401 : vector<1x32xf32>
    %c7 = arith.constant 7 : index
    %c0_507 = arith.constant 0 : index
    %1403 = vector.load %arg14[%c7, %c0_507] : memref<8x32xf32, #tpu.memory_space<vmem>>, vector<1x32xf32>
    tpu.vector_store %arg14[%c7, %c0_507], %1402 {strides = array<i32>} : memref<8x32xf32, #tpu.memory_space<vmem>>, vector<1x32xf32>,
    %c0_508 = arith.constant 0 : index
    %c0_509 = arith.constant 0 : index
    %1404 = vector.load %arg14[%c0_508, %c0_509] : memref<8x32xf32, #tpu.memory_space<vmem>>, vector<8x32xf32>
    %c0_510 = arith.constant 0 : index
    %c0_511 = arith.constant 0 : index
    %1405 = vector.load %arg11[%c0_510, %c0_511] : memref<32x4xf32, #tpu.memory_space<vmem>>, vector<32x4xf32>
    %cst_512 = arith.constant dense<0.000000e+00> : vector<8x4xf32>
    %1406 = tpu.matmul %1404, %1405, %cst_512 {dimension_numbers = #tpu.dot_dimension_numbers<[1], [0], [0], [1], [0, 0, 1, 1], [], []>} : vector<8x32xf32>, vector<32x4xf32>, vector<8x4xf32> -> vector<8x4xf32>
    %c0_513 = arith.constant 0 : index
    %c0_514 = arith.constant 0 : index
    %1407 = vector.load %arg12[%c0_513, %c0_514] : memref<1x4xf32, #tpu.memory_space<vmem>>, vector<1x4xf32>
    %1408 = vector.broadcast %1407 : vector<1x4xf32> to vector<8x4xf32>
    %1409 = arith.addf %1406, %1408 : vector<8x4xf32>
    %c0_515 = arith.constant 0 : index
    %c0_516 = arith.constant 0 : index
    %1410 = vector.load %arg13[%c0_515, %c0_516] : memref<8x4xf32, #tpu.memory_space<vmem>>, vector<8x4xf32>
    tpu.vector_store %arg13[%c0_515, %c0_516], %1409 {strides = array<i32>} : memref<8x4xf32, #tpu.memory_space<vmem>>, vector<8x4xf32>,
    return
  }
}

</mosaic_0001>

<bundles_post_ra>
// kernel: rnn_md_forward.1
= control target key start
LH: loop header
LB: loop body
LE: loop exit
PB: predicated region body
PF: predicated region fallthrough
CT: control target
= control target key end

     0   :  { %vm56_vm0 = vcmask 64512   ;;  %v4982_v3 = vmov 0.0   ;;  %vm4983_vm1 = vmmov 0   ;;  %s6694_s0 = inlined_call_operand.vmem [shape: f32[8,8], index: 0, kind: input, shape index: {}]   ;;  %s6695_s1 = inlined_call_operand.vmem [shape: f32[8,8], index: 1, kind: input, shape index: {}]   ;;  %s6696_s2 = inlined_call_operand.vmem [shape: f32[8,32], index: 2, kind: input, shape index: {}]   ;;  %s6697_s3 = inlined_call_operand.vmem [shape: f32[1,32], index: 3, kind: input, shape index: {}]   ;;  %s6698_s4 = inlined_call_operand.vmem [shape: f32[8,32], index: 4, kind: input, shape index: {}]   ;;  %s6699_s5 = inlined_call_operand.vmem [shape: f32[32,8], index: 5, kind: input, shape index: {}]   ;;  %s6700_s6 = inlined_call_operand.vmem [shape: f32[1,32], index: 6, kind: input, shape index: {}]   ;;  %s6701_s7 = inlined_call_operand.vmem [shape: f32[32,1], index: 7, kind: input, shape index: {}]   ;;  %s6702_s8 = inlined_call_operand.vmem [shape: f32[32,32], index: 8, kind: input, shape index: {}]   ;;  %s6703_s9 = inlined_call_operand.vmem [shape: f32[4,32], index: 9, kind: input, shape index: {}]   ;;  %s6704_s10 = inlined_call_operand.vmem [shape: f32[32,4], index: 10, kind: input, shape index: {}]   ;;  %s6705_s11 = inlined_call_operand.vmem [shape: f32[32,4], index: 11, kind: input, shape index: {}]   ;;  %s6706_s12 = inlined_call_operand.vmem [shape: f32[1,4], index: 12, kind: input, shape index: {}]   ;;  %s6707_s13 = inlined_call_operand.vmem [shape: f32[8,4], index: 13, kind: output, shape index: {0}]   ;;  %s6708_s14 = inlined_call_operand.hbm [shape: f32[8,32], index: 14, kind: output, shape index: {1}]  }
   0x1   :  { %v130_v0 = vld [vmem:[%s6698_s4] sm:$0xff]  ;;  %4693 = vmatprep.subr.mxu1 %v4982_v3  ;;  %4695 = vmatprep.mubr.msk.f32.mxu1 %vm4983_vm1, %v4982_v3 }
   0x2   :  { %v47_v1 = vld [vmem:[%s6694_s0] sm:$0xff]  ;;  %4694 = vmatpush3.msra.mxu1 %v130_v0  ;;  %4688 = vmatprep.subr.mxu0 %v4982_v3 }
   0x3   :  { %v48_v2 = vld [vmem:[%s6696_s2] sm:$0xff] }
   0x4   :  { %v214_v4 = vld [vmem:[%s6695_s1] sm:$0xff] }
   0x5   :  { %20 = vsyncpa [#allocation3], 0  ;;  %4696 = vmatmul.mubr.msk.f32.vlgmr.msra.gmra.mxu1 %vm56_vm0, %v47_v1  ;;  %4689 = vmatpush3.msra.mxu0 %v48_v2  ;;  %v210_v5 = vld [vmem:[%s6699_s5] sm:$0xff]  ;;  %v211_v6 = vld [vmem:[%s6699_s5 + $0x8] sm:$0xff]  ;;  %vm355_vm2 = vcmask 261120   ;;  %vm582_vm3 = vcmask 253952   ;;  %v353_v22 = vlaneseq }
   0x6   :  { %4690 = vmatprep.mubr.msk.f32.mxu0 %vm4983_vm1, %v4982_v3  ;;  %4698 = vmatprep.subr.mxu0 %v214_v4  ;;  %v5099_v7 = vld [vmem:[%s6704_s10 + $0x18] sm:$0xff]  ;;  %v212_v8 = vld [vmem:[%s6699_s5 + $0x10] sm:$0xff]  ;;  %v5124_v11 = vld [vmem:[%s6704_s10 + $0x8] sm:$0xff]  ;;  %vm505_vm15 = vcmask 24576   ;;  %s4986_s2 = smov 126   ;;  %s4987_s1 = smov 125  }
   0x7   :  { %4691 = vmatmul.mubr.msk.f32.vlgmr.msra.gmra.mxu0 %vm56_vm0, %v47_v1  ;;  %4706 = vmatprep.subr.mxu1 %v4982_v3  ;;  %v5112_v9 = vld [vmem:[%s6704_s10 + $0x10] sm:$0xff]  ;;  %v213_v10 = vld [vmem:[%s6699_s5 + $0x18] sm:$0xff]  ;;  %v5133_v12 = vld [vmem:[%s6704_s10] sm:$0xff]  ;;  %v5154_v23 = vand.u32 127, %v353_v22  ;;  %s4988_s29 = smov 124   ;;  %s4989_s30 = smov 123  }
   0x8   :  { %4699 = vmatpush3.msra.mxu0 %v214_v4  ;;  %4700 = vmatprep.mubr.msk.f32.mxu0 %vm56_vm0, %v210_v5  ;;  %v4505_v13 = vld [vmem:[%s6700_s6] ss:$0 sm:$0xff]  ;;  %s4990_s20 = smov 122  }
   0x9   :  { %4717 = vmatprep.subr.mxu0 %v4982_v3  ;;  %4714 = vmatprep.mubr.msk.f32.mxu1 %vm4983_vm1, %v4982_v3 }
   0xb   :  { %4701 = vmatmul.mubr.msk.f32.vlgmr.msra.gmra.mxu0 %vm56_vm0, %v211_v6 }
   0xc   :  { %4718 = vmatpush3.msra.mxu0 %v5099_v7  ;;  %4703 = vmatprep.mubr.msk.f32.mxu0 %vm56_vm0, %v212_v8 }
   0xd   :  { %4719 = vmatprep.subr.mxu0 %v4982_v3 }
   0xe   :  { %4720 = vmatpush3.msra.mxu0 %v5112_v9 }
   0xf   :  { %4704 = vmatmul.mubr.msk.f32.gmra.mxu0 %vm56_vm0, %v213_v10  ;;  %4721 = vmatprep.subr.mxu0 %v4982_v3  ;;  %v5190_v10 = vld [vmem:[%s6702_s8 + $0x18] sm:$0xff] }
  0x10   :  { %4722 = vmatpush3.msra.mxu0 %v5124_v11  ;;  %4725 = vmatprep.mubr.msk.f32.mxu0 %vm4983_vm1, %v4982_v3 }
  0x11   :  { %4723 = vmatprep.subr.mxu0 %v4982_v3  ;;  %4707 = vmatpush3.msra.mxu1 %v5190_v10 }
  0x12   :  { %4724 = vmatpush3.msra.mxu0 %v5133_v12  ;;  %4708 = vmatprep.subr.mxu1 %v4982_v3 }
  0x13   :  { %4733 = vmatprep.subr.mxu0 %v4982_v3 }
  0xc5   :  { %v197_v14 = vpop.f32.mrf.mxu1 }
  0xc6   :  { %v208_v15 = vmul.f32 %v4505_v13, %v197_v14  ;;  %v5195_v13 = vld [vmem:[%s6702_s8 + $0x10] sm:$0xff]  ;;  %v5203_v14 = vld [vmem:[%s6702_s8 + $0x8] sm:$0xff] }
  0xc7   :  { %v4697_v16 = vpop.f32.mrf.mxu1  ;;  %v5151_v20 = vpop.f32.mrf.mxu0  ;;  %4709 = vmatpush3.msra.mxu1 %v5195_v13 }
  0xc8   :  { %v5140_v17 = vmax.f32 %v208_v15, 0.0  ;;  %4710 = vmatprep.subr.mxu1 %v4982_v3  ;;  %v5212_v15 = vld [vmem:[%s6702_s8] sm:$0xff] }
  0xc9   :  { %v4692_v21 = vpop.f32.mrf.mxu0  ;;  %4711 = vmatpush3.msra.mxu1 %v5203_v14 }
  0xca   :  { %4726 = vmatmul.mubr.msk.f32.vlgmr.msra.gmra.mxu0 %vm355_vm2, %v5140_v17  ;;  %v5145_v18 = vmul.f32 0.001, %v5140_v17  ;;  %4712 = vmatprep.subr.mxu1 %v4982_v3 }
  0xcb   :  { %4741 = vmatprep.mubr.msk.f32.mxu0 %vm4983_vm1, %v4982_v3  ;;  %v5162_v29 = vpop.f32.mrf.mxu0  ;;  %4734 = vmatpush3.msra.mxu0 %v5190_v10 }
  0xcc   :  { %v586_v19 = vsel %vm582_vm3, %v5145_v18, -inf  ;;  %4735 = vmatprep.subr.mxu0 %v4982_v3  ;;  %4713 = vmatpush3.msra.mxu1 %v5212_v15 }
  0xcd   :  { %587 = vmax.xlane.f32.xlu0 %v586_v19  ;;  %v5164_v30 = vpop.f32.mrf.mxu0  ;;  %4736 = vmatpush3.msra.mxu0 %v5195_v13 }
  0xce   :  { %4737 = vmatprep.subr.mxu0 %v4982_v3  ;;  %4715 = vmatmul.mubr.f32.vlgmr.msra.gmra.mxu1 %v4982_v3 }
  0xcf   :  { %v5166_v31 = vpop.f32.mrf.mxu0  ;;  %4738 = vmatpush3.msra.mxu0 %v5203_v14  ;;  %4728 = vmatprep.subr.mxu1 %v4982_v3 }
  0xd0   :  { %4739 = vmatprep.subr.mxu0 %v4982_v3  ;;  %4730 = vmatprep.mubr.msk.f32.mxu1 %vm4983_vm1, %v4982_v3 }
  0xd1   :  { %v5168_v32 = vpop.f32.mrf.mxu0  ;;  %4740 = vmatpush3.msra.mxu0 %v5212_v15 }
  0xd2   :  { %4755 = vmatprep.subr.mxu0 %v4982_v3 }
 0x156   :  { %v5156_v24 = vpop.xlane.xlu0 %587 }
 0x157   :  { %vm590_vm4 = vcmp.eq.f32.partialorder %v5145_v18, %v5156_v24 }
 0x158   :  { %v591_v25 = vsel %vm590_vm4, %v5154_v23, 32 }
 0x159   :  { %v592_v26 = vsel %vm582_vm3, %v591_v25, 2147483647 }
 0x15a   :  { %v594_v27 = vshra.s32 %v592_v26, 16  ;;  %v593_v35 = vand.u32 65535, %v592_v26 }
 0x15c   :  { %v596_v28 = vcvt.s32.f32 %v594_v27  ;;  %v595_v37 = vcvt.s32.f32 %v593_v35  ;;  %v951_v35 = vrot.slane %v5140_v17, 1 }
 0x15e   :  { %597 = vmin.xlane.f32.xlu0 %v596_v28 }
 0x18a   :  { %v5170_v33 = vpop.f32.mrf.mxu0 }
 0x18c   :  { %v4727_v34 = vpop.f32.mrf.mxu0 }
 0x18d   :  { %v1057_v34 = vsub.f32 0.0, %v5145_v18 }
 0x1e7   :  { %v598_v36 = vpop.xlane.xlu0 %597 }
 0x1e8   :  { %vm599_vm5 = vcmp.eq.f32.partialorder %v596_v28, %v598_v36  ;;  %v604_v39 = vcvt.f32.s32 %v598_v36  ;;  %v1059_v36 = vadd.f32 %v1057_v34, %v951_v35 }
 0x1e9   :  { %v600_v38 = vsel %vm599_vm5, %v595_v37, inf }
 0x1ea   :  { %601 = vmin.xlane.f32.xlu1 %v600_v38  ;;  %v605_v41 = vshll.u32 %v604_v39, 16 }
 0x273   :  { %v602_v40 = vpop.xlane.xlu1 %601 }
 0x274   :  { %v603_v42 = vcvt.f32.s32 %v602_v40  ;;  %v1060_v40 = vmul.f32 0.001, %v1059_v36 }
 0x276   :  { %v606_v43 = vadd.s32 %v605_v41, %v603_v42 }
 0x278   :  { %vm607_vm6 = vcmp.eq.s32.totalorder %v5154_v23, %v606_v43  ;;  %v5238_v43 = vadd.f32 %v1060_v40, %v5145_v18 }
 0x279   :  { %v608_v44 = vsel %vm607_vm6, -inf, %v5145_v18 }
 0x27a   :  { %v609_v45 = vsel %vm582_vm3, %v608_v44, -inf }
 0x27b   :  { %610 = vmax.xlane.f32.xlu1 %v609_v45  ;;  %v5242_v45 = vpop.f32.mrf.mxu1 }
 0x304   :  { %v5175_v46 = vpop.xlane.xlu1 %610 }
 0x305   :  { %vm613_vm7 = vcmp.eq.f32.partialorder %v608_v44, %v5175_v46 }
 0x306   :  { %v614_v47 = vsel %vm613_vm7, %v5154_v23, 32 }
 0x307   :  { %v615_v48 = vsel %vm582_vm3, %v614_v47, 2147483647  ;;  %v4716_v47 = vpop.f32.mrf.mxu1 }
 0x308   :  { %v617_v49 = vshra.s32 %v615_v48, 16  ;;  %v616_v51 = vand.u32 65535, %v615_v48 }
 0x30a   :  { %v619_v50 = vcvt.s32.f32 %v617_v49  ;;  %v618_v53 = vcvt.s32.f32 %v616_v51  ;;  %v5245_v51 = vmul.f32 0.0125, %v5170_v33 }
 0x30c   :  { %620 = vmin.xlane.f32.xlu0 %v619_v50 }
 0x395   :  { %v621_v52 = vpop.xlane.xlu0 %620 }
 0x396   :  { %vm622_vm8 = vcmp.eq.f32.partialorder %v619_v50, %v621_v52  ;;  %v627_v55 = vcvt.f32.s32 %v621_v52 }
 0x397   :  { %v623_v54 = vsel %vm622_vm8, %v618_v53, inf }
 0x398   :  { %624 = vmin.xlane.f32.xlu1 %v623_v54  ;;  %v628_v57 = vshll.u32 %v627_v55, 16  ;;  %v506_v54 = vsel %vm505_vm15, %v5245_v51, -inf }
 0x421   :  { %v625_v56 = vpop.xlane.xlu1 %624 }
 0x422   :  { %v626_v58 = vcvt.f32.s32 %v625_v56 }
 0x424   :  { %v629_v59 = vadd.s32 %v628_v57, %v626_v58 }
 0x426   :  { %vm630_vm9 = vcmp.eq.s32.totalorder %v5154_v23, %v629_v59 }
 0x427   :  { %v631_v60 = vsel %vm630_vm9, -inf, %v608_v44  ;;  %v1130_v44 = vsel %vm582_vm3, %v5238_v43, -inf }
 0x428   :  { %v632_v61 = vsel %vm582_vm3, %v631_v60, -inf }
 0x429   :  { %633 = vmax.xlane.f32.xlu0 %v632_v61 }
 0x4b2   :  { %v5182_v62 = vpop.xlane.xlu0 %633 }
 0x4b3   :  { %vm636_vm10 = vcmp.eq.f32.partialorder %v631_v60, %v5182_v62 }
 0x4b4   :  { %v637_v63 = vsel %vm636_vm10, %v5154_v23, 32 }
 0x4b5   :  { %v638_v0 = vsel %vm582_vm3, %v637_v63, 2147483647 }
 0x4b6   :  { %v640_v1 = vshra.s32 %v638_v0, 16  ;;  %v639_v4 = vand.u32 65535, %v638_v0 }
 0x4b8   :  { %v642_v2 = vcvt.s32.f32 %v640_v1  ;;  %v641_v6 = vcvt.s32.f32 %v639_v4 }
 0x4ba   :  { %643 = vmin.xlane.f32.xlu1 %v642_v2 }
 0x543   :  { %v644_v5 = vpop.xlane.xlu1 %643 }
 0x544   :  { %vm645_vm11 = vcmp.eq.f32.partialorder %v642_v2, %v644_v5  ;;  %v650_v16 = vcvt.f32.s32 %v644_v5 }
 0x545   :  { %v646_v8 = vsel %vm645_vm11, %v641_v6, inf }
 0x546   :  { %647 = vmin.xlane.f32.xlu0 %v646_v8  ;;  %v651_v21 = vshll.u32 %v650_v16, 16 }
 0x5cf   :  { %v648_v19 = vpop.xlane.xlu0 %647 }
 0x5d0   :  { %v649_v25 = vcvt.f32.s32 %v648_v19 }
 0x5d2   :  { %v652_v26 = vadd.s32 %v651_v21, %v649_v25 }
 0x5d4   :  { %vm653_vm12 = vcmp.eq.s32.totalorder %v5154_v23, %v652_v26 }
 0x5d5   :  { %v654_v27 = vsel %vm653_vm12, -inf, %v631_v60 }
 0x5d6   :  { %v655_v28 = vsel %vm582_vm3, %v654_v27, -inf }
 0x5d7   :  { %656 = vmax.xlane.f32.xlu1 %v655_v28 }
 0x660   :  { %v5232_v37 = vpop.xlane.xlu1 %656 }
 0x661   :  { %vm659_vm13 = vcmp.eq.f32.partialorder %v654_v27, %v5232_v37 }
 0x662   :  { %v660_v38 = vsel %vm659_vm13, %v5154_v23, 32  ;;  %vm795_vm13 = vcmask 1043456  }
 0x663   :  { %v661_v39 = vsel %vm582_vm3, %v660_v38, 2147483647 }
 0x664   :  { %v663_v41 = vshra.s32 %v661_v39, 16  ;;  %v662_v48 = vand.u32 65535, %v661_v39 }
 0x666   :  { %v665_v42 = vcvt.s32.f32 %v663_v41  ;;  %v664_v50 = vcvt.s32.f32 %v662_v48 }
 0x668   :  { %666 = vmin.xlane.f32.xlu0 %v665_v42 }
 0x66c   :  { %1131 = vmax.xlane.f32.xlu0 %v1130_v44 }
 0x6f1   :  { %v667_v49 = vpop.xlane.xlu0 %666 }
 0x6f2   :  { %vm668_vm14 = vcmp.eq.f32.partialorder %v665_v42, %v667_v49  ;;  %v673_v33 = vcvt.f32.s32 %v667_v49 }
 0x6f3   :  { %v669_v52 = vsel %vm668_vm14, %v664_v50, inf }
 0x6f4   :  { %670 = vmin.xlane.f32.xlu1 %v669_v52  ;;  %v674_v60 = vshll.u32 %v673_v33, 16 }
 0x6f5   :  { %v5247_v53 = vpop.xlane.xlu0 %1131 }
 0x6f6   :  { %vm1134_vm0 = vcmp.eq.f32.partialorder %v5238_v43, %v5247_v53 }
 0x6f7   :  { %v1135_v55 = vsel %vm1134_vm0, %v5154_v23, 32  ;;  %vm791_vm0 = vcmask 31744  }
 0x6f8   :  { %507 = vmax.xlane.f32.xlu1 %v506_v54  ;;  %v1136_v56 = vsel %vm582_vm3, %v1135_v55, 2147483647 }
 0x6f9   :  { %v1138_v57 = vshra.s32 %v1136_v56, 16  ;;  %v1137_v1 = vand.u32 65535, %v1136_v56 }
 0x6fb   :  { %v1140_v58 = vcvt.s32.f32 %v1138_v57  ;;  %v1139_v19 = vcvt.s32.f32 %v1137_v1 }
 0x6fd   :  { %1141 = vmin.xlane.f32.xlu1 %v1140_v58 }
 0x77d   :  { %v671_v59 = vpop.xlane.xlu1 %670 }
 0x77e   :  { %v672_v61 = vcvt.f32.s32 %v671_v59 }
 0x780   :  { %v675_v63 = vadd.s32 %v674_v60, %v672_v61 }
 0x781   :  { %v5255_v0 = vpop.xlane.xlu1 %507 }
 0x782   :  { %vm509_vm4 = vcmp.eq.f32.partialorder %v5245_v51, %v5255_v0  ;;  %vm676_vm5 = vcmp.eq.s32.totalorder %v5154_v23, %v675_v63 }
 0x783   :  { %v5260_v2 = vsel %vm676_vm5, -inf, %v654_v27  ;;  %v510_v4 = vsel %vm509_vm4, %v5154_v23, 4 }
 0x784   :  { %v678_v5 = vsel %vm582_vm3, %v5260_v2, -inf  ;;  %v511_v6 = vsel %vm505_vm15, %v510_v4, 2147483647 }
 0x785   :  { %679 = vmax.xlane.f32.xlu0 %v678_v5  ;;  %v513_v8 = vshra.s32 %v511_v6, 16  ;;  %v512_v27 = vand.u32 65535, %v511_v6 }
 0x786   :  { %v1142_v16 = vpop.xlane.xlu1 %1141 }
 0x787   :  { %v515_v21 = vcvt.s32.f32 %v513_v8  ;;  %vm1143_vm6 = vcmp.eq.f32.partialorder %v1140_v58, %v1142_v16  ;;  %v1148_v28 = vcvt.f32.s32 %v1142_v16  ;;  %v514_v40 = vcvt.s32.f32 %v512_v27 }
 0x788   :  { %v1144_v25 = vsel %vm1143_vm6, %v1139_v19, inf  ;;  %v5290_v19 = vld [vmem:[%s6703_s9] sm:$0xf] }
 0x789   :  { %516 = vmin.xlane.f32.xlu0 %v515_v21  ;;  %1145 = vmin.xlane.f32.xlu1 %v1144_v25  ;;  %v1149_v42 = vshll.u32 %v1148_v28, 16 }
 0x78a   :  { %4729 = vmatpush3.msk.msra.mxu1 %vm795_vm13, %v5290_v19 }
 0x78b   :  { %4744 = vmatprep.subr.mxu1 %v4982_v3 }
 0x80e   :  { %v5266_v26 = vpop.xlane.xlu0 %679 }
 0x80f   :  { %vm682_vm7 = vcmp.eq.f32.partialorder %v5260_v2, %v5266_v26 }
 0x810   :  { %v683_v34 = vsel %vm682_vm7, %v5154_v23, 32 }
 0x811   :  { %v684_v36 = vsel %vm582_vm3, %v683_v34, 2147483647 }
 0x812   :  { %v517_v38 = vpop.xlane.xlu0 %516  ;;  %v1146_v39 = vpop.xlane.xlu1 %1145  ;;  %v686_v41 = vshra.s32 %v684_v36, 16  ;;  %v685_v55 = vand.u32 65535, %v684_v36 }
 0x813   :  { %v1147_v44 = vcvt.f32.s32 %v1146_v39  ;;  %vm518_vm8 = vcmp.eq.f32.partialorder %v515_v21, %v517_v38  ;;  %v523_v54 = vcvt.f32.s32 %v517_v38 }
 0x814   :  { %v519_v47 = vsel %vm518_vm8, %v514_v40, inf  ;;  %v688_v48 = vcvt.s32.f32 %v686_v41  ;;  %v687_v59 = vcvt.s32.f32 %v685_v55 }
 0x815   :  { %v1150_v49 = vadd.s32 %v1149_v42, %v1147_v44  ;;  %520 = vmin.xlane.f32.xlu1 %v519_v47  ;;  %v524_v57 = vshll.u32 %v523_v54, 16 }
 0x816   :  { %689 = vmin.xlane.f32.xlu0 %v688_v48 }
 0x817   :  { %vm1151_vm9 = vcmp.eq.s32.totalorder %v5154_v23, %v1150_v49 }
 0x818   :  { %v5274_v50 = vsel %vm1151_vm9, -inf, %v5238_v43 }
 0x819   :  { %v1153_v52 = vsel %vm582_vm3, %v5274_v50, -inf }
 0x81a   :  { %1154 = vmax.xlane.f32.xlu1 %v1153_v52 }
 0x89e   :  { %v521_v56 = vpop.xlane.xlu1 %520 }
 0x89f   :  { %v522_v58 = vcvt.f32.s32 %v521_v56  ;;  %v690_v33 = vpop.xlane.xlu0 %689 }
 0x8a0   :  { %vm691_vm10 = vcmp.eq.f32.partialorder %v688_v48, %v690_v33  ;;  %v696_v21 = vcvt.f32.s32 %v690_v33 }
 0x8a1   :  { %v525_v60 = vadd.s32 %v524_v57, %v522_v58  ;;  %v692_v61 = vsel %vm691_vm10, %v687_v59, inf }
 0x8a2   :  { %693 = vmin.xlane.f32.xlu0 %v692_v61  ;;  %v697_v27 = vshll.u32 %v696_v21, 16 }
 0x8a3   :  { %v5278_v63 = vpop.xlane.xlu1 %1154  ;;  %vm526_vm11 = vcmp.eq.s32.totalorder %v5154_v23, %v525_v60 }
 0x8a4   :  { %vm1157_vm12 = vcmp.eq.f32.partialorder %v5274_v50, %v5278_v63  ;;  %v527_v1 = vsel %vm526_vm11, -inf, %v5245_v51 }
 0x8a5   :  { %v528_v4 = vsel %vm505_vm15, %v527_v1, -inf  ;;  %v1158_v5 = vsel %vm1157_vm12, %v5154_v23, 32 }
 0x8a6   :  { %529 = vmax.xlane.f32.xlu0 %v528_v4  ;;  %v1159_v6 = vsel %vm582_vm3, %v1158_v5, 2147483647 }
 0x8a7   :  { %v1161_v8 = vshra.s32 %v1159_v6, 16  ;;  %v1160_v39 = vand.u32 65535, %v1159_v6 }
 0x8a9   :  { %v1163_v16 = vcvt.s32.f32 %v1161_v8  ;;  %v1162_v47 = vcvt.s32.f32 %v1160_v39 }
 0x8ab   :  { %1164 = vmin.xlane.f32.xlu0 %v1163_v16 }
 0x92b   :  { %v694_v25 = vpop.xlane.xlu0 %693 }
 0x92c   :  { %v695_v28 = vcvt.f32.s32 %v694_v25  ;;  %v4984_v25 = vmov 0  }
 0x92d   :  { %4943 = vset.pattern.permute.xlu1 %v4984_v25  ;;  %4944 = vset.pattern.permute.xlu0 %v4984_v25 }
 0x92e   :  { %v698_v34 = vadd.s32 %v697_v27, %v695_v28  ;;  %v4502_v27 = vld [vmem:[%s6697_s3] ss:$0 sm:$0xff] }
 0x92f   :  { %v530_v36 = vpop.xlane.xlu0 %529  ;;  %v5333_v28 = vadd.f32 %v4502_v27, %v5151_v20 }
 0x930   :  { %v531_v38 = vadd.f32 %v530_v36, %v5255_v0  ;;  %vm699_vm14 = vcmp.eq.s32.totalorder %v5154_v23, %v698_v34 }
 0x931   :  { %v5298_v40 = vsel %vm699_vm14, -inf, %v5260_v2  ;;  %v429_v34 = vadd.f32 %v5242_v45, %v5333_v28 }
 0x932   :  { %v532_v41 = vmul.f32 0.5, %v531_v38  ;;  %v701_v42 = vsel %vm582_vm3, %v5298_v40, -inf }
 0x933   :  { %702 = vmax.xlane.f32.xlu1 %v701_v42 }
 0x934   :  { %vm533_vm4 = vcmp.ge.f32.partialorder %v5245_v51, %v532_v41  ;;  %v1165_v44 = vpop.xlane.xlu0 %1164 }
 0x935   :  { %v534_v48 = vsel %vm533_vm4, 1.0, %v4982_v3  ;;  %vm1166_vm5 = vcmp.eq.f32.partialorder %v1163_v16, %v1165_v44  ;;  %v1171_v54 = vcvt.f32.s32 %v1165_v44 }
 0x936   :  { %v5304_v0 = vmul.f32 0.001, %v534_v48  ;;  %4731 = vmatmul.mubr.msk.f32.vlgmr.msra.gmra.mxu1 %vm791_vm0, %v534_v48  ;;  %v1167_v49 = vsel %vm1166_vm5, %v1162_v47, inf }
 0x937   :  { %1168 = vmin.xlane.f32.xlu0 %v1167_v49  ;;  %4752 = vmatprep.mubr.msk.f32.mxu1 %vm4983_vm1, %v4982_v3  ;;  %v1172_v33 = vshll.u32 %v1171_v54, 16 }
 0x938   :  { %v553_v2 = vsel %vm505_vm15, %v5304_v0, -inf }
 0x939   :  { %554 = vmax.xlane.f32.xlu1 %v553_v2 }
 0x9bc   :  { %v5311_v52 = vpop.xlane.xlu1 %702 }
 0x9bd   :  { %vm705_vm6 = vcmp.eq.f32.partialorder %v5298_v40, %v5311_v52 }
 0x9be   :  { %v706_v55 = vsel %vm705_vm6, %v5154_v23, 32 }
 0x9bf   :  { %v707_v56 = vsel %vm582_vm3, %v706_v55, 2147483647  ;;  %v583_v55 = vsel %vm582_vm3, %v5145_v18, 0.0  ;;  %v312_v18 = vld [vmem:[%s6701_s7] sm:$0xff] }
 0x9c0   :  { %v1169_v57 = vpop.xlane.xlu0 %1168  ;;  %v709_v58 = vshra.s32 %v707_v56, 16  ;;  %v708_v20 = vand.u32 65535, %v707_v56 }
 0x9c1   :  { %v1170_v59 = vcvt.f32.s32 %v1169_v57 }
 0x9c2   :  { %v5317_v60 = vpop.xlane.xlu1 %554  ;;  %v711_v61 = vcvt.s32.f32 %v709_v58  ;;  %v710_v42 = vcvt.s32.f32 %v708_v20 }
 0x9c3   :  { %v1173_v1 = vadd.s32 %v1172_v33, %v1170_v59  ;;  %vm556_vm7 = vcmp.eq.f32.partialorder %v5304_v0, %v5317_v60  ;;  %v315_v59 = vld [vmem:[%s6701_s7 + $0x18] sm:$0xff] }
 0x9c4   :  { %712 = vmin.xlane.f32.xlu1 %v711_v61  ;;  %v557_v4 = vsel %vm556_vm7, %v5154_v23, 4 }
 0x9c5   :  { %v558_v5 = vsel %vm505_vm15, %v557_v4, 2147483647  ;;  %vm1174_vm8 = vcmp.eq.s32.totalorder %v5154_v23, %v1173_v1 }
 0x9c6   :  { %v560_v6 = vshra.s32 %v558_v5, 16  ;;  %v5325_v16 = vsel %vm1174_vm8, -inf, %v5274_v50  ;;  %v559_v47 = vand.u32 65535, %v558_v5 }
 0x9c7   :  { %v1176_v21 = vsel %vm582_vm3, %v5325_v16, -inf }
 0x9c8   :  { %v562_v8 = vcvt.s32.f32 %v560_v6  ;;  %v561_v49 = vcvt.s32.f32 %v559_v47 }
 0x9ca   :  { %563 = vmin.xlane.f32.xlu0 %v562_v8 }
 0x9ce   :  { %1177 = vmax.xlane.f32.xlu0 %v1176_v21 }
 0x9f6   :  { %v865_v36 = vpop.f32.mrf.mxu1 }
 0x9f7   :  { %v869_v50 = vadd.f32 %v865_v36, %v429_v34 }
 0x9f8   :  { %v4732_v38 = vpop.f32.mrf.mxu1 }
 0x9f9   :  { %v870_v39 = vmul.f32 0.1, %v869_v50 }
 0x9fb   :  { %v5337_v41 = vmax.f32 %v870_v39, 0.0 }
 0x9fd   :  { %873 = vst.msk [vmem:[#allocation2] sm:$0x1] %vm582_vm3, %v5337_v41  ;;  %4742 = vmatmul.mubr.msk.f32.vlgmr.msra.gmra.mxu0 %vm355_vm2, %v5337_v41 }
 0x9fe   :  { %4756 = vmatpush3.msk.msra.mxu0 %vm795_vm13, %v5290_v19  ;;  %4757 = vmatprep.mubr.msk.f32.mxu0 %vm4983_vm1, %v4982_v3 }
 0x9ff   :  { %4771 = vmatprep.subr.mxu0 %v4982_v3 }
 0xa4d   :  { %v713_v45 = vpop.xlane.xlu1 %712 }
 0xa4e   :  { %vm714_vm9 = vcmp.eq.f32.partialorder %v711_v61, %v713_v45  ;;  %v313_v61 = vld [vmem:[%s6701_s7 + $0x8] sm:$0xff]  ;;  %v719_v5 = vcvt.f32.s32 %v713_v45 }
 0xa4f   :  { %v715_v44 = vsel %vm714_vm9, %v710_v42, inf }
 0xa50   :  { %716 = vmin.xlane.f32.xlu1 %v715_v44  ;;  %v314_v44 = vld [vmem:[%s6701_s7 + $0x10] sm:$0xff]  ;;  %s4985_s7 = smov 127  }
 0xa53   :  { %v564_v48 = vpop.xlane.xlu0 %563 }
 0xa54   :  { %vm565_vm10 = vcmp.eq.f32.partialorder %v562_v8, %v564_v48  ;;  %v720_v8 = vshll.u32 %v719_v5, 16  ;;  %v570_v25 = vcvt.f32.s32 %v564_v48  ;;  %v731_v5 = vshrl.u32 %v353_v22, 7 }
 0xa55   :  { %v566_v2 = vsel %vm565_vm10, %v561_v49, inf }
 0xa56   :  { %567 = vmin.xlane.f32.xlu1 %v566_v2  ;;  %v571_v50 = vshll.u32 %v570_v25, 16 }
 0xa57   :  { %v5348_v54 = vpop.xlane.xlu0 %1177 }
 0xa58   :  { %vm1180_vm11 = vcmp.eq.f32.partialorder %v5325_v16, %v5348_v54 }
 0xa59   :  { %v1181_v56 = vsel %vm1180_vm11, %v5154_v23, 32 }
 0xa5a   :  { %584 = vadd.xlane.f32.xlu1 %v583_v55  ;;  %v1182_v57 = vsel %vm582_vm3, %v1181_v56, 2147483647  ;;  %v612_v56 = vadd.f32 %v5175_v46, %v5156_v24  ;;  %v5389_v46 = vsub.s32 0, %v731_v5 }
 0xa5b   :  { %v1184_v58 = vshra.s32 %v1182_v57, 16 }
 0xa5d   :  { %v1186_v33 = vcvt.s32.f32 %v1184_v58  ;;  %v635_v58 = vadd.f32 %v5182_v62, %v612_v56 }
 0xa5f   :  { %1187 = vmin.xlane.f32.xlu0 %v1186_v33 }
 0xa6b   :  { %333 = vperm.xlu1 %4943, %v315_v59   ;;  %v658_v59 = vadd.f32 %v5232_v37, %v635_v58 }
 0xa6f   :  { %323 = vperm.xlu1 %4943, %v313_v61  }
 0xa73   :  { %318 = vperm.xlu1 %4943, %v312_v18   ;;  %v681_v18 = vadd.f32 %v5266_v26, %v658_v59 }
 0xabd   :  { %v5365_v1 = vpop.f32.mrf.mxu0 }
 0xabf   :  { %v4743_v4 = vpop.f32.mrf.mxu0 }
 0xac0   :  { %v704_v4 = vadd.f32 %v5311_v52, %v681_v18 }
 0xad9   :  { %v717_v6 = vpop.xlane.xlu1 %716 }
 0xada   :  { %v718_v21 = vcvt.f32.s32 %v717_v6 }
 0xadc   :  { %v721_v27 = vadd.s32 %v720_v8, %v718_v21 }
 0xade   :  { %vm722_vm12 = vcmp.eq.s32.totalorder %v5154_v23, %v721_v27 }
 0xadf   :  { %v568_v34 = vpop.xlane.xlu1 %567  ;;  %v723_v36 = vsel %vm722_vm12, -inf, %v5298_v40  ;;  %v1183_v40 = vand.u32 65535, %v1182_v57 }
 0xae0   :  { %v569_v38 = vcvt.f32.s32 %v568_v34  ;;  %v724_v39 = vsel %vm582_vm3, %v723_v36, -inf }
 0xae1   :  { %725 = vmax.xlane.f32.xlu0 %v724_v39  ;;  %v1185_v48 = vcvt.s32.f32 %v1183_v40 }
 0xae2   :  { %v572_v20 = vadd.s32 %v571_v50, %v569_v38 }
 0xae3   :  { %v585_v2 = vpop.xlane.xlu1 %584 }
 0xae4   :  { %vm573_vm14 = vcmp.eq.s32.totalorder %v5154_v23, %v572_v20 }
 0xae5   :  { %v574_v45 = vsel %vm573_vm14, -inf, %v5304_v0 }
 0xae6   :  { %v575_v42 = vsel %vm505_vm15, %v574_v45, -inf }
 0xae7   :  { %576 = vmax.xlane.f32.xlu1 %v575_v42  ;;  %v334_v55 = vpop.permute.xlu1 %333 }
 0xae8   :  { %v1188_v47 = vpop.xlane.xlu0 %1187  ;;  %v339_v57 = vmul.f32 %v5166_v31, %v334_v55 }
 0xae9   :  { %vm1189_vm4 = vcmp.eq.f32.partialorder %v1186_v33, %v1188_v47  ;;  %v1194_v56 = vcvt.f32.s32 %v1188_v47 }
 0xaea   :  { %v1190_v49 = vsel %vm1189_vm4, %v1185_v48, inf  ;;  %v5385_v25 = vmax.f32 %v339_v57, 0.0 }
 0xaeb   :  { %v324_v61 = vpop.permute.xlu1 %323  ;;  %v1195_v59 = vshll.u32 %v1194_v56, 16 }
 0xaec   :  { %v337_v33 = vmul.f32 %v5162_v29, %v324_v61  ;;  %v5394_v31 = vmul.f32 0.001, %v5385_v25 }
 0xaee   :  { %v5387_v24 = vmax.f32 %v337_v33, 0.0 }
 0xaef   :  { %v319_v8 = vpop.permute.xlu1 %318 }
 0xaf0   :  { %v336_v37 = vmul.f32 %v319_v8, %v5164_v30  ;;  %v5397_v22 = vmul.f32 0.001, %v5387_v24 }
 0xaf2   :  { %v5399_v29 = vmax.f32 %v336_v37, 0.0 }
 0xaf4   :  { %v5409_v20 = vmul.f32 0.001, %v5399_v29 }
 0xaf7   :  { %328 = vperm.xlu0 %4944, %v314_v44  }
 0xb16   :  { %1191 = vmin.xlane.f32.xlu0 %v1190_v49 }
 0xb6a   :  { %v726_v6 = vpop.xlane.xlu0 %725 }
 0xb6b   :  { %v727_v21 = vadd.f32 %v726_v6, %v704_v4 }
 0xb6d   :  { %v728_v62 = vsub.f32 %v585_v2, %v727_v21 }
 0xb6f   :  { %v729_v26 = vmul.f32 0.04, %v728_v62 }
 0xb70   :  { %v577_v33 = vpop.xlane.xlu1 %576 }
 0xb71   :  { %v733_v52 = vrot.slane %v729_v26, %v5389_v46  ;;  %v578_v5 = vadd.f32 %v577_v33, %v5317_v60 }
 0xb72   :  { %v329_v27 = vpop.permute.xlu0 %328 }
 0xb73   :  { %v338_v34 = vmul.f32 %v329_v27, %v5168_v32  ;;  %vm737_vm5 = vcmp.gt.f32.partialorder %v5394_v31, %v733_v52  ;;  %vm735_vm6 = vcmp.gt.f32.partialorder %v5397_v22, %v733_v52  ;;  %vm734_vm7 = vcmp.gt.f32.partialorder %v5409_v20, %v733_v52 }
 0xb74   :  { %v741_v30 = vsel %vm737_vm5, 1.0, %v4982_v3  ;;  %v739_v36 = vsel %vm735_vm6, 1.0, %v4982_v3  ;;  %v738_v40 = vsel %vm734_vm7, 1.0, %v4982_v3  ;;  %v579_v6 = vmul.f32 0.5, %v578_v5 }
 0xb75   :  { %v5406_v50 = vmax.f32 %v338_v34, 0.0  ;;  %v4514_v38 = vadd.f32 -0.5, %v741_v30  ;;  %v4512_v39 = vadd.f32 -0.5, %v739_v36  ;;  %v4511_v2 = vadd.f32 -0.5, %v738_v40 }
 0xb76   :  { %vm580_vm10 = vcmp.ge.f32.partialorder %v5304_v0, %v579_v6 }
 0xb77   :  { %v749_v45 = vmul.f32 5e-05, %v4514_v38  ;;  %v747_v42 = vmul.f32 5e-05, %v4512_v39  ;;  %v5412_v44 = vmul.f32 0.001, %v5406_v50 }
 0xb78   :  { %v746_v55 = vmul.f32 5e-05, %v4511_v2  ;;  %v581_v47 = vsel %vm580_vm10, 1.0, %v4982_v3  ;;  %v1497_v2 = vrot.slane %v5140_v17, 2 }
 0xb79   :  { %768 = vperm.xlu1 %4943, %v749_v45   ;;  %758 = vperm.xlu0 %4944, %v747_v42   ;;  %vm736_vm8 = vcmp.gt.f32.partialorder %v5412_v44, %v733_v52  ;;  %v4515_v8 = vadd.f32 -0.5, %v581_v47 }
 0xb7a   :  { %v740_v32 = vsel %vm736_vm8, 1.0, %v4982_v3 }
 0xb7b   :  { %v4513_v48 = vadd.f32 -0.5, %v740_v32  ;;  %v774_v21 = vrot.slane %v4515_v8, %v5389_v46 }
 0xb7d   :  { %v748_v49 = vmul.f32 5e-05, %v4513_v48 }
 0xb7f   :  { %763 = vperm.xlu1 %4943, %v748_v49  }
 0xb83   :  { %753 = vperm.xlu1 %4943, %v746_v55  }
 0xb9f   :  { %v1192_v58 = vpop.xlane.xlu0 %1191 }
 0xba0   :  { %v1193_v61 = vcvt.f32.s32 %v1192_v58 }
 0xba2   :  { %v1196_v18 = vadd.s32 %v1195_v59, %v1193_v61 }
 0xba4   :  { %vm1197_vm9 = vcmp.eq.s32.totalorder %v5154_v23, %v1196_v18 }
 0xba5   :  { %v5420_v4 = vsel %vm1197_vm9, -inf, %v5325_v16 }
 0xba6   :  { %v1199_v57 = vsel %vm582_vm3, %v5420_v4, -inf }
 0xba7   :  { %1200 = vmax.xlane.f32.xlu1 %v1199_v57  ;;  %v1024_v57 = vsub.f32 0.0, %v5245_v51 }
 0xbf4   :  { %v769_v62 = vpop.permute.xlu1 %768  ;;  %v759_v37 = vpop.permute.xlu0 %758 }
 0xbf5   :  { %v778_v26 = vmul.f32 %v774_v21, %v769_v62  ;;  %v776_v52 = vmul.f32 %v774_v21, %v759_v37 }
 0xbf7   :  { %v782_v16 = vadd.f32 %v778_v26, %v5099_v7  ;;  %v780_v60 = vadd.f32 %v776_v52, %v5124_v11 }
 0xbf9   :  { %v786_v27 = vmax.f32 %v782_v16, 0.0  ;;  %v784_v45 = vmax.f32 %v780_v60, 0.0 }
 0xbfa   :  { %v764_v30 = vpop.permute.xlu1 %763 }
 0xbfb   :  { %v5429_v34 = vmin.f32 %v786_v27, 1.0  ;;  %v777_v36 = vmul.f32 %v774_v21, %v764_v30  ;;  %v5438_v48 = vmin.f32 %v784_v45, 1.0 }
 0xbfd   :  { %4745 = vmatpush3.msra.mxu1 %v5429_v34  ;;  %v781_v38 = vadd.f32 %v777_v36, %v5112_v9 }
 0xbfe   :  { %4746 = vmatprep.subr.mxu1 %v4982_v3  ;;  %v754_v39 = vpop.permute.xlu1 %753 }
 0xbff   :  { %v785_v42 = vmax.f32 %v781_v38, 0.0  ;;  %v775_v32 = vmul.f32 %v774_v21, %v754_v39 }
 0xc01   :  { %v5435_v40 = vmin.f32 %v785_v42, 1.0  ;;  %v779_v7 = vadd.f32 %v775_v32, %v5133_v12 }
 0xc03   :  { %v783_v49 = vmax.f32 %v779_v7, 0.0  ;;  %4747 = vmatpush3.msra.mxu1 %v5435_v40 }
 0xc04   :  { %4748 = vmatprep.subr.mxu1 %v4982_v3 }
 0xc05   :  { %v5442_v11 = vmin.f32 %v783_v49, 1.0  ;;  %4749 = vmatpush3.msra.mxu1 %v5438_v48 }
 0xc06   :  { %4750 = vmatprep.subr.mxu1 %v4982_v3 }
 0xc07   :  { %4751 = vmatpush3.msra.mxu1 %v5442_v11 }
 0xc08   :  { %4753 = vmatmul.mubr.msk.f32.vlgmr.msra.gmra.mxu1 %vm355_vm2, %v951_v35  ;;  %4760 = vmatprep.subr.mxu1 %v4982_v3 }
 0xc09   :  { %4761 = vmatpush3.msra.mxu1 %v5190_v10  ;;  %4768 = vmatprep.mubr.msk.f32.mxu1 %vm4983_vm1, %v4982_v3 }
 0xc0a   :  { %4762 = vmatprep.subr.mxu1 %v4982_v3 }
 0xc0b   :  { %4763 = vmatpush3.msra.mxu1 %v5195_v13 }
 0xc0c   :  { %4764 = vmatprep.subr.mxu1 %v4982_v3 }
 0xc0d   :  { %4765 = vmatpush3.msra.mxu1 %v5203_v14  ;;  %v1603_v14 = vsub.f32 0.0, %v5238_v43 }
 0xc0e   :  { %4766 = vmatprep.subr.mxu1 %v4982_v3 }
 0xc0f   :  { %4767 = vmatpush3.msra.mxu1 %v5212_v15  ;;  %v1605_v15 = vadd.f32 %v1603_v14, %v1497_v2 }
 0xc10   :  { %4782 = vmatprep.subr.mxu1 %v4982_v3 }
 0xc11   :  { %v1606_v56 = vmul.f32 0.001, %v1605_v15 }
 0xc13   :  { %v5472_v18 = vadd.f32 %v1606_v56, %v5238_v43 }
 0xc15   :  { %v1672_v33 = vsel %vm582_vm3, %v5472_v18, -inf }
 0xc30   :  { %v5461_v9 = vpop.xlane.xlu1 %1200 }
 0xc31   :  { %vm1203_vm11 = vcmp.eq.f32.partialorder %v5420_v4, %v5461_v9 }
 0xc32   :  { %v1204_v12 = vsel %vm1203_vm11, %v5154_v23, 32 }
 0xc33   :  { %v1205_v10 = vsel %vm582_vm3, %v1204_v12, 2147483647 }
 0xc34   :  { %v1207_v13 = vshra.s32 %v1205_v10, 16  ;;  %v1206_v55 = vand.u32 65535, %v1205_v10 }
 0xc36   :  { %v1209_v35 = vcvt.s32.f32 %v1207_v13  ;;  %v1208_v59 = vcvt.s32.f32 %v1206_v55 }
 0xc38   :  { %1210 = vmin.xlane.f32.xlu0 %v1209_v35 }
 0xcc1   :  { %v1211_v58 = vpop.xlane.xlu0 %1210 }
 0xcc2   :  { %vm1212_vm12 = vcmp.eq.f32.partialorder %v1209_v35, %v1211_v58  ;;  %v1217_v37 = vcvt.f32.s32 %v1211_v58 }
 0xcc3   :  { %v1213_v61 = vsel %vm1212_vm12, %v1208_v59, inf }
 0xcc4   :  { %1214 = vmin.xlane.f32.xlu1 %v1213_v61  ;;  %v1218_v16 = vshll.u32 %v1217_v37, 16 }
 0xcc8   :  { %v1020_v5 = vpop.f32.mrf.mxu1  ;;  %1673 = vmax.xlane.f32.xlu1 %v1672_v33 }
 0xcc9   :  { %v1025_v6 = vadd.f32 %v1024_v57, %v1020_v5 }
 0xcca   :  { %v4754_v47 = vpop.f32.mrf.mxu1 }
 0xccb   :  { %v1026_v8 = vmul.f32 0.0125, %v1025_v6 }
 0xccd   :  { %v5478_v21 = vadd.f32 %v1026_v8, %v5245_v51 }
 0xccf   :  { %v1028_v62 = vsel %vm505_vm15, %v5478_v21, -inf }
 0xcd0   :  { %1029 = vmax.xlane.f32.xlu1 %v1028_v62 }
 0xd4d   :  { %v1215_v26 = vpop.xlane.xlu1 %1214 }
 0xd4e   :  { %v1216_v52 = vcvt.f32.s32 %v1215_v26 }
 0xd50   :  { %v1219_v27 = vadd.s32 %v1218_v16, %v1216_v52 }
 0xd51   :  { %v5482_v30 = vpop.xlane.xlu1 %1673 }
 0xd52   :  { %vm1676_vm14 = vcmp.eq.f32.partialorder %v5472_v18, %v5482_v30  ;;  %vm1220_vm4 = vcmp.eq.s32.totalorder %v5154_v23, %v1219_v27 }
 0xd53   :  { %v5488_v60 = vsel %vm1220_vm4, -inf, %v5420_v4  ;;  %v1677_v51 = vsel %vm1676_vm14, %v5154_v23, 32 }
 0xd54   :  { %v1222_v36 = vsel %vm582_vm3, %v5488_v60, -inf  ;;  %v1678_v38 = vsel %vm582_vm3, %v1677_v51, 2147483647 }
 0xd55   :  { %1223 = vmax.xlane.f32.xlu0 %v1222_v36  ;;  %v1680_v39 = vshra.s32 %v1678_v38, 16  ;;  %v1679_v10 = vand.u32 65535, %v1678_v38 }
 0xd57   :  { %v1682_v45 = vcvt.s32.f32 %v1680_v39  ;;  %v1681_v15 = vcvt.s32.f32 %v1679_v10 }
 0xd59   :  { %1683 = vmin.xlane.f32.xlu1 %v1682_v45  ;;  %v5494_v42 = vpop.xlane.xlu1 %1029 }
 0xd5a   :  { %vm1031_vm5 = vcmp.eq.f32.partialorder %v5478_v21, %v5494_v42 }
 0xd5b   :  { %v1032_v32 = vsel %vm1031_vm5, %v5154_v23, 4 }
 0xd5c   :  { %v1033_v4 = vsel %vm505_vm15, %v1032_v32, 2147483647 }
 0xd5d   :  { %v1035_v7 = vshra.s32 %v1033_v4, 16  ;;  %v1034_v59 = vand.u32 65535, %v1033_v4 }
 0xd5f   :  { %v1037_v49 = vcvt.s32.f32 %v1035_v7  ;;  %v1036_v57 = vcvt.s32.f32 %v1034_v59 }
 0xd61   :  { %1038 = vmin.xlane.f32.xlu0 %v1037_v49 }
 0xdde   :  { %v5500_v12 = vpop.xlane.xlu0 %1223 }
 0xddf   :  { %vm1226_vm6 = vcmp.eq.f32.partialorder %v5488_v60, %v5500_v12 }
 0xde0   :  { %v1227_v13 = vsel %vm1226_vm6, %v5154_v23, 32 }
 0xde1   :  { %v1228_v35 = vsel %vm582_vm3, %v1227_v13, 2147483647 }
 0xde2   :  { %v1684_v14 = vpop.xlane.xlu1 %1683  ;;  %v1230_v55 = vshra.s32 %v1228_v35, 16  ;;  %v1229_v6 = vand.u32 65535, %v1228_v35 }
 0xde3   :  { %vm1685_vm7 = vcmp.eq.f32.partialorder %v1682_v45, %v1684_v14  ;;  %v1690_v5 = vcvt.f32.s32 %v1684_v14 }
 0xde4   :  { %v1686_v56 = vsel %vm1685_vm7, %v1681_v15, inf  ;;  %v1232_v58 = vcvt.s32.f32 %v1230_v55  ;;  %v1231_v26 = vcvt.s32.f32 %v1229_v6 }
 0xde5   :  { %1687 = vmin.xlane.f32.xlu1 %v1686_v56  ;;  %v1691_v8 = vshll.u32 %v1690_v5, 16 }
 0xde6   :  { %1233 = vmin.xlane.f32.xlu0 %v1232_v58 }
 0xdea   :  { %v1039_v61 = vpop.xlane.xlu0 %1038 }
 0xdeb   :  { %vm1040_vm8 = vcmp.eq.f32.partialorder %v1037_v49, %v1039_v61  ;;  %v1045_v27 = vcvt.f32.s32 %v1039_v61 }
 0xdec   :  { %v1041_v33 = vsel %vm1040_vm8, %v1036_v57, inf }
 0xded   :  { %1042 = vmin.xlane.f32.xlu1 %v1041_v33  ;;  %v1046_v39 = vshll.u32 %v1045_v27, 16 }
 0xe6e   :  { %v1688_v47 = vpop.xlane.xlu1 %1687 }
 0xe6f   :  { %v1689_v62 = vcvt.f32.s32 %v1688_v47  ;;  %v1234_v37 = vpop.xlane.xlu0 %1233  ;;  %v1094_v47 = vsub.f32 0.0, %v5304_v0 }
 0xe70   :  { %vm1235_vm9 = vcmp.eq.f32.partialorder %v1232_v58, %v1234_v37  ;;  %v1240_v49 = vcvt.f32.s32 %v1234_v37 }
 0xe71   :  { %v1692_v16 = vadd.s32 %v1691_v8, %v1689_v62  ;;  %v1236_v52 = vsel %vm1235_vm9, %v1231_v26, inf }
 0xe72   :  { %1237 = vmin.xlane.f32.xlu0 %v1236_v52  ;;  %v1241_v13 = vshll.u32 %v1240_v49, 16 }
 0xe73   :  { %vm1693_vm10 = vcmp.eq.s32.totalorder %v5154_v23, %v1692_v16 }
 0xe74   :  { %v5508_v51 = vsel %vm1693_vm10, -inf, %v5472_v18 }
 0xe75   :  { %v1695_v36 = vsel %vm582_vm3, %v5508_v51, -inf }
 0xe76   :  { %1696 = vmax.xlane.f32.xlu1 %v1695_v36  ;;  %v1043_v38 = vpop.xlane.xlu1 %1042 }
 0xe77   :  { %v1044_v45 = vcvt.f32.s32 %v1043_v38 }
 0xe79   :  { %v1047_v32 = vadd.s32 %v1046_v39, %v1044_v45 }
 0xe7b   :  { %vm1048_vm11 = vcmp.eq.s32.totalorder %v5154_v23, %v1047_v32 }
 0xe7c   :  { %v1049_v4 = vsel %vm1048_vm11, -inf, %v5478_v21 }
 0xe7d   :  { %v1050_v7 = vsel %vm505_vm15, %v1049_v4, -inf }
 0xe7e   :  { %1051 = vmax.xlane.f32.xlu0 %v1050_v7 }
 0xefb   :  { %v1238_v10 = vpop.xlane.xlu0 %1237 }
 0xefc   :  { %v1239_v35 = vcvt.f32.s32 %v1238_v10 }
 0xefe   :  { %v1242_v14 = vadd.s32 %v1241_v13, %v1239_v35  ;;  %v948_v13 = vrot.slane %v5365_v1, 7 }
 0xeff   :  { %v5515_v15 = vpop.xlane.xlu1 %1696 }
 0xf00   :  { %vm1699_vm12 = vcmp.eq.f32.partialorder %v5508_v51, %v5515_v15  ;;  %vm1243_vm14 = vcmp.eq.s32.totalorder %v5154_v23, %v1242_v14  ;;  %v950_v14 = vadd.f32 %v948_v13, %v5333_v28 }
 0xf01   :  { %v5521_v55 = vsel %vm1243_vm14, -inf, %v5488_v60  ;;  %v1700_v56 = vsel %vm1699_vm12, %v5154_v23, 32 }
 0xf02   :  { %v1245_v58 = vsel %vm582_vm3, %v5521_v55, -inf  ;;  %v1701_v59 = vsel %vm582_vm3, %v1700_v56, 2147483647 }
 0xf03   :  { %1246 = vmax.xlane.f32.xlu1 %v1245_v58  ;;  %v1703_v61 = vshra.s32 %v1701_v59, 16  ;;  %v1702_v16 = vand.u32 65535, %v1701_v59 }
 0xf05   :  { %v1705_v57 = vcvt.s32.f32 %v1703_v61  ;;  %v1704_v38 = vcvt.s32.f32 %v1702_v16 }
 0xf07   :  { %v1052_v33 = vpop.xlane.xlu0 %1051  ;;  %1706 = vmin.xlane.f32.xlu0 %v1705_v57 }
 0xf08   :  { %v1053_v5 = vadd.f32 %v1052_v33, %v5494_v42 }
 0xf0a   :  { %v1054_v6 = vmul.f32 0.5, %v1053_v5 }
 0xf0c   :  { %vm1055_vm4 = vcmp.ge.f32.partialorder %v5478_v21, %v1054_v6 }
 0xf0d   :  { %v1056_v60 = vsel %vm1055_vm4, 1.0, %v4982_v3 }
 0xf0e   :  { %v1095_v8 = vadd.f32 %v1094_v47, %v1056_v60  ;;  %4758 = vmatmul.mubr.msk.f32.vlgmr.msra.gmra.mxu0 %vm791_vm0, %v1056_v60 }
 0xf0f   :  { %4779 = vmatprep.mubr.msk.f32.mxu0 %vm4983_vm1, %v4982_v3 }
 0xf10   :  { %v1096_v62 = vmul.f32 0.001, %v1095_v8 }
 0xf12   :  { %v5535_v37 = vadd.f32 %v1096_v62, %v5304_v0 }
 0xf14   :  { %v1098_v42 = vsel %vm505_vm15, %v5535_v37, -inf }
 0xf15   :  { %1099 = vmax.xlane.f32.xlu1 %v1098_v42 }
 0xf8c   :  { %v5539_v26 = vpop.xlane.xlu1 %1246 }
 0xf8d   :  { %vm1249_vm5 = vcmp.eq.f32.partialorder %v5521_v55, %v5539_v26 }
 0xf8e   :  { %v1250_v52 = vsel %vm1249_vm5, %v5154_v23, 32 }
 0xf8f   :  { %v1251_v27 = vsel %vm582_vm3, %v1250_v52, 2147483647 }
 0xf90   :  { %v1707_v36 = vpop.xlane.xlu0 %1706  ;;  %v1253_v39 = vshra.s32 %v1251_v27, 16 }
 0xf91   :  { %vm1708_vm6 = vcmp.eq.f32.partialorder %v1705_v57, %v1707_v36  ;;  %v1408_v57 = vmul.f32 0.9, %v5337_v41  ;;  %v1713_v1 = vcvt.f32.s32 %v1707_v36  ;;  %v1252_v41 = vand.u32 65535, %v1251_v27 }
 0xf92   :  { %v1709_v0 = vsel %vm1708_vm6, %v1704_v38, inf  ;;  %v1255_v45 = vcvt.s32.f32 %v1253_v39  ;;  %v1127_v27 = vsel %vm582_vm3, %v5238_v43, 0.0 }
 0xf93   :  { %1710 = vmin.xlane.f32.xlu0 %v1709_v0  ;;  %v1714_v60 = vshll.u32 %v1713_v1, 16  ;;  %v1254_v42 = vcvt.s32.f32 %v1252_v41  ;;  %v1156_v1 = vadd.f32 %v5278_v63, %v5247_v53  ;;  %v1062_v53 = vsub.f32 0.0, %v5409_v20 }
 0xf94   :  { %1256 = vmin.xlane.f32.xlu1 %v1255_v45 }
 0xf95   :  { %v1179_v41 = vadd.f32 %v5348_v54, %v1156_v1 }
 0xf9e   :  { %v5545_v32 = vpop.xlane.xlu1 %1099 }
 0xf9f   :  { %vm1101_vm7 = vcmp.eq.f32.partialorder %v5535_v37, %v5545_v32 }
 0xfa0   :  { %v1102_v4 = vsel %vm1101_vm7, %v5154_v23, 4 }
 0xfa1   :  { %v1103_v7 = vsel %vm505_vm15, %v1102_v4, 2147483647 }
 0xfa2   :  { %v1105_v49 = vshra.s32 %v1103_v7, 16  ;;  %v1104_v39 = vand.u32 65535, %v1103_v7 }
 0xfa4   :  { %v1107_v10 = vcvt.s32.f32 %v1105_v49 }
 0xfa6   :  { %1108 = vmin.xlane.f32.xlu0 %v1107_v10 }
 0xfce   :  { %v1404_v35 = vpop.f32.mrf.mxu0 }
 0xfcf   :  { %v1410_v56 = vrot.slane %v1404_v35, 7 }
 0xfd0   :  { %v4759_v58 = vpop.f32.mrf.mxu0 }
 0xfd1   :  { %v1412_v59 = vadd.f32 %v1410_v56, %v950_v14 }
 0xfd3   :  { %v1413_v61 = vmul.f32 0.1, %v1412_v59 }
 0xfd5   :  { %v1415_v33 = vrot.slane %v1413_v61, 1 }
 0xfd7   :  { %v1417_v5 = vadd.f32 %v1415_v33, %v1408_v57 }
 0xfd9   :  { %v5554_v6 = vmax.f32 %v1417_v5, 0.0 }
 0xfdb   :  { %1419 = vst.msk [vmem:[#allocation2 + $0x1] sm:$0x1] %vm582_vm3, %v5554_v6  ;;  %4769 = vmatmul.mubr.msk.f32.vlgmr.msra.gmra.mxu1 %vm355_vm2, %v5554_v6 }
 0xfdc   :  { %4783 = vmatpush3.msk.msra.mxu1 %vm795_vm13, %v5290_v19  ;;  %4784 = vmatprep.mubr.msk.f32.mxu1 %vm4983_vm1, %v4982_v3 }
 0xfdd   :  { %4798 = vmatprep.subr.mxu1 %v4982_v3 }
0x101c   :  { %v1711_v47 = vpop.xlane.xlu0 %1710 }
0x101d   :  { %v1712_v8 = vcvt.f32.s32 %v1711_v47  ;;  %v1257_v62 = vpop.xlane.xlu1 %1256  ;;  %v1202_v47 = vadd.f32 %v5461_v9, %v1179_v41 }
0x101e   :  { %vm1258_vm8 = vcmp.eq.f32.partialorder %v1255_v45, %v1257_v62  ;;  %v1263_v4 = vcvt.f32.s32 %v1257_v62 }
0x101f   :  { %v1715_v16 = vadd.s32 %v1714_v60, %v1712_v8  ;;  %v1259_v52 = vsel %vm1258_vm8, %v1254_v42, inf  ;;  %v1225_v60 = vadd.f32 %v5500_v12, %v1202_v47  ;;  %v1065_v8 = vsub.f32 0.0, %v5394_v31 }
0x1020   :  { %1260 = vmin.xlane.f32.xlu1 %v1259_v52  ;;  %v1264_v13 = vshll.u32 %v1263_v4, 16 }
0x1021   :  { %vm1716_vm9 = vcmp.eq.s32.totalorder %v5154_v23, %v1715_v16  ;;  %v1248_v42 = vadd.f32 %v5539_v26, %v1225_v60 }
0x1022   :  { %v5567_v19 = vsel %vm1716_vm9, -inf, %v5508_v51  ;;  %v1106_v51 = vcvt.s32.f32 %v1104_v39 }
0x1023   :  { %v1718_v38 = vsel %vm582_vm3, %v5567_v19, -inf }
0x1024   :  { %1719 = vmax.xlane.f32.xlu0 %v1718_v38  ;;  %1128 = vadd.xlane.f32.xlu1 %v1127_v27 }
0x102f   :  { %v5575_v36 = vpop.xlane.xlu0 %1108 }
0x1030   :  { %vm1110_vm10 = vcmp.eq.f32.partialorder %v1107_v10, %v5575_v36 }
0x1031   :  { %v1111_v0 = vsel %vm1110_vm10, %v1106_v51, inf }
0x1035   :  { %1076 = vrot.lane.b32.xlu1 %v5385_v25, %s4985_s7 }
0x1039   :  { %1072 = vrot.lane.b32.xlu1 %v5387_v24, %s4985_s7 }
0x105d   :  { %1112 = vmin.xlane.f32.xlu1 %v1111_v0 }
0x106e   :  { %1070 = vrot.lane.b32.xlu1 %v5399_v29, %s4985_s7 }
0x109b   :  { %v5579_v45 = vpop.f32.mrf.mxu1 }
0x109d   :  { %v4770_v43 = vpop.f32.mrf.mxu1 }
0x10a9   :  { %v1261_v49 = vpop.xlane.xlu1 %1260 }
0x10aa   :  { %v1262_v35 = vcvt.f32.s32 %v1261_v49  ;;  %v1064_v49 = vsub.f32 0.0, %v5412_v44 }
0x10ac   :  { %v1265_v14 = vadd.s32 %v1264_v13, %v1262_v35 }
0x10ad   :  { %v5581_v56 = vpop.xlane.xlu0 %1719  ;;  %v1129_v33 = vpop.xlane.xlu1 %1128 }
0x10ae   :  { %vm1722_vm11 = vcmp.eq.f32.partialorder %v5567_v19, %v5581_v56  ;;  %vm1266_vm12 = vcmp.eq.s32.totalorder %v5154_v23, %v1265_v14 }
0x10af   :  { %v1267_v7 = vsel %vm1266_vm12, -inf, %v5521_v55  ;;  %v1723_v10 = vsel %vm1722_vm11, %v5154_v23, 32 }
0x10b0   :  { %v1268_v58 = vsel %vm582_vm3, %v1267_v7, -inf  ;;  %v1724_v59 = vsel %vm582_vm3, %v1723_v10, 2147483647 }
0x10b1   :  { %1269 = vmax.xlane.f32.xlu0 %v1268_v58  ;;  %v1726_v61 = vshra.s32 %v1724_v59, 16  ;;  %v1077_v5 = vpop.permute.xlu1 %1076  ;;  %v1725_v38 = vand.u32 65535, %v1724_v59 }
0x10b2   :  { %v1085_v16 = vadd.f32 %v1077_v5, %v1065_v8 }
0x10b3   :  { %v1728_v57 = vcvt.s32.f32 %v1726_v61  ;;  %v1727_v54 = vcvt.s32.f32 %v1725_v38 }
0x10b4   :  { %v1089_v39 = vmul.f32 0.001, %v1085_v16  ;;  %v1063_v16 = vsub.f32 0.0, %v5397_v22 }
0x10b5   :  { %1729 = vmin.xlane.f32.xlu0 %v1728_v57  ;;  %v1073_v55 = vpop.permute.xlu1 %1072 }
0x10b6   :  { %v5600_v4 = vadd.f32 %v1089_v39, %v5394_v31  ;;  %v1083_v38 = vadd.f32 %v1073_v55, %v1063_v16 }
0x10cb   :  { %1074 = vrot.lane.b32.xlu0 %v5406_v50, %s4985_s7 }
0x10e6   :  { %v1113_v62 = vpop.xlane.xlu1 %1112 }
0x10e7   :  { %v1114_v60 = vcvt.f32.s32 %v1113_v62 }
0x10ea   :  { %v1071_v51 = vpop.permute.xlu1 %1070 }
0x10eb   :  { %v1082_v9 = vadd.f32 %v1071_v51, %v1062_v53 }
0x10ed   :  { %v1086_v14 = vmul.f32 0.001, %v1082_v9 }
0x10ef   :  { %v5610_v31 = vadd.f32 %v1086_v14, %v5409_v20 }
0x113a   :  { %v1270_v52 = vpop.xlane.xlu0 %1269 }
0x113b   :  { %v1271_v27 = vadd.f32 %v1270_v52, %v1248_v42 }
0x113d   :  { %v1272_v0 = vsub.f32 %v1129_v33, %v1271_v27  ;;  %v1087_v27 = vmul.f32 0.001, %v1083_v38 }
0x113e   :  { %v1730_v63 = vpop.xlane.xlu0 %1729 }
0x113f   :  { %v1273_v43 = vmul.f32 0.04, %v1272_v0  ;;  %vm1731_vm14 = vcmp.eq.f32.partialorder %v1728_v57, %v1730_v63  ;;  %v5622_v39 = vadd.f32 %v1087_v27, %v5397_v22  ;;  %v1736_v0 = vcvt.f32.s32 %v1730_v63 }
0x1140   :  { %v1732_v12 = vsel %vm1731_vm14, %v1727_v54, inf }
0x1141   :  { %v1277_v26 = vrot.slane %v1273_v43, %v5389_v46  ;;  %1733 = vmin.xlane.f32.xlu1 %v1732_v12  ;;  %v1737_v54 = vshll.u32 %v1736_v0, 16 }
0x1142   :  { %v1075_v13 = vpop.permute.xlu0 %1074 }
0x1143   :  { %v1084_v35 = vadd.f32 %v1075_v13, %v1064_v49  ;;  %vm1281_vm4 = vcmp.gt.f32.partialorder %v5600_v4, %v1277_v26  ;;  %vm1278_vm6 = vcmp.gt.f32.partialorder %v5610_v31, %v1277_v26  ;;  %vm1279_vm8 = vcmp.gt.f32.partialorder %v5622_v39, %v1277_v26 }
0x1144   :  { %v1285_v7 = vsel %vm1281_vm4, 1.0, %v4982_v3  ;;  %v1282_v5 = vsel %vm1278_vm6, 1.0, %v4982_v3 }
0x1145   :  { %v1088_v10 = vmul.f32 0.001, %v1084_v35  ;;  %v4523_v58 = vadd.f32 -0.5, %v1285_v7  ;;  %v4520_v41 = vadd.f32 -0.5, %v1282_v5 }
0x1147   :  { %v5607_v59 = vadd.f32 %v1088_v10, %v5412_v44  ;;  %v1293_v61 = vmul.f32 5e-05, %v4523_v58  ;;  %v1290_v47 = vmul.f32 5e-05, %v4520_v41  ;;  %v1115_v44 = vcvt.f32.s32 %v5575_v36 }
0x1148   :  { %v1283_v36 = vsel %vm1279_vm8, 1.0, %v4982_v3 }
0x1149   :  { %1312 = vperm.xlu0 %4944, %v1293_v61   ;;  %vm1280_vm5 = vcmp.gt.f32.partialorder %v5607_v59, %v1277_v26  ;;  %v1116_v20 = vshll.u32 %v1115_v44, 16  ;;  %v4521_v62 = vadd.f32 -0.5, %v1283_v36 }
0x114a   :  { %v1284_v57 = vsel %vm1280_vm5, 1.0, %v4982_v3 }
0x114b   :  { %v4522_v33 = vadd.f32 -0.5, %v1284_v57  ;;  %v1117_v8 = vadd.s32 %v1116_v20, %v1114_v60  ;;  %v1291_v51 = vmul.f32 5e-05, %v4521_v62 }
0x114d   :  { %v1292_v1 = vmul.f32 5e-05, %v4522_v33  ;;  %vm1118_vm7 = vcmp.eq.s32.totalorder %v5154_v23, %v1117_v8 }
0x114e   :  { %v1119_v42 = vsel %vm1118_vm7, -inf, %v5535_v37 }
0x114f   :  { %v1120_v52 = vsel %vm505_vm15, %v1119_v42, -inf }
0x1152   :  { %1307 = vperm.xlu1 %4943, %v1292_v1  }
0x1156   :  { %1297 = vperm.xlu1 %4943, %v1290_v47  }
0x1168   :  { %1121 = vmax.xlane.f32.xlu0 %v1120_v52 }
0x117e   :  { %1302 = vperm.xlu0 %4944, %v1291_v51   ;;  %v1570_v51 = vsub.f32 0.0, %v5478_v21 }
0x11c4   :  { %v1313_v12 = vpop.permute.xlu0 %1312 }
0x11ca   :  { %v1734_v53 = vpop.xlane.xlu1 %1733 }
0x11cb   :  { %v1735_v43 = vcvt.f32.s32 %v1734_v53 }
0x11cd   :  { %v1738_v9 = vadd.s32 %v1737_v54, %v1735_v43 }
0x11ce   :  { %v1308_v35 = vpop.permute.xlu1 %1307 }
0x11cf   :  { %vm1739_vm9 = vcmp.eq.s32.totalorder %v5154_v23, %v1738_v9 }
0x11d0   :  { %v5628_v55 = vsel %vm1739_vm9, -inf, %v5567_v19 }
0x11d1   :  { %v1741_v22 = vsel %vm582_vm3, %v5628_v55, -inf }
0x11d2   :  { %1742 = vmax.xlane.f32.xlu0 %v1741_v22  ;;  %v1298_v10 = vpop.permute.xlu1 %1297 }
0x11f1   :  { %v1122_v26 = vpop.xlane.xlu0 %1121 }
0x11f2   :  { %v1123_v49 = vadd.f32 %v1122_v26, %v5545_v32  ;;  %v2039_v26 = vrot.slane %v5140_v17, 3 }
0x11f4   :  { %v1124_v13 = vmul.f32 0.5, %v1123_v49 }
0x11f6   :  { %vm1125_vm10 = vcmp.ge.f32.partialorder %v5535_v37, %v1124_v13 }
0x11f7   :  { %v1126_v63 = vsel %vm1125_vm10, 1.0, %v4982_v3 }
0x11f8   :  { %v4524_v14 = vadd.f32 -0.5, %v1126_v63 }
0x11f9   :  { %v1303_v19 = vpop.permute.xlu0 %1302 }
0x11fa   :  { %v1318_v7 = vrot.slane %v4524_v14, %v5389_v46 }
0x11fc   :  { %v1320_v58 = vmul.f32 %v1318_v7, %v1303_v19  ;;  %v1322_v61 = vmul.f32 %v1318_v7, %v1313_v12  ;;  %v1321_v57 = vmul.f32 %v1318_v7, %v1308_v35  ;;  %v1319_v33 = vmul.f32 %v1318_v7, %v1298_v10 }
0x11fd   :  { %v2145_v12 = vsub.f32 0.0, %v5472_v18 }
0x11fe   :  { %v1324_v5 = vadd.f32 %v1320_v58, %v5438_v48  ;;  %v1326_v1 = vadd.f32 %v1322_v61, %v5429_v34  ;;  %v1325_v32 = vadd.f32 %v1321_v57, %v5435_v40  ;;  %v1323_v44 = vadd.f32 %v1319_v33, %v5442_v11  ;;  %v5662_v40 = vld [vmem:[%s6702_s8 + $0x18] sm:$0xff]  ;;  %v5671_v48 = vld [vmem:[%s6702_s8 + $0x10] sm:$0xff]  ;;  %v5678_v11 = vld [vmem:[%s6702_s8 + $0x8] sm:$0xff] }
0x11ff   :  { %v2147_v49 = vadd.f32 %v2145_v12, %v2039_v26 }
0x1200   :  { %v1330_v41 = vmax.f32 %v1326_v1, 0.0  ;;  %v1329_v47 = vmax.f32 %v1325_v32, 0.0  ;;  %v1328_v60 = vmax.f32 %v1324_v5, 0.0  ;;  %v1327_v42 = vmax.f32 %v1323_v44, 0.0 }
0x1201   :  { %v2148_v35 = vmul.f32 0.001, %v2147_v49 }
0x1202   :  { %v5640_v20 = vmin.f32 %v1330_v41, 1.0  ;;  %v5643_v8 = vmin.f32 %v1329_v47, 1.0  ;;  %v5646_v16 = vmin.f32 %v1328_v60, 1.0  ;;  %v5651_v34 = vmin.f32 %v1327_v42, 1.0 }
0x1204   :  { %4772 = vmatpush3.msra.mxu0 %v5640_v20 }
0x1205   :  { %4773 = vmatprep.subr.mxu0 %v4982_v3 }
0x1206   :  { %4774 = vmatpush3.msra.mxu0 %v5643_v8 }
0x1207   :  { %4775 = vmatprep.subr.mxu0 %v4982_v3 }
0x1208   :  { %4776 = vmatpush3.msra.mxu0 %v5646_v16 }
0x1209   :  { %4777 = vmatprep.subr.mxu0 %v4982_v3 }
0x120a   :  { %4778 = vmatpush3.msra.mxu0 %v5651_v34 }
0x120b   :  { %4780 = vmatmul.mubr.msk.f32.vlgmr.msra.gmra.mxu0 %vm355_vm2, %v1497_v2  ;;  %4787 = vmatprep.subr.mxu0 %v4982_v3  ;;  %v5685_v2 = vld [vmem:[%s6702_s8] sm:$0xff] }
0x120c   :  { %4788 = vmatpush3.msra.mxu0 %v5662_v40  ;;  %4795 = vmatprep.mubr.msk.f32.mxu0 %vm4983_vm1, %v4982_v3 }
0x120d   :  { %4789 = vmatprep.subr.mxu0 %v4982_v3 }
0x120e   :  { %4790 = vmatpush3.msra.mxu0 %v5671_v48 }
0x120f   :  { %4791 = vmatprep.subr.mxu0 %v4982_v3 }
0x1210   :  { %4792 = vmatpush3.msra.mxu0 %v5678_v11 }
0x1211   :  { %4793 = vmatprep.subr.mxu0 %v4982_v3 }
0x1212   :  { %4794 = vmatpush3.msra.mxu0 %v5685_v2 }
0x1213   :  { %4809 = vmatprep.subr.mxu0 %v4982_v3 }
0x125b   :  { %v5689_v52 = vpop.xlane.xlu0 %1742 }
0x125c   :  { %vm1745_vm11 = vcmp.eq.f32.partialorder %v5628_v55, %v5689_v52 }
0x125d   :  { %v1746_v38 = vsel %vm1745_vm11, %v5154_v23, 32 }
0x125e   :  { %v1747_v27 = vsel %vm582_vm3, %v1746_v38, 2147483647 }
0x125f   :  { %v1749_v36 = vshra.s32 %v1747_v27, 16  ;;  %v1748_v13 = vand.u32 65535, %v1747_v27 }
0x1261   :  { %v1751_v62 = vcvt.s32.f32 %v1749_v36  ;;  %v1750_v14 = vcvt.s32.f32 %v1748_v13 }
0x1263   :  { %1752 = vmin.xlane.f32.xlu1 %v1751_v62 }
0x12cb   :  { %v1566_v0 = vpop.f32.mrf.mxu0 }
0x12cc   :  { %v1571_v53 = vadd.f32 %v1570_v51, %v1566_v0 }
0x12cd   :  { %v4781_v54 = vpop.f32.mrf.mxu0 }
0x12ce   :  { %v1572_v43 = vmul.f32 0.0125, %v1571_v53 }
0x12d0   :  { %v5697_v9 = vadd.f32 %v1572_v43, %v5478_v21  ;;  %v5706_v21 = vadd.f32 %v2148_v35, %v5472_v18 }
0x12d2   :  { %v1574_v22 = vsel %vm505_vm15, %v5697_v9, -inf  ;;  %v2214_v10 = vsel %vm582_vm3, %v5706_v21, -inf }
0x12d3   :  { %1575 = vmax.xlane.f32.xlu1 %v1574_v22 }
0x12ec   :  { %v1753_v63 = vpop.xlane.xlu1 %1752 }
0x12ed   :  { %vm1754_vm12 = vcmp.eq.f32.partialorder %v1751_v62, %v1753_v63  ;;  %v1759_v58 = vcvt.f32.s32 %v1753_v63 }
0x12ee   :  { %v1755_v7 = vsel %vm1754_vm12, %v1750_v14, inf }
0x12ef   :  { %1756 = vmin.xlane.f32.xlu0 %v1755_v7  ;;  %v1760_v33 = vshll.u32 %v1759_v58, 16 }
0x12f3   :  { %2215 = vmax.xlane.f32.xlu0 %v2214_v10 }
0x135c   :  { %v5710_v19 = vpop.xlane.xlu1 %1575 }
0x135d   :  { %vm1577_vm14 = vcmp.eq.f32.partialorder %v5697_v9, %v5710_v19 }
0x135e   :  { %v1578_v57 = vsel %vm1577_vm14, %v5154_v23, 4 }
0x135f   :  { %v1579_v32 = vsel %vm505_vm15, %v1578_v57, 2147483647 }
0x1360   :  { %v1581_v60 = vshra.s32 %v1579_v32, 16  ;;  %v1580_v49 = vand.u32 65535, %v1579_v32 }
0x1362   :  { %v1583_v62 = vcvt.s32.f32 %v1581_v60  ;;  %v1582_v63 = vcvt.s32.f32 %v1580_v49 }
0x1378   :  { %v1757_v61 = vpop.xlane.xlu0 %1756 }
0x1379   :  { %v1758_v5 = vcvt.f32.s32 %v1757_v61 }
0x137b   :  { %v1761_v1 = vadd.s32 %v1760_v33, %v1758_v5 }
0x137c   :  { %v5716_v41 = vpop.xlane.xlu0 %2215 }
0x137d   :  { %vm2218_vm4 = vcmp.eq.f32.partialorder %v5706_v21, %v5716_v41  ;;  %vm1762_vm5 = vcmp.eq.s32.totalorder %v5154_v23, %v1761_v1 }
0x137e   :  { %v1763_v47 = vsel %vm1762_vm5, -inf, %v5628_v55  ;;  %v2219_v44 = vsel %vm2218_vm4, %v5154_v23, 32 }
0x137f   :  { %v1764_v42 = vsel %vm582_vm3, %v1763_v47, -inf  ;;  %v2220_v38 = vsel %vm582_vm3, %v2219_v44, 2147483647 }
0x1380   :  { %1765 = vmax.xlane.f32.xlu0 %v1764_v42  ;;  %v2222_v27 = vshra.s32 %v2220_v38, 16  ;;  %v2221_v0 = vand.u32 65535, %v2220_v38 }
0x1382   :  { %v2224_v36 = vcvt.s32.f32 %v2222_v27  ;;  %v2223_v22 = vcvt.s32.f32 %v2221_v0 }
0x1384   :  { %2225 = vmin.xlane.f32.xlu1 %v2224_v36  ;;  %1584 = vmin.xlane.f32.xlu0 %v1583_v62 }
0x1409   :  { %v5725_v51 = vpop.xlane.xlu0 %1765 }
0x140a   :  { %vm1768_vm6 = vcmp.eq.f32.partialorder %v1763_v47, %v5725_v51 }
0x140b   :  { %v1769_v55 = vsel %vm1768_vm6, %v5154_v23, 32 }
0x140c   :  { %v1770_v53 = vsel %vm582_vm3, %v1769_v55, 2147483647 }
0x140d   :  { %v1585_v54 = vpop.xlane.xlu0 %1584  ;;  %v2226_v43 = vpop.xlane.xlu1 %2225  ;;  %v1772_v12 = vshra.s32 %v1770_v53, 16  ;;  %v1771_v10 = vand.u32 65535, %v1770_v53 }
0x140e   :  { %vm2227_vm7 = vcmp.eq.f32.partialorder %v2224_v36, %v2226_v43  ;;  %vm1586_vm8 = vcmp.eq.f32.partialorder %v1583_v62, %v1585_v54  ;;  %v2232_v7 = vcvt.f32.s32 %v2226_v43  ;;  %v1591_v61 = vcvt.f32.s32 %v1585_v54 }
0x140f   :  { %v2228_v13 = vsel %vm2227_vm7, %v2223_v22, inf  ;;  %v1774_v35 = vcvt.s32.f32 %v1772_v12  ;;  %v1587_v14 = vsel %vm1586_vm8, %v1582_v63, inf  ;;  %v1773_v1 = vcvt.s32.f32 %v1771_v10 }
0x1410   :  { %2229 = vmin.xlane.f32.xlu1 %v2228_v13  ;;  %v2233_v57 = vshll.u32 %v2232_v7, 16  ;;  %v1592_v42 = vshll.u32 %v1591_v61, 16 }
0x1411   :  { %1775 = vmin.xlane.f32.xlu0 %v1774_v35 }
0x1414   :  { %1588 = vmin.xlane.f32.xlu1 %v1587_v14 }
0x1499   :  { %v2230_v58 = vpop.xlane.xlu1 %2229 }
0x149a   :  { %v2231_v33 = vcvt.f32.s32 %v2230_v58  ;;  %v1776_v5 = vpop.xlane.xlu0 %1775 }
0x149b   :  { %vm1777_vm9 = vcmp.eq.f32.partialorder %v1774_v35, %v1776_v5  ;;  %v1782_v53 = vcvt.f32.s32 %v1776_v5 }
0x149c   :  { %v2234_v44 = vadd.s32 %v2233_v57, %v2231_v33  ;;  %v1778_v32 = vsel %vm1777_vm9, %v1773_v1, inf  ;;  %v1636_v33 = vsub.f32 0.0, %v5535_v37 }
0x149d   :  { %1779 = vmin.xlane.f32.xlu0 %v1778_v32  ;;  %v1589_v60 = vpop.xlane.xlu1 %1588  ;;  %v1783_v43 = vshll.u32 %v1782_v53, 16 }
0x149e   :  { %v1590_v38 = vcvt.f32.s32 %v1589_v60  ;;  %vm2235_vm10 = vcmp.eq.s32.totalorder %v5154_v23, %v2234_v44 }
0x149f   :  { %v5732_v27 = vsel %vm2235_vm10, -inf, %v5706_v21 }
0x14a0   :  { %v1593_v36 = vadd.s32 %v1592_v42, %v1590_v38  ;;  %v2237_v62 = vsel %vm582_vm3, %v5732_v27, -inf }
0x14a1   :  { %2238 = vmax.xlane.f32.xlu1 %v2237_v62 }
0x14a2   :  { %vm1594_vm11 = vcmp.eq.s32.totalorder %v5154_v23, %v1593_v36 }
0x14a3   :  { %v1595_v0 = vsel %vm1594_vm11, -inf, %v5697_v9 }
0x14a4   :  { %v1596_v55 = vsel %vm505_vm15, %v1595_v0, -inf }
0x14a5   :  { %1597 = vmax.xlane.f32.xlu0 %v1596_v55 }
0x1526   :  { %v1780_v54 = vpop.xlane.xlu0 %1779 }
0x1527   :  { %v1781_v22 = vcvt.f32.s32 %v1780_v54 }
0x1529   :  { %v1784_v12 = vadd.s32 %v1783_v43, %v1781_v22 }
0x152a   :  { %v5739_v49 = vpop.xlane.xlu1 %2238 }
0x152b   :  { %vm2241_vm12 = vcmp.eq.f32.partialorder %v5732_v27, %v5739_v49  ;;  %vm1785_vm14 = vcmp.eq.s32.totalorder %v5154_v23, %v1784_v12 }
0x152c   :  { %v5744_v13 = vsel %vm1785_vm14, -inf, %v1763_v47  ;;  %v2242_v35 = vsel %vm2241_vm12, %v5154_v23, 32 }
0x152d   :  { %v1787_v63 = vsel %vm582_vm3, %v5744_v13, -inf  ;;  %v2243_v14 = vsel %vm582_vm3, %v2242_v35, 2147483647  ;;  %v1494_v35 = vrot.slane %v5579_v45, 6  ;;  %v5786_v45 = vld [vmem:[%s6703_s9] sm:$0xf] }
0x152e   :  { %1788 = vmax.xlane.f32.xlu1 %v1787_v63  ;;  %v1598_v7 = vpop.xlane.xlu0 %1597  ;;  %v2245_v10 = vshra.s32 %v2243_v14, 16  ;;  %v2244_v60 = vand.u32 65535, %v2243_v14 }
0x152f   :  { %v1599_v58 = vadd.f32 %v1598_v7, %v5710_v19  ;;  %v1496_v14 = vadd.f32 %v1494_v35, %v5333_v28 }
0x1530   :  { %v2247_v61 = vcvt.s32.f32 %v2245_v10  ;;  %v2246_v62 = vcvt.s32.f32 %v2244_v60 }
0x1531   :  { %v1600_v57 = vmul.f32 0.5, %v1599_v58 }
0x1532   :  { %2248 = vmin.xlane.f32.xlu0 %v2247_v61 }
0x1533   :  { %vm1601_vm4 = vcmp.ge.f32.partialorder %v5697_v9, %v1600_v57  ;;  %v1950_v57 = vmul.f32 0.9, %v5554_v6 }
0x1534   :  { %v1602_v47 = vsel %vm1601_vm4, 1.0, %v4982_v3 }
0x1535   :  { %v1637_v5 = vadd.f32 %v1636_v33, %v1602_v47  ;;  %4785 = vmatmul.mubr.msk.f32.vlgmr.msra.gmra.mxu1 %vm791_vm0, %v1602_v47 }
0x1536   :  { %4806 = vmatprep.mubr.msk.f32.mxu1 %vm4983_vm1, %v4982_v3 }
0x1537   :  { %v1638_v1 = vmul.f32 0.001, %v1637_v5 }
0x1539   :  { %v5758_v44 = vadd.f32 %v1638_v1, %v5535_v37 }
0x153b   :  { %v1640_v19 = vsel %vm505_vm15, %v5758_v44, -inf }
0x153c   :  { %1641 = vmax.xlane.f32.xlu1 %v1640_v19 }
0x15b7   :  { %v5762_v32 = vpop.xlane.xlu1 %1788 }
0x15b8   :  { %vm1791_vm5 = vcmp.eq.f32.partialorder %v5744_v13, %v5762_v32 }
0x15b9   :  { %v1792_v42 = vsel %vm1791_vm5, %v5154_v23, 32 }
0x15ba   :  { %v1793_v38 = vsel %vm582_vm3, %v1792_v42, 2147483647 }
0x15bb   :  { %v2249_v36 = vpop.xlane.xlu0 %2248  ;;  %v1795_v0 = vshra.s32 %v1793_v38, 16  ;;  %v1794_v1 = vand.u32 65535, %v1793_v38  ;;  %v1669_v38 = vsel %vm582_vm3, %v5472_v18, 0.0 }
0x15bc   :  { %vm2250_vm6 = vcmp.eq.f32.partialorder %v2247_v61, %v2249_v36  ;;  %v2255_v6 = vcvt.f32.s32 %v2249_v36 }
0x15bd   :  { %v2251_v37 = vsel %vm2250_vm6, %v2246_v62, inf  ;;  %v1797_v55 = vcvt.s32.f32 %v1795_v0  ;;  %v1796_v0 = vcvt.s32.f32 %v1794_v1 }
0x15be   :  { %2252 = vmin.xlane.f32.xlu0 %v2251_v37  ;;  %v2256_v60 = vshll.u32 %v2255_v6, 16 }
0x15bf   :  { %1798 = vmin.xlane.f32.xlu1 %v1797_v55 }
0x15c5   :  { %v5768_v53 = vpop.xlane.xlu1 %1641 }
0x15c6   :  { %vm1643_vm7 = vcmp.eq.f32.partialorder %v5758_v44, %v5768_v53 }
0x15c7   :  { %v1644_v54 = vsel %vm1643_vm7, %v5154_v23, 4 }
0x15c8   :  { %v1645_v43 = vsel %vm505_vm15, %v1644_v54, 2147483647 }
0x15c9   :  { %v1647_v22 = vshra.s32 %v1645_v43, 16  ;;  %v1646_v36 = vand.u32 65535, %v1645_v43 }
0x15cb   :  { %v1649_v12 = vcvt.s32.f32 %v1647_v22 }
0x15cd   :  { %1650 = vmin.xlane.f32.xlu0 %v1649_v12 }
0x15f5   :  { %v1946_v63 = vpop.f32.mrf.mxu1 }
0x15f6   :  { %v1952_v7 = vrot.slane %v1946_v63, 6 }
0x15f7   :  { %v4786_v10 = vpop.f32.mrf.mxu1 }
0x15f8   :  { %v1954_v58 = vadd.f32 %v1952_v7, %v1496_v14 }
0x15fa   :  { %v1955_v61 = vmul.f32 0.1, %v1954_v58 }
0x15fc   :  { %v1957_v33 = vrot.slane %v1955_v61, 2 }
0x15fe   :  { %v1959_v47 = vadd.f32 %v1957_v33, %v1950_v57 }
0x1600   :  { %v5777_v5 = vmax.f32 %v1959_v47, 0.0 }
0x1602   :  { %1961 = vst.msk [vmem:[#allocation2 + $0x2] sm:$0x1] %vm582_vm3, %v5777_v5  ;;  %4796 = vmatmul.mubr.msk.f32.vlgmr.msra.gmra.mxu0 %vm355_vm2, %v5777_v5 }
0x1603   :  { %4810 = vmatpush3.msk.msra.mxu0 %vm795_vm13, %v5786_v45  ;;  %4811 = vmatprep.mubr.msk.f32.mxu0 %vm4983_vm1, %v4982_v3 }
0x1604   :  { %4825 = vmatprep.subr.mxu0 %v4982_v3 }
0x1647   :  { %v2253_v19 = vpop.xlane.xlu0 %2252 }
0x1648   :  { %v2254_v42 = vcvt.f32.s32 %v2253_v19  ;;  %v1799_v62 = vpop.xlane.xlu1 %1798 }
0x1649   :  { %vm1800_vm8 = vcmp.eq.f32.partialorder %v1797_v55, %v1799_v62  ;;  %v1805_v7 = vcvt.f32.s32 %v1799_v62  ;;  %v1698_v62 = vadd.f32 %v5515_v15, %v5482_v30  ;;  %v1608_v30 = vsub.f32 0.0, %v5610_v31 }
0x164a   :  { %v2257_v37 = vadd.s32 %v2256_v60, %v2254_v42  ;;  %v1801_v54 = vsel %vm1800_vm8, %v1796_v0, inf }
0x164b   :  { %1802 = vmin.xlane.f32.xlu1 %v1801_v54  ;;  %v1806_v58 = vshll.u32 %v1805_v7, 16  ;;  %v1721_v0 = vadd.f32 %v5581_v56, %v1698_v62 }
0x164c   :  { %vm2258_vm9 = vcmp.eq.s32.totalorder %v5154_v23, %v2257_v37 }
0x164d   :  { %v5795_v22 = vsel %vm2258_vm9, -inf, %v5732_v27  ;;  %v1648_v27 = vcvt.s32.f32 %v1646_v36 }
0x164e   :  { %v2260_v35 = vsel %vm582_vm3, %v5795_v22, -inf }
0x164f   :  { %2261 = vmax.xlane.f32.xlu0 %v2260_v35  ;;  %1670 = vadd.xlane.f32.xlu1 %v1669_v38  ;;  %v1611_v35 = vsub.f32 0.0, %v5600_v4 }
0x1656   :  { %v5803_v55 = vpop.xlane.xlu0 %1650 }
0x1657   :  { %vm1652_vm10 = vcmp.eq.f32.partialorder %v1649_v12, %v5803_v55 }
0x1658   :  { %v1653_v63 = vsel %vm1652_vm10, %v1648_v27, inf }
0x1660   :  { %1618 = vrot.lane.b32.xlu1 %v5385_v25, %s4986_s2 }
0x1664   :  { %1614 = vrot.lane.b32.xlu1 %v5387_v24, %s4986_s2 }
0x1688   :  { %1654 = vmin.xlane.f32.xlu1 %v1653_v63 }
0x1699   :  { %1612 = vrot.lane.b32.xlu1 %v5399_v29, %s4986_s2 }
0x16c2   :  { %v5807_v14 = vpop.f32.mrf.mxu0 }
0x16c4   :  { %v4797_v18 = vpop.f32.mrf.mxu0 }
0x16d4   :  { %v1803_v10 = vpop.xlane.xlu1 %1802 }
0x16d5   :  { %v1804_v61 = vcvt.f32.s32 %v1803_v10 }
0x16d7   :  { %v1807_v57 = vadd.s32 %v1806_v58, %v1804_v61 }
0x16d8   :  { %v5809_v33 = vpop.xlane.xlu0 %2261  ;;  %v1671_v60 = vpop.xlane.xlu1 %1670 }
0x16d9   :  { %vm2264_vm11 = vcmp.eq.f32.partialorder %v5795_v22, %v5809_v33  ;;  %vm1808_vm12 = vcmp.eq.s32.totalorder %v5154_v23, %v1807_v57 }
0x16da   :  { %v2265_v43 = vsel %vm2264_vm11, %v5154_v23, 32  ;;  %v1809_v12 = vsel %vm1808_vm12, -inf, %v5744_v13  ;;  %v1744_v13 = vadd.f32 %v5689_v52, %v1721_v0 }
0x16db   :  { %v1810_v47 = vsel %vm582_vm3, %v1809_v12, -inf  ;;  %v2266_v6 = vsel %vm582_vm3, %v2265_v43, 2147483647  ;;  %v1610_v12 = vsub.f32 0.0, %v5607_v59 }
0x16dc   :  { %1811 = vmax.xlane.f32.xlu0 %v1810_v47  ;;  %v2268_v1 = vshra.s32 %v2266_v6, 16  ;;  %v1619_v42 = vpop.permute.xlu1 %1618  ;;  %v1767_v54 = vadd.f32 %v5725_v51, %v1744_v13  ;;  %v2267_v18 = vand.u32 65535, %v2266_v6 }
0x16dd   :  { %v1627_v27 = vadd.f32 %v1619_v42, %v1611_v35 }
0x16de   :  { %v2270_v19 = vcvt.s32.f32 %v2268_v1  ;;  %v1790_v36 = vadd.f32 %v5762_v32, %v1767_v54  ;;  %v2269_v56 = vcvt.s32.f32 %v2267_v18 }
0x16df   :  { %v1631_v10 = vmul.f32 0.001, %v1627_v27 }
0x16e0   :  { %2271 = vmin.xlane.f32.xlu0 %v2270_v19  ;;  %v1615_v37 = vpop.permute.xlu1 %1614 }
0x16e1   :  { %v5828_v43 = vadd.f32 %v1631_v10, %v5600_v4 }
0x16f6   :  { %1616 = vrot.lane.b32.xlu0 %v5406_v50, %s4986_s2 }
0x1711   :  { %v1655_v38 = vpop.xlane.xlu1 %1654 }
0x1712   :  { %v1656_v18 = vcvt.f32.s32 %v1655_v38 }
0x1715   :  { %v1613_v58 = vpop.permute.xlu1 %1612 }
0x1716   :  { %v1624_v52 = vadd.f32 %v1613_v58, %v1608_v30  ;;  %v1609_v58 = vsub.f32 0.0, %v5622_v39 }
0x1718   :  { %v1628_v1 = vmul.f32 0.001, %v1624_v52  ;;  %v1625_v30 = vadd.f32 %v1615_v37, %v1609_v58 }
0x171a   :  { %v5838_v4 = vadd.f32 %v1628_v1, %v5610_v31 }
0x1765   :  { %v1812_v63 = vpop.xlane.xlu0 %1811 }
0x1766   :  { %v1813_v7 = vadd.f32 %v1812_v63, %v1790_v36 }
0x1768   :  { %v1814_v61 = vsub.f32 %v1671_v60, %v1813_v7 }
0x1769   :  { %v2272_v15 = vpop.xlane.xlu0 %2271 }
0x176a   :  { %v1815_v57 = vmul.f32 0.04, %v1814_v61  ;;  %vm2273_vm14 = vcmp.eq.f32.partialorder %v2270_v19, %v2272_v15 }
0x176b   :  { %v2274_v51 = vsel %vm2273_vm14, %v2269_v56, inf  ;;  %v1629_v56 = vmul.f32 0.001, %v1625_v30 }
0x176c   :  { %v1819_v32 = vrot.slane %v1815_v57, %v5389_v46  ;;  %2275 = vmin.xlane.f32.xlu1 %v2274_v51  ;;  %v2278_v51 = vcvt.f32.s32 %v2272_v15 }
0x176d   :  { %v1617_v47 = vpop.permute.xlu0 %1616  ;;  %v5850_v57 = vadd.f32 %v1629_v56, %v5622_v39 }
0x176e   :  { %v1626_v6 = vadd.f32 %v1617_v47, %v1610_v12  ;;  %vm1823_vm4 = vcmp.gt.f32.partialorder %v5828_v43, %v1819_v32  ;;  %vm1820_vm6 = vcmp.gt.f32.partialorder %v5838_v4, %v1819_v32  ;;  %v2279_v47 = vshll.u32 %v2278_v51, 16 }
0x176f   :  { %v1827_v60 = vsel %vm1823_vm4, 1.0, %v4982_v3  ;;  %v1824_v35 = vsel %vm1820_vm6, 1.0, %v4982_v3  ;;  %vm1821_vm8 = vcmp.gt.f32.partialorder %v5850_v57, %v1819_v32 }
0x1770   :  { %v1630_v42 = vmul.f32 0.001, %v1626_v6  ;;  %v4532_v62 = vadd.f32 -0.5, %v1827_v60  ;;  %v4529_v27 = vadd.f32 -0.5, %v1824_v35 }
0x1772   :  { %v5835_v19 = vadd.f32 %v1630_v42, %v5607_v59  ;;  %v1835_v0 = vmul.f32 5e-05, %v4532_v62  ;;  %v1832_v63 = vmul.f32 5e-05, %v4529_v27  ;;  %v1657_v59 = vcvt.f32.s32 %v5803_v55 }
0x1773   :  { %v1825_v55 = vsel %vm1821_vm8, 1.0, %v4982_v3 }
0x1774   :  { %vm1822_vm5 = vcmp.gt.f32.partialorder %v5835_v19, %v1819_v32  ;;  %1854 = vperm.xlu0 %4944, %v1835_v0   ;;  %v1658_v31 = vshll.u32 %v1657_v59, 16  ;;  %v4530_v38 = vadd.f32 -0.5, %v1825_v55 }
0x1775   :  { %v1826_v13 = vsel %vm1822_vm5, 1.0, %v4982_v3 }
0x1776   :  { %v4531_v54 = vadd.f32 -0.5, %v1826_v13  ;;  %v1659_v7 = vadd.s32 %v1658_v31, %v1656_v18  ;;  %v1833_v52 = vmul.f32 5e-05, %v4530_v38 }
0x1778   :  { %v1834_v36 = vmul.f32 5e-05, %v4531_v54  ;;  %vm1660_vm7 = vcmp.eq.s32.totalorder %v5154_v23, %v1659_v7 }
0x1779   :  { %v1661_v10 = vsel %vm1660_vm7, -inf, %v5758_v44 }
0x177a   :  { %v1662_v61 = vsel %vm505_vm15, %v1661_v10, -inf }
0x177d   :  { %1849 = vperm.xlu1 %4943, %v1834_v36  }
0x1781   :  { %1839 = vperm.xlu1 %4943, %v1832_v63  }
0x1793   :  { %1663 = vmax.xlane.f32.xlu0 %v1662_v61 }
0x17a9   :  { %1844 = vperm.xlu0 %4944, %v1833_v52  }
0x17ef   :  { %v1855_v32 = vpop.permute.xlu0 %1854 }
0x17f5   :  { %v2276_v12 = vpop.xlane.xlu1 %2275 }
0x17f6   :  { %v2277_v6 = vcvt.f32.s32 %v2276_v12 }
0x17f8   :  { %v2280_v1 = vadd.s32 %v2279_v47, %v2277_v6  ;;  %v2687_v6 = vsub.f32 0.0, %v5706_v21 }
0x17f9   :  { %v1850_v0 = vpop.permute.xlu1 %1849 }
0x17fa   :  { %vm2281_vm9 = vcmp.eq.s32.totalorder %v5154_v23, %v2280_v1  ;;  %v2581_v1 = vrot.slane %v5140_v17, 4 }
0x17fb   :  { %v5856_v37 = vsel %vm2281_vm9, -inf, %v5795_v22 }
0x17fc   :  { %v2283_v39 = vsel %vm582_vm3, %v5856_v37, -inf }
0x17fd   :  { %2284 = vmax.xlane.f32.xlu0 %v2283_v39  ;;  %v1840_v35 = vpop.permute.xlu1 %1839  ;;  %v2689_v39 = vadd.f32 %v2687_v6, %v2581_v1 }
0x181c   :  { %v1664_v60 = vpop.xlane.xlu0 %1663 }
0x181d   :  { %v1665_v42 = vadd.f32 %v1664_v60, %v5768_v53  ;;  %v2690_v60 = vmul.f32 0.001, %v2689_v39 }
0x181f   :  { %v1666_v62 = vmul.f32 0.5, %v1665_v42 }
0x1821   :  { %vm1667_vm10 = vcmp.ge.f32.partialorder %v5758_v44, %v1666_v62 }
0x1822   :  { %v1668_v15 = vsel %vm1667_vm10, 1.0, %v4982_v3 }
0x1823   :  { %v4533_v13 = vadd.f32 -0.5, %v1668_v15 }
0x1824   :  { %v1845_v22 = vpop.permute.xlu0 %1844 }
0x1825   :  { %v1860_v54 = vrot.slane %v4533_v13, %v5389_v46 }
0x1827   :  { %v1862_v36 = vmul.f32 %v1860_v54, %v1845_v22  ;;  %v1864_v27 = vmul.f32 %v1860_v54, %v1855_v32  ;;  %v1863_v63 = vmul.f32 %v1860_v54, %v1850_v0  ;;  %v1861_v59 = vmul.f32 %v1860_v54, %v1840_v35 }
0x1829   :  { %v1866_v18 = vadd.f32 %v1862_v36, %v5646_v16  ;;  %v1868_v31 = vadd.f32 %v1864_v27, %v5640_v20  ;;  %v1867_v53 = vadd.f32 %v1863_v63, %v5643_v8  ;;  %v1865_v58 = vadd.f32 %v1861_v59, %v5651_v34 }
0x182b   :  { %v1872_v7 = vmax.f32 %v1868_v31, 0.0  ;;  %v1871_v10 = vmax.f32 %v1867_v53, 0.0  ;;  %v1870_v61 = vmax.f32 %v1866_v18, 0.0  ;;  %v1869_v55 = vmax.f32 %v1865_v58, 0.0 }
0x182d   :  { %v5868_v30 = vmin.f32 %v1872_v7, 1.0  ;;  %v5871_v56 = vmin.f32 %v1871_v10, 1.0  ;;  %v5874_v38 = vmin.f32 %v1870_v61, 1.0  ;;  %v5879_v20 = vmin.f32 %v1869_v55, 1.0 }
0x182f   :  { %4799 = vmatpush3.msra.mxu1 %v5868_v30 }
0x1830   :  { %4800 = vmatprep.subr.mxu1 %v4982_v3 }
0x1831   :  { %4801 = vmatpush3.msra.mxu1 %v5871_v56 }
0x1832   :  { %4802 = vmatprep.subr.mxu1 %v4982_v3 }
0x1833   :  { %4803 = vmatpush3.msra.mxu1 %v5874_v38 }
0x1834   :  { %4804 = vmatprep.subr.mxu1 %v4982_v3 }
0x1835   :  { %4805 = vmatpush3.msra.mxu1 %v5879_v20 }
0x1836   :  { %4807 = vmatmul.mubr.msk.f32.vlgmr.msra.gmra.mxu1 %vm355_vm2, %v2039_v26  ;;  %4814 = vmatprep.subr.mxu1 %v4982_v3 }
0x1837   :  { %4815 = vmatpush3.msra.mxu1 %v5662_v40  ;;  %4822 = vmatprep.mubr.msk.f32.mxu1 %vm4983_vm1, %v4982_v3 }
0x1838   :  { %4816 = vmatprep.subr.mxu1 %v4982_v3 }
0x1839   :  { %4817 = vmatpush3.msra.mxu1 %v5671_v48 }
0x183a   :  { %4818 = vmatprep.subr.mxu1 %v4982_v3 }
0x183b   :  { %4819 = vmatpush3.msra.mxu1 %v5678_v11  ;;  %v2112_v11 = vsub.f32 0.0, %v5697_v9 }
0x183c   :  { %4820 = vmatprep.subr.mxu1 %v4982_v3 }
0x183d   :  { %4821 = vmatpush3.msra.mxu1 %v5685_v2 }
0x183e   :  { %4836 = vmatprep.subr.mxu1 %v4982_v3 }
0x1886   :  { %v5897_v8 = vpop.xlane.xlu0 %2284 }
0x1887   :  { %vm2287_vm11 = vcmp.eq.f32.partialorder %v5856_v37, %v5897_v8 }
0x1888   :  { %v2288_v16 = vsel %vm2287_vm11, %v5154_v23, 32 }
0x1889   :  { %v2289_v34 = vsel %vm582_vm3, %v2288_v16, 2147483647 }
0x188a   :  { %v2291_v40 = vshra.s32 %v2289_v34, 16  ;;  %v2290_v32 = vand.u32 65535, %v2289_v34 }
0x188c   :  { %v2293_v48 = vcvt.s32.f32 %v2291_v40  ;;  %v2292_v62 = vcvt.s32.f32 %v2290_v32 }
0x188e   :  { %2294 = vmin.xlane.f32.xlu1 %v2293_v48 }
0x18f6   :  { %v2108_v26 = vpop.f32.mrf.mxu1 }
0x18f7   :  { %v2113_v52 = vadd.f32 %v2112_v11, %v2108_v26 }
0x18f8   :  { %v4808_v51 = vpop.f32.mrf.mxu1 }
0x18f9   :  { %v2114_v2 = vmul.f32 0.0125, %v2113_v52 }
0x18fb   :  { %v5905_v12 = vadd.f32 %v2114_v2, %v5697_v9  ;;  %v5914_v9 = vadd.f32 %v2690_v60, %v5706_v21 }
0x18fd   :  { %v2116_v47 = vsel %vm505_vm15, %v5905_v12, -inf  ;;  %v2756_v15 = vsel %vm582_vm3, %v5914_v9, -inf }
0x18fe   :  { %2117 = vmax.xlane.f32.xlu1 %v2116_v47 }
0x1917   :  { %v2295_v42 = vpop.xlane.xlu1 %2294 }
0x1918   :  { %vm2296_vm12 = vcmp.eq.f32.partialorder %v2293_v48, %v2295_v42  ;;  %v2301_v54 = vcvt.f32.s32 %v2295_v42 }
0x1919   :  { %v2297_v0 = vsel %vm2296_vm12, %v2292_v62, inf }
0x191a   :  { %2298 = vmin.xlane.f32.xlu0 %v2297_v0  ;;  %v2302_v36 = vshll.u32 %v2301_v54, 16 }
0x191e   :  { %2757 = vmax.xlane.f32.xlu0 %v2756_v15 }
0x1987   :  { %v5918_v13 = vpop.xlane.xlu1 %2117 }
0x1988   :  { %vm2119_vm14 = vcmp.eq.f32.partialorder %v5905_v12, %v5918_v13 }
0x1989   :  { %v2120_v35 = vsel %vm2119_vm14, %v5154_v23, 4 }
0x198a   :  { %v2121_v59 = vsel %vm505_vm15, %v2120_v35, 2147483647 }
0x198b   :  { %v2123_v7 = vshra.s32 %v2121_v59, 16  ;;  %v2122_v2 = vand.u32 65535, %v2121_v59 }
0x198d   :  { %v2125_v16 = vcvt.s32.f32 %v2123_v7  ;;  %v2124_v39 = vcvt.s32.f32 %v2122_v2 }
0x19a3   :  { %v2299_v22 = vpop.xlane.xlu0 %2298 }
0x19a4   :  { %v2300_v27 = vcvt.f32.s32 %v2299_v22 }
0x19a6   :  { %v2303_v63 = vadd.s32 %v2302_v36, %v2300_v27 }
0x19a7   :  { %v5924_v18 = vpop.xlane.xlu0 %2757 }
0x19a8   :  { %vm2760_vm4 = vcmp.eq.f32.partialorder %v5914_v9, %v5924_v18  ;;  %vm2304_vm5 = vcmp.eq.s32.totalorder %v5154_v23, %v2303_v63 }
0x19a9   :  { %v2761_v31 = vsel %vm2760_vm4, %v5154_v23, 32  ;;  %v2305_v53 = vsel %vm2304_vm5, -inf, %v5856_v37 }
0x19aa   :  { %v2306_v10 = vsel %vm582_vm3, %v2305_v53, -inf  ;;  %v2762_v58 = vsel %vm582_vm3, %v2761_v31, 2147483647 }
0x19ab   :  { %2307 = vmax.xlane.f32.xlu0 %v2306_v10  ;;  %v2764_v61 = vshra.s32 %v2762_v58, 16  ;;  %v2763_v40 = vand.u32 65535, %v2762_v58 }
0x19ad   :  { %v2766_v55 = vcvt.s32.f32 %v2764_v61  ;;  %v2765_v52 = vcvt.s32.f32 %v2763_v40 }
0x19af   :  { %2767 = vmin.xlane.f32.xlu1 %v2766_v55  ;;  %2126 = vmin.xlane.f32.xlu0 %v2125_v16 }
0x1a34   :  { %v5933_v34 = vpop.xlane.xlu0 %2307 }
0x1a35   :  { %vm2310_vm6 = vcmp.eq.f32.partialorder %v2305_v53, %v5933_v34 }
0x1a36   :  { %v2311_v48 = vsel %vm2310_vm6, %v5154_v23, 32 }
0x1a37   :  { %v2312_v37 = vsel %vm582_vm3, %v2311_v48, 2147483647 }
0x1a38   :  { %v2127_v11 = vpop.xlane.xlu0 %2126  ;;  %v2768_v26 = vpop.xlane.xlu1 %2767  ;;  %v2314_v51 = vshra.s32 %v2312_v37, 16  ;;  %v2313_v42 = vand.u32 65535, %v2312_v37 }
0x1a39   :  { %vm2769_vm7 = vcmp.eq.f32.partialorder %v2766_v55, %v2768_v26  ;;  %vm2128_vm8 = vcmp.eq.f32.partialorder %v2125_v16, %v2127_v11  ;;  %v2774_v60 = vcvt.f32.s32 %v2768_v26  ;;  %v2133_v0 = vcvt.f32.s32 %v2127_v11 }
0x1a3a   :  { %v2770_v47 = vsel %vm2769_vm7, %v2765_v52, inf  ;;  %v2316_v6 = vcvt.s32.f32 %v2314_v51  ;;  %v2129_v32 = vsel %vm2128_vm8, %v2124_v39, inf  ;;  %v2315_v22 = vcvt.s32.f32 %v2313_v42 }
0x1a3b   :  { %2771 = vmin.xlane.f32.xlu1 %v2770_v47  ;;  %v2775_v15 = vshll.u32 %v2774_v60, 16  ;;  %v2134_v59 = vshll.u32 %v2133_v0, 16 }
0x1a3c   :  { %2317 = vmin.xlane.f32.xlu0 %v2316_v6 }
0x1a3f   :  { %2130 = vmin.xlane.f32.xlu1 %v2129_v32 }
0x1ac4   :  { %v2772_v62 = vpop.xlane.xlu1 %2771 }
0x1ac5   :  { %v2773_v54 = vcvt.f32.s32 %v2772_v62  ;;  %v2318_v35 = vpop.xlane.xlu0 %2317  ;;  %v2178_v62 = vsub.f32 0.0, %v5758_v44 }
0x1ac6   :  { %vm2319_vm9 = vcmp.eq.f32.partialorder %v2316_v6, %v2318_v35  ;;  %v2324_v16 = vcvt.f32.s32 %v2318_v35 }
0x1ac7   :  { %v2776_v36 = vadd.s32 %v2775_v15, %v2773_v54  ;;  %v2320_v27 = vsel %vm2319_vm9, %v2315_v22, inf }
0x1ac8   :  { %2321 = vmin.xlane.f32.xlu0 %v2320_v27  ;;  %v2131_v63 = vpop.xlane.xlu1 %2130  ;;  %v2325_v48 = vshll.u32 %v2324_v16, 16 }
0x1ac9   :  { %v2132_v31 = vcvt.f32.s32 %v2131_v63  ;;  %vm2777_vm10 = vcmp.eq.s32.totalorder %v5154_v23, %v2776_v36 }
0x1aca   :  { %v5940_v7 = vsel %vm2777_vm10, -inf, %v5914_v9 }
0x1acb   :  { %v2135_v10 = vadd.s32 %v2134_v59, %v2132_v31  ;;  %v2779_v58 = vsel %vm582_vm3, %v5940_v7, -inf }
0x1acc   :  { %2780 = vmax.xlane.f32.xlu1 %v2779_v58 }
0x1acd   :  { %vm2136_vm11 = vcmp.eq.s32.totalorder %v5154_v23, %v2135_v10 }
0x1ace   :  { %v2137_v61 = vsel %vm2136_vm11, -inf, %v5905_v12 }
0x1acf   :  { %v2138_v55 = vsel %vm505_vm15, %v2137_v61, -inf }
0x1ad0   :  { %2139 = vmax.xlane.f32.xlu0 %v2138_v55 }
0x1b51   :  { %v2322_v40 = vpop.xlane.xlu0 %2321 }
0x1b52   :  { %v2323_v37 = vcvt.f32.s32 %v2322_v40 }
0x1b54   :  { %v2326_v11 = vadd.s32 %v2325_v48, %v2323_v37  ;;  %v2036_v48 = vrot.slane %v5807_v14, 5 }
0x1b55   :  { %v5947_v26 = vpop.xlane.xlu1 %2780 }
0x1b56   :  { %vm2783_vm12 = vcmp.eq.f32.partialorder %v5940_v7, %v5947_v26  ;;  %vm2327_vm14 = vcmp.eq.s32.totalorder %v5154_v23, %v2326_v11  ;;  %v2038_v11 = vadd.f32 %v2036_v48, %v5333_v28 }
0x1b57   :  { %v2784_v52 = vsel %vm2783_vm12, %v5154_v23, 32  ;;  %v5953_v51 = vsel %vm2327_vm14, -inf, %v2305_v53 }
0x1b58   :  { %v2329_v2 = vsel %vm582_vm3, %v5953_v51, -inf  ;;  %v2785_v47 = vsel %vm582_vm3, %v2784_v52, 2147483647 }
0x1b59   :  { %2330 = vmax.xlane.f32.xlu1 %v2329_v2  ;;  %v2140_v6 = vpop.xlane.xlu0 %2139  ;;  %v2787_v39 = vshra.s32 %v2785_v47, 16  ;;  %v2786_v22 = vand.u32 65535, %v2785_v47 }
0x1b5a   :  { %v2141_v32 = vadd.f32 %v2140_v6, %v5918_v13 }
0x1b5b   :  { %v2789_v60 = vcvt.s32.f32 %v2787_v39  ;;  %v2788_v59 = vcvt.s32.f32 %v2786_v22  ;;  %v2492_v39 = vmul.f32 0.9, %v5777_v5 }
0x1b5c   :  { %v2142_v42 = vmul.f32 0.5, %v2141_v32 }
0x1b5d   :  { %2790 = vmin.xlane.f32.xlu0 %v2789_v60 }
0x1b5e   :  { %vm2143_vm4 = vcmp.ge.f32.partialorder %v5905_v12, %v2142_v42 }
0x1b5f   :  { %v2144_v53 = vsel %vm2143_vm4, 1.0, %v4982_v3 }
0x1b60   :  { %v2179_v0 = vadd.f32 %v2178_v62, %v2144_v53  ;;  %4812 = vmatmul.mubr.msk.f32.vlgmr.msra.gmra.mxu0 %vm791_vm0, %v2144_v53 }
0x1b61   :  { %4833 = vmatprep.mubr.msk.f32.mxu0 %vm4983_vm1, %v4982_v3 }
0x1b62   :  { %v2180_v15 = vmul.f32 0.001, %v2179_v0 }
0x1b64   :  { %v5966_v54 = vadd.f32 %v2180_v15, %v5758_v44 }
0x1b66   :  { %v2182_v13 = vsel %vm505_vm15, %v5966_v54, -inf }
0x1b67   :  { %2183 = vmax.xlane.f32.xlu1 %v2182_v13 }
0x1be2   :  { %v5970_v35 = vpop.xlane.xlu1 %2330 }
0x1be3   :  { %vm2333_vm5 = vcmp.eq.f32.partialorder %v5953_v51, %v5970_v35 }
0x1be4   :  { %v2334_v36 = vsel %vm2333_vm5, %v5154_v23, 32 }
0x1be5   :  { %v2335_v27 = vsel %vm582_vm3, %v2334_v36, 2147483647 }
0x1be6   :  { %v2791_v63 = vpop.xlane.xlu0 %2790  ;;  %v2337_v31 = vshra.s32 %v2335_v27, 16  ;;  %v2336_v5 = vand.u32 65535, %v2335_v27  ;;  %v2211_v27 = vsel %vm582_vm3, %v5706_v21, 0.0 }
0x1be7   :  { %vm2792_vm6 = vcmp.eq.f32.partialorder %v2789_v60, %v2791_v63  ;;  %v2797_v14 = vcvt.f32.s32 %v2791_v63 }
0x1be8   :  { %v2793_v44 = vsel %vm2792_vm6, %v2788_v59, inf  ;;  %v2339_v10 = vcvt.s32.f32 %v2337_v31  ;;  %v2338_v13 = vcvt.s32.f32 %v2336_v5 }
0x1be9   :  { %2794 = vmin.xlane.f32.xlu0 %v2793_v44  ;;  %v2798_v53 = vshll.u32 %v2797_v14, 16  ;;  %v2240_v14 = vadd.f32 %v5739_v49, %v5716_v41  ;;  %v2150_v41 = vsub.f32 0.0, %v5838_v4 }
0x1bea   :  { %2340 = vmin.xlane.f32.xlu1 %v2339_v10 }
0x1beb   :  { %v2263_v5 = vadd.f32 %v5809_v33, %v2240_v14 }
0x1bf0   :  { %v5976_v58 = vpop.xlane.xlu1 %2183 }
0x1bf1   :  { %vm2185_vm7 = vcmp.eq.f32.partialorder %v5966_v54, %v5976_v58 }
0x1bf2   :  { %v2186_v61 = vsel %vm2185_vm7, %v5154_v23, 4 }
0x1bf3   :  { %v2187_v55 = vsel %vm505_vm15, %v2186_v61, 2147483647 }
0x1bf4   :  { %v2189_v16 = vshra.s32 %v2187_v55, 16  ;;  %v2188_v31 = vand.u32 65535, %v2187_v55 }
0x1bf6   :  { %v2191_v40 = vcvt.s32.f32 %v2189_v16 }
0x1bf8   :  { %2192 = vmin.xlane.f32.xlu0 %v2191_v40 }
0x1c20   :  { %v2488_v37 = vpop.f32.mrf.mxu0 }
0x1c21   :  { %v2494_v52 = vrot.slane %v2488_v37, 5 }
0x1c22   :  { %v4813_v2 = vpop.f32.mrf.mxu0 }
0x1c23   :  { %v2496_v47 = vadd.f32 %v2494_v52, %v2038_v11 }
0x1c25   :  { %v2497_v6 = vmul.f32 0.1, %v2496_v47 }
0x1c27   :  { %v2499_v32 = vrot.slane %v2497_v6, 3 }
0x1c29   :  { %v2501_v60 = vadd.f32 %v2499_v32, %v2492_v39 }
0x1c2b   :  { %v5985_v42 = vmax.f32 %v2501_v60, 0.0 }
0x1c2d   :  { %2503 = vst.msk [vmem:[#allocation2 + $0x3] sm:$0x1] %vm582_vm3, %v5985_v42  ;;  %4823 = vmatmul.mubr.msk.f32.vlgmr.msra.gmra.mxu1 %vm355_vm2, %v5985_v42 }
0x1c2e   :  { %4837 = vmatpush3.msk.msra.mxu1 %vm795_vm13, %v5786_v45  ;;  %4838 = vmatprep.mubr.msk.f32.mxu1 %vm4983_vm1, %v4982_v3 }
0x1c2f   :  { %4852 = vmatprep.subr.mxu1 %v4982_v3 }
0x1c72   :  { %v2795_v62 = vpop.xlane.xlu0 %2794 }
0x1c73   :  { %v2796_v0 = vcvt.f32.s32 %v2795_v62  ;;  %v2341_v15 = vpop.xlane.xlu1 %2340 }
0x1c74   :  { %vm2342_vm8 = vcmp.eq.f32.partialorder %v2339_v10, %v2341_v15  ;;  %v2347_v61 = vcvt.f32.s32 %v2341_v15 }
0x1c75   :  { %v2799_v22 = vadd.s32 %v2798_v53, %v2796_v0  ;;  %v2343_v36 = vsel %vm2342_vm8, %v2338_v13, inf  ;;  %v2153_v0 = vsub.f32 0.0, %v5828_v43 }
0x1c76   :  { %2344 = vmin.xlane.f32.xlu1 %v2343_v36  ;;  %v2348_v48 = vshll.u32 %v2347_v61, 16 }
0x1c77   :  { %vm2800_vm9 = vcmp.eq.s32.totalorder %v5154_v23, %v2799_v22 }
0x1c78   :  { %v5998_v45 = vsel %vm2800_vm9, -inf, %v5940_v7  ;;  %v2190_v7 = vcvt.s32.f32 %v2188_v31 }
0x1c79   :  { %v2802_v59 = vsel %vm582_vm3, %v5998_v45, -inf }
0x1c7a   :  { %2803 = vmax.xlane.f32.xlu0 %v2802_v59  ;;  %2212 = vadd.xlane.f32.xlu1 %v2211_v27 }
0x1c81   :  { %v6006_v63 = vpop.xlane.xlu0 %2192 }
0x1c82   :  { %vm2194_vm10 = vcmp.eq.f32.partialorder %v2191_v40, %v6006_v63 }
0x1c83   :  { %v2195_v44 = vsel %vm2194_vm10, %v2190_v7, inf }
0x1c8b   :  { %2160 = vrot.lane.b32.xlu1 %v5385_v25, %s4987_s1 }
0x1c8f   :  { %2156 = vrot.lane.b32.xlu1 %v5387_v24, %s4987_s1 }
0x1cb3   :  { %2196 = vmin.xlane.f32.xlu1 %v2195_v44 }
0x1cc4   :  { %2154 = vrot.lane.b32.xlu1 %v5399_v29, %s4987_s1 }
0x1ced   :  { %v6010_v10 = vpop.f32.mrf.mxu1 }
0x1cef   :  { %v4824_v21 = vpop.f32.mrf.mxu1 }
0x1cff   :  { %v2345_v16 = vpop.xlane.xlu1 %2344 }
0x1d00   :  { %v2346_v37 = vcvt.f32.s32 %v2345_v16  ;;  %v2152_v16 = vsub.f32 0.0, %v5835_v19 }
0x1d02   :  { %v2349_v11 = vadd.s32 %v2348_v48, %v2346_v37 }
0x1d03   :  { %v6012_v52 = vpop.xlane.xlu0 %2803  ;;  %v2213_v32 = vpop.xlane.xlu1 %2212 }
0x1d04   :  { %vm2806_vm11 = vcmp.eq.f32.partialorder %v5998_v45, %v6012_v52  ;;  %vm2350_vm12 = vcmp.eq.s32.totalorder %v5154_v23, %v2349_v11 }
0x1d05   :  { %v2807_v55 = vsel %vm2806_vm11, %v5154_v23, 32  ;;  %v2351_v40 = vsel %vm2350_vm12, -inf, %v5953_v51  ;;  %v2286_v51 = vadd.f32 %v5897_v8, %v2263_v5 }
0x1d06   :  { %v2352_v2 = vsel %vm582_vm3, %v2351_v40, -inf  ;;  %v2808_v47 = vsel %vm582_vm3, %v2807_v55, 2147483647 }
0x1d07   :  { %2353 = vmax.xlane.f32.xlu0 %v2352_v2  ;;  %v2810_v6 = vshra.s32 %v2808_v47, 16  ;;  %v2161_v60 = vpop.permute.xlu1 %2160  ;;  %v2309_v53 = vadd.f32 %v5933_v34, %v2286_v51  ;;  %v2809_v59 = vand.u32 65535, %v2808_v47 }
0x1d08   :  { %v2169_v22 = vadd.f32 %v2161_v60, %v2153_v0 }
0x1d09   :  { %v2812_v39 = vcvt.s32.f32 %v2810_v6  ;;  %v2332_v13 = vadd.f32 %v5970_v35, %v2309_v53  ;;  %v2811_v33 = vcvt.s32.f32 %v2809_v59 }
0x1d0a   :  { %v2173_v31 = vmul.f32 0.001, %v2169_v22  ;;  %v2151_v22 = vsub.f32 0.0, %v5850_v57 }
0x1d0b   :  { %2813 = vmin.xlane.f32.xlu0 %v2812_v39  ;;  %v2157_v62 = vpop.permute.xlu1 %2156 }
0x1d0c   :  { %v6031_v61 = vadd.f32 %v2173_v31, %v5828_v43  ;;  %v2167_v59 = vadd.f32 %v2157_v62, %v2151_v22 }
0x1d21   :  { %2158 = vrot.lane.b32.xlu0 %v5406_v50, %s4987_s1 }
0x1d3c   :  { %v2197_v15 = vpop.xlane.xlu1 %2196 }
0x1d3d   :  { %v2198_v53 = vcvt.f32.s32 %v2197_v15 }
0x1d40   :  { %v2155_v7 = vpop.permute.xlu1 %2154 }
0x1d41   :  { %v2166_v8 = vadd.f32 %v2155_v7, %v2150_v41 }
0x1d43   :  { %v2170_v11 = vmul.f32 0.001, %v2166_v8 }
0x1d45   :  { %v6041_v43 = vadd.f32 %v2170_v11, %v5838_v4 }
0x1d90   :  { %v2354_v36 = vpop.xlane.xlu0 %2353 }
0x1d91   :  { %v2355_v27 = vadd.f32 %v2354_v36, %v2332_v13 }
0x1d93   :  { %v2356_v44 = vsub.f32 %v2213_v32, %v2355_v27  ;;  %v2171_v27 = vmul.f32 0.001, %v2167_v59 }
0x1d94   :  { %v2814_v49 = vpop.xlane.xlu0 %2813 }
0x1d95   :  { %v2357_v21 = vmul.f32 0.04, %v2356_v44  ;;  %vm2815_vm14 = vcmp.eq.f32.partialorder %v2812_v39, %v2814_v49  ;;  %v6053_v31 = vadd.f32 %v2171_v27, %v5850_v57  ;;  %v2820_v44 = vcvt.f32.s32 %v2814_v49 }
0x1d96   :  { %v2816_v34 = vsel %vm2815_vm14, %v2811_v33, inf }
0x1d97   :  { %v2361_v35 = vrot.slane %v2357_v21, %v5389_v46  ;;  %2817 = vmin.xlane.f32.xlu1 %v2816_v34  ;;  %v2821_v33 = vshll.u32 %v2820_v44, 16 }
0x1d98   :  { %v2159_v48 = vpop.permute.xlu0 %2158 }
0x1d99   :  { %v2168_v37 = vadd.f32 %v2159_v48, %v2152_v16  ;;  %vm2365_vm4 = vcmp.gt.f32.partialorder %v6031_v61, %v2361_v35  ;;  %vm2362_vm6 = vcmp.gt.f32.partialorder %v6041_v43, %v2361_v35  ;;  %vm2363_vm8 = vcmp.gt.f32.partialorder %v6053_v31, %v2361_v35 }
0x1d9a   :  { %v2369_v55 = vsel %vm2365_vm4, 1.0, %v4982_v3  ;;  %v2366_v60 = vsel %vm2362_vm6, 1.0, %v4982_v3 }
0x1d9b   :  { %v2172_v40 = vmul.f32 0.001, %v2168_v37  ;;  %v4541_v2 = vadd.f32 -0.5, %v2369_v55  ;;  %v4538_v5 = vadd.f32 -0.5, %v2366_v60 }
0x1d9d   :  { %v6038_v47 = vadd.f32 %v2172_v40, %v5835_v19  ;;  %v2377_v6 = vmul.f32 5e-05, %v4541_v2  ;;  %v2374_v51 = vmul.f32 5e-05, %v4538_v5  ;;  %v2199_v19 = vcvt.f32.s32 %v6006_v63 }
0x1d9e   :  { %v2367_v63 = vsel %vm2363_vm8, 1.0, %v4982_v3 }
0x1d9f   :  { %vm2364_vm5 = vcmp.gt.f32.partialorder %v6038_v47, %v2361_v35  ;;  %2396 = vperm.xlu0 %4944, %v2377_v6   ;;  %v2200_v4 = vshll.u32 %v2199_v19, 16  ;;  %v4539_v15 = vadd.f32 -0.5, %v2367_v63 }
0x1da0   :  { %v2368_v39 = vsel %vm2364_vm5, 1.0, %v4982_v3 }
0x1da1   :  { %v4540_v32 = vadd.f32 -0.5, %v2368_v39  ;;  %v2201_v0 = vadd.s32 %v2200_v4, %v2198_v53  ;;  %v2375_v7 = vmul.f32 5e-05, %v4539_v15 }
0x1da3   :  { %v2376_v14 = vmul.f32 5e-05, %v4540_v32  ;;  %vm2202_vm7 = vcmp.eq.s32.totalorder %v5154_v23, %v2201_v0 }
0x1da4   :  { %v2203_v13 = vsel %vm2202_vm7, -inf, %v5966_v54 }
0x1da5   :  { %v2204_v36 = vsel %vm505_vm15, %v2203_v13, -inf }
0x1da8   :  { %2391 = vperm.xlu1 %4943, %v2376_v14  }
0x1dac   :  { %2381 = vperm.xlu1 %4943, %v2374_v51  }
0x1dbe   :  { %2205 = vmax.xlane.f32.xlu0 %v2204_v36 }
0x1dd4   :  { %2386 = vperm.xlu0 %4944, %v2375_v7   ;;  %v2654_v7 = vsub.f32 0.0, %v5905_v12 }
0x1e1a   :  { %v2397_v34 = vpop.permute.xlu0 %2396 }
0x1e20   :  { %v2818_v41 = vpop.xlane.xlu1 %2817 }
0x1e21   :  { %v2819_v21 = vcvt.f32.s32 %v2818_v41 }
0x1e23   :  { %v2822_v8 = vadd.s32 %v2821_v33, %v2819_v21 }
0x1e24   :  { %v2392_v37 = vpop.permute.xlu1 %2391 }
0x1e25   :  { %vm2823_vm9 = vcmp.eq.s32.totalorder %v5154_v23, %v2822_v8 }
0x1e26   :  { %v6059_v62 = vsel %vm2823_vm9, -inf, %v5998_v45 }
0x1e27   :  { %v2825_v57 = vsel %vm582_vm3, %v6059_v62, -inf }
0x1e28   :  { %2826 = vmax.xlane.f32.xlu0 %v2825_v57  ;;  %v2382_v40 = vpop.permute.xlu1 %2381 }
0x1e47   :  { %v2206_v35 = vpop.xlane.xlu0 %2205 }
0x1e48   :  { %v2207_v16 = vadd.f32 %v2206_v35, %v5976_v58  ;;  %v3123_v35 = vrot.slane %v5140_v17, 5 }
0x1e4a   :  { %v2208_v48 = vmul.f32 0.5, %v2207_v16 }
0x1e4c   :  { %vm2209_vm10 = vcmp.ge.f32.partialorder %v5966_v54, %v2208_v48 }
0x1e4d   :  { %v2210_v49 = vsel %vm2209_vm10, 1.0, %v4982_v3 }
0x1e4e   :  { %v4542_v11 = vadd.f32 -0.5, %v2210_v49 }
0x1e4f   :  { %v2387_v45 = vpop.permute.xlu0 %2386 }
0x1e50   :  { %v2402_v55 = vrot.slane %v4542_v11, %v5389_v46 }
0x1e52   :  { %v2404_v2 = vmul.f32 %v2402_v55, %v2387_v45  ;;  %v2406_v6 = vmul.f32 %v2402_v55, %v2397_v34  ;;  %v2405_v39 = vmul.f32 %v2402_v55, %v2392_v37  ;;  %v2403_v32 = vmul.f32 %v2402_v55, %v2382_v40 }
0x1e53   :  { %v3229_v34 = vsub.f32 0.0, %v5914_v9 }
0x1e54   :  { %v2408_v60 = vadd.f32 %v2404_v2, %v5874_v38  ;;  %v2410_v14 = vadd.f32 %v2406_v6, %v5868_v30  ;;  %v2409_v58 = vadd.f32 %v2405_v39, %v5871_v56  ;;  %v2407_v19 = vadd.f32 %v2403_v32, %v5879_v20  ;;  %v6093_v56 = vld [vmem:[%s6702_s8 + $0x18] sm:$0xff]  ;;  %v6102_v38 = vld [vmem:[%s6702_s8 + $0x10] sm:$0xff]  ;;  %v6109_v20 = vld [vmem:[%s6702_s8 + $0x8] sm:$0xff] }
0x1e55   :  { %v3231_v16 = vadd.f32 %v3229_v34, %v3123_v35 }
0x1e56   :  { %v2414_v5 = vmax.f32 %v2410_v14, 0.0  ;;  %v2413_v51 = vmax.f32 %v2409_v58, 0.0  ;;  %v2412_v53 = vmax.f32 %v2408_v60, 0.0  ;;  %v2411_v13 = vmax.f32 %v2407_v19, 0.0 }
0x1e57   :  { %v3232_v37 = vmul.f32 0.001, %v3231_v16 }
0x1e58   :  { %v6071_v4 = vmin.f32 %v2414_v5, 1.0  ;;  %v6074_v0 = vmin.f32 %v2413_v51, 1.0  ;;  %v6077_v22 = vmin.f32 %v2412_v53, 1.0  ;;  %v6082_v30 = vmin.f32 %v2411_v13, 1.0 }
0x1e5a   :  { %4826 = vmatpush3.msra.mxu0 %v6071_v4 }
0x1e5b   :  { %4827 = vmatprep.subr.mxu0 %v4982_v3 }
0x1e5c   :  { %4828 = vmatpush3.msra.mxu0 %v6074_v0 }
0x1e5d   :  { %4829 = vmatprep.subr.mxu0 %v4982_v3 }
0x1e5e   :  { %4830 = vmatpush3.msra.mxu0 %v6077_v22 }
0x1e5f   :  { %4831 = vmatprep.subr.mxu0 %v4982_v3 }
0x1e60   :  { %4832 = vmatpush3.msra.mxu0 %v6082_v30 }
0x1e61   :  { %4834 = vmatmul.mubr.msk.f32.vlgmr.msra.gmra.mxu0 %vm355_vm2, %v2581_v1  ;;  %4841 = vmatprep.subr.mxu0 %v4982_v3  ;;  %v6116_v1 = vld [vmem:[%s6702_s8] sm:$0xff] }
0x1e62   :  { %4842 = vmatpush3.msra.mxu0 %v6093_v56  ;;  %4849 = vmatprep.mubr.msk.f32.mxu0 %vm4983_vm1, %v4982_v3 }
0x1e63   :  { %4843 = vmatprep.subr.mxu0 %v4982_v3 }
0x1e64   :  { %4844 = vmatpush3.msra.mxu0 %v6102_v38 }
0x1e65   :  { %4845 = vmatprep.subr.mxu0 %v4982_v3 }
0x1e66   :  { %4846 = vmatpush3.msra.mxu0 %v6109_v20 }
0x1e67   :  { %4847 = vmatprep.subr.mxu0 %v4982_v3 }
0x1e68   :  { %4848 = vmatpush3.msra.mxu0 %v6116_v1 }
0x1e69   :  { %4863 = vmatprep.subr.mxu0 %v4982_v3 }
0x1eb1   :  { %v6120_v36 = vpop.xlane.xlu0 %2826 }
0x1eb2   :  { %vm2829_vm11 = vcmp.eq.f32.partialorder %v6059_v62, %v6120_v36 }
0x1eb3   :  { %v2830_v59 = vsel %vm2829_vm11, %v5154_v23, 32 }
0x1eb4   :  { %v2831_v27 = vsel %vm582_vm3, %v2830_v59, 2147483647 }
0x1eb5   :  { %v2833_v63 = vshra.s32 %v2831_v27, 16  ;;  %v2832_v48 = vand.u32 65535, %v2831_v27 }
0x1eb7   :  { %v2835_v15 = vcvt.s32.f32 %v2833_v63  ;;  %v2834_v11 = vcvt.s32.f32 %v2832_v48 }
0x1eb9   :  { %2836 = vmin.xlane.f32.xlu1 %v2835_v15 }
0x1f21   :  { %v2650_v44 = vpop.f32.mrf.mxu0 }
0x1f22   :  { %v2655_v41 = vadd.f32 %v2654_v7, %v2650_v44 }
0x1f23   :  { %v4835_v33 = vpop.f32.mrf.mxu0 }
0x1f24   :  { %v2656_v21 = vmul.f32 0.0125, %v2655_v41 }
0x1f26   :  { %v6128_v8 = vadd.f32 %v2656_v21, %v5905_v12  ;;  %v6137_v12 = vadd.f32 %v3232_v37, %v5914_v9 }
0x1f28   :  { %v2658_v57 = vsel %vm505_vm15, %v6128_v8, -inf  ;;  %v3298_v40 = vsel %vm582_vm3, %v6137_v12, -inf }
0x1f29   :  { %2659 = vmax.xlane.f32.xlu1 %v2658_v57 }
0x1f42   :  { %v2837_v49 = vpop.xlane.xlu1 %2836 }
0x1f43   :  { %vm2838_vm12 = vcmp.eq.f32.partialorder %v2835_v15, %v2837_v49  ;;  %v2843_v2 = vcvt.f32.s32 %v2837_v49 }
0x1f44   :  { %v2839_v55 = vsel %vm2838_vm12, %v2834_v11, inf }
0x1f45   :  { %2840 = vmin.xlane.f32.xlu0 %v2839_v55  ;;  %v2844_v32 = vshll.u32 %v2843_v2, 16 }
0x1f49   :  { %3299 = vmax.xlane.f32.xlu0 %v3298_v40 }
0x1fb2   :  { %v6141_v45 = vpop.xlane.xlu1 %2659 }
0x1fb3   :  { %vm2661_vm14 = vcmp.eq.f32.partialorder %v6128_v8, %v6141_v45 }
0x1fb4   :  { %v2662_v6 = vsel %vm2661_vm14, %v5154_v23, 4 }
0x1fb5   :  { %v2663_v58 = vsel %vm505_vm15, %v2662_v6, 2147483647 }
0x1fb6   :  { %v2665_v53 = vshra.s32 %v2663_v58, 16  ;;  %v2664_v16 = vand.u32 65535, %v2663_v58 }
0x1fb8   :  { %v2667_v15 = vcvt.s32.f32 %v2665_v53  ;;  %v2666_v49 = vcvt.s32.f32 %v2664_v16 }
0x1fce   :  { %v2841_v39 = vpop.xlane.xlu0 %2840 }
0x1fcf   :  { %v2842_v60 = vcvt.f32.s32 %v2841_v39 }
0x1fd1   :  { %v2845_v14 = vadd.s32 %v2844_v32, %v2842_v60 }
0x1fd2   :  { %v6147_v5 = vpop.xlane.xlu0 %3299 }
0x1fd3   :  { %vm3302_vm4 = vcmp.eq.f32.partialorder %v6137_v12, %v6147_v5  ;;  %vm2846_vm5 = vcmp.eq.s32.totalorder %v5154_v23, %v2845_v14 }
0x1fd4   :  { %v3303_v51 = vsel %vm3302_vm4, %v5154_v23, 32  ;;  %v2847_v19 = vsel %vm2846_vm5, -inf, %v6059_v62 }
0x1fd5   :  { %v3304_v13 = vsel %vm582_vm3, %v3303_v51, 2147483647  ;;  %v2848_v59 = vsel %vm582_vm3, %v2847_v19, -inf }
0x1fd6   :  { %2849 = vmax.xlane.f32.xlu0 %v2848_v59  ;;  %v3306_v27 = vshra.s32 %v3304_v13, 16  ;;  %v3305_v44 = vand.u32 65535, %v3304_v13 }
0x1fd8   :  { %v3308_v63 = vcvt.s32.f32 %v3306_v27  ;;  %v3307_v57 = vcvt.s32.f32 %v3305_v44 }
0x1fda   :  { %3309 = vmin.xlane.f32.xlu1 %v3308_v63  ;;  %2668 = vmin.xlane.f32.xlu0 %v2667_v15 }
0x205f   :  { %v6156_v7 = vpop.xlane.xlu0 %2849 }
0x2060   :  { %vm2852_vm6 = vcmp.eq.f32.partialorder %v2847_v19, %v6156_v7 }
0x2061   :  { %v2853_v41 = vsel %vm2852_vm6, %v5154_v23, 32 }
0x2062   :  { %v2854_v62 = vsel %vm582_vm3, %v2853_v41, 2147483647 }
0x2063   :  { %v2669_v33 = vpop.xlane.xlu0 %2668  ;;  %v3310_v21 = vpop.xlane.xlu1 %3309  ;;  %v2856_v34 = vshra.s32 %v2854_v62, 16  ;;  %v2855_v40 = vand.u32 65535, %v2854_v62 }
0x2064   :  { %vm3311_vm7 = vcmp.eq.f32.partialorder %v3308_v63, %v3310_v21  ;;  %vm2670_vm8 = vcmp.eq.f32.partialorder %v2667_v15, %v2669_v33  ;;  %v3316_v55 = vcvt.f32.s32 %v3310_v21  ;;  %v2675_v6 = vcvt.f32.s32 %v2669_v33 }
0x2065   :  { %v3312_v48 = vsel %vm3311_vm7, %v3307_v57, inf  ;;  %v2858_v37 = vcvt.s32.f32 %v2856_v34  ;;  %v2671_v11 = vsel %vm2670_vm8, %v2666_v49, inf  ;;  %v2857_v14 = vcvt.s32.f32 %v2855_v40 }
0x2066   :  { %3313 = vmin.xlane.f32.xlu1 %v3312_v48  ;;  %v3317_v39 = vshll.u32 %v3316_v55, 16  ;;  %v2676_v13 = vshll.u32 %v2675_v6, 16 }
0x2067   :  { %2859 = vmin.xlane.f32.xlu0 %v2858_v37 }
0x206a   :  { %2672 = vmin.xlane.f32.xlu1 %v2671_v11 }
0x20ef   :  { %v3314_v2 = vpop.xlane.xlu1 %3313 }
0x20f0   :  { %v3315_v32 = vcvt.f32.s32 %v3314_v2  ;;  %v2860_v60 = vpop.xlane.xlu0 %2859 }
0x20f1   :  { %vm2861_vm9 = vcmp.eq.f32.partialorder %v2858_v37, %v2860_v60  ;;  %v2866_v62 = vcvt.f32.s32 %v2860_v60 }
0x20f2   :  { %v3318_v51 = vadd.s32 %v3317_v39, %v3315_v32  ;;  %v2862_v58 = vsel %vm2861_vm9, %v2857_v14, inf  ;;  %v2720_v32 = vsub.f32 0.0, %v5966_v54 }
0x20f3   :  { %2863 = vmin.xlane.f32.xlu0 %v2862_v58  ;;  %v2673_v53 = vpop.xlane.xlu1 %2672  ;;  %v2867_v21 = vshll.u32 %v2866_v62, 16  ;;  %v2782_v58 = vadd.f32 %v5947_v26, %v5924_v18 }
0x20f4   :  { %vm3319_vm10 = vcmp.eq.s32.totalorder %v5154_v23, %v3318_v51  ;;  %v2674_v59 = vcvt.f32.s32 %v2673_v53 }
0x20f5   :  { %v6163_v27 = vsel %vm3319_vm10, -inf, %v6137_v12  ;;  %v2805_v53 = vadd.f32 %v6012_v52, %v2782_v58 }
0x20f6   :  { %v2677_v63 = vadd.s32 %v2676_v13, %v2674_v59  ;;  %v3321_v15 = vsel %vm582_vm3, %v6163_v27, -inf }
0x20f7   :  { %3322 = vmax.xlane.f32.xlu1 %v3321_v15  ;;  %v2828_v13 = vadd.f32 %v6120_v36, %v2805_v53 }
0x20f8   :  { %vm2678_vm11 = vcmp.eq.s32.totalorder %v5154_v23, %v2677_v63 }
0x20f9   :  { %v2679_v44 = vsel %vm2678_vm11, -inf, %v6128_v8  ;;  %v2851_v59 = vadd.f32 %v6156_v7, %v2828_v13 }
0x20fa   :  { %v2680_v41 = vsel %vm505_vm15, %v2679_v44, -inf }
0x20fb   :  { %2681 = vmax.xlane.f32.xlu0 %v2680_v41 }
0x217c   :  { %v2864_v33 = vpop.xlane.xlu0 %2863 }
0x217d   :  { %v2865_v57 = vcvt.f32.s32 %v2864_v33 }
0x217f   :  { %v2868_v34 = vadd.s32 %v2867_v21, %v2865_v57 }
0x2180   :  { %v6170_v16 = vpop.xlane.xlu1 %3322 }
0x2181   :  { %vm2869_vm12 = vcmp.eq.s32.totalorder %v5154_v23, %v2868_v34  ;;  %vm3325_vm14 = vcmp.eq.f32.partialorder %v6163_v27, %v6170_v16 }
0x2182   :  { %v3326_v48 = vsel %vm3325_vm14, %v5154_v23, 32  ;;  %v6176_v37 = vsel %vm2869_vm12, -inf, %v2847_v19 }
0x2183   :  { %v3327_v49 = vsel %vm582_vm3, %v3326_v48, 2147483647  ;;  %v2871_v11 = vsel %vm582_vm3, %v6176_v37, -inf  ;;  %v2578_v48 = vrot.slane %v6010_v10, 4  ;;  %v6221_v10 = vld [vmem:[%s6703_s9] sm:$0xf] }
0x2184   :  { %2872 = vmax.xlane.f32.xlu1 %v2871_v11  ;;  %v2682_v55 = vpop.xlane.xlu0 %2681  ;;  %v3329_v40 = vshra.s32 %v3327_v49, 16  ;;  %v3328_v15 = vand.u32 65535, %v3327_v49 }
0x2185   :  { %v2683_v2 = vadd.f32 %v2682_v55, %v6141_v45  ;;  %v2580_v11 = vadd.f32 %v2578_v48, %v5333_v28 }
0x2186   :  { %v3331_v6 = vcvt.s32.f32 %v3329_v40  ;;  %v3330_v33 = vcvt.s32.f32 %v3328_v15 }
0x2187   :  { %v2684_v39 = vmul.f32 0.5, %v2683_v2 }
0x2188   :  { %3332 = vmin.xlane.f32.xlu0 %v3331_v6 }
0x2189   :  { %vm2685_vm4 = vcmp.ge.f32.partialorder %v6128_v8, %v2684_v39  ;;  %v3034_v39 = vmul.f32 0.9, %v5985_v42 }
0x218a   :  { %v2686_v19 = vsel %vm2685_vm4, 1.0, %v4982_v3 }
0x218b   :  { %v2721_v60 = vadd.f32 %v2720_v32, %v2686_v19  ;;  %4839 = vmatmul.mubr.msk.f32.vlgmr.msra.gmra.mxu1 %vm791_vm0, %v2686_v19 }
0x218c   :  { %4860 = vmatprep.mubr.msk.f32.mxu1 %vm4983_vm1, %v4982_v3 }
0x218d   :  { %v2722_v14 = vmul.f32 0.001, %v2721_v60 }
0x218f   :  { %v6189_v51 = vadd.f32 %v2722_v14, %v5966_v54 }
0x2191   :  { %v2724_v45 = vsel %vm505_vm15, %v6189_v51, -inf }
0x2192   :  { %2725 = vmax.xlane.f32.xlu1 %v2724_v45 }
0x220d   :  { %v2873_v63 = vpop.xlane.xlu1 %2872 }
0x220e   :  { %v6198_v44 = vadd.f32 %v2873_v63, %v2851_v59  ;;  %vm2875_vm5 = vcmp.eq.f32.partialorder %v6176_v37, %v2873_v63 }
0x220f   :  { %v2876_v54 = vsel %vm2875_vm5, %v5154_v23, 32 }
0x2210   :  { %v2877_v41 = vsel %vm582_vm3, %v2876_v54, 2147483647 }
0x2211   :  { %v3333_v62 = vpop.xlane.xlu0 %3332  ;;  %v2879_v21 = vshra.s32 %v2877_v41, 16  ;;  %v2878_v14 = vand.u32 65535, %v2877_v41  ;;  %v2753_v41 = vsel %vm582_vm3, %v5914_v9, 0.0 }
0x2212   :  { %vm3334_vm6 = vcmp.eq.f32.partialorder %v3331_v6, %v3333_v62  ;;  %v3339_v42 = vcvt.f32.s32 %v3333_v62 }
0x2213   :  { %v3335_v18 = vsel %vm3334_vm6, %v3330_v33, inf  ;;  %v2881_v26 = vcvt.s32.f32 %v2879_v21  ;;  %v2880_v59 = vcvt.s32.f32 %v2878_v14  ;;  %v2695_v14 = vsub.f32 0.0, %v6031_v61 }
0x2214   :  { %3336 = vmin.xlane.f32.xlu0 %v3335_v18  ;;  %v3340_v58 = vshll.u32 %v3339_v42, 16 }
0x2215   :  { %2882 = vmin.xlane.f32.xlu1 %v2881_v26 }
0x221b   :  { %v6203_v52 = vpop.xlane.xlu1 %2725 }
0x221c   :  { %vm2727_vm7 = vcmp.eq.f32.partialorder %v6189_v51, %v6203_v52 }
0x221d   :  { %v2728_v36 = vsel %vm2727_vm7, %v5154_v23, 4 }
0x221e   :  { %v2729_v7 = vsel %vm505_vm15, %v2728_v36, 2147483647 }
0x221f   :  { %v2731_v57 = vshra.s32 %v2729_v7, 16  ;;  %v2730_v21 = vand.u32 65535, %v2729_v7 }
0x2221   :  { %v2733_v34 = vcvt.s32.f32 %v2731_v57 }
0x2223   :  { %2734 = vmin.xlane.f32.xlu0 %v2733_v34 }
0x224b   :  { %v3030_v49 = vpop.f32.mrf.mxu1 }
0x224c   :  { %v3036_v55 = vrot.slane %v3030_v49, 4 }
0x224d   :  { %v4840_v40 = vpop.f32.mrf.mxu1 }
0x224e   :  { %v3038_v2 = vadd.f32 %v3036_v55, %v2580_v11 }
0x2250   :  { %v3039_v6 = vmul.f32 0.1, %v3038_v2 }
0x2252   :  { %v3041_v32 = vrot.slane %v3039_v6, 4 }
0x2254   :  { %v3043_v19 = vadd.f32 %v3041_v32, %v3034_v39 }
0x2256   :  { %v6212_v60 = vmax.f32 %v3043_v19, 0.0 }
0x2258   :  { %3045 = vst.msk [vmem:[#allocation2 + $0x4] sm:$0x1] %vm582_vm3, %v6212_v60  ;;  %4850 = vmatmul.mubr.msk.f32.vlgmr.msra.gmra.mxu0 %vm355_vm2, %v6212_v60 }
0x2259   :  { %4864 = vmatpush3.msk.msra.mxu0 %vm795_vm13, %v6221_v10  ;;  %4865 = vmatprep.mubr.msk.f32.mxu0 %vm4983_vm1, %v4982_v3 }
0x225a   :  { %4879 = vmatprep.subr.mxu0 %v4982_v3 }
0x229d   :  { %v3337_v45 = vpop.xlane.xlu0 %3336 }
0x229e   :  { %v3338_v53 = vcvt.f32.s32 %v3337_v45  ;;  %v2883_v13 = vpop.xlane.xlu1 %2882 }
0x229f   :  { %vm2884_vm8 = vcmp.eq.f32.partialorder %v2881_v26, %v2883_v13  ;;  %v2889_v36 = vcvt.f32.s32 %v2883_v13 }
0x22a0   :  { %v3341_v63 = vadd.s32 %v3340_v58, %v3338_v53  ;;  %v2885_v15 = vsel %vm2884_vm8, %v2880_v59, inf }
0x22a1   :  { %2886 = vmin.xlane.f32.xlu1 %v2885_v15  ;;  %v2890_v48 = vshll.u32 %v2889_v36, 16 }
0x22a2   :  { %vm3342_vm9 = vcmp.eq.s32.totalorder %v5154_v23, %v3341_v63 }
0x22a3   :  { %v6230_v54 = vsel %vm3342_vm9, -inf, %v6163_v27  ;;  %v2732_v27 = vcvt.s32.f32 %v2730_v21 }
0x22a4   :  { %v3344_v33 = vsel %vm582_vm3, %v6230_v54, -inf }
0x22a5   :  { %3345 = vmax.xlane.f32.xlu0 %v3344_v33  ;;  %2754 = vadd.xlane.f32.xlu1 %v2753_v41  ;;  %v2692_v33 = vsub.f32 0.0, %v6041_v43 }
0x22ac   :  { %v6238_v62 = vpop.xlane.xlu0 %2734 }
0x22ad   :  { %vm2736_vm10 = vcmp.eq.f32.partialorder %v2733_v34, %v6238_v62 }
0x22ae   :  { %v2737_v18 = vsel %vm2736_vm10, %v2732_v27, inf }
0x22b6   :  { %2702 = vrot.lane.b32.xlu1 %v5385_v25, %s4988_s29 }
0x22ba   :  { %2698 = vrot.lane.b32.xlu1 %v5387_v24, %s4988_s29 }
0x22de   :  { %2738 = vmin.xlane.f32.xlu1 %v2737_v18 }
0x22ef   :  { %2696 = vrot.lane.b32.xlu1 %v5399_v29, %s4988_s29 }
0x2318   :  { %v6242_v26 = vpop.f32.mrf.mxu0 }
0x231a   :  { %v4851_v9 = vpop.f32.mrf.mxu0 }
0x232a   :  { %v2887_v57 = vpop.xlane.xlu1 %2886 }
0x232b   :  { %v2888_v49 = vcvt.f32.s32 %v2887_v57 }
0x232d   :  { %v2891_v11 = vadd.s32 %v2890_v48, %v2888_v49  ;;  %v2694_v48 = vsub.f32 0.0, %v6038_v47 }
0x232e   :  { %v6244_v55 = vpop.xlane.xlu0 %3345  ;;  %v2755_v32 = vpop.xlane.xlu1 %2754 }
0x232f   :  { %vm3348_vm11 = vcmp.eq.f32.partialorder %v6230_v54, %v6244_v55  ;;  %vm2892_vm12 = vcmp.eq.s32.totalorder %v5154_v23, %v2891_v11 }
0x2330   :  { %v3349_v7 = vsel %vm3348_vm11, %v5154_v23, 32  ;;  %v2893_v34 = vsel %vm2892_vm12, -inf, %v6176_v37 }
0x2331   :  { %v3350_v40 = vsel %vm582_vm3, %v3349_v7, 2147483647  ;;  %v2894_v2 = vsel %vm582_vm3, %v2893_v34, -inf }
0x2332   :  { %2895 = vmax.xlane.f32.xlu0 %v2894_v2  ;;  %v3352_v6 = vshra.s32 %v3350_v40, 16  ;;  %v2703_v19 = vpop.permute.xlu1 %2702  ;;  %v3351_v13 = vand.u32 65535, %v3350_v40 }
0x2333   :  { %v2711_v58 = vadd.f32 %v2703_v19, %v2695_v14 }
0x2334   :  { %v3354_v39 = vcvt.s32.f32 %v3352_v6  ;;  %v3353_v21 = vcvt.s32.f32 %v3351_v13 }
0x2335   :  { %v2715_v59 = vmul.f32 0.001, %v2711_v58 }
0x2336   :  { %3355 = vmin.xlane.f32.xlu0 %v3354_v39  ;;  %v2699_v42 = vpop.permute.xlu1 %2698 }
0x2337   :  { %v6258_v36 = vadd.f32 %v2715_v59, %v6031_v61 }
0x234c   :  { %2700 = vrot.lane.b32.xlu0 %v5406_v50, %s4988_s29 }
0x2367   :  { %v2739_v45 = vpop.xlane.xlu1 %2738 }
0x2368   :  { %v2740_v13 = vcvt.f32.s32 %v2739_v45 }
0x236b   :  { %v2697_v63 = vpop.permute.xlu1 %2696 }
0x236c   :  { %v2708_v18 = vadd.f32 %v2697_v63, %v2692_v33  ;;  %v2693_v63 = vsub.f32 0.0, %v6053_v31 }
0x236e   :  { %v2712_v11 = vmul.f32 0.001, %v2708_v18  ;;  %v2709_v33 = vadd.f32 %v2699_v42, %v2693_v63 }
0x2370   :  { %v6268_v61 = vadd.f32 %v2712_v11, %v6041_v43 }
0x23bb   :  { %v2896_v53 = vpop.xlane.xlu0 %2895 }
0x23bc   :  { %v2897_v37 = vadd.f32 %v2896_v53, %v6198_v44 }
0x23be   :  { %v2898_v15 = vsub.f32 %v2755_v32, %v2897_v37 }
0x23bf   :  { %v3356_v41 = vpop.xlane.xlu0 %3355 }
0x23c0   :  { %v2899_v27 = vmul.f32 0.04, %v2898_v15  ;;  %vm3357_vm14 = vcmp.eq.f32.partialorder %v3354_v39, %v3356_v41 }
0x23c1   :  { %v3358_v9 = vsel %vm3357_vm14, %v3353_v21, inf  ;;  %v2713_v21 = vmul.f32 0.001, %v2709_v33 }
0x23c2   :  { %v2903_v57 = vrot.slane %v2899_v27, %v5389_v46  ;;  %3359 = vmin.xlane.f32.xlu1 %v3358_v9  ;;  %v3362_v9 = vcvt.f32.s32 %v3356_v41 }
0x23c3   :  { %v2701_v44 = vpop.permute.xlu0 %2700  ;;  %v6280_v27 = vadd.f32 %v2713_v21, %v6053_v31 }
0x23c4   :  { %v2710_v49 = vadd.f32 %v2701_v44, %v2694_v48  ;;  %vm2907_vm4 = vcmp.gt.f32.partialorder %v6258_v36, %v2903_v57  ;;  %vm2904_vm6 = vcmp.gt.f32.partialorder %v6268_v61, %v2903_v57  ;;  %v3363_v44 = vshll.u32 %v3362_v9, 16 }
0x23c5   :  { %v2911_v7 = vsel %vm2907_vm4, 1.0, %v4982_v3  ;;  %v2908_v19 = vsel %vm2904_vm6, 1.0, %v4982_v3  ;;  %vm2905_vm8 = vcmp.gt.f32.partialorder %v6280_v27, %v2903_v57 }
0x23c6   :  { %v2714_v34 = vmul.f32 0.001, %v2710_v49  ;;  %v4550_v40 = vadd.f32 -0.5, %v2911_v7  ;;  %v4547_v58 = vadd.f32 -0.5, %v2908_v19 }
0x23c8   :  { %v6265_v2 = vadd.f32 %v2714_v34, %v6038_v47  ;;  %v2919_v6 = vmul.f32 5e-05, %v4550_v40  ;;  %v2916_v53 = vmul.f32 5e-05, %v4547_v58  ;;  %v2741_v47 = vcvt.f32.s32 %v6238_v62 }
0x23c9   :  { %v2909_v62 = vsel %vm2905_vm8, 1.0, %v4982_v3 }
0x23ca   :  { %vm2906_vm5 = vcmp.gt.f32.partialorder %v6265_v2, %v2903_v57  ;;  %2938 = vperm.xlu0 %4944, %v2919_v6   ;;  %v2742_v43 = vshll.u32 %v2741_v47, 16  ;;  %v4548_v45 = vadd.f32 -0.5, %v2909_v62 }
0x23cb   :  { %v2910_v39 = vsel %vm2906_vm5, 1.0, %v4982_v3 }
0x23cc   :  { %v4549_v32 = vadd.f32 -0.5, %v2910_v39  ;;  %v2743_v37 = vadd.s32 %v2742_v43, %v2740_v13  ;;  %v2917_v18 = vmul.f32 5e-05, %v4548_v45 }
0x23ce   :  { %v2918_v14 = vmul.f32 5e-05, %v4549_v32  ;;  %vm2744_vm7 = vcmp.eq.s32.totalorder %v5154_v23, %v2743_v37 }
0x23cf   :  { %v2745_v59 = vsel %vm2744_vm7, -inf, %v6189_v51 }
0x23d0   :  { %v2746_v15 = vsel %vm505_vm15, %v2745_v59, -inf }
0x23d3   :  { %2933 = vperm.xlu1 %4943, %v2918_v14  }
0x23d7   :  { %2923 = vperm.xlu1 %4943, %v2916_v53  }
0x23e9   :  { %2747 = vmax.xlane.f32.xlu0 %v2746_v15 }
0x23ff   :  { %2928 = vperm.xlu0 %4944, %v2917_v18  }
0x2445   :  { %v2939_v57 = vpop.permute.xlu0 %2938 }
0x244b   :  { %v3360_v48 = vpop.xlane.xlu1 %3359 }
0x244c   :  { %v3361_v49 = vcvt.f32.s32 %v3360_v48 }
0x244e   :  { %v3364_v11 = vadd.s32 %v3363_v44, %v3361_v49  ;;  %v3771_v49 = vsub.f32 0.0, %v6137_v12 }
0x244f   :  { %v2934_v6 = vpop.permute.xlu1 %2933 }
0x2450   :  { %vm3365_vm9 = vcmp.eq.s32.totalorder %v5154_v23, %v3364_v11  ;;  %v3665_v11 = vrot.slane %v5140_v17, 6 }
0x2451   :  { %v6286_v42 = vsel %vm3365_vm9, -inf, %v6230_v54 }
0x2452   :  { %v3367_v31 = vsel %vm582_vm3, %v6286_v42, -inf }
0x2453   :  { %3368 = vmax.xlane.f32.xlu0 %v3367_v31  ;;  %v2924_v19 = vpop.permute.xlu1 %2923  ;;  %v3773_v31 = vadd.f32 %v3771_v49, %v3665_v11 }
0x2472   :  { %v2748_v7 = vpop.xlane.xlu0 %2747 }
0x2473   :  { %v2749_v34 = vadd.f32 %v2748_v7, %v6203_v52  ;;  %v3774_v7 = vmul.f32 0.001, %v3773_v31 }
0x2475   :  { %v2750_v40 = vmul.f32 0.5, %v2749_v34 }
0x2477   :  { %vm2751_vm10 = vcmp.ge.f32.partialorder %v6189_v51, %v2750_v40 }
0x2478   :  { %v2752_v41 = vsel %vm2751_vm10, 1.0, %v4982_v3 }
0x2479   :  { %v4551_v39 = vadd.f32 -0.5, %v2752_v41 }
0x247a   :  { %v2929_v54 = vpop.permute.xlu0 %2928 }
0x247b   :  { %v2944_v32 = vrot.slane %v4551_v39, %v5389_v46 }
0x247d   :  { %v2946_v14 = vmul.f32 %v2944_v32, %v2929_v54  ;;  %v2948_v58 = vmul.f32 %v2944_v32, %v2939_v57  ;;  %v2947_v53 = vmul.f32 %v2944_v32, %v2934_v6  ;;  %v2945_v47 = vmul.f32 %v2944_v32, %v2924_v19 }
0x247f   :  { %v2950_v13 = vadd.f32 %v2946_v14, %v6077_v22  ;;  %v2952_v43 = vadd.f32 %v2948_v58, %v6071_v4  ;;  %v2951_v52 = vadd.f32 %v2947_v53, %v6074_v0  ;;  %v2949_v63 = vadd.f32 %v2945_v47, %v6082_v30 }
0x2481   :  { %v2956_v37 = vmax.f32 %v2952_v43, 0.0  ;;  %v2955_v59 = vmax.f32 %v2951_v52, 0.0  ;;  %v2954_v15 = vmax.f32 %v2950_v13, 0.0  ;;  %v2953_v62 = vmax.f32 %v2949_v63, 0.0 }
0x2483   :  { %v6298_v33 = vmin.f32 %v2956_v37, 1.0  ;;  %v6301_v21 = vmin.f32 %v2955_v59, 1.0  ;;  %v6304_v45 = vmin.f32 %v2954_v15, 1.0  ;;  %v6309_v4 = vmin.f32 %v2953_v62, 1.0 }
0x2485   :  { %4853 = vmatpush3.msra.mxu1 %v6298_v33 }
0x2486   :  { %4854 = vmatprep.subr.mxu1 %v4982_v3 }
0x2487   :  { %4855 = vmatpush3.msra.mxu1 %v6301_v21 }
0x2488   :  { %4856 = vmatprep.subr.mxu1 %v4982_v3 }
0x2489   :  { %4857 = vmatpush3.msra.mxu1 %v6304_v45 }
0x248a   :  { %4858 = vmatprep.subr.mxu1 %v4982_v3 }
0x248b   :  { %4859 = vmatpush3.msra.mxu1 %v6309_v4 }
0x248c   :  { %4861 = vmatmul.mubr.msk.f32.vlgmr.msra.gmra.mxu1 %vm355_vm2, %v3123_v35  ;;  %4868 = vmatprep.subr.mxu1 %v4982_v3 }
0x248d   :  { %4869 = vmatpush3.msra.mxu1 %v6093_v56  ;;  %4876 = vmatprep.mubr.msk.f32.mxu1 %vm4983_vm1, %v4982_v3 }
0x248e   :  { %4870 = vmatprep.subr.mxu1 %v4982_v3 }
0x248f   :  { %4871 = vmatpush3.msra.mxu1 %v6102_v38 }
0x2490   :  { %4872 = vmatprep.subr.mxu1 %v4982_v3 }
0x2491   :  { %4873 = vmatpush3.msra.mxu1 %v6109_v20  ;;  %v3196_v20 = vsub.f32 0.0, %v6128_v8 }
0x2492   :  { %4874 = vmatprep.subr.mxu1 %v4982_v3 }
0x2493   :  { %4875 = vmatpush3.msra.mxu1 %v6116_v1 }
0x2494   :  { %4890 = vmatprep.subr.mxu1 %v4982_v3 }
0x24dc   :  { %v6327_v0 = vpop.xlane.xlu0 %3368 }
0x24dd   :  { %vm3371_vm11 = vcmp.eq.f32.partialorder %v6286_v42, %v6327_v0 }
0x24de   :  { %v3372_v22 = vsel %vm3371_vm11, %v5154_v23, 32 }
0x24df   :  { %v3373_v30 = vsel %vm582_vm3, %v3372_v22, 2147483647 }
0x24e0   :  { %v3375_v56 = vshra.s32 %v3373_v30, 16  ;;  %v3374_v57 = vand.u32 65535, %v3373_v30 }
0x24e2   :  { %v3377_v38 = vcvt.s32.f32 %v3375_v56  ;;  %v3376_v40 = vcvt.s32.f32 %v3374_v57 }
0x24e4   :  { %3378 = vmin.xlane.f32.xlu1 %v3377_v38 }
0x254c   :  { %v3192_v35 = vpop.f32.mrf.mxu1 }
0x254d   :  { %v3197_v18 = vadd.f32 %v3196_v20, %v3192_v35 }
0x254e   :  { %v4862_v9 = vpop.f32.mrf.mxu1 }
0x254f   :  { %v3198_v1 = vmul.f32 0.0125, %v3197_v18 }
0x2551   :  { %v6335_v48 = vadd.f32 %v3198_v1, %v6128_v8  ;;  %v6344_v8 = vadd.f32 %v3774_v7, %v6137_v12 }
0x2553   :  { %v3200_v44 = vsel %vm505_vm15, %v6335_v48, -inf  ;;  %v3840_v41 = vsel %vm582_vm3, %v6344_v8, -inf }
0x2554   :  { %3201 = vmax.xlane.f32.xlu1 %v3200_v44 }
0x256d   :  { %v3379_v34 = vpop.xlane.xlu1 %3378 }
0x256e   :  { %vm3380_vm12 = vcmp.eq.f32.partialorder %v3377_v38, %v3379_v34  ;;  %v3385_v32 = vcvt.f32.s32 %v3379_v34 }
0x256f   :  { %v3381_v6 = vsel %vm3380_vm12, %v3376_v40, inf }
0x2570   :  { %3382 = vmin.xlane.f32.xlu0 %v3381_v6  ;;  %v3386_v14 = vshll.u32 %v3385_v32, 16 }
0x2574   :  { %3841 = vmax.xlane.f32.xlu0 %v3840_v41 }
0x25dd   :  { %v6348_v39 = vpop.xlane.xlu1 %3201 }
0x25de   :  { %vm3203_vm14 = vcmp.eq.f32.partialorder %v6335_v48, %v6348_v39 }
0x25df   :  { %v3204_v19 = vsel %vm3203_vm14, %v5154_v23, 4 }
0x25e0   :  { %v3205_v53 = vsel %vm505_vm15, %v3204_v19, 2147483647 }
0x25e1   :  { %v3207_v37 = vshra.s32 %v3205_v53, 16  ;;  %v3206_v1 = vand.u32 65535, %v3205_v53 }
0x25e3   :  { %v3209_v22 = vcvt.s32.f32 %v3207_v37  ;;  %v3208_v31 = vcvt.s32.f32 %v3206_v1 }
0x25f9   :  { %v3383_v54 = vpop.xlane.xlu0 %3382 }
0x25fa   :  { %v3384_v58 = vcvt.f32.s32 %v3383_v54 }
0x25fc   :  { %v3387_v47 = vadd.s32 %v3386_v14, %v3384_v58 }
0x25fd   :  { %v6354_v13 = vpop.xlane.xlu0 %3841 }
0x25fe   :  { %vm3388_vm4 = vcmp.eq.s32.totalorder %v5154_v23, %v3387_v47  ;;  %vm3844_vm5 = vcmp.eq.f32.partialorder %v6344_v8, %v6354_v13 }
0x25ff   :  { %v3845_v43 = vsel %vm3844_vm5, %v5154_v23, 32  ;;  %v3389_v52 = vsel %vm3388_vm4, -inf, %v6286_v42 }
0x2600   :  { %v3846_v59 = vsel %vm582_vm3, %v3845_v43, 2147483647  ;;  %v3390_v63 = vsel %vm582_vm3, %v3389_v52, -inf }
0x2601   :  { %3391 = vmax.xlane.f32.xlu0 %v3390_v63  ;;  %v3848_v15 = vshra.s32 %v3846_v59, 16  ;;  %v3847_v56 = vand.u32 65535, %v3846_v59 }
0x2603   :  { %v3850_v62 = vcvt.s32.f32 %v3848_v15  ;;  %v3849_v18 = vcvt.s32.f32 %v3847_v56 }
0x2605   :  { %3851 = vmin.xlane.f32.xlu1 %v3850_v62  ;;  %3210 = vmin.xlane.f32.xlu0 %v3209_v22 }
0x268a   :  { %v6363_v30 = vpop.xlane.xlu0 %3391 }
0x268b   :  { %vm3394_vm6 = vcmp.eq.f32.partialorder %v3389_v52, %v6363_v30 }
0x268c   :  { %v3395_v38 = vsel %vm3394_vm6, %v5154_v23, 32 }
0x268d   :  { %v3396_v42 = vsel %vm582_vm3, %v3395_v38, 2147483647 }
0x268e   :  { %v3211_v20 = vpop.xlane.xlu0 %3210  ;;  %v3852_v35 = vpop.xlane.xlu1 %3851  ;;  %v3398_v9 = vshra.s32 %v3396_v42, 16  ;;  %v3397_v34 = vand.u32 65535, %v3396_v42 }
0x268f   :  { %vm3853_vm7 = vcmp.eq.f32.partialorder %v3850_v62, %v3852_v35  ;;  %vm3212_vm8 = vcmp.eq.f32.partialorder %v3209_v22, %v3211_v20  ;;  %v3858_v7 = vcvt.f32.s32 %v3852_v35  ;;  %v3217_v6 = vcvt.f32.s32 %v3211_v20 }
0x2690   :  { %v3854_v44 = vsel %vm3853_vm7, %v3849_v18, inf  ;;  %v3400_v49 = vcvt.s32.f32 %v3398_v9  ;;  %v3213_v57 = vsel %vm3212_vm8, %v3208_v31, inf  ;;  %v3399_v54 = vcvt.s32.f32 %v3397_v34 }
0x2691   :  { %3855 = vmin.xlane.f32.xlu1 %v3854_v44  ;;  %v3859_v41 = vshll.u32 %v3858_v7, 16  ;;  %v3218_v47 = vshll.u32 %v3217_v6, 16 }
0x2692   :  { %3401 = vmin.xlane.f32.xlu0 %v3400_v49 }
0x2695   :  { %3214 = vmin.xlane.f32.xlu1 %v3213_v57 }
0x271a   :  { %v3856_v40 = vpop.xlane.xlu1 %3855 }
0x271b   :  { %v3857_v32 = vcvt.f32.s32 %v3856_v40  ;;  %v3402_v19 = vpop.xlane.xlu0 %3401  ;;  %v3262_v40 = vsub.f32 0.0, %v6189_v51 }
0x271c   :  { %vm3403_vm9 = vcmp.eq.f32.partialorder %v3400_v49, %v3402_v19  ;;  %v3408_v22 = vcvt.f32.s32 %v3402_v19  ;;  %v3324_v19 = vadd.f32 %v6170_v16, %v6147_v5 }
0x271d   :  { %v3860_v14 = vadd.s32 %v3859_v41, %v3857_v32  ;;  %v3404_v58 = vsel %vm3403_vm9, %v3399_v54, inf }
0x271e   :  { %3405 = vmin.xlane.f32.xlu0 %v3404_v58  ;;  %v3215_v53 = vpop.xlane.xlu1 %3214  ;;  %v3409_v38 = vshll.u32 %v3408_v22, 16  ;;  %v3347_v54 = vadd.f32 %v6244_v55, %v3324_v19 }
0x271f   :  { %vm3861_vm10 = vcmp.eq.s32.totalorder %v5154_v23, %v3860_v14  ;;  %v3216_v43 = vcvt.f32.s32 %v3215_v53 }
0x2720   :  { %v6370_v37 = vsel %vm3861_vm10, -inf, %v6344_v8  ;;  %v3370_v14 = vadd.f32 %v6327_v0, %v3347_v54 }
0x2721   :  { %v3219_v59 = vadd.s32 %v3218_v47, %v3216_v43  ;;  %v3863_v63 = vsel %vm582_vm3, %v6370_v37, -inf }
0x2722   :  { %3864 = vmax.xlane.f32.xlu1 %v3863_v63  ;;  %v3393_v58 = vadd.f32 %v6363_v30, %v3370_v14 }
0x2723   :  { %vm3220_vm11 = vcmp.eq.s32.totalorder %v5154_v23, %v3219_v59 }
0x2724   :  { %v3221_v15 = vsel %vm3220_vm11, -inf, %v6335_v48 }
0x2725   :  { %v3222_v62 = vsel %vm505_vm15, %v3221_v15, -inf }
0x2726   :  { %3223 = vmax.xlane.f32.xlu0 %v3222_v62 }
0x27a7   :  { %v3406_v56 = vpop.xlane.xlu0 %3405 }
0x27a8   :  { %v3407_v42 = vcvt.f32.s32 %v3406_v56 }
0x27aa   :  { %v3410_v20 = vadd.s32 %v3409_v38, %v3407_v42  ;;  %v3120_v38 = vrot.slane %v6242_v26, 3 }
0x27ab   :  { %v6377_v35 = vpop.xlane.xlu1 %3864 }
0x27ac   :  { %vm3411_vm12 = vcmp.eq.s32.totalorder %v5154_v23, %v3410_v20  ;;  %vm3867_vm14 = vcmp.eq.f32.partialorder %v6370_v37, %v6377_v35  ;;  %v3122_v20 = vadd.f32 %v3120_v38, %v5333_v28 }
0x27ad   :  { %v3868_v18 = vsel %vm3867_vm14, %v5154_v23, 32  ;;  %v6383_v9 = vsel %vm3411_vm12, -inf, %v3389_v52 }
0x27ae   :  { %v3869_v1 = vsel %vm582_vm3, %v3868_v18, 2147483647  ;;  %v3413_v44 = vsel %vm582_vm3, %v6383_v9, -inf }
0x27af   :  { %3414 = vmax.xlane.f32.xlu1 %v3413_v44  ;;  %v3224_v49 = vpop.xlane.xlu0 %3223  ;;  %v3871_v31 = vshra.s32 %v3869_v1, 16  ;;  %v3870_v47 = vand.u32 65535, %v3869_v1 }
0x27b0   :  { %v3225_v57 = vadd.f32 %v3224_v49, %v6348_v39 }
0x27b1   :  { %v3873_v7 = vcvt.s32.f32 %v3871_v31  ;;  %v3872_v15 = vcvt.s32.f32 %v3870_v47  ;;  %v3576_v31 = vmul.f32 0.9, %v6212_v60 }
0x27b2   :  { %v3226_v34 = vmul.f32 0.5, %v3225_v57 }
0x27b3   :  { %3874 = vmin.xlane.f32.xlu0 %v3873_v7 }
0x27b4   :  { %vm3227_vm4 = vcmp.ge.f32.partialorder %v6335_v48, %v3226_v34 }
0x27b5   :  { %v3228_v52 = vsel %vm3227_vm4, 1.0, %v4982_v3 }
0x27b6   :  { %v3263_v6 = vadd.f32 %v3262_v40, %v3228_v52  ;;  %4866 = vmatmul.mubr.msk.f32.vlgmr.msra.gmra.mxu0 %vm791_vm0, %v3228_v52 }
0x27b7   :  { %4887 = vmatprep.mubr.msk.f32.mxu0 %vm4983_vm1, %v4982_v3 }
0x27b8   :  { %v3264_v41 = vmul.f32 0.001, %v3263_v6 }
0x27ba   :  { %v6396_v32 = vadd.f32 %v3264_v41, %v6189_v51 }
0x27bc   :  { %v3266_v39 = vsel %vm505_vm15, %v6396_v32, -inf }
0x27bd   :  { %3267 = vmax.xlane.f32.xlu1 %v3266_v39 }
0x2838   :  { %v3415_v53 = vpop.xlane.xlu1 %3414 }
0x2839   :  { %v6405_v43 = vadd.f32 %v3415_v53, %v3393_v58  ;;  %vm3417_vm5 = vcmp.eq.f32.partialorder %v6383_v9, %v3415_v53  ;;  %v3295_v58 = vsel %vm582_vm3, %v6137_v12, 0.0 }
0x283a   :  { %v3418_v51 = vsel %vm3417_vm5, %v5154_v23, 32 }
0x283b   :  { %v3419_v59 = vsel %vm582_vm3, %v3418_v51, 2147483647 }
0x283c   :  { %v3875_v63 = vpop.xlane.xlu0 %3874  ;;  %v3421_v62 = vshra.s32 %v3419_v59, 16  ;;  %v3420_v60 = vand.u32 65535, %v3419_v59 }
0x283d   :  { %vm3876_vm6 = vcmp.eq.f32.partialorder %v3873_v7, %v3875_v63  ;;  %v3881_v26 = vcvt.f32.s32 %v3875_v63 }
0x283e   :  { %v3877_v5 = vsel %vm3876_vm6, %v3872_v15, inf  ;;  %v3423_v16 = vcvt.s32.f32 %v3421_v62  ;;  %v3422_v39 = vcvt.s32.f32 %v3420_v60 }
0x283f   :  { %3878 = vmin.xlane.f32.xlu0 %v3877_v5  ;;  %v3882_v52 = vshll.u32 %v3881_v26, 16 }
0x2840   :  { %3424 = vmin.xlane.f32.xlu1 %v3423_v16 }
0x2846   :  { %v6410_v55 = vpop.xlane.xlu1 %3267 }
0x2847   :  { %vm3269_vm7 = vcmp.eq.f32.partialorder %v6396_v32, %v6410_v55 }
0x2848   :  { %v3270_v0 = vsel %vm3269_vm7, %v5154_v23, 4 }
0x2849   :  { %v3271_v30 = vsel %vm505_vm15, %v3270_v0, 2147483647 }
0x284a   :  { %v3273_v22 = vshra.s32 %v3271_v30, 16  ;;  %v3272_v47 = vand.u32 65535, %v3271_v30 }
0x284c   :  { %v3275_v56 = vcvt.s32.f32 %v3273_v22 }
0x284e   :  { %3276 = vmin.xlane.f32.xlu0 %v3275_v56 }
0x2876   :  { %v3572_v42 = vpop.f32.mrf.mxu0 }
0x2877   :  { %v3578_v18 = vrot.slane %v3572_v42, 3 }
0x2878   :  { %v4867_v1 = vpop.f32.mrf.mxu0 }
0x2879   :  { %v3580_v44 = vadd.f32 %v3578_v18, %v3122_v20 }
0x287b   :  { %v3581_v49 = vmul.f32 0.1, %v3580_v44 }
0x287d   :  { %v3583_v57 = vrot.slane %v3581_v49, 5  ;;  %v3237_v49 = vsub.f32 0.0, %v6258_v36 }
0x287f   :  { %v3585_v7 = vadd.f32 %v3583_v57, %v3576_v31 }
0x2881   :  { %v6419_v34 = vmax.f32 %v3585_v7, 0.0 }
0x2883   :  { %3587 = vst.msk [vmem:[#allocation2 + $0x5] sm:$0x1] %vm582_vm3, %v6419_v34  ;;  %4877 = vmatmul.mubr.msk.f32.vlgmr.msra.gmra.mxu1 %vm355_vm2, %v6419_v34 }
0x2884   :  { %4891 = vmatpush3.msk.msra.mxu1 %vm795_vm13, %v6221_v10  ;;  %4892 = vmatprep.mubr.msk.f32.mxu1 %vm4983_vm1, %v4982_v3 }
0x2885   :  { %4906 = vmatprep.subr.mxu1 %v4982_v3 }
0x28c8   :  { %v3879_v40 = vpop.xlane.xlu0 %3878 }
0x28c9   :  { %v3880_v6 = vcvt.f32.s32 %v3879_v40  ;;  %v3425_v41 = vpop.xlane.xlu1 %3424 }
0x28ca   :  { %vm3426_vm8 = vcmp.eq.f32.partialorder %v3423_v16, %v3425_v41  ;;  %v3431_v63 = vcvt.f32.s32 %v3425_v41 }
0x28cb   :  { %v3883_v19 = vadd.s32 %v3882_v52, %v3880_v6  ;;  %v3427_v54 = vsel %vm3426_vm8, %v3422_v39, inf  ;;  %v3234_v6 = vsub.f32 0.0, %v6268_v61 }
0x28cc   :  { %3428 = vmin.xlane.f32.xlu1 %v3427_v54  ;;  %v3432_v62 = vshll.u32 %v3431_v63, 16 }
0x28cd   :  { %vm3884_vm9 = vcmp.eq.s32.totalorder %v5154_v23, %v3883_v19 }
0x28ce   :  { %v6432_v10 = vsel %vm3884_vm9, -inf, %v6370_v37  ;;  %v3274_v37 = vcvt.s32.f32 %v3272_v47 }
0x28cf   :  { %v3886_v14 = vsel %vm582_vm3, %v6432_v10, -inf }
0x28d0   :  { %3887 = vmax.xlane.f32.xlu0 %v3886_v14  ;;  %3296 = vadd.xlane.f32.xlu1 %v3295_v58 }
0x28d7   :  { %v6440_v53 = vpop.xlane.xlu0 %3276 }
0x28d8   :  { %vm3278_vm10 = vcmp.eq.f32.partialorder %v3275_v56, %v6440_v53 }
0x28d9   :  { %v3279_v51 = vsel %vm3278_vm10, %v3274_v37, inf  ;;  %v3236_v37 = vsub.f32 0.0, %v6265_v2 }
0x28e1   :  { %3244 = vrot.lane.b32.xlu1 %v5385_v25, %s4989_s30 }
0x28e5   :  { %3240 = vrot.lane.b32.xlu1 %v5387_v24, %s4989_s30 }
0x2909   :  { %3280 = vmin.xlane.f32.xlu1 %v3279_v51 }
0x291a   :  { %3238 = vrot.lane.b32.xlu1 %v5399_v29, %s4989_s30 }
0x2943   :  { %v6444_v59 = vpop.f32.mrf.mxu1 }
0x2945   :  { %v4878_v12 = vpop.f32.mrf.mxu1 }
0x2955   :  { %v3429_v15 = vpop.xlane.xlu1 %3428 }
0x2956   :  { %v3430_v5 = vcvt.f32.s32 %v3429_v15 }
0x2958   :  { %v3433_v16 = vadd.s32 %v3432_v62, %v3430_v5 }
0x2959   :  { %v6446_v0 = vpop.xlane.xlu0 %3887  ;;  %v3297_v18 = vpop.xlane.xlu1 %3296 }
0x295a   :  { %vm3890_vm11 = vcmp.eq.f32.partialorder %v6432_v10, %v6446_v0  ;;  %vm3434_vm12 = vcmp.eq.s32.totalorder %v5154_v23, %v3433_v16 }
0x295b   :  { %v3891_v30 = vsel %vm3890_vm11, %v5154_v23, 32  ;;  %v3435_v22 = vsel %vm3434_vm12, -inf, %v6383_v9 }
0x295c   :  { %v3892_v56 = vsel %vm582_vm3, %v3891_v30, 2147483647  ;;  %v3436_v38 = vsel %vm582_vm3, %v3435_v22, -inf }
0x295d   :  { %3437 = vmax.xlane.f32.xlu0 %v3436_v38  ;;  %v3894_v42 = vshra.s32 %v3892_v56, 16  ;;  %v3245_v1 = vpop.permute.xlu1 %3244  ;;  %v3893_v26 = vand.u32 65535, %v3892_v56 }
0x295e   :  { %v3253_v57 = vadd.f32 %v3245_v1, %v3237_v49 }
0x295f   :  { %v3896_v20 = vcvt.s32.f32 %v3894_v42  ;;  %v3895_v39 = vcvt.s32.f32 %v3893_v26 }
0x2960   :  { %v3257_v60 = vmul.f32 0.001, %v3253_v57  ;;  %v3235_v57 = vsub.f32 0.0, %v6280_v27 }
0x2961   :  { %3897 = vmin.xlane.f32.xlu0 %v3896_v20  ;;  %v3241_v44 = vpop.permute.xlu1 %3240 }
0x2962   :  { %v6460_v58 = vadd.f32 %v3257_v60, %v6258_v36  ;;  %v3251_v26 = vadd.f32 %v3241_v44, %v3235_v57 }
0x2977   :  { %3242 = vrot.lane.b32.xlu0 %v5406_v50, %s4989_s30 }
0x2992   :  { %v3281_v31 = vpop.xlane.xlu1 %3280 }
0x2996   :  { %v3239_v40 = vpop.permute.xlu1 %3238 }
0x2997   :  { %v3250_v54 = vadd.f32 %v3239_v40, %v3234_v6 }
0x2999   :  { %v3254_v12 = vmul.f32 0.001, %v3250_v54 }
0x299b   :  { %v6470_v36 = vadd.f32 %v3254_v12, %v6268_v61 }
0x29e6   :  { %v3438_v7 = vpop.xlane.xlu0 %3437 }
0x29e7   :  { %v3439_v9 = vadd.f32 %v3438_v7, %v6405_v43 }
0x29e9   :  { %v3440_v52 = vsub.f32 %v3297_v18, %v3439_v9  ;;  %v3282_v18 = vcvt.f32.s32 %v3281_v31  ;;  %v3255_v9 = vmul.f32 0.001, %v3251_v26 }
0x29ea   :  { %v3898_v41 = vpop.xlane.xlu0 %3897 }
0x29eb   :  { %v3441_v19 = vmul.f32 0.04, %v3440_v52  ;;  %vm3899_vm14 = vcmp.eq.f32.partialorder %v3896_v20, %v3898_v41  ;;  %v6482_v60 = vadd.f32 %v3255_v9, %v6280_v27  ;;  %v3904_v52 = vcvt.f32.s32 %v3898_v41 }
0x29ec   :  { %v3900_v14 = vsel %vm3899_vm14, %v3895_v39, inf }
0x29ed   :  { %v3445_v47 = vrot.slane %v3441_v19, %v5389_v46  ;;  %3901 = vmin.xlane.f32.xlu1 %v3900_v14  ;;  %v3905_v39 = vshll.u32 %v3904_v52, 16 }
0x29ee   :  { %v3243_v43 = vpop.permute.xlu0 %3242 }
0x29ef   :  { %v3252_v51 = vadd.f32 %v3243_v43, %v3236_v37  ;;  %vm3449_vm4 = vcmp.gt.f32.partialorder %v6460_v58, %v3445_v47  ;;  %vm3446_vm6 = vcmp.gt.f32.partialorder %v6470_v36, %v3445_v47  ;;  %vm3447_vm8 = vcmp.gt.f32.partialorder %v6482_v60, %v3445_v47 }
0x29f0   :  { %v3453_v63 = vsel %vm3449_vm4, 1.0, %v4982_v3  ;;  %v3450_v56 = vsel %vm3446_vm6, 1.0, %v4982_v3 }
0x29f1   :  { %v3256_v15 = vmul.f32 0.001, %v3252_v51  ;;  %v4559_v62 = vadd.f32 -0.5, %v3453_v63  ;;  %v4556_v42 = vadd.f32 -0.5, %v3450_v56 }
0x29f3   :  { %v6467_v5 = vadd.f32 %v3256_v15, %v6265_v2  ;;  %v3461_v16 = vmul.f32 5e-05, %v4559_v62  ;;  %v3458_v20 = vmul.f32 5e-05, %v4556_v42  ;;  %v3283_v2 = vcvt.f32.s32 %v6440_v53 }
0x29f4   :  { %v3451_v53 = vsel %vm3447_vm8, 1.0, %v4982_v3 }
0x29f5   :  { %vm3448_vm5 = vcmp.gt.f32.partialorder %v6467_v5, %v3445_v47  ;;  %3480 = vperm.xlu0 %4944, %v3461_v16   ;;  %v3284_v61 = vshll.u32 %v3283_v2, 16  ;;  %v4557_v31 = vadd.f32 -0.5, %v3451_v53 }
0x29f6   :  { %v3452_v30 = vsel %vm3448_vm5, 1.0, %v4982_v3 }
0x29f7   :  { %v4558_v22 = vadd.f32 -0.5, %v3452_v30  ;;  %v3285_v1 = vadd.s32 %v3284_v61, %v3282_v18  ;;  %v3459_v40 = vmul.f32 5e-05, %v4557_v31 }
0x29f9   :  { %v3460_v38 = vmul.f32 5e-05, %v4558_v22  ;;  %vm3286_vm7 = vcmp.eq.s32.totalorder %v5154_v23, %v3285_v1 }
0x29fa   :  { %v3287_v49 = vsel %vm3286_vm7, -inf, %v6396_v32 }
0x29fb   :  { %v3288_v7 = vsel %vm505_vm15, %v3287_v49, -inf }
0x29fe   :  { %3475 = vperm.xlu1 %4943, %v3460_v38  }
0x2a02   :  { %3465 = vperm.xlu1 %4943, %v3458_v20  }
0x2a14   :  { %3289 = vmax.xlane.f32.xlu0 %v3288_v7 }
0x2a2a   :  { %3470 = vperm.xlu0 %4944, %v3459_v40  }
0x2a70   :  { %v3481_v14 = vpop.permute.xlu0 %3480 }
0x2a76   :  { %v3902_v6 = vpop.xlane.xlu1 %3901 }
0x2a77   :  { %v3903_v19 = vcvt.f32.s32 %v3902_v6  ;;  %v3738_v6 = vsub.f32 0.0, %v6335_v48 }
0x2a79   :  { %v3906_v54 = vadd.s32 %v3905_v39, %v3903_v19 }
0x2a7a   :  { %v3476_v51 = vpop.permute.xlu1 %3475 }
0x2a7b   :  { %vm3907_vm9 = vcmp.eq.s32.totalorder %v5154_v23, %v3906_v54 }
0x2a7c   :  { %v6488_v44 = vsel %vm3907_vm9, -inf, %v6432_v10 }
0x2a7d   :  { %v3909_v27 = vsel %vm582_vm3, %v6488_v44, -inf }
0x2a7e   :  { %3910 = vmax.xlane.f32.xlu0 %v3909_v27  ;;  %v3466_v15 = vpop.permute.xlu1 %3465 }
0x2a9d   :  { %v3290_v47 = vpop.xlane.xlu0 %3289 }
0x2a9e   :  { %v3291_v37 = vadd.f32 %v3290_v47, %v6410_v55 }
0x2aa0   :  { %v3292_v43 = vmul.f32 0.5, %v3291_v37 }
0x2aa2   :  { %vm3293_vm10 = vcmp.ge.f32.partialorder %v6396_v32, %v3292_v43 }
0x2aa3   :  { %v3294_v41 = vsel %vm3293_vm10, 1.0, %v4982_v3 }
0x2aa4   :  { %v4560_v12 = vadd.f32 -0.5, %v3294_v41 }
0x2aa5   :  { %v3471_v10 = vpop.permute.xlu0 %3470 }
0x2aa6   :  { %v3486_v63 = vrot.slane %v4560_v12, %v5389_v46 }
0x2aa8   :  { %v3488_v62 = vmul.f32 %v3486_v63, %v3471_v10  ;;  %v3490_v16 = vmul.f32 %v3486_v63, %v3481_v14  ;;  %v3489_v30 = vmul.f32 %v3486_v63, %v3476_v51  ;;  %v3487_v22 = vmul.f32 %v3486_v63, %v3466_v15 }
0x2aaa   :  { %v3492_v56 = vadd.f32 %v3488_v62, %v6304_v45  ;;  %v3494_v38 = vadd.f32 %v3490_v16, %v6298_v33  ;;  %v3493_v55 = vadd.f32 %v3489_v30, %v6301_v21  ;;  %v3491_v2 = vadd.f32 %v3487_v22, %v6309_v4  ;;  %v4955_v21 = vld [vmem:[%s6702_s8 + $0x18] sm:$0xff]  ;;  %v4956_v45 = vld [vmem:[%s6702_s8 + $0x10] sm:$0xff]  ;;  %v4957_v4 = vld [vmem:[%s6702_s8 + $0x8] sm:$0xff] }
0x2aac   :  { %v3498_v42 = vmax.f32 %v3494_v38, 0.0  ;;  %v3497_v20 = vmax.f32 %v3493_v55, 0.0  ;;  %v3496_v18 = vmax.f32 %v3492_v56, 0.0  ;;  %v3495_v49 = vmax.f32 %v3491_v2, 0.0 }
0x2aae   :  { %v6500_v61 = vmin.f32 %v3498_v42, 1.0  ;;  %v6503_v1 = vmin.f32 %v3497_v20, 1.0  ;;  %v6506_v57 = vmin.f32 %v3496_v18, 1.0  ;;  %v6511_v33 = vmin.f32 %v3495_v49, 1.0 }
0x2ab0   :  { %4880 = vmatpush3.msra.mxu0 %v6500_v61 }
0x2ab1   :  { %4881 = vmatprep.subr.mxu0 %v4982_v3 }
0x2ab2   :  { %4882 = vmatpush3.msra.mxu0 %v6503_v1 }
0x2ab3   :  { %4883 = vmatprep.subr.mxu0 %v4982_v3 }
0x2ab4   :  { %4884 = vmatpush3.msra.mxu0 %v6506_v57 }
0x2ab5   :  { %4885 = vmatprep.subr.mxu0 %v4982_v3 }
0x2ab6   :  { %4886 = vmatpush3.msra.mxu0 %v6511_v33 }
0x2ab7   :  { %4888 = vmatmul.mubr.msk.f32.vlgmr.msra.gmra.mxu0 %vm355_vm2, %v3665_v11  ;;  %4895 = vmatprep.subr.mxu0 %v4982_v3  ;;  %v4958_v11 = vld [vmem:[%s6702_s8] sm:$0xff] }
0x2ab8   :  { %4896 = vmatpush3.msra.mxu0 %v4955_v21  ;;  %4903 = vmatprep.mubr.msk.f32.mxu0 %vm4983_vm1, %v4982_v3 }
0x2ab9   :  { %4897 = vmatprep.subr.mxu0 %v4982_v3 }
0x2aba   :  { %4898 = vmatpush3.msra.mxu0 %v4956_v45 }
0x2abb   :  { %4899 = vmatprep.subr.mxu0 %v4982_v3 }
0x2abc   :  { %4900 = vmatpush3.msra.mxu0 %v4957_v4 }
0x2abd   :  { %4901 = vmatprep.subr.mxu0 %v4982_v3 }
0x2abe   :  { %4902 = vmatpush3.msra.mxu0 %v4958_v11 }
0x2abf   :  { %4917 = vmatprep.subr.mxu0 %v4982_v3 }
0x2b07   :  { %v6537_v7 = vpop.xlane.xlu0 %3910 }
0x2b08   :  { %vm3913_vm11 = vcmp.eq.f32.partialorder %v6488_v44, %v6537_v7 }
0x2b09   :  { %v3914_v26 = vsel %vm3913_vm11, %v5154_v23, 32 }
0x2b0a   :  { %v3915_v9 = vsel %vm582_vm3, %v3914_v26, 2147483647 }
0x2b0b   :  { %v3917_v53 = vshra.s32 %v3915_v9, 16  ;;  %v3916_v19 = vand.u32 65535, %v3915_v9 }
0x2b0d   :  { %v3919_v31 = vcvt.s32.f32 %v3917_v53  ;;  %v3918_v14 = vcvt.s32.f32 %v3916_v19 }
0x2b0f   :  { %3920 = vmin.xlane.f32.xlu1 %v3919_v31 }
0x2b77   :  { %v3734_v40 = vpop.f32.mrf.mxu0 }
0x2b78   :  { %v3739_v39 = vadd.f32 %v3738_v6, %v3734_v40 }
0x2b79   :  { %v4889_v52 = vpop.f32.mrf.mxu0 }
0x2b7a   :  { %v3740_v54 = vmul.f32 0.0125, %v3739_v39 }
0x2b7c   :  { %v6545_v47 = vadd.f32 %v3740_v54, %v6335_v48 }
0x2b7e   :  { %v3742_v43 = vsel %vm505_vm15, %v6545_v47, -inf }
0x2b98   :  { %v3921_v27 = vpop.xlane.xlu1 %3920 }
0x2b99   :  { %vm3922_vm12 = vcmp.eq.f32.partialorder %v3919_v31, %v3921_v27  ;;  %v3927_v51 = vcvt.f32.s32 %v3921_v27 }
0x2b9a   :  { %v3923_v37 = vsel %vm3922_vm12, %v3918_v14, inf }
0x2b9b   :  { %3924 = vmin.xlane.f32.xlu0 %v3923_v37  ;;  %v3928_v12 = vshll.u32 %v3927_v51, 16 }
0x2b9f   :  { %3743 = vmax.xlane.f32.xlu0 %v3742_v43 }
0x2c24   :  { %v3925_v41 = vpop.xlane.xlu0 %3924 }
0x2c25   :  { %v3926_v63 = vcvt.f32.s32 %v3925_v41 }
0x2c27   :  { %v3929_v15 = vadd.s32 %v3928_v12, %v3926_v63 }
0x2c28   :  { %v3744_v10 = vpop.xlane.xlu0 %3743 }
0x2c29   :  { %vm3930_vm14 = vcmp.eq.s32.totalorder %v5154_v23, %v3929_v15  ;;  %vm3745_vm4 = vcmp.eq.f32.partialorder %v6545_v47, %v3744_v10  ;;  %v3804_v15 = vsub.f32 0.0, %v6396_v32 }
0x2c2a   :  { %v3746_v62 = vsel %vm3745_vm4, %v5154_v23, 4  ;;  %v3931_v48 = vsel %vm3930_vm14, -inf, %v6488_v44 }
0x2c2b   :  { %v3747_v16 = vsel %vm505_vm15, %v3746_v62, 2147483647  ;;  %v3932_v30 = vsel %vm582_vm3, %v3931_v48, -inf }
0x2c2c   :  { %3933 = vmax.xlane.f32.xlu1 %v3932_v30  ;;  %v3749_v22 = vshra.s32 %v3747_v16, 16  ;;  %v3748_v55 = vand.u32 65535, %v3747_v16 }
0x2c2e   :  { %v3751_v56 = vcvt.s32.f32 %v3749_v22  ;;  %v3750_v18 = vcvt.s32.f32 %v3748_v55 }
0x2c30   :  { %3752 = vmin.xlane.f32.xlu0 %v3751_v56 }
0x2cb5   :  { %v6555_v38 = vpop.xlane.xlu1 %3933 }
0x2cb6   :  { %vm3936_vm5 = vcmp.eq.f32.partialorder %v3931_v48, %v6555_v38 }
0x2cb7   :  { %v3937_v42 = vsel %vm3936_vm5, %v5154_v23, 32 }
0x2cb8   :  { %v3938_v20 = vsel %vm582_vm3, %v3937_v42, 2147483647 }
0x2cb9   :  { %v3753_v2 = vpop.xlane.xlu0 %3752  ;;  %v3940_v44 = vshra.s32 %v3938_v20, 16  ;;  %v3939_v4 = vand.u32 65535, %v3938_v20 }
0x2cba   :  { %vm3754_vm6 = vcmp.eq.f32.partialorder %v3751_v56, %v3753_v2  ;;  %v3759_v45 = vcvt.f32.s32 %v3753_v2 }
0x2cbb   :  { %v3755_v49 = vsel %vm3754_vm6, %v3750_v18, inf  ;;  %v3942_v21 = vcvt.s32.f32 %v3940_v44  ;;  %v3941_v31 = vcvt.s32.f32 %v3939_v4 }
0x2cbc   :  { %3756 = vmin.xlane.f32.xlu0 %v3755_v49  ;;  %v3760_v26 = vshll.u32 %v3759_v45, 16  ;;  %v3662_v45 = vrot.slane %v6444_v59, 2 }
0x2cbd   :  { %3943 = vmin.xlane.f32.xlu1 %v3942_v21 }
0x2d45   :  { %v3757_v11 = vpop.xlane.xlu0 %3756 }
0x2d46   :  { %v3758_v9 = vcvt.f32.s32 %v3757_v11  ;;  %v3944_v53 = vpop.xlane.xlu1 %3943  ;;  %v3664_v11 = vadd.f32 %v3662_v45, %v5333_v28 }
0x2d47   :  { %vm3945_vm7 = vcmp.eq.f32.partialorder %v3942_v21, %v3944_v53  ;;  %v3950_v19 = vcvt.f32.s32 %v3944_v53  ;;  %v3837_v21 = vsel %vm582_vm3, %v6344_v8, 0.0  ;;  %v4959_v8 = vld [vmem:[%s6703_s9] sm:$0xf] }
0x2d48   :  { %v3761_v40 = vadd.s32 %v3760_v26, %v3758_v9  ;;  %v3946_v52 = vsel %vm3945_vm7, %v3941_v31, inf }
0x2d49   :  { %3947 = vmin.xlane.f32.xlu1 %v3946_v52  ;;  %v3951_v27 = vshll.u32 %v3950_v19, 16 }
0x2d4a   :  { %vm3762_vm8 = vcmp.eq.s32.totalorder %v5154_v23, %v3761_v40  ;;  %v4118_v40 = vmul.f32 0.9, %v6419_v34 }
0x2d4b   :  { %v3763_v6 = vsel %vm3762_vm8, -inf, %v6545_v47 }
0x2d4c   :  { %v3764_v39 = vsel %vm505_vm15, %v3763_v6, -inf }
0x2d4d   :  { %3765 = vmax.xlane.f32.xlu0 %v3764_v39 }
0x2dd2   :  { %v3948_v54 = vpop.xlane.xlu1 %3947 }
0x2dd3   :  { %v3949_v14 = vcvt.f32.s32 %v3948_v54 }
0x2dd5   :  { %v3952_v37 = vadd.s32 %v3951_v27, %v3949_v14 }
0x2dd6   :  { %v3766_v43 = vpop.xlane.xlu0 %3765 }
0x2dd7   :  { %vm3953_vm9 = vcmp.eq.s32.totalorder %v5154_v23, %v3952_v37  ;;  %v3767_v51 = vadd.f32 %v3766_v43, %v3744_v10 }
0x2dd8   :  { %v6564_v41 = vsel %vm3953_vm9, -inf, %v3931_v48 }
0x2dd9   :  { %v3768_v12 = vmul.f32 0.5, %v3767_v51  ;;  %v3955_v63 = vsel %vm582_vm3, %v6564_v41, -inf }
0x2dda   :  { %3956 = vmax.xlane.f32.xlu1 %v3955_v63 }
0x2ddb   :  { %vm3769_vm10 = vcmp.ge.f32.partialorder %v6545_v47, %v3768_v12 }
0x2ddc   :  { %v3770_v62 = vsel %vm3769_vm10, 1.0, %v4982_v3 }
0x2ddd   :  { %v3805_v16 = vadd.f32 %v3804_v15, %v3770_v62  ;;  %4893 = vmatmul.mubr.msk.f32.vlgmr.msra.gmra.mxu1 %vm791_vm0, %v3770_v62 }
0x2dde   :  { %4914 = vmatprep.mubr.msk.f32.mxu1 %vm4983_vm1, %v4982_v3 }
0x2ddf   :  { %v3806_v10 = vmul.f32 0.001, %v3805_v16 }
0x2de1   :  { %v6575_v48 = vadd.f32 %v3806_v10, %v6396_v32 }
0x2de3   :  { %v3808_v30 = vsel %vm505_vm15, %v6575_v48, -inf }
0x2de4   :  { %3809 = vmax.xlane.f32.xlu0 %v3808_v30 }
0x2e63   :  { %v6579_v22 = vpop.xlane.xlu1 %3956 }
0x2e64   :  { %vm3959_vm11 = vcmp.eq.f32.partialorder %v6564_v41, %v6579_v22 }
0x2e65   :  { %v3960_v56 = vsel %vm3959_vm11, %v5154_v23, 32 }
0x2e66   :  { %v3961_v55 = vsel %vm582_vm3, %v3960_v56, 2147483647 }
0x2e67   :  { %v3963_v42 = vshra.s32 %v3961_v55, 16  ;;  %v3962_v34 = vand.u32 65535, %v3961_v55 }
0x2e69   :  { %v3965_v20 = vcvt.s32.f32 %v3963_v42  ;;  %v3964_v19 = vcvt.s32.f32 %v3962_v34 }
0x2e6b   :  { %3966 = vmin.xlane.f32.xlu1 %v3965_v20 }
0x2e6d   :  { %v6585_v2 = vpop.xlane.xlu0 %3809 }
0x2e6e   :  { %vm3811_vm12 = vcmp.eq.f32.partialorder %v6575_v48, %v6585_v2 }
0x2e6f   :  { %v3812_v32 = vsel %vm3811_vm12, %v5154_v23, 4 }
0x2e70   :  { %v3813_v18 = vsel %vm505_vm15, %v3812_v32, 2147483647 }
0x2e71   :  { %v3815_v44 = vshra.s32 %v3813_v18, 16  ;;  %v3814_v27 = vand.u32 65535, %v3813_v18 }
0x2e73   :  { %v3817_v49 = vcvt.s32.f32 %v3815_v44  ;;  %v3816_v37 = vcvt.s32.f32 %v3814_v27 }
0x2e75   :  { %3818 = vmin.xlane.f32.xlu0 %v3817_v49 }
0x2e79   :  { %3838 = vadd.xlane.f32.xlu0 %v3837_v21 }
0x2e9d   :  { %v4114_v4 = vpop.f32.mrf.mxu1 }
0x2e9e   :  { %v4120_v26 = vrot.slane %v4114_v4, 2 }
0x2e9f   :  { %v4894_v9 = vpop.f32.mrf.mxu1 }
0x2ea0   :  { %v4122_v53 = vadd.f32 %v4120_v26, %v3664_v11  ;;  %v3778_v26 = vsub.f32 0.0, %v6467_v5 }
0x2ea2   :  { %v4123_v31 = vmul.f32 0.1, %v4122_v53 }
0x2ea4   :  { %v4125_v52 = vrot.slane %v4123_v31, 6 }
0x2ea6   :  { %v4127_v6 = vadd.f32 %v4125_v52, %v4118_v40 }
0x2ea8   :  { %v6596_v39 = vmax.f32 %v4127_v6, 0.0 }
0x2eaa   :  { %4129 = vst.msk [vmem:[#allocation2 + $0x6] sm:$0x1] %vm582_vm3, %v6596_v39  ;;  %4904 = vmatmul.mubr.msk.f32.vlgmr.msra.gmra.mxu0 %vm355_vm2, %v6596_v39 }
0x2eab   :  { %4918 = vmatpush3.msk.msra.mxu0 %vm795_vm13, %v4959_v8  ;;  %4919 = vmatprep.mubr.msk.f32.mxu0 %vm4983_vm1, %v4982_v3 }
0x2ef4   :  { %v3967_v59 = vpop.xlane.xlu1 %3966 }
0x2ef5   :  { %vm3968_vm14 = vcmp.eq.f32.partialorder %v3965_v20, %v3967_v59  ;;  %v3973_v63 = vcvt.f32.s32 %v3967_v59 }
0x2ef6   :  { %v3969_v54 = vsel %vm3968_vm14, %v3964_v19, inf  ;;  %v3776_v19 = vsub.f32 0.0, %v6470_v36 }
0x2ef7   :  { %3970 = vmin.xlane.f32.xlu1 %v3969_v54  ;;  %v3974_v62 = vshll.u32 %v3973_v63, 16 }
0x2efe   :  { %v3819_v14 = vpop.xlane.xlu0 %3818 }
0x2eff   :  { %vm3820_vm4 = vcmp.eq.f32.partialorder %v3817_v49, %v3819_v14  ;;  %v3825_v55 = vcvt.f32.s32 %v3819_v14 }
0x2f00   :  { %v3821_v43 = vsel %vm3820_vm4, %v3816_v37, inf }
0x2f01   :  { %3822 = vmin.xlane.f32.xlu0 %v3821_v43  ;;  %v3826_v32 = vshll.u32 %v3825_v55, 16 }
0x2f02   :  { %v3839_v30 = vpop.xlane.xlu0 %3838 }
0x2f17   :  { %3784 = vrot.lane.b32.xlu0 %v5406_v50, %s4990_s20 }
0x2f6a   :  { %v6609_v51 = vpop.f32.mrf.mxu0 }
0x2f6c   :  { %v4905_v12 = vpop.f32.mrf.mxu0 }
0x2f80   :  { %v3971_v15 = vpop.xlane.xlu1 %3970 }
0x2f81   :  { %v3972_v16 = vcvt.f32.s32 %v3971_v15 }
0x2f83   :  { %v3975_v10 = vadd.s32 %v3974_v62, %v3972_v16 }
0x2f85   :  { %vm3976_vm13 = vcmp.eq.s32.totalorder %v5154_v23, %v3975_v10 }
0x2f86   :  { %v3977_v56 = vsel %vm3976_vm13, -inf, %v6564_v41  ;;  %v3866_v41 = vadd.f32 %v6377_v35, %v6354_v13 }
0x2f87   :  { %v3978_v42 = vsel %vm582_vm3, %v3977_v56, -inf }
0x2f88   :  { %3979 = vmax.xlane.f32.xlu1 %v3978_v42  ;;  %v3889_v21 = vadd.f32 %v6446_v0, %v3866_v41 }
0x2f8a   :  { %v3823_v20 = vpop.xlane.xlu0 %3822  ;;  %v3912_v45 = vadd.f32 %v6537_v7, %v3889_v21 }
0x2f8b   :  { %v3824_v50 = vcvt.f32.s32 %v3823_v20 }
0x2f8c   :  { %v3935_v11 = vadd.f32 %v6555_v38, %v3912_v45  ;;  %v3777_v38 = vsub.f32 0.0, %v6482_v60 }
0x2f8d   :  { %v3827_v18 = vadd.s32 %v3826_v32, %v3824_v50 }
0x2f8e   :  { %v3785_v4 = vpop.permute.xlu0 %3784  ;;  %v3958_v9 = vadd.f32 %v6579_v22, %v3935_v11 }
0x2f8f   :  { %vm3828_vm5 = vcmp.eq.s32.totalorder %v5154_v23, %v3827_v18  ;;  %v3794_v53 = vadd.f32 %v3785_v4, %v3778_v26 }
0x2f90   :  { %v3829_v44 = vsel %vm3828_vm5, -inf, %v6575_v48 }
0x2f91   :  { %v3830_v49 = vsel %vm505_vm15, %v3829_v44, -inf }
0x2f92   :  { %3831 = vmax.xlane.f32.xlu0 %v3830_v49 }
0x2f99   :  { %3786 = vrot.lane.b32.xlu1 %v5385_v25, %s4990_s20 }
0x2f9d   :  { %3782 = vrot.lane.b32.xlu1 %v5387_v24, %s4990_s20  ;;  %v3798_v24 = vmul.f32 0.001, %v3794_v53 }
0x2f9f   :  { %v3802_v0 = vadd.f32 %v3798_v24, %v6467_v5 }
0x2fa1   :  { %3780 = vrot.lane.b32.xlu1 %v5399_v29, %s4990_s20  ;;  %v3779_v29 = vsub.f32 0.0, %v6460_v58 }
0x3011   :  { %v3980_v25 = vpop.xlane.xlu1 %3979 }
0x3012   :  { %v3981_v31 = vadd.f32 %v3980_v25, %v3958_v9 }
0x3014   :  { %v3982_v40 = vsub.f32 %v3839_v30, %v3981_v31 }
0x3015   :  { %v3787_v52 = vpop.permute.xlu1 %3786 }
0x3016   :  { %v3983_v13 = vmul.f32 0.04, %v3982_v40  ;;  %v3795_v35 = vadd.f32 %v3787_v52, %v3779_v29  ;;  %v4207_v52 = vrot.slane %v5140_v17, 7 }
0x3018   :  { %v3987_v7 = vrot.slane %v3983_v13, %v5389_v46  ;;  %v3799_v6 = vmul.f32 0.001, %v3795_v35 }
0x3019   :  { %v3783_v8 = vpop.permute.xlu1 %3782 }
0x301a   :  { %v3803_v22 = vadd.f32 %v3799_v6, %v6460_v58  ;;  %v3793_v34 = vadd.f32 %v3783_v8, %v3777_v38  ;;  %vm3990_vm6 = vcmp.gt.f32.partialorder %v3802_v0, %v3987_v7 }
0x301b   :  { %v3994_v14 = vsel %vm3990_vm6, 1.0, %v4982_v3  ;;  %v3832_v42 = vpop.xlane.xlu0 %3831 }
0x301c   :  { %vm3991_vm7 = vcmp.gt.f32.partialorder %v3803_v22, %v3987_v7  ;;  %v3797_v59 = vmul.f32 0.001, %v3793_v34  ;;  %v4567_v15 = vadd.f32 -0.5, %v3994_v14  ;;  %v3833_v20 = vadd.f32 %v3832_v42, %v6585_v2 }
0x301d   :  { %v3995_v54 = vsel %vm3991_vm7, 1.0, %v4982_v3  ;;  %v3781_v27 = vpop.permute.xlu1 %3780 }
0x301e   :  { %v4568_v5 = vadd.f32 -0.5, %v3995_v54  ;;  %v3801_v37 = vadd.f32 %v3797_v59, %v6482_v60  ;;  %v3792_v43 = vadd.f32 %v3781_v27, %v3776_v19  ;;  %v4002_v10 = vmul.f32 5e-05, %v4567_v15 }
0x301f   :  { %v3834_v32 = vmul.f32 0.5, %v3833_v20 }
0x3020   :  { %v4003_v12 = vmul.f32 5e-05, %v4568_v5  ;;  %vm3989_vm8 = vcmp.gt.f32.partialorder %v3801_v37, %v3987_v7  ;;  %v3796_v63 = vmul.f32 0.001, %v3792_v43 }
0x3021   :  { %v3993_v58 = vsel %vm3989_vm8, 1.0, %v4982_v3  ;;  %vm3835_vm10 = vcmp.ge.f32.partialorder %v6575_v48, %v3834_v32 }
0x3022   :  { %v3800_v62 = vadd.f32 %v3796_v63, %v6470_v36  ;;  %4022 = vperm.xlu1 %4943, %v4003_v12   ;;  %v4566_v16 = vadd.f32 -0.5, %v3993_v58  ;;  %v3836_v36 = vsel %vm3835_vm10, 1.0, %v4982_v3 }
0x3023   :  { %v4569_v50 = vadd.f32 -0.5, %v3836_v36 }
0x3024   :  { %vm3988_vm9 = vcmp.gt.f32.partialorder %v3800_v62, %v3987_v7  ;;  %v4001_v56 = vmul.f32 5e-05, %v4566_v16 }
0x3025   :  { %v3992_v30 = vsel %vm3988_vm9, 1.0, %v4982_v3  ;;  %v4028_v18 = vrot.slane %v4569_v50, %v5389_v46 }
0x3026   :  { %4017 = vperm.xlu1 %4943, %v4002_v10   ;;  %v4565_v55 = vadd.f32 -0.5, %v3992_v30  ;;  %v4402_v10 = vld [vmem:[%s6705_s11 + $0x18] sm:$0xff]  ;;  %v4400_v30 = vld [vmem:[%s6705_s11 + $0x8] sm:$0xff] }
0x3028   :  { %v4000_v60 = vmul.f32 5e-05, %v4565_v55  ;;  %v4204_v55 = vrot.slane %v6609_v51, 1 }
0x302a   :  { %4012 = vperm.xlu1 %4943, %v4001_v56   ;;  %v4399_v56 = vld [vmem:[%s6705_s11] sm:$0xff]  ;;  %v4206_v42 = vadd.f32 %v4204_v55, %v5333_v28 }
0x302e   :  { %4007 = vperm.xlu1 %4943, %v4000_v60  }
0x309d   :  { %v4023_v44 = vpop.permute.xlu1 %4022 }
0x309e   :  { %v4032_v49 = vmul.f32 %v4028_v18, %v4023_v44 }
0x30a0   :  { %v4036_v41 = vadd.f32 %v4032_v49, %v6500_v61 }
0x30a1   :  { %v4018_v21 = vpop.permute.xlu1 %4017 }
0x30a2   :  { %v4040_v45 = vmax.f32 %v4036_v41, 0.0  ;;  %v4031_v4 = vmul.f32 %v4028_v18, %v4018_v21 }
0x30a4   :  { %v4044_v11 = vmin.f32 %v4040_v45, 1.0  ;;  %v4035_v26 = vadd.f32 %v4031_v4, %v6503_v1 }
0x30a5   :  { %v4013_v9 = vpop.permute.xlu1 %4012 }
0x30a6   :  { %v4039_v2 = vmax.f32 %v4035_v26, 0.0  ;;  %v4030_v53 = vmul.f32 %v4028_v18, %v4013_v9  ;;  %4907 = vmatpush3.msra.mxu1 %v4044_v11 }
0x30a7   :  { %4908 = vmatprep.subr.mxu1 %v4982_v3 }
0x30a8   :  { %v4043_v48 = vmin.f32 %v4039_v2, 1.0  ;;  %v4034_v25 = vadd.f32 %v4030_v53, %v6506_v57  ;;  %v4280_v57 = vsub.f32 0.0, %v6545_v47 }
0x30a9   :  { %v4008_v46 = vpop.permute.xlu1 %4007 }
0x30aa   :  { %v4038_v31 = vmax.f32 %v4034_v25, 0.0  ;;  %v4029_v24 = vmul.f32 %v4028_v18, %v4008_v46  ;;  %4909 = vmatpush3.msra.mxu1 %v4043_v48  ;;  %v4386_v18 = vmul.f32 0.9, %v6596_v39 }
0x30ab   :  { %4910 = vmatprep.subr.mxu1 %v4982_v3 }
0x30ac   :  { %v4042_v61 = vmin.f32 %v4038_v31, 1.0  ;;  %v4033_v40 = vadd.f32 %v4029_v24, %v6511_v33 }
0x30ae   :  { %v4037_v29 = vmax.f32 %v4033_v40, 0.0  ;;  %4911 = vmatpush3.msra.mxu1 %v4042_v61 }
0x30af   :  { %4912 = vmatprep.subr.mxu1 %v4982_v3 }
0x30b0   :  { %v4041_v1 = vmin.f32 %v4037_v29, 1.0 }
0x30b2   :  { %4913 = vmatpush3.msra.mxu1 %v4041_v1 }
0x30b3   :  { %4915 = vmatmul.mubr.msk.f32.vlgmr.msra.gmra.mxu1 %vm355_vm2, %v4207_v52  ;;  %4922 = vmatprep.subr.mxu1 %v4982_v3 }
0x30b4   :  { %4930 = vmatprep.mubr.msk.f32.mxu1 %vm4983_vm1, %v4982_v3  ;;  %4923 = vmatpush3.msra.mxu1 %v4402_v10 }
0x30b5   :  { %4924 = vmatprep.subr.mxu1 %v4982_v3 }
0x3173   :  { %v4276_v13 = vpop.f32.mrf.mxu1 }
0x3174   :  { %v4281_v35 = vadd.f32 %v4280_v57, %v4276_v13 }
0x3175   :  { %v4916_v33 = vpop.f32.mrf.mxu1 }
0x3176   :  { %v4282_v0 = vmul.f32 0.0125, %v4281_v35 }
0x3178   :  { %v4283_v7 = vadd.f32 %v4282_v0, %v6545_v47 }
0x317a   :  { %v4284_v6 = vsel %vm505_vm15, %v4283_v7, -inf }
0x317b   :  { %4285 = vmax.xlane.f32.xlu1 %v4284_v6 }
0x3204   :  { %v4286_v17 = vpop.xlane.xlu1 %4285 }
0x3205   :  { %vm4287_vm11 = vcmp.eq.f32.partialorder %v4283_v7, %v4286_v17 }
0x3206   :  { %v4288_v38 = vsel %vm4287_vm11, %v5154_v23, 4 }
0x3207   :  { %v4289_v8 = vsel %vm505_vm15, %v4288_v38, 2147483647 }
0x3208   :  { %v4291_v22 = vshra.s32 %v4289_v8, 16  ;;  %v4290_v59 = vand.u32 65535, %v4289_v8 }
0x320a   :  { %v4293_v34 = vcvt.s32.f32 %v4291_v22  ;;  %v4292_v54 = vcvt.s32.f32 %v4290_v59 }
0x320c   :  { %4294 = vmin.xlane.f32.xlu0 %v4293_v34 }
0x3295   :  { %v4295_v19 = vpop.xlane.xlu0 %4294 }
0x3296   :  { %vm4296_vm1 = vcmp.eq.f32.partialorder %v4293_v34, %v4295_v19  ;;  %v4301_v14 = vcvt.f32.s32 %v4295_v19 }
0x3297   :  { %v4297_v27 = vsel %vm4296_vm1, %v4292_v54, inf }
0x3298   :  { %4298 = vmin.xlane.f32.xlu0 %v4297_v27  ;;  %v4302_v5 = vshll.u32 %v4301_v14, 16 }
0x3321   :  { %v4299_v47 = vpop.xlane.xlu0 %4298 }
0x3322   :  { %v4300_v37 = vcvt.f32.s32 %v4299_v47 }
0x3324   :  { %v4303_v43 = vadd.s32 %v4302_v5, %v4300_v37 }
0x3326   :  { %vm4304_vm12 = vcmp.eq.s32.totalorder %v5154_v23, %v4303_v43  ;;  %v4401_v23 = vld [vmem:[%s6705_s11 + $0x10] sm:$0xff]  ;;  %s4991_s11 = smov [#allocation2]  }
0x3327   :  { %v4305_v12 = vsel %vm4304_vm12, -inf, %v4283_v7  ;;  %4925 = vmatpush3.msra.mxu1 %v4401_v23  ;;  %s4492_s3 = sshll.u32 %s4991_s11, 4  ;;  %s4493_s3 = int_to_ptr.vmem [resolvable:$true] %s4492_s3 }
0x3328   :  { %v4306_v63 = vsel %vm505_vm15, %v4305_v12, -inf  ;;  %4926 = vmatprep.subr.mxu1 %v4982_v3  ;;  %s4960_s24 = scalar_lea.vmem %s4493_s3, 128  ;;  %p4965_p1 = scmp.lt.s32.totalorder %s4493_s3, %s4493_s3 }
0x3329   :  { %4307 = vmax.xlane.f32.xlu0 %v4306_v63  ;;  %4927 = vmatpush3.msra.mxu1 %v4400_v30  ;;  %p4961_p0 = scmp.ne.s32.totalorder %s4493_s3, %s4960_s24  ;;  %p4966_p2 = scmp.lt.s32.totalorder %s4960_s24, %s4960_s24 }
0x332a   :  { %4928 = vmatprep.subr.mxu1 %v4982_v3 }
0x332b   :  { %4929 = vmatpush3.msra.mxu1 %v4399_v56  ;;  %p4967_p3 = por %p4966_p2, %p4965_p1 }
0x332d   :  { %p4968_p4 = pnand %p4967_p3, %p4961_p0 }
0x33b2   :  { %v4308_v15 = vpop.xlane.xlu0 %4307 }
0x33b3   :  { %v4309_v58 = vadd.f32 %v4308_v15, %v4286_v17 }
0x33b5   :  { %v4310_v62 = vmul.f32 0.5, %v4309_v58 }
0x33b7   :  { %vm4311_vm14 = vcmp.ge.f32.partialorder %v4283_v7, %v4310_v62 }
0x33b8   :  { %v4312_v16 = vsel %vm4311_vm14, 1.0, %v4982_v3 }
0x33b9   :  { %4920 = vmatmul.mubr.msk.f32.vlgmr.msra.gmra.mxu0 %vm791_vm0, %v4312_v16 }
0x3479   :  { %v4382_v60 = vpop.f32.mrf.mxu0 }
0x347a   :  { %v4388_v20 = vrot.slane %v4382_v60, 1 }
0x347b   :  { %v4921_v32 = vpop.f32.mrf.mxu0 }
0x347c   :  { %v4390_v36 = vadd.f32 %v4388_v20, %v4206_v42 }
0x347e   :  { %v4391_v50 = vmul.f32 0.1, %v4390_v36 }
0x3480   :  { %v4393_v44 = vrot.slane %v4391_v50, 7 }
0x3482   :  { %v4395_v49 = vadd.f32 %v4393_v44, %v4386_v18 }
0x3484   :  { %v4396_v41 = vmax.f32 %v4395_v49, 0.0 }
0x3486   :  { %4397 = vst.msk [vmem:[#allocation2 + $0x7] sm:$0x1] %vm582_vm3, %v4396_v41 }
0x348d   :  { %v4398_v21 = vld [vmem:[#allocation2] sm:$0xff] }
0x348e   :  { %4931 = vmatmul.mubr.msk.f32.vlgmr.msra.gmra.mxu1 %vm355_vm2, %v4398_v21 }
0x348f   :  { %4971 = shalt.err (!%p4968_p4)
}
0x3490   :  { %4495 = dma.vmem_to_hbm [thread:$0]  %s4493_s3, 128, %s6708_s14, [#allocation3]   ;;  %v4576_v3 = vld [vmem:[%s6706_s12] ss:$0 sm:$0xff] }
0x354e   :  { %v4479_v28 = vpop.f32.mrf.mxu1 }
0x354f   :  { %v4480_v39 = vadd.f32 %v4576_v3, %v4479_v28 }
0x3550   :  { %v4932_v51 = vpop.f32.mrf.mxu1 }
0x3551   :  { %4483 = vst.msk [vmem:[%s6707_s13] sm:$0xff] %vm791_vm0, %v4480_v39 }
0x3552   :  { %4980 = dma.done.wait [#allocation3], 128  }
0x3553   :  { %4981 = vsyncadd [#allocation3], 4294967168 }
0x3554   :  { %4501 = vsyncpa [#allocation3], 1 }

</bundles_post_ra>
